<compile_context>
chip_gen: v7x
topology: tpu7x:2x2x1
jax: 0.10.0
libtpu: 0.0.40
codegen_flags: <defaults>
</compile_context>

<pallas_src>
import jax
import jax.numpy as jnp
from jax.experimental import pallas as pl


TOWERS = 4
DROP_P = 0.1


# ------------------------------ fused kernel --------------------------------

def _gnn_forward_kernel(
    x_ref, edge_attr_ref, src_col_ref, dst_col_ref, dst_row_ref, rand_ref,
    We_ref, be_ref,
    Wpre_i_ref, Wpre_j_ref, Wpre_e_ref, bpre_ref,
    Wpost_x_ref, Wpost_m_ref, Wpost_s_ref, Wpost_mx_ref, bpost_ref,
    Wlin_ref, blin_ref,
    out_ref,
):
    x = x_ref[...]                      # (N, F) running node features
    ea = edge_attr_ref[...]             # (E, edge_dim)
    src_col = src_col_ref[...]          # (E, 1) int32
    dst_col = dst_col_ref[...]          # (E, 1) int32
    dst_row = dst_row_ref[...]          # (1, E) int32

    N, F = x.shape
    E = ea.shape[0]
    L = We_ref.shape[0]

    # One-hot gather / scatter matrices built in-kernel (no HBM adjacency,
    # no XLA one_hot / transpose / gather ops).
    oh_dst = (jax.lax.broadcasted_iota(jnp.int32, (E, N), 1)
              == dst_col).astype(jnp.float32)                       # (E, N)
    oh_src = (jax.lax.broadcasted_iota(jnp.int32, (E, N), 1)
              == src_col).astype(jnp.float32)                       # (E, N)
    adj = (jax.lax.broadcasted_iota(jnp.int32, (N, E), 0)
           == dst_row).astype(jnp.float32)                          # (N, E)

    cnt = jnp.sum(adj, axis=1, keepdims=True)                       # (N, 1)
    inv_cnt = 1.0 / jnp.maximum(cnt, 1.0)
    has_nb = cnt > 0.0

    keep_thr = jnp.float32(DROP_P)
    inv_keep = jnp.float32(1.0 / (1.0 - DROP_P))
    neg = jnp.float32(-1e30)

    for l in range(L):  # all layers fused; static weight indexing
        # ---- edge encoder ----------------------------------------------------
        e_emb = (jnp.dot(ea, We_ref[l], preferred_element_type=jnp.float32)
                 + be_ref[l])                                        # (E, f_in)

        # ---- endpoint gather via one-hot MXU matmul ---------------------------
        x_i = jnp.dot(oh_dst, x, preferred_element_type=jnp.float32)  # (E, F)
        x_j = jnp.dot(oh_src, x, preferred_element_type=jnp.float32)  # (E, F)

        # ---- per-tower pre-MLP (row-split block-diagonal; no concat) ---------
        msgs = (jnp.dot(x_i, Wpre_i_ref[l], preferred_element_type=jnp.float32)
                + jnp.dot(x_j, Wpre_j_ref[l], preferred_element_type=jnp.float32)
                + jnp.dot(e_emb, Wpre_e_ref[l], preferred_element_type=jnp.float32)
                + bpre_ref[l])                                       # (E, F)

        # ---- sum / mean aggregation on the MXU --------------------------------
        s = jnp.dot(adj, msgs, preferred_element_type=jnp.float32)   # (N, F)
        mean = s * inv_cnt

        # ---- max aggregation: per-node masked max, 2-D (E, F) working set ----
        rows = []
        for n in range(N):
            m_col = oh_dst[:, n:n + 1]                               # (E, 1)
            cand = jnp.where(m_col > 0.0, msgs, neg)                 # (E, F)
            rows.append(jnp.max(cand, axis=0, keepdims=True))        # (1, F)
        mx = jnp.concatenate(rows, axis=0)                           # (N, F)
        mx = jnp.where(has_nb, mx, 0.0)

        # ---- per-tower post-MLP (row-split block-diagonal; no concat) --------
        o = (jnp.dot(x, Wpost_x_ref[l], preferred_element_type=jnp.float32)
             + jnp.dot(mean, Wpost_m_ref[l], preferred_element_type=jnp.float32)
             + jnp.dot(s, Wpost_s_ref[l], preferred_element_type=jnp.float32)
             + jnp.dot(mx, Wpost_mx_ref[l], preferred_element_type=jnp.float32)
             + bpost_ref[l])                                         # (N, F)

        # ---- final linear + ReLU + dropout(0.1, train=True) -------------------
        y = (jnp.dot(o, Wlin_ref[l], preferred_element_type=jnp.float32)
             + blin_ref[l])
        y = jnp.maximum(y, 0.0)
        keep = rand_ref[l] >= keep_thr                               # (N, F)
        x = jnp.where(keep, y * inv_keep, 0.0)

    out_ref[...] = x


# ------------------------------ wrapper --------------------------------------

def gnn_module_forward(x, edge_index, edge_attr, stacked_params, dropout_rng):
    N, F = x.shape
    E = edge_attr.shape[0]
    L = stacked_params["We"].shape[0]

    src = edge_index[0].astype(jnp.int32)
    dst = edge_index[1].astype(jnp.int32)
    src_col = src.reshape(E, 1)
    dst_col = dst.reshape(E, 1)
    dst_row = dst.reshape(1, E)

    # TODO(synk): dropout randomness is generated outside the kernel because the
    # TPU hardware PRNG (pltpu.prng_*) cannot be lowered in interpret mode; in
    # the kernel it is a single compare + select per element.
    rand = jax.random.uniform(dropout_rng, (L, N, F), jnp.float32)

    return pl.pallas_call(
        _gnn_forward_kernel,
        out_shape=jax.ShapeDtypeStruct((N, F), jnp.float32),
    )(
        x, edge_attr, src_col, dst_col, dst_row, rand,
        stacked_params["We"], stacked_params["be"],
        stacked_params["Wpre_i"], stacked_params["Wpre_j"],
        stacked_params["Wpre_e"], stacked_params["bpre"],
        stacked_params["Wpost_x"], stacked_params["Wpost_m"],
        stacked_params["Wpost_s"], stacked_params["Wpost_mx"],
        stacked_params["bpost"],
        stacked_params["Wlin"], stacked_params["blin"],
    )


# ------------------------------ parameter setup ------------------------------

def _uniform(key, shape, fan_in):
    bound = 1.0 / jnp.sqrt(jnp.float32(fan_in))
    return jax.random.uniform(key, shape, jnp.float32, -bound, bound)


def _block_diag(ws):
    towers = len(ws)
    in_t, out_t = ws[0].shape
    W = jnp.zeros((towers * in_t, towers * out_t), jnp.float32)
    for t, w in enumerate(ws):
        W = W.at[t * in_t:(t + 1) * in_t, t * out_t:(t + 1) * out_t].set(w)
    return W


def init_pna_layer_params(key, in_dim, out_dim, edge_dim):
    T = TOWERS
    f_in = in_dim // T
    f_out = out_dim // T
    keys = jax.random.split(key, 2 + 2 * T + 2)
    k = iter(keys)

    We = _uniform(next(k), (edge_dim, f_in), edge_dim)
    be = _uniform(next(k), (f_in,), edge_dim).reshape(1, f_in)

    pre_i, pre_j, pre_e = [], [], []
    post_x, post_m, post_s, post_mx = [], [], [], []
    for _ in range(T):
        wpre = _uniform(next(k), (3 * f_in, f_in), 3 * f_in)
        pre_i.append(wpre[0:f_in])
        pre_j.append(wpre[f_in:2 * f_in])
        pre_e.append(wpre[2 * f_in:3 * f_in])
        wpost = _uniform(next(k), (4 * f_in, f_out), 4 * f_in)
        post_x.append(wpost[0:f_in])
        post_m.append(wpost[f_in:2 * f_in])
        post_s.append(wpost[2 * f_in:3 * f_in])
        post_mx.append(wpost[3 * f_in:4 * f_in])

    Wlin = _uniform(next(k), (out_dim, out_dim), out_dim)
    blin = _uniform(next(k), (out_dim,), out_dim).reshape(1, out_dim)

    return dict(
        We=We, be=be,
        Wpre_i=_block_diag(pre_i),
        Wpre_j=_block_diag(pre_j),
        Wpre_e=jnp.concatenate(pre_e, axis=1),
        bpre=jnp.zeros((1, T * f_in), jnp.float32),
        Wpost_x=_block_diag(post_x),
        Wpost_m=_block_diag(post_m),
        Wpost_s=_block_diag(post_s),
        Wpost_mx=_block_diag(post_mx),
        bpost=jnp.zeros((1, T * f_out), jnp.float32),
        Wlin=Wlin, blin=blin,
    )


# --------------------------------- main ---------------------------------------

if __name__ == "__main__":
    # Shapes consistent with the module: input_dim = output_dim = 32,
    # num_layers = 5, towers = 4 (per-tower width 8), edge_dim = 16.
    INPUT_DIM = 32
    EDGE_DIM = 16
    NUM_LAYERS = 5
    N_NODES = 16
    N_EDGES = 48

    key = jax.random.PRNGKey(0)
    kx, ke, ks, kd, kp, kr = jax.random.split(key, 6)

    x = jax.random.normal(kx, (N_NODES, INPUT_DIM), jnp.float32)
    edge_attr = jax.random.normal(ke, (N_EDGES, EDGE_DIM), jnp.float32)
    src = jax.random.randint(ks, (N_EDGES,), 0, N_NODES, jnp.int32)
    dst = jax.random.randint(kd, (N_EDGES,), 0, N_NODES, jnp.int32)
    edge_index = jnp.stack([src, dst], axis=0)

    # Deterministic synthetic parameter init (not a checkpoint load).
    # TODO(synk): torch.save(deg)/torch.load(deg_path) file side effects are
    # skipped; deg is unused with scalers=['identity'].
    pkeys = jax.random.split(kp, NUM_LAYERS)
    per_layer = [
        init_pna_layer_params(pkeys[l], INPUT_DIM, INPUT_DIM, EDGE_DIM)
        for l in range(NUM_LAYERS)
    ]
    stacked_params = {k: jnp.stack([p[k] for p in per_layer], axis=0)
                      for k in per_layer[0]}

    out = gnn_module_forward(x, edge_index, edge_attr, stacked_params, kr)
    out = jax.block_until_ready(out)
    assert out.shape == (N_NODES, INPUT_DIM)
    assert bool(jnp.all(jnp.isfinite(out)))
    print("KERNEL_OK")
</pallas_src>

<mosaic_0001>
module attributes {stable_mosaic.version = 11 : i64} {
  func.func @_gnn_forward_kernel(%arg0: memref<16x32xf32, #tpu.memory_space<vmem>>, %arg1: memref<48x16xf32, #tpu.memory_space<vmem>>, %arg2: memref<48x1xi32, #tpu.memory_space<vmem>>, %arg3: memref<48x1xi32, #tpu.memory_space<vmem>>, %arg4: memref<1x48xi32, #tpu.memory_space<vmem>>, %arg5: memref<5x16x32xf32, #tpu.memory_space<vmem>>, %arg6: memref<5x16x8xf32, #tpu.memory_space<vmem>>, %arg7: memref<5x1x8xf32, #tpu.memory_space<vmem>>, %arg8: memref<5x32x32xf32, #tpu.memory_space<vmem>>, %arg9: memref<5x32x32xf32, #tpu.memory_space<vmem>>, %arg10: memref<5x8x32xf32, #tpu.memory_space<vmem>>, %arg11: memref<5x1x32xf32, #tpu.memory_space<vmem>>, %arg12: memref<5x32x32xf32, #tpu.memory_space<vmem>>, %arg13: memref<5x32x32xf32, #tpu.memory_space<vmem>>, %arg14: memref<5x32x32xf32, #tpu.memory_space<vmem>>, %arg15: memref<5x32x32xf32, #tpu.memory_space<vmem>>, %arg16: memref<5x1x32xf32, #tpu.memory_space<vmem>>, %arg17: memref<5x32x32xf32, #tpu.memory_space<vmem>>, %arg18: memref<5x1x32xf32, #tpu.memory_space<vmem>>, %arg19: memref<16x32xf32, #tpu.memory_space<vmem>>) attributes {dimension_semantics = [], scalar_prefetch = 0 : i64, scratch_operands = 0 : i64, tpu.core_type = #tpu.core_type<tc>} {
    %c0 = arith.constant 0 : index
    %c0_0 = arith.constant 0 : index
    %0 = vector.load %arg0[%c0, %c0_0] : memref<16x32xf32, #tpu.memory_space<vmem>>, vector<16x32xf32>
    %c0_1 = arith.constant 0 : index
    %c0_2 = arith.constant 0 : index
    %1 = vector.load %arg1[%c0_1, %c0_2] : memref<48x16xf32, #tpu.memory_space<vmem>>, vector<48x16xf32>
    %c0_3 = arith.constant 0 : index
    %c0_4 = arith.constant 0 : index
    %2 = vector.load %arg2[%c0_3, %c0_4] : memref<48x1xi32, #tpu.memory_space<vmem>>, vector<48x1xi32>
    %c0_5 = arith.constant 0 : index
    %c0_6 = arith.constant 0 : index
    %3 = vector.load %arg3[%c0_5, %c0_6] : memref<48x1xi32, #tpu.memory_space<vmem>>, vector<48x1xi32>
    %c0_7 = arith.constant 0 : index
    %c0_8 = arith.constant 0 : index
    %4 = vector.load %arg4[%c0_7, %c0_8] : memref<1x48xi32, #tpu.memory_space<vmem>>, vector<1x48xi32>
    %5 = tpu.iota {dimensions = array<i32: 1>} : vector<48x16xi32>
    %6 = vector.broadcast %3 : vector<48x1xi32> to vector<48x16xi32>
    %7 = arith.cmpi eq, %5, %6 : vector<48x16xi32>
    %8 = arith.extui %7 : vector<48x16xi1> to vector<48x16xi32>
    %9 = arith.sitofp %8 : vector<48x16xi32> to vector<48x16xf32>
    %10 = tpu.iota {dimensions = array<i32: 1>} : vector<48x16xi32>
    %11 = vector.broadcast %2 : vector<48x1xi32> to vector<48x16xi32>
    %12 = arith.cmpi eq, %10, %11 : vector<48x16xi32>
    %13 = arith.extui %12 : vector<48x16xi1> to vector<48x16xi32>
    %14 = arith.sitofp %13 : vector<48x16xi32> to vector<48x16xf32>
    %15 = tpu.iota {dimensions = array<i32: 0>} : vector<16x48xi32>
    %16 = vector.broadcast %4 : vector<1x48xi32> to vector<16x48xi32>
    %17 = arith.cmpi eq, %15, %16 : vector<16x48xi32>
    %18 = arith.extui %17 : vector<16x48xi1> to vector<16x48xi32>
    %19 = arith.sitofp %18 : vector<16x48xi32> to vector<16x48xf32>
    %cst = arith.constant dense<0.000000e+00> : vector<16xf32>
    %20 = vector.multi_reduction <add>, %19, %cst [1] : vector<16x48xf32> to vector<16xf32>
    %21 = vector.shape_cast %20 : vector<16xf32> to vector<16x1xf32>
    %cst_9 = arith.constant 1.000000e+00 : f32
    %22 = vector.broadcast %cst_9 : f32 to vector<16x1xf32>
    %23 = arith.maximumf %21, %22 : vector<16x1xf32>
    %cst_10 = arith.constant 1.000000e+00 : f32
    %24 = vector.broadcast %cst_10 : f32 to vector<16x1xf32>
    %25 = arith.divf %24, %23 : vector<16x1xf32>
    %cst_11 = arith.constant 0.000000e+00 : f32
    %26 = vector.broadcast %cst_11 : f32 to vector<16x1xf32>
    %27 = arith.cmpf ogt, %21, %26 : vector<16x1xf32>
    %c0_12 = arith.constant 0 : index
    %c0_13 = arith.constant 0 : index
    %c0_14 = arith.constant 0 : index
    %28 = vector.load %arg6[%c0_12, %c0_13, %c0_14] : memref<5x16x8xf32, #tpu.memory_space<vmem>>, vector<1x16x8xf32>
    %29 = vector.shape_cast %28 : vector<1x16x8xf32> to vector<16x8xf32>
    %cst_15 = arith.constant dense<0.000000e+00> : vector<48x8xf32>
    %30 = tpu.matmul %1, %29, %cst_15 {dimension_numbers = #tpu.dot_dimension_numbers<[1], [0], [0], [1], [0, 0, 1, 1], [], []>} : vector<48x16xf32>, vector<16x8xf32>, vector<48x8xf32> -> vector<48x8xf32>
    %c0_16 = arith.constant 0 : index
    %c0_17 = arith.constant 0 : index
    %c0_18 = arith.constant 0 : index
    %31 = vector.load %arg7[%c0_16, %c0_17, %c0_18] : memref<5x1x8xf32, #tpu.memory_space<vmem>>, vector<1x1x8xf32>
    %32 = vector.shape_cast %31 : vector<1x1x8xf32> to vector<1x8xf32>
    %33 = vector.broadcast %32 : vector<1x8xf32> to vector<48x8xf32>
    %34 = arith.addf %30, %33 : vector<48x8xf32>
    %cst_19 = arith.constant dense<0.000000e+00> : vector<48x32xf32>
    %35 = tpu.matmul %9, %0, %cst_19 {dimension_numbers = #tpu.dot_dimension_numbers<[1], [0], [0], [1], [0, 0, 1, 1], [], []>} : vector<48x16xf32>, vector<16x32xf32>, vector<48x32xf32> -> vector<48x32xf32>
    %cst_20 = arith.constant dense<0.000000e+00> : vector<48x32xf32>
    %36 = tpu.matmul %14, %0, %cst_20 {dimension_numbers = #tpu.dot_dimension_numbers<[1], [0], [0], [1], [0, 0, 1, 1], [], []>} : vector<48x16xf32>, vector<16x32xf32>, vector<48x32xf32> -> vector<48x32xf32>
    %c0_21 = arith.constant 0 : index
    %c0_22 = arith.constant 0 : index
    %c0_23 = arith.constant 0 : index
    %37 = vector.load %arg8[%c0_21, %c0_22, %c0_23] : memref<5x32x32xf32, #tpu.memory_space<vmem>>, vector<1x32x32xf32>
    %38 = vector.shape_cast %37 : vector<1x32x32xf32> to vector<32x32xf32>
    %cst_24 = arith.constant dense<0.000000e+00> : vector<48x32xf32>
    %39 = tpu.matmul %35, %38, %cst_24 {dimension_numbers = #tpu.dot_dimension_numbers<[1], [0], [0], [1], [0, 0, 1, 1], [], []>} : vector<48x32xf32>, vector<32x32xf32>, vector<48x32xf32> -> vector<48x32xf32>
    %c0_25 = arith.constant 0 : index
    %c0_26 = arith.constant 0 : index
    %c0_27 = arith.constant 0 : index
    %40 = vector.load %arg9[%c0_25, %c0_26, %c0_27] : memref<5x32x32xf32, #tpu.memory_space<vmem>>, vector<1x32x32xf32>
    %41 = vector.shape_cast %40 : vector<1x32x32xf32> to vector<32x32xf32>
    %cst_28 = arith.constant dense<0.000000e+00> : vector<48x32xf32>
    %42 = tpu.matmul %36, %41, %cst_28 {dimension_numbers = #tpu.dot_dimension_numbers<[1], [0], [0], [1], [0, 0, 1, 1], [], []>} : vector<48x32xf32>, vector<32x32xf32>, vector<48x32xf32> -> vector<48x32xf32>
    %43 = arith.addf %39, %42 : vector<48x32xf32>
    %c0_29 = arith.constant 0 : index
    %c0_30 = arith.constant 0 : index
    %c0_31 = arith.constant 0 : index
    %44 = vector.load %arg10[%c0_29, %c0_30, %c0_31] : memref<5x8x32xf32, #tpu.memory_space<vmem>>, vector<1x8x32xf32>
    %45 = vector.shape_cast %44 : vector<1x8x32xf32> to vector<8x32xf32>
    %cst_32 = arith.constant dense<0.000000e+00> : vector<48x32xf32>
    %46 = tpu.matmul %34, %45, %cst_32 {dimension_numbers = #tpu.dot_dimension_numbers<[1], [0], [0], [1], [0, 0, 1, 1], [], []>} : vector<48x8xf32>, vector<8x32xf32>, vector<48x32xf32> -> vector<48x32xf32>
    %47 = arith.addf %43, %46 : vector<48x32xf32>
    %c0_33 = arith.constant 0 : index
    %c0_34 = arith.constant 0 : index
    %c0_35 = arith.constant 0 : index
    %48 = vector.load %arg11[%c0_33, %c0_34, %c0_35] : memref<5x1x32xf32, #tpu.memory_space<vmem>>, vector<1x1x32xf32>
    %49 = vector.shape_cast %48 : vector<1x1x32xf32> to vector<1x32xf32>
    %50 = vector.broadcast %49 : vector<1x32xf32> to vector<48x32xf32>
    %51 = arith.addf %47, %50 : vector<48x32xf32>
    %cst_36 = arith.constant dense<0.000000e+00> : vector<16x32xf32>
    %52 = tpu.matmul %19, %51, %cst_36 {dimension_numbers = #tpu.dot_dimension_numbers<[1], [0], [0], [1], [0, 0, 1, 1], [], []>} : vector<16x48xf32>, vector<48x32xf32>, vector<16x32xf32> -> vector<16x32xf32>
    %53 = vector.broadcast %25 : vector<16x1xf32> to vector<16x32xf32>
    %54 = arith.mulf %52, %53 : vector<16x32xf32>
    %55 = vector.extract_strided_slice %9 {offsets = [0, 0], sizes = [48, 1], strides = [1, 1]} : vector<48x16xf32> to vector<48x1xf32>
    %cst_37 = arith.constant 0.000000e+00 : f32
    %56 = vector.broadcast %cst_37 : f32 to vector<48x1xf32>
    %57 = arith.cmpf ogt, %55, %56 : vector<48x1xf32>
    %cst_38 = arith.constant -1.000000e+30 : f32
    %58 = vector.shape_cast %57 : vector<48x1xi1> to vector<48x1xi1>
    %59 = vector.broadcast %58 : vector<48x1xi1> to vector<48x32xi1>
    %60 = vector.broadcast %cst_38 : f32 to vector<48x32xf32>
    %61 = arith.select %59, %51, %60 : vector<48x32xi1>, vector<48x32xf32>
    %cst_39 = arith.constant dense<0xFF800000> : vector<32xf32>
    %62 = vector.multi_reduction <maximumf>, %61, %cst_39 [0] : vector<48x32xf32> to vector<32xf32>
    %63 = vector.shape_cast %62 : vector<32xf32> to vector<1x32xf32>
    %64 = vector.extract_strided_slice %9 {offsets = [0, 1], sizes = [48, 1], strides = [1, 1]} : vector<48x16xf32> to vector<48x1xf32>
    %cst_40 = arith.constant 0.000000e+00 : f32
    %65 = vector.broadcast %cst_40 : f32 to vector<48x1xf32>
    %66 = arith.cmpf ogt, %64, %65 : vector<48x1xf32>
    %cst_41 = arith.constant -1.000000e+30 : f32
    %67 = vector.shape_cast %66 : vector<48x1xi1> to vector<48x1xi1>
    %68 = vector.broadcast %67 : vector<48x1xi1> to vector<48x32xi1>
    %69 = vector.broadcast %cst_41 : f32 to vector<48x32xf32>
    %70 = arith.select %68, %51, %69 : vector<48x32xi1>, vector<48x32xf32>
    %cst_42 = arith.constant dense<0xFF800000> : vector<32xf32>
    %71 = vector.multi_reduction <maximumf>, %70, %cst_42 [0] : vector<48x32xf32> to vector<32xf32>
    %72 = vector.shape_cast %71 : vector<32xf32> to vector<1x32xf32>
    %73 = vector.extract_strided_slice %9 {offsets = [0, 2], sizes = [48, 1], strides = [1, 1]} : vector<48x16xf32> to vector<48x1xf32>
    %cst_43 = arith.constant 0.000000e+00 : f32
    %74 = vector.broadcast %cst_43 : f32 to vector<48x1xf32>
    %75 = arith.cmpf ogt, %73, %74 : vector<48x1xf32>
    %cst_44 = arith.constant -1.000000e+30 : f32
    %76 = vector.shape_cast %75 : vector<48x1xi1> to vector<48x1xi1>
    %77 = vector.broadcast %76 : vector<48x1xi1> to vector<48x32xi1>
    %78 = vector.broadcast %cst_44 : f32 to vector<48x32xf32>
    %79 = arith.select %77, %51, %78 : vector<48x32xi1>, vector<48x32xf32>
    %cst_45 = arith.constant dense<0xFF800000> : vector<32xf32>
    %80 = vector.multi_reduction <maximumf>, %79, %cst_45 [0] : vector<48x32xf32> to vector<32xf32>
    %81 = vector.shape_cast %80 : vector<32xf32> to vector<1x32xf32>
    %82 = vector.extract_strided_slice %9 {offsets = [0, 3], sizes = [48, 1], strides = [1, 1]} : vector<48x16xf32> to vector<48x1xf32>
    %cst_46 = arith.constant 0.000000e+00 : f32
    %83 = vector.broadcast %cst_46 : f32 to vector<48x1xf32>
    %84 = arith.cmpf ogt, %82, %83 : vector<48x1xf32>
    %cst_47 = arith.constant -1.000000e+30 : f32
    %85 = vector.shape_cast %84 : vector<48x1xi1> to vector<48x1xi1>
    %86 = vector.broadcast %85 : vector<48x1xi1> to vector<48x32xi1>
    %87 = vector.broadcast %cst_47 : f32 to vector<48x32xf32>
    %88 = arith.select %86, %51, %87 : vector<48x32xi1>, vector<48x32xf32>
    %cst_48 = arith.constant dense<0xFF800000> : vector<32xf32>
    %89 = vector.multi_reduction <maximumf>, %88, %cst_48 [0] : vector<48x32xf32> to vector<32xf32>
    %90 = vector.shape_cast %89 : vector<32xf32> to vector<1x32xf32>
    %91 = vector.extract_strided_slice %9 {offsets = [0, 4], sizes = [48, 1], strides = [1, 1]} : vector<48x16xf32> to vector<48x1xf32>
    %cst_49 = arith.constant 0.000000e+00 : f32
    %92 = vector.broadcast %cst_49 : f32 to vector<48x1xf32>
    %93 = arith.cmpf ogt, %91, %92 : vector<48x1xf32>
    %cst_50 = arith.constant -1.000000e+30 : f32
    %94 = vector.shape_cast %93 : vector<48x1xi1> to vector<48x1xi1>
    %95 = vector.broadcast %94 : vector<48x1xi1> to vector<48x32xi1>
    %96 = vector.broadcast %cst_50 : f32 to vector<48x32xf32>
    %97 = arith.select %95, %51, %96 : vector<48x32xi1>, vector<48x32xf32>
    %cst_51 = arith.constant dense<0xFF800000> : vector<32xf32>
    %98 = vector.multi_reduction <maximumf>, %97, %cst_51 [0] : vector<48x32xf32> to vector<32xf32>
    %99 = vector.shape_cast %98 : vector<32xf32> to vector<1x32xf32>
    %100 = vector.extract_strided_slice %9 {offsets = [0, 5], sizes = [48, 1], strides = [1, 1]} : vector<48x16xf32> to vector<48x1xf32>
    %cst_52 = arith.constant 0.000000e+00 : f32
    %101 = vector.broadcast %cst_52 : f32 to vector<48x1xf32>
    %102 = arith.cmpf ogt, %100, %101 : vector<48x1xf32>
    %cst_53 = arith.constant -1.000000e+30 : f32
    %103 = vector.shape_cast %102 : vector<48x1xi1> to vector<48x1xi1>
    %104 = vector.broadcast %103 : vector<48x1xi1> to vector<48x32xi1>
    %105 = vector.broadcast %cst_53 : f32 to vector<48x32xf32>
    %106 = arith.select %104, %51, %105 : vector<48x32xi1>, vector<48x32xf32>
    %cst_54 = arith.constant dense<0xFF800000> : vector<32xf32>
    %107 = vector.multi_reduction <maximumf>, %106, %cst_54 [0] : vector<48x32xf32> to vector<32xf32>
    %108 = vector.shape_cast %107 : vector<32xf32> to vector<1x32xf32>
    %109 = vector.extract_strided_slice %9 {offsets = [0, 6], sizes = [48, 1], strides = [1, 1]} : vector<48x16xf32> to vector<48x1xf32>
    %cst_55 = arith.constant 0.000000e+00 : f32
    %110 = vector.broadcast %cst_55 : f32 to vector<48x1xf32>
    %111 = arith.cmpf ogt, %109, %110 : vector<48x1xf32>
    %cst_56 = arith.constant -1.000000e+30 : f32
    %112 = vector.shape_cast %111 : vector<48x1xi1> to vector<48x1xi1>
    %113 = vector.broadcast %112 : vector<48x1xi1> to vector<48x32xi1>
    %114 = vector.broadcast %cst_56 : f32 to vector<48x32xf32>
    %115 = arith.select %113, %51, %114 : vector<48x32xi1>, vector<48x32xf32>
    %cst_57 = arith.constant dense<0xFF800000> : vector<32xf32>
    %116 = vector.multi_reduction <maximumf>, %115, %cst_57 [0] : vector<48x32xf32> to vector<32xf32>
    %117 = vector.shape_cast %116 : vector<32xf32> to vector<1x32xf32>
    %118 = vector.extract_strided_slice %9 {offsets = [0, 7], sizes = [48, 1], strides = [1, 1]} : vector<48x16xf32> to vector<48x1xf32>
    %cst_58 = arith.constant 0.000000e+00 : f32
    %119 = vector.broadcast %cst_58 : f32 to vector<48x1xf32>
    %120 = arith.cmpf ogt, %118, %119 : vector<48x1xf32>
    %cst_59 = arith.constant -1.000000e+30 : f32
    %121 = vector.shape_cast %120 : vector<48x1xi1> to vector<48x1xi1>
    %122 = vector.broadcast %121 : vector<48x1xi1> to vector<48x32xi1>
    %123 = vector.broadcast %cst_59 : f32 to vector<48x32xf32>
    %124 = arith.select %122, %51, %123 : vector<48x32xi1>, vector<48x32xf32>
    %cst_60 = arith.constant dense<0xFF800000> : vector<32xf32>
    %125 = vector.multi_reduction <maximumf>, %124, %cst_60 [0] : vector<48x32xf32> to vector<32xf32>
    %126 = vector.shape_cast %125 : vector<32xf32> to vector<1x32xf32>
    %127 = vector.extract_strided_slice %9 {offsets = [0, 8], sizes = [48, 1], strides = [1, 1]} : vector<48x16xf32> to vector<48x1xf32>
    %cst_61 = arith.constant 0.000000e+00 : f32
    %128 = vector.broadcast %cst_61 : f32 to vector<48x1xf32>
    %129 = arith.cmpf ogt, %127, %128 : vector<48x1xf32>
    %cst_62 = arith.constant -1.000000e+30 : f32
    %130 = vector.shape_cast %129 : vector<48x1xi1> to vector<48x1xi1>
    %131 = vector.broadcast %130 : vector<48x1xi1> to vector<48x32xi1>
    %132 = vector.broadcast %cst_62 : f32 to vector<48x32xf32>
    %133 = arith.select %131, %51, %132 : vector<48x32xi1>, vector<48x32xf32>
    %cst_63 = arith.constant dense<0xFF800000> : vector<32xf32>
    %134 = vector.multi_reduction <maximumf>, %133, %cst_63 [0] : vector<48x32xf32> to vector<32xf32>
    %135 = vector.shape_cast %134 : vector<32xf32> to vector<1x32xf32>
    %136 = vector.extract_strided_slice %9 {offsets = [0, 9], sizes = [48, 1], strides = [1, 1]} : vector<48x16xf32> to vector<48x1xf32>
    %cst_64 = arith.constant 0.000000e+00 : f32
    %137 = vector.broadcast %cst_64 : f32 to vector<48x1xf32>
    %138 = arith.cmpf ogt, %136, %137 : vector<48x1xf32>
    %cst_65 = arith.constant -1.000000e+30 : f32
    %139 = vector.shape_cast %138 : vector<48x1xi1> to vector<48x1xi1>
    %140 = vector.broadcast %139 : vector<48x1xi1> to vector<48x32xi1>
    %141 = vector.broadcast %cst_65 : f32 to vector<48x32xf32>
    %142 = arith.select %140, %51, %141 : vector<48x32xi1>, vector<48x32xf32>
    %cst_66 = arith.constant dense<0xFF800000> : vector<32xf32>
    %143 = vector.multi_reduction <maximumf>, %142, %cst_66 [0] : vector<48x32xf32> to vector<32xf32>
    %144 = vector.shape_cast %143 : vector<32xf32> to vector<1x32xf32>
    %145 = vector.extract_strided_slice %9 {offsets = [0, 10], sizes = [48, 1], strides = [1, 1]} : vector<48x16xf32> to vector<48x1xf32>
    %cst_67 = arith.constant 0.000000e+00 : f32
    %146 = vector.broadcast %cst_67 : f32 to vector<48x1xf32>
    %147 = arith.cmpf ogt, %145, %146 : vector<48x1xf32>
    %cst_68 = arith.constant -1.000000e+30 : f32
    %148 = vector.shape_cast %147 : vector<48x1xi1> to vector<48x1xi1>
    %149 = vector.broadcast %148 : vector<48x1xi1> to vector<48x32xi1>
    %150 = vector.broadcast %cst_68 : f32 to vector<48x32xf32>
    %151 = arith.select %149, %51, %150 : vector<48x32xi1>, vector<48x32xf32>
    %cst_69 = arith.constant dense<0xFF800000> : vector<32xf32>
    %152 = vector.multi_reduction <maximumf>, %151, %cst_69 [0] : vector<48x32xf32> to vector<32xf32>
    %153 = vector.shape_cast %152 : vector<32xf32> to vector<1x32xf32>
    %154 = vector.extract_strided_slice %9 {offsets = [0, 11], sizes = [48, 1], strides = [1, 1]} : vector<48x16xf32> to vector<48x1xf32>
    %cst_70 = arith.constant 0.000000e+00 : f32
    %155 = vector.broadcast %cst_70 : f32 to vector<48x1xf32>
    %156 = arith.cmpf ogt, %154, %155 : vector<48x1xf32>
    %cst_71 = arith.constant -1.000000e+30 : f32
    %157 = vector.shape_cast %156 : vector<48x1xi1> to vector<48x1xi1>
    %158 = vector.broadcast %157 : vector<48x1xi1> to vector<48x32xi1>
    %159 = vector.broadcast %cst_71 : f32 to vector<48x32xf32>
    %160 = arith.select %158, %51, %159 : vector<48x32xi1>, vector<48x32xf32>
    %cst_72 = arith.constant dense<0xFF800000> : vector<32xf32>
    %161 = vector.multi_reduction <maximumf>, %160, %cst_72 [0] : vector<48x32xf32> to vector<32xf32>
    %162 = vector.shape_cast %161 : vector<32xf32> to vector<1x32xf32>
    %163 = vector.extract_strided_slice %9 {offsets = [0, 12], sizes = [48, 1], strides = [1, 1]} : vector<48x16xf32> to vector<48x1xf32>
    %cst_73 = arith.constant 0.000000e+00 : f32
    %164 = vector.broadcast %cst_73 : f32 to vector<48x1xf32>
    %165 = arith.cmpf ogt, %163, %164 : vector<48x1xf32>
    %cst_74 = arith.constant -1.000000e+30 : f32
    %166 = vector.shape_cast %165 : vector<48x1xi1> to vector<48x1xi1>
    %167 = vector.broadcast %166 : vector<48x1xi1> to vector<48x32xi1>
    %168 = vector.broadcast %cst_74 : f32 to vector<48x32xf32>
    %169 = arith.select %167, %51, %168 : vector<48x32xi1>, vector<48x32xf32>
    %cst_75 = arith.constant dense<0xFF800000> : vector<32xf32>
    %170 = vector.multi_reduction <maximumf>, %169, %cst_75 [0] : vector<48x32xf32> to vector<32xf32>
    %171 = vector.shape_cast %170 : vector<32xf32> to vector<1x32xf32>
    %172 = vector.extract_strided_slice %9 {offsets = [0, 13], sizes = [48, 1], strides = [1, 1]} : vector<48x16xf32> to vector<48x1xf32>
    %cst_76 = arith.constant 0.000000e+00 : f32
    %173 = vector.broadcast %cst_76 : f32 to vector<48x1xf32>
    %174 = arith.cmpf ogt, %172, %173 : vector<48x1xf32>
    %cst_77 = arith.constant -1.000000e+30 : f32
    %175 = vector.shape_cast %174 : vector<48x1xi1> to vector<48x1xi1>
    %176 = vector.broadcast %175 : vector<48x1xi1> to vector<48x32xi1>
    %177 = vector.broadcast %cst_77 : f32 to vector<48x32xf32>
    %178 = arith.select %176, %51, %177 : vector<48x32xi1>, vector<48x32xf32>
    %cst_78 = arith.constant dense<0xFF800000> : vector<32xf32>
    %179 = vector.multi_reduction <maximumf>, %178, %cst_78 [0] : vector<48x32xf32> to vector<32xf32>
    %180 = vector.shape_cast %179 : vector<32xf32> to vector<1x32xf32>
    %181 = vector.extract_strided_slice %9 {offsets = [0, 14], sizes = [48, 1], strides = [1, 1]} : vector<48x16xf32> to vector<48x1xf32>
    %cst_79 = arith.constant 0.000000e+00 : f32
    %182 = vector.broadcast %cst_79 : f32 to vector<48x1xf32>
    %183 = arith.cmpf ogt, %181, %182 : vector<48x1xf32>
    %cst_80 = arith.constant -1.000000e+30 : f32
    %184 = vector.shape_cast %183 : vector<48x1xi1> to vector<48x1xi1>
    %185 = vector.broadcast %184 : vector<48x1xi1> to vector<48x32xi1>
    %186 = vector.broadcast %cst_80 : f32 to vector<48x32xf32>
    %187 = arith.select %185, %51, %186 : vector<48x32xi1>, vector<48x32xf32>
    %cst_81 = arith.constant dense<0xFF800000> : vector<32xf32>
    %188 = vector.multi_reduction <maximumf>, %187, %cst_81 [0] : vector<48x32xf32> to vector<32xf32>
    %189 = vector.shape_cast %188 : vector<32xf32> to vector<1x32xf32>
    %190 = vector.extract_strided_slice %9 {offsets = [0, 15], sizes = [48, 1], strides = [1, 1]} : vector<48x16xf32> to vector<48x1xf32>
    %cst_82 = arith.constant 0.000000e+00 : f32
    %191 = vector.broadcast %cst_82 : f32 to vector<48x1xf32>
    %192 = arith.cmpf ogt, %190, %191 : vector<48x1xf32>
    %cst_83 = arith.constant -1.000000e+30 : f32
    %193 = vector.shape_cast %192 : vector<48x1xi1> to vector<48x1xi1>
    %194 = vector.broadcast %193 : vector<48x1xi1> to vector<48x32xi1>
    %195 = vector.broadcast %cst_83 : f32 to vector<48x32xf32>
    %196 = arith.select %194, %51, %195 : vector<48x32xi1>, vector<48x32xf32>
    %cst_84 = arith.constant dense<0xFF800000> : vector<32xf32>
    %197 = vector.multi_reduction <maximumf>, %196, %cst_84 [0] : vector<48x32xf32> to vector<32xf32>
    %198 = vector.shape_cast %197 : vector<32xf32> to vector<1x32xf32>
    %199 = tpu.concatenate %63, %72, %81, %90, %99, %108, %117, %126, %135, %144, %153, %162, %171, %180, %189, %198 in 0 : vector<1x32xf32>, vector<1x32xf32>, vector<1x32xf32>, vector<1x32xf32>, vector<1x32xf32>, vector<1x32xf32>, vector<1x32xf32>, vector<1x32xf32>, vector<1x32xf32>, vector<1x32xf32>, vector<1x32xf32>, vector<1x32xf32>, vector<1x32xf32>, vector<1x32xf32>, vector<1x32xf32>, vector<1x32xf32> -> vector<16x32xf32>
    %cst_85 = arith.constant 0.000000e+00 : f32
    %200 = vector.shape_cast %27 : vector<16x1xi1> to vector<16x1xi1>
    %201 = vector.broadcast %200 : vector<16x1xi1> to vector<16x32xi1>
    %202 = vector.broadcast %cst_85 : f32 to vector<16x32xf32>
    %203 = arith.select %201, %199, %202 : vector<16x32xi1>, vector<16x32xf32>
    %c0_86 = arith.constant 0 : index
    %c0_87 = arith.constant 0 : index
    %c0_88 = arith.constant 0 : index
    %204 = vector.load %arg12[%c0_86, %c0_87, %c0_88] : memref<5x32x32xf32, #tpu.memory_space<vmem>>, vector<1x32x32xf32>
    %205 = vector.shape_cast %204 : vector<1x32x32xf32> to vector<32x32xf32>
    %cst_89 = arith.constant dense<0.000000e+00> : vector<16x32xf32>
    %206 = tpu.matmul %0, %205, %cst_89 {dimension_numbers = #tpu.dot_dimension_numbers<[1], [0], [0], [1], [0, 0, 1, 1], [], []>} : vector<16x32xf32>, vector<32x32xf32>, vector<16x32xf32> -> vector<16x32xf32>
    %c0_90 = arith.constant 0 : index
    %c0_91 = arith.constant 0 : index
    %c0_92 = arith.constant 0 : index
    %207 = vector.load %arg13[%c0_90, %c0_91, %c0_92] : memref<5x32x32xf32, #tpu.memory_space<vmem>>, vector<1x32x32xf32>
    %208 = vector.shape_cast %207 : vector<1x32x32xf32> to vector<32x32xf32>
    %cst_93 = arith.constant dense<0.000000e+00> : vector<16x32xf32>
    %209 = tpu.matmul %54, %208, %cst_93 {dimension_numbers = #tpu.dot_dimension_numbers<[1], [0], [0], [1], [0, 0, 1, 1], [], []>} : vector<16x32xf32>, vector<32x32xf32>, vector<16x32xf32> -> vector<16x32xf32>
    %210 = arith.addf %206, %209 : vector<16x32xf32>
    %c0_94 = arith.constant 0 : index
    %c0_95 = arith.constant 0 : index
    %c0_96 = arith.constant 0 : index
    %211 = vector.load %arg14[%c0_94, %c0_95, %c0_96] : memref<5x32x32xf32, #tpu.memory_space<vmem>>, vector<1x32x32xf32>
    %212 = vector.shape_cast %211 : vector<1x32x32xf32> to vector<32x32xf32>
    %cst_97 = arith.constant dense<0.000000e+00> : vector<16x32xf32>
    %213 = tpu.matmul %52, %212, %cst_97 {dimension_numbers = #tpu.dot_dimension_numbers<[1], [0], [0], [1], [0, 0, 1, 1], [], []>} : vector<16x32xf32>, vector<32x32xf32>, vector<16x32xf32> -> vector<16x32xf32>
    %214 = arith.addf %210, %213 : vector<16x32xf32>
    %c0_98 = arith.constant 0 : index
    %c0_99 = arith.constant 0 : index
    %c0_100 = arith.constant 0 : index
    %215 = vector.load %arg15[%c0_98, %c0_99, %c0_100] : memref<5x32x32xf32, #tpu.memory_space<vmem>>, vector<1x32x32xf32>
    %216 = vector.shape_cast %215 : vector<1x32x32xf32> to vector<32x32xf32>
    %cst_101 = arith.constant dense<0.000000e+00> : vector<16x32xf32>
    %217 = tpu.matmul %203, %216, %cst_101 {dimension_numbers = #tpu.dot_dimension_numbers<[1], [0], [0], [1], [0, 0, 1, 1], [], []>} : vector<16x32xf32>, vector<32x32xf32>, vector<16x32xf32> -> vector<16x32xf32>
    %218 = arith.addf %214, %217 : vector<16x32xf32>
    %c0_102 = arith.constant 0 : index
    %c0_103 = arith.constant 0 : index
    %c0_104 = arith.constant 0 : index
    %219 = vector.load %arg16[%c0_102, %c0_103, %c0_104] : memref<5x1x32xf32, #tpu.memory_space<vmem>>, vector<1x1x32xf32>
    %220 = vector.shape_cast %219 : vector<1x1x32xf32> to vector<1x32xf32>
    %221 = vector.broadcast %220 : vector<1x32xf32> to vector<16x32xf32>
    %222 = arith.addf %218, %221 : vector<16x32xf32>
    %c0_105 = arith.constant 0 : index
    %c0_106 = arith.constant 0 : index
    %c0_107 = arith.constant 0 : index
    %223 = vector.load %arg17[%c0_105, %c0_106, %c0_107] : memref<5x32x32xf32, #tpu.memory_space<vmem>>, vector<1x32x32xf32>
    %224 = vector.shape_cast %223 : vector<1x32x32xf32> to vector<32x32xf32>
    %cst_108 = arith.constant dense<0.000000e+00> : vector<16x32xf32>
    %225 = tpu.matmul %222, %224, %cst_108 {dimension_numbers = #tpu.dot_dimension_numbers<[1], [0], [0], [1], [0, 0, 1, 1], [], []>} : vector<16x32xf32>, vector<32x32xf32>, vector<16x32xf32> -> vector<16x32xf32>
    %c0_109 = arith.constant 0 : index
    %c0_110 = arith.constant 0 : index
    %c0_111 = arith.constant 0 : index
    %226 = vector.load %arg18[%c0_109, %c0_110, %c0_111] : memref<5x1x32xf32, #tpu.memory_space<vmem>>, vector<1x1x32xf32>
    %227 = vector.shape_cast %226 : vector<1x1x32xf32> to vector<1x32xf32>
    %228 = vector.broadcast %227 : vector<1x32xf32> to vector<16x32xf32>
    %229 = arith.addf %225, %228 : vector<16x32xf32>
    %cst_112 = arith.constant 0.000000e+00 : f32
    %230 = vector.broadcast %cst_112 : f32 to vector<16x32xf32>
    %231 = arith.maximumf %229, %230 : vector<16x32xf32>
    %c0_113 = arith.constant 0 : index
    %c0_114 = arith.constant 0 : index
    %c0_115 = arith.constant 0 : index
    %232 = vector.load %arg5[%c0_113, %c0_114, %c0_115] : memref<5x16x32xf32, #tpu.memory_space<vmem>>, vector<1x16x32xf32>
    %233 = vector.shape_cast %232 : vector<1x16x32xf32> to vector<16x32xf32>
    %cst_116 = arith.constant 1.000000e-01 : f32
    %234 = vector.broadcast %cst_116 : f32 to vector<16x32xf32>
    %235 = arith.cmpf oge, %233, %234 : vector<16x32xf32>
    %cst_117 = arith.constant 1.11111116 : f32
    %236 = vector.broadcast %cst_117 : f32 to vector<16x32xf32>
    %237 = arith.mulf %231, %236 : vector<16x32xf32>
    %cst_118 = arith.constant 0.000000e+00 : f32
    %238 = vector.broadcast %cst_118 : f32 to vector<16x32xf32>
    %239 = arith.select %235, %237, %238 : vector<16x32xi1>, vector<16x32xf32>
    %c1 = arith.constant 1 : index
    %c0_119 = arith.constant 0 : index
    %c0_120 = arith.constant 0 : index
    %240 = vector.load %arg6[%c1, %c0_119, %c0_120] : memref<5x16x8xf32, #tpu.memory_space<vmem>>, vector<1x16x8xf32>
    %241 = vector.shape_cast %240 : vector<1x16x8xf32> to vector<16x8xf32>
    %cst_121 = arith.constant dense<0.000000e+00> : vector<48x8xf32>
    %242 = tpu.matmul %1, %241, %cst_121 {dimension_numbers = #tpu.dot_dimension_numbers<[1], [0], [0], [1], [0, 0, 1, 1], [], []>} : vector<48x16xf32>, vector<16x8xf32>, vector<48x8xf32> -> vector<48x8xf32>
    %c1_122 = arith.constant 1 : index
    %c0_123 = arith.constant 0 : index
    %c0_124 = arith.constant 0 : index
    %243 = vector.load %arg7[%c1_122, %c0_123, %c0_124] : memref<5x1x8xf32, #tpu.memory_space<vmem>>, vector<1x1x8xf32>
    %244 = vector.shape_cast %243 : vector<1x1x8xf32> to vector<1x8xf32>
    %245 = vector.broadcast %244 : vector<1x8xf32> to vector<48x8xf32>
    %246 = arith.addf %242, %245 : vector<48x8xf32>
    %cst_125 = arith.constant dense<0.000000e+00> : vector<48x32xf32>
    %247 = tpu.matmul %9, %239, %cst_125 {dimension_numbers = #tpu.dot_dimension_numbers<[1], [0], [0], [1], [0, 0, 1, 1], [], []>} : vector<48x16xf32>, vector<16x32xf32>, vector<48x32xf32> -> vector<48x32xf32>
    %cst_126 = arith.constant dense<0.000000e+00> : vector<48x32xf32>
    %248 = tpu.matmul %14, %239, %cst_126 {dimension_numbers = #tpu.dot_dimension_numbers<[1], [0], [0], [1], [0, 0, 1, 1], [], []>} : vector<48x16xf32>, vector<16x32xf32>, vector<48x32xf32> -> vector<48x32xf32>
    %c1_127 = arith.constant 1 : index
    %c0_128 = arith.constant 0 : index
    %c0_129 = arith.constant 0 : index
    %249 = vector.load %arg8[%c1_127, %c0_128, %c0_129] : memref<5x32x32xf32, #tpu.memory_space<vmem>>, vector<1x32x32xf32>
    %250 = vector.shape_cast %249 : vector<1x32x32xf32> to vector<32x32xf32>
    %cst_130 = arith.constant dense<0.000000e+00> : vector<48x32xf32>
    %251 = tpu.matmul %247, %250, %cst_130 {dimension_numbers = #tpu.dot_dimension_numbers<[1], [0], [0], [1], [0, 0, 1, 1], [], []>} : vector<48x32xf32>, vector<32x32xf32>, vector<48x32xf32> -> vector<48x32xf32>
    %c1_131 = arith.constant 1 : index
    %c0_132 = arith.constant 0 : index
    %c0_133 = arith.constant 0 : index
    %252 = vector.load %arg9[%c1_131, %c0_132, %c0_133] : memref<5x32x32xf32, #tpu.memory_space<vmem>>, vector<1x32x32xf32>
    %253 = vector.shape_cast %252 : vector<1x32x32xf32> to vector<32x32xf32>
    %cst_134 = arith.constant dense<0.000000e+00> : vector<48x32xf32>
    %254 = tpu.matmul %248, %253, %cst_134 {dimension_numbers = #tpu.dot_dimension_numbers<[1], [0], [0], [1], [0, 0, 1, 1], [], []>} : vector<48x32xf32>, vector<32x32xf32>, vector<48x32xf32> -> vector<48x32xf32>
    %255 = arith.addf %251, %254 : vector<48x32xf32>
    %c1_135 = arith.constant 1 : index
    %c0_136 = arith.constant 0 : index
    %c0_137 = arith.constant 0 : index
    %256 = vector.load %arg10[%c1_135, %c0_136, %c0_137] : memref<5x8x32xf32, #tpu.memory_space<vmem>>, vector<1x8x32xf32>
    %257 = vector.shape_cast %256 : vector<1x8x32xf32> to vector<8x32xf32>
    %cst_138 = arith.constant dense<0.000000e+00> : vector<48x32xf32>
    %258 = tpu.matmul %246, %257, %cst_138 {dimension_numbers = #tpu.dot_dimension_numbers<[1], [0], [0], [1], [0, 0, 1, 1], [], []>} : vector<48x8xf32>, vector<8x32xf32>, vector<48x32xf32> -> vector<48x32xf32>
    %259 = arith.addf %255, %258 : vector<48x32xf32>
    %c1_139 = arith.constant 1 : index
    %c0_140 = arith.constant 0 : index
    %c0_141 = arith.constant 0 : index
    %260 = vector.load %arg11[%c1_139, %c0_140, %c0_141] : memref<5x1x32xf32, #tpu.memory_space<vmem>>, vector<1x1x32xf32>
    %261 = vector.shape_cast %260 : vector<1x1x32xf32> to vector<1x32xf32>
    %262 = vector.broadcast %261 : vector<1x32xf32> to vector<48x32xf32>
    %263 = arith.addf %259, %262 : vector<48x32xf32>
    %cst_142 = arith.constant dense<0.000000e+00> : vector<16x32xf32>
    %264 = tpu.matmul %19, %263, %cst_142 {dimension_numbers = #tpu.dot_dimension_numbers<[1], [0], [0], [1], [0, 0, 1, 1], [], []>} : vector<16x48xf32>, vector<48x32xf32>, vector<16x32xf32> -> vector<16x32xf32>
    %265 = vector.broadcast %25 : vector<16x1xf32> to vector<16x32xf32>
    %266 = arith.mulf %264, %265 : vector<16x32xf32>
    %267 = vector.extract_strided_slice %9 {offsets = [0, 0], sizes = [48, 1], strides = [1, 1]} : vector<48x16xf32> to vector<48x1xf32>
    %cst_143 = arith.constant 0.000000e+00 : f32
    %268 = vector.broadcast %cst_143 : f32 to vector<48x1xf32>
    %269 = arith.cmpf ogt, %267, %268 : vector<48x1xf32>
    %cst_144 = arith.constant -1.000000e+30 : f32
    %270 = vector.shape_cast %269 : vector<48x1xi1> to vector<48x1xi1>
    %271 = vector.broadcast %270 : vector<48x1xi1> to vector<48x32xi1>
    %272 = vector.broadcast %cst_144 : f32 to vector<48x32xf32>
    %273 = arith.select %271, %263, %272 : vector<48x32xi1>, vector<48x32xf32>
    %cst_145 = arith.constant dense<0xFF800000> : vector<32xf32>
    %274 = vector.multi_reduction <maximumf>, %273, %cst_145 [0] : vector<48x32xf32> to vector<32xf32>
    %275 = vector.shape_cast %274 : vector<32xf32> to vector<1x32xf32>
    %276 = vector.extract_strided_slice %9 {offsets = [0, 1], sizes = [48, 1], strides = [1, 1]} : vector<48x16xf32> to vector<48x1xf32>
    %cst_146 = arith.constant 0.000000e+00 : f32
    %277 = vector.broadcast %cst_146 : f32 to vector<48x1xf32>
    %278 = arith.cmpf ogt, %276, %277 : vector<48x1xf32>
    %cst_147 = arith.constant -1.000000e+30 : f32
    %279 = vector.shape_cast %278 : vector<48x1xi1> to vector<48x1xi1>
    %280 = vector.broadcast %279 : vector<48x1xi1> to vector<48x32xi1>
    %281 = vector.broadcast %cst_147 : f32 to vector<48x32xf32>
    %282 = arith.select %280, %263, %281 : vector<48x32xi1>, vector<48x32xf32>
    %cst_148 = arith.constant dense<0xFF800000> : vector<32xf32>
    %283 = vector.multi_reduction <maximumf>, %282, %cst_148 [0] : vector<48x32xf32> to vector<32xf32>
    %284 = vector.shape_cast %283 : vector<32xf32> to vector<1x32xf32>
    %285 = vector.extract_strided_slice %9 {offsets = [0, 2], sizes = [48, 1], strides = [1, 1]} : vector<48x16xf32> to vector<48x1xf32>
    %cst_149 = arith.constant 0.000000e+00 : f32
    %286 = vector.broadcast %cst_149 : f32 to vector<48x1xf32>
    %287 = arith.cmpf ogt, %285, %286 : vector<48x1xf32>
    %cst_150 = arith.constant -1.000000e+30 : f32
    %288 = vector.shape_cast %287 : vector<48x1xi1> to vector<48x1xi1>
    %289 = vector.broadcast %288 : vector<48x1xi1> to vector<48x32xi1>
    %290 = vector.broadcast %cst_150 : f32 to vector<48x32xf32>
    %291 = arith.select %289, %263, %290 : vector<48x32xi1>, vector<48x32xf32>
    %cst_151 = arith.constant dense<0xFF800000> : vector<32xf32>
    %292 = vector.multi_reduction <maximumf>, %291, %cst_151 [0] : vector<48x32xf32> to vector<32xf32>
    %293 = vector.shape_cast %292 : vector<32xf32> to vector<1x32xf32>
    %294 = vector.extract_strided_slice %9 {offsets = [0, 3], sizes = [48, 1], strides = [1, 1]} : vector<48x16xf32> to vector<48x1xf32>
    %cst_152 = arith.constant 0.000000e+00 : f32
    %295 = vector.broadcast %cst_152 : f32 to vector<48x1xf32>
    %296 = arith.cmpf ogt, %294, %295 : vector<48x1xf32>
    %cst_153 = arith.constant -1.000000e+30 : f32
    %297 = vector.shape_cast %296 : vector<48x1xi1> to vector<48x1xi1>
    %298 = vector.broadcast %297 : vector<48x1xi1> to vector<48x32xi1>
    %299 = vector.broadcast %cst_153 : f32 to vector<48x32xf32>
    %300 = arith.select %298, %263, %299 : vector<48x32xi1>, vector<48x32xf32>
    %cst_154 = arith.constant dense<0xFF800000> : vector<32xf32>
    %301 = vector.multi_reduction <maximumf>, %300, %cst_154 [0] : vector<48x32xf32> to vector<32xf32>
    %302 = vector.shape_cast %301 : vector<32xf32> to vector<1x32xf32>
    %303 = vector.extract_strided_slice %9 {offsets = [0, 4], sizes = [48, 1], strides = [1, 1]} : vector<48x16xf32> to vector<48x1xf32>
    %cst_155 = arith.constant 0.000000e+00 : f32
    %304 = vector.broadcast %cst_155 : f32 to vector<48x1xf32>
    %305 = arith.cmpf ogt, %303, %304 : vector<48x1xf32>
    %cst_156 = arith.constant -1.000000e+30 : f32
    %306 = vector.shape_cast %305 : vector<48x1xi1> to vector<48x1xi1>
    %307 = vector.broadcast %306 : vector<48x1xi1> to vector<48x32xi1>
    %308 = vector.broadcast %cst_156 : f32 to vector<48x32xf32>
    %309 = arith.select %307, %263, %308 : vector<48x32xi1>, vector<48x32xf32>
    %cst_157 = arith.constant dense<0xFF800000> : vector<32xf32>
    %310 = vector.multi_reduction <maximumf>, %309, %cst_157 [0] : vector<48x32xf32> to vector<32xf32>
    %311 = vector.shape_cast %310 : vector<32xf32> to vector<1x32xf32>
    %312 = vector.extract_strided_slice %9 {offsets = [0, 5], sizes = [48, 1], strides = [1, 1]} : vector<48x16xf32> to vector<48x1xf32>
    %cst_158 = arith.constant 0.000000e+00 : f32
    %313 = vector.broadcast %cst_158 : f32 to vector<48x1xf32>
    %314 = arith.cmpf ogt, %312, %313 : vector<48x1xf32>
    %cst_159 = arith.constant -1.000000e+30 : f32
    %315 = vector.shape_cast %314 : vector<48x1xi1> to vector<48x1xi1>
    %316 = vector.broadcast %315 : vector<48x1xi1> to vector<48x32xi1>
    %317 = vector.broadcast %cst_159 : f32 to vector<48x32xf32>
    %318 = arith.select %316, %263, %317 : vector<48x32xi1>, vector<48x32xf32>
    %cst_160 = arith.constant dense<0xFF800000> : vector<32xf32>
    %319 = vector.multi_reduction <maximumf>, %318, %cst_160 [0] : vector<48x32xf32> to vector<32xf32>
    %320 = vector.shape_cast %319 : vector<32xf32> to vector<1x32xf32>
    %321 = vector.extract_strided_slice %9 {offsets = [0, 6], sizes = [48, 1], strides = [1, 1]} : vector<48x16xf32> to vector<48x1xf32>
    %cst_161 = arith.constant 0.000000e+00 : f32
    %322 = vector.broadcast %cst_161 : f32 to vector<48x1xf32>
    %323 = arith.cmpf ogt, %321, %322 : vector<48x1xf32>
    %cst_162 = arith.constant -1.000000e+30 : f32
    %324 = vector.shape_cast %323 : vector<48x1xi1> to vector<48x1xi1>
    %325 = vector.broadcast %324 : vector<48x1xi1> to vector<48x32xi1>
    %326 = vector.broadcast %cst_162 : f32 to vector<48x32xf32>
    %327 = arith.select %325, %263, %326 : vector<48x32xi1>, vector<48x32xf32>
    %cst_163 = arith.constant dense<0xFF800000> : vector<32xf32>
    %328 = vector.multi_reduction <maximumf>, %327, %cst_163 [0] : vector<48x32xf32> to vector<32xf32>
    %329 = vector.shape_cast %328 : vector<32xf32> to vector<1x32xf32>
    %330 = vector.extract_strided_slice %9 {offsets = [0, 7], sizes = [48, 1], strides = [1, 1]} : vector<48x16xf32> to vector<48x1xf32>
    %cst_164 = arith.constant 0.000000e+00 : f32
    %331 = vector.broadcast %cst_164 : f32 to vector<48x1xf32>
    %332 = arith.cmpf ogt, %330, %331 : vector<48x1xf32>
    %cst_165 = arith.constant -1.000000e+30 : f32
    %333 = vector.shape_cast %332 : vector<48x1xi1> to vector<48x1xi1>
    %334 = vector.broadcast %333 : vector<48x1xi1> to vector<48x32xi1>
    %335 = vector.broadcast %cst_165 : f32 to vector<48x32xf32>
    %336 = arith.select %334, %263, %335 : vector<48x32xi1>, vector<48x32xf32>
    %cst_166 = arith.constant dense<0xFF800000> : vector<32xf32>
    %337 = vector.multi_reduction <maximumf>, %336, %cst_166 [0] : vector<48x32xf32> to vector<32xf32>
    %338 = vector.shape_cast %337 : vector<32xf32> to vector<1x32xf32>
    %339 = vector.extract_strided_slice %9 {offsets = [0, 8], sizes = [48, 1], strides = [1, 1]} : vector<48x16xf32> to vector<48x1xf32>
    %cst_167 = arith.constant 0.000000e+00 : f32
    %340 = vector.broadcast %cst_167 : f32 to vector<48x1xf32>
    %341 = arith.cmpf ogt, %339, %340 : vector<48x1xf32>
    %cst_168 = arith.constant -1.000000e+30 : f32
    %342 = vector.shape_cast %341 : vector<48x1xi1> to vector<48x1xi1>
    %343 = vector.broadcast %342 : vector<48x1xi1> to vector<48x32xi1>
    %344 = vector.broadcast %cst_168 : f32 to vector<48x32xf32>
    %345 = arith.select %343, %263, %344 : vector<48x32xi1>, vector<48x32xf32>
    %cst_169 = arith.constant dense<0xFF800000> : vector<32xf32>
    %346 = vector.multi_reduction <maximumf>, %345, %cst_169 [0] : vector<48x32xf32> to vector<32xf32>
    %347 = vector.shape_cast %346 : vector<32xf32> to vector<1x32xf32>
    %348 = vector.extract_strided_slice %9 {offsets = [0, 9], sizes = [48, 1], strides = [1, 1]} : vector<48x16xf32> to vector<48x1xf32>
    %cst_170 = arith.constant 0.000000e+00 : f32
    %349 = vector.broadcast %cst_170 : f32 to vector<48x1xf32>
    %350 = arith.cmpf ogt, %348, %349 : vector<48x1xf32>
    %cst_171 = arith.constant -1.000000e+30 : f32
    %351 = vector.shape_cast %350 : vector<48x1xi1> to vector<48x1xi1>
    %352 = vector.broadcast %351 : vector<48x1xi1> to vector<48x32xi1>
    %353 = vector.broadcast %cst_171 : f32 to vector<48x32xf32>
    %354 = arith.select %352, %263, %353 : vector<48x32xi1>, vector<48x32xf32>
    %cst_172 = arith.constant dense<0xFF800000> : vector<32xf32>
    %355 = vector.multi_reduction <maximumf>, %354, %cst_172 [0] : vector<48x32xf32> to vector<32xf32>
    %356 = vector.shape_cast %355 : vector<32xf32> to vector<1x32xf32>
    %357 = vector.extract_strided_slice %9 {offsets = [0, 10], sizes = [48, 1], strides = [1, 1]} : vector<48x16xf32> to vector<48x1xf32>
    %cst_173 = arith.constant 0.000000e+00 : f32
    %358 = vector.broadcast %cst_173 : f32 to vector<48x1xf32>
    %359 = arith.cmpf ogt, %357, %358 : vector<48x1xf32>
    %cst_174 = arith.constant -1.000000e+30 : f32
    %360 = vector.shape_cast %359 : vector<48x1xi1> to vector<48x1xi1>
    %361 = vector.broadcast %360 : vector<48x1xi1> to vector<48x32xi1>
    %362 = vector.broadcast %cst_174 : f32 to vector<48x32xf32>
    %363 = arith.select %361, %263, %362 : vector<48x32xi1>, vector<48x32xf32>
    %cst_175 = arith.constant dense<0xFF800000> : vector<32xf32>
    %364 = vector.multi_reduction <maximumf>, %363, %cst_175 [0] : vector<48x32xf32> to vector<32xf32>
    %365 = vector.shape_cast %364 : vector<32xf32> to vector<1x32xf32>
    %366 = vector.extract_strided_slice %9 {offsets = [0, 11], sizes = [48, 1], strides = [1, 1]} : vector<48x16xf32> to vector<48x1xf32>
    %cst_176 = arith.constant 0.000000e+00 : f32
    %367 = vector.broadcast %cst_176 : f32 to vector<48x1xf32>
    %368 = arith.cmpf ogt, %366, %367 : vector<48x1xf32>
    %cst_177 = arith.constant -1.000000e+30 : f32
    %369 = vector.shape_cast %368 : vector<48x1xi1> to vector<48x1xi1>
    %370 = vector.broadcast %369 : vector<48x1xi1> to vector<48x32xi1>
    %371 = vector.broadcast %cst_177 : f32 to vector<48x32xf32>
    %372 = arith.select %370, %263, %371 : vector<48x32xi1>, vector<48x32xf32>
    %cst_178 = arith.constant dense<0xFF800000> : vector<32xf32>
    %373 = vector.multi_reduction <maximumf>, %372, %cst_178 [0] : vector<48x32xf32> to vector<32xf32>
    %374 = vector.shape_cast %373 : vector<32xf32> to vector<1x32xf32>
    %375 = vector.extract_strided_slice %9 {offsets = [0, 12], sizes = [48, 1], strides = [1, 1]} : vector<48x16xf32> to vector<48x1xf32>
    %cst_179 = arith.constant 0.000000e+00 : f32
    %376 = vector.broadcast %cst_179 : f32 to vector<48x1xf32>
    %377 = arith.cmpf ogt, %375, %376 : vector<48x1xf32>
    %cst_180 = arith.constant -1.000000e+30 : f32
    %378 = vector.shape_cast %377 : vector<48x1xi1> to vector<48x1xi1>
    %379 = vector.broadcast %378 : vector<48x1xi1> to vector<48x32xi1>
    %380 = vector.broadcast %cst_180 : f32 to vector<48x32xf32>
    %381 = arith.select %379, %263, %380 : vector<48x32xi1>, vector<48x32xf32>
    %cst_181 = arith.constant dense<0xFF800000> : vector<32xf32>
    %382 = vector.multi_reduction <maximumf>, %381, %cst_181 [0] : vector<48x32xf32> to vector<32xf32>
    %383 = vector.shape_cast %382 : vector<32xf32> to vector<1x32xf32>
    %384 = vector.extract_strided_slice %9 {offsets = [0, 13], sizes = [48, 1], strides = [1, 1]} : vector<48x16xf32> to vector<48x1xf32>
    %cst_182 = arith.constant 0.000000e+00 : f32
    %385 = vector.broadcast %cst_182 : f32 to vector<48x1xf32>
    %386 = arith.cmpf ogt, %384, %385 : vector<48x1xf32>
    %cst_183 = arith.constant -1.000000e+30 : f32
    %387 = vector.shape_cast %386 : vector<48x1xi1> to vector<48x1xi1>
    %388 = vector.broadcast %387 : vector<48x1xi1> to vector<48x32xi1>
    %389 = vector.broadcast %cst_183 : f32 to vector<48x32xf32>
    %390 = arith.select %388, %263, %389 : vector<48x32xi1>, vector<48x32xf32>
    %cst_184 = arith.constant dense<0xFF800000> : vector<32xf32>
    %391 = vector.multi_reduction <maximumf>, %390, %cst_184 [0] : vector<48x32xf32> to vector<32xf32>
    %392 = vector.shape_cast %391 : vector<32xf32> to vector<1x32xf32>
    %393 = vector.extract_strided_slice %9 {offsets = [0, 14], sizes = [48, 1], strides = [1, 1]} : vector<48x16xf32> to vector<48x1xf32>
    %cst_185 = arith.constant 0.000000e+00 : f32
    %394 = vector.broadcast %cst_185 : f32 to vector<48x1xf32>
    %395 = arith.cmpf ogt, %393, %394 : vector<48x1xf32>
    %cst_186 = arith.constant -1.000000e+30 : f32
    %396 = vector.shape_cast %395 : vector<48x1xi1> to vector<48x1xi1>
    %397 = vector.broadcast %396 : vector<48x1xi1> to vector<48x32xi1>
    %398 = vector.broadcast %cst_186 : f32 to vector<48x32xf32>
    %399 = arith.select %397, %263, %398 : vector<48x32xi1>, vector<48x32xf32>
    %cst_187 = arith.constant dense<0xFF800000> : vector<32xf32>
    %400 = vector.multi_reduction <maximumf>, %399, %cst_187 [0] : vector<48x32xf32> to vector<32xf32>
    %401 = vector.shape_cast %400 : vector<32xf32> to vector<1x32xf32>
    %402 = vector.extract_strided_slice %9 {offsets = [0, 15], sizes = [48, 1], strides = [1, 1]} : vector<48x16xf32> to vector<48x1xf32>
    %cst_188 = arith.constant 0.000000e+00 : f32
    %403 = vector.broadcast %cst_188 : f32 to vector<48x1xf32>
    %404 = arith.cmpf ogt, %402, %403 : vector<48x1xf32>
    %cst_189 = arith.constant -1.000000e+30 : f32
    %405 = vector.shape_cast %404 : vector<48x1xi1> to vector<48x1xi1>
    %406 = vector.broadcast %405 : vector<48x1xi1> to vector<48x32xi1>
    %407 = vector.broadcast %cst_189 : f32 to vector<48x32xf32>
    %408 = arith.select %406, %263, %407 : vector<48x32xi1>, vector<48x32xf32>
    %cst_190 = arith.constant dense<0xFF800000> : vector<32xf32>
    %409 = vector.multi_reduction <maximumf>, %408, %cst_190 [0] : vector<48x32xf32> to vector<32xf32>
    %410 = vector.shape_cast %409 : vector<32xf32> to vector<1x32xf32>
    %411 = tpu.concatenate %275, %284, %293, %302, %311, %320, %329, %338, %347, %356, %365, %374, %383, %392, %401, %410 in 0 : vector<1x32xf32>, vector<1x32xf32>, vector<1x32xf32>, vector<1x32xf32>, vector<1x32xf32>, vector<1x32xf32>, vector<1x32xf32>, vector<1x32xf32>, vector<1x32xf32>, vector<1x32xf32>, vector<1x32xf32>, vector<1x32xf32>, vector<1x32xf32>, vector<1x32xf32>, vector<1x32xf32>, vector<1x32xf32> -> vector<16x32xf32>
    %cst_191 = arith.constant 0.000000e+00 : f32
    %412 = vector.shape_cast %27 : vector<16x1xi1> to vector<16x1xi1>
    %413 = vector.broadcast %412 : vector<16x1xi1> to vector<16x32xi1>
    %414 = vector.broadcast %cst_191 : f32 to vector<16x32xf32>
    %415 = arith.select %413, %411, %414 : vector<16x32xi1>, vector<16x32xf32>
    %c1_192 = arith.constant 1 : index
    %c0_193 = arith.constant 0 : index
    %c0_194 = arith.constant 0 : index
    %416 = vector.load %arg12[%c1_192, %c0_193, %c0_194] : memref<5x32x32xf32, #tpu.memory_space<vmem>>, vector<1x32x32xf32>
    %417 = vector.shape_cast %416 : vector<1x32x32xf32> to vector<32x32xf32>
    %cst_195 = arith.constant dense<0.000000e+00> : vector<16x32xf32>
    %418 = tpu.matmul %239, %417, %cst_195 {dimension_numbers = #tpu.dot_dimension_numbers<[1], [0], [0], [1], [0, 0, 1, 1], [], []>} : vector<16x32xf32>, vector<32x32xf32>, vector<16x32xf32> -> vector<16x32xf32>
    %c1_196 = arith.constant 1 : index
    %c0_197 = arith.constant 0 : index
    %c0_198 = arith.constant 0 : index
    %419 = vector.load %arg13[%c1_196, %c0_197, %c0_198] : memref<5x32x32xf32, #tpu.memory_space<vmem>>, vector<1x32x32xf32>
    %420 = vector.shape_cast %419 : vector<1x32x32xf32> to vector<32x32xf32>
    %cst_199 = arith.constant dense<0.000000e+00> : vector<16x32xf32>
    %421 = tpu.matmul %266, %420, %cst_199 {dimension_numbers = #tpu.dot_dimension_numbers<[1], [0], [0], [1], [0, 0, 1, 1], [], []>} : vector<16x32xf32>, vector<32x32xf32>, vector<16x32xf32> -> vector<16x32xf32>
    %422 = arith.addf %418, %421 : vector<16x32xf32>
    %c1_200 = arith.constant 1 : index
    %c0_201 = arith.constant 0 : index
    %c0_202 = arith.constant 0 : index
    %423 = vector.load %arg14[%c1_200, %c0_201, %c0_202] : memref<5x32x32xf32, #tpu.memory_space<vmem>>, vector<1x32x32xf32>
    %424 = vector.shape_cast %423 : vector<1x32x32xf32> to vector<32x32xf32>
    %cst_203 = arith.constant dense<0.000000e+00> : vector<16x32xf32>
    %425 = tpu.matmul %264, %424, %cst_203 {dimension_numbers = #tpu.dot_dimension_numbers<[1], [0], [0], [1], [0, 0, 1, 1], [], []>} : vector<16x32xf32>, vector<32x32xf32>, vector<16x32xf32> -> vector<16x32xf32>
    %426 = arith.addf %422, %425 : vector<16x32xf32>
    %c1_204 = arith.constant 1 : index
    %c0_205 = arith.constant 0 : index
    %c0_206 = arith.constant 0 : index
    %427 = vector.load %arg15[%c1_204, %c0_205, %c0_206] : memref<5x32x32xf32, #tpu.memory_space<vmem>>, vector<1x32x32xf32>
    %428 = vector.shape_cast %427 : vector<1x32x32xf32> to vector<32x32xf32>
    %cst_207 = arith.constant dense<0.000000e+00> : vector<16x32xf32>
    %429 = tpu.matmul %415, %428, %cst_207 {dimension_numbers = #tpu.dot_dimension_numbers<[1], [0], [0], [1], [0, 0, 1, 1], [], []>} : vector<16x32xf32>, vector<32x32xf32>, vector<16x32xf32> -> vector<16x32xf32>
    %430 = arith.addf %426, %429 : vector<16x32xf32>
    %c1_208 = arith.constant 1 : index
    %c0_209 = arith.constant 0 : index
    %c0_210 = arith.constant 0 : index
    %431 = vector.load %arg16[%c1_208, %c0_209, %c0_210] : memref<5x1x32xf32, #tpu.memory_space<vmem>>, vector<1x1x32xf32>
    %432 = vector.shape_cast %431 : vector<1x1x32xf32> to vector<1x32xf32>
    %433 = vector.broadcast %432 : vector<1x32xf32> to vector<16x32xf32>
    %434 = arith.addf %430, %433 : vector<16x32xf32>
    %c1_211 = arith.constant 1 : index
    %c0_212 = arith.constant 0 : index
    %c0_213 = arith.constant 0 : index
    %435 = vector.load %arg17[%c1_211, %c0_212, %c0_213] : memref<5x32x32xf32, #tpu.memory_space<vmem>>, vector<1x32x32xf32>
    %436 = vector.shape_cast %435 : vector<1x32x32xf32> to vector<32x32xf32>
    %cst_214 = arith.constant dense<0.000000e+00> : vector<16x32xf32>
    %437 = tpu.matmul %434, %436, %cst_214 {dimension_numbers = #tpu.dot_dimension_numbers<[1], [0], [0], [1], [0, 0, 1, 1], [], []>} : vector<16x32xf32>, vector<32x32xf32>, vector<16x32xf32> -> vector<16x32xf32>
    %c1_215 = arith.constant 1 : index
    %c0_216 = arith.constant 0 : index
    %c0_217 = arith.constant 0 : index
    %438 = vector.load %arg18[%c1_215, %c0_216, %c0_217] : memref<5x1x32xf32, #tpu.memory_space<vmem>>, vector<1x1x32xf32>
    %439 = vector.shape_cast %438 : vector<1x1x32xf32> to vector<1x32xf32>
    %440 = vector.broadcast %439 : vector<1x32xf32> to vector<16x32xf32>
    %441 = arith.addf %437, %440 : vector<16x32xf32>
    %cst_218 = arith.constant 0.000000e+00 : f32
    %442 = vector.broadcast %cst_218 : f32 to vector<16x32xf32>
    %443 = arith.maximumf %441, %442 : vector<16x32xf32>
    %c1_219 = arith.constant 1 : index
    %c0_220 = arith.constant 0 : index
    %c0_221 = arith.constant 0 : index
    %444 = vector.load %arg5[%c1_219, %c0_220, %c0_221] : memref<5x16x32xf32, #tpu.memory_space<vmem>>, vector<1x16x32xf32>
    %445 = vector.shape_cast %444 : vector<1x16x32xf32> to vector<16x32xf32>
    %cst_222 = arith.constant 1.000000e-01 : f32
    %446 = vector.broadcast %cst_222 : f32 to vector<16x32xf32>
    %447 = arith.cmpf oge, %445, %446 : vector<16x32xf32>
    %cst_223 = arith.constant 1.11111116 : f32
    %448 = vector.broadcast %cst_223 : f32 to vector<16x32xf32>
    %449 = arith.mulf %443, %448 : vector<16x32xf32>
    %cst_224 = arith.constant 0.000000e+00 : f32
    %450 = vector.broadcast %cst_224 : f32 to vector<16x32xf32>
    %451 = arith.select %447, %449, %450 : vector<16x32xi1>, vector<16x32xf32>
    %c2 = arith.constant 2 : index
    %c0_225 = arith.constant 0 : index
    %c0_226 = arith.constant 0 : index
    %452 = vector.load %arg6[%c2, %c0_225, %c0_226] : memref<5x16x8xf32, #tpu.memory_space<vmem>>, vector<1x16x8xf32>
    %453 = vector.shape_cast %452 : vector<1x16x8xf32> to vector<16x8xf32>
    %cst_227 = arith.constant dense<0.000000e+00> : vector<48x8xf32>
    %454 = tpu.matmul %1, %453, %cst_227 {dimension_numbers = #tpu.dot_dimension_numbers<[1], [0], [0], [1], [0, 0, 1, 1], [], []>} : vector<48x16xf32>, vector<16x8xf32>, vector<48x8xf32> -> vector<48x8xf32>
    %c2_228 = arith.constant 2 : index
    %c0_229 = arith.constant 0 : index
    %c0_230 = arith.constant 0 : index
    %455 = vector.load %arg7[%c2_228, %c0_229, %c0_230] : memref<5x1x8xf32, #tpu.memory_space<vmem>>, vector<1x1x8xf32>
    %456 = vector.shape_cast %455 : vector<1x1x8xf32> to vector<1x8xf32>
    %457 = vector.broadcast %456 : vector<1x8xf32> to vector<48x8xf32>
    %458 = arith.addf %454, %457 : vector<48x8xf32>
    %cst_231 = arith.constant dense<0.000000e+00> : vector<48x32xf32>
    %459 = tpu.matmul %9, %451, %cst_231 {dimension_numbers = #tpu.dot_dimension_numbers<[1], [0], [0], [1], [0, 0, 1, 1], [], []>} : vector<48x16xf32>, vector<16x32xf32>, vector<48x32xf32> -> vector<48x32xf32>
    %cst_232 = arith.constant dense<0.000000e+00> : vector<48x32xf32>
    %460 = tpu.matmul %14, %451, %cst_232 {dimension_numbers = #tpu.dot_dimension_numbers<[1], [0], [0], [1], [0, 0, 1, 1], [], []>} : vector<48x16xf32>, vector<16x32xf32>, vector<48x32xf32> -> vector<48x32xf32>
    %c2_233 = arith.constant 2 : index
    %c0_234 = arith.constant 0 : index
    %c0_235 = arith.constant 0 : index
    %461 = vector.load %arg8[%c2_233, %c0_234, %c0_235] : memref<5x32x32xf32, #tpu.memory_space<vmem>>, vector<1x32x32xf32>
    %462 = vector.shape_cast %461 : vector<1x32x32xf32> to vector<32x32xf32>
    %cst_236 = arith.constant dense<0.000000e+00> : vector<48x32xf32>
    %463 = tpu.matmul %459, %462, %cst_236 {dimension_numbers = #tpu.dot_dimension_numbers<[1], [0], [0], [1], [0, 0, 1, 1], [], []>} : vector<48x32xf32>, vector<32x32xf32>, vector<48x32xf32> -> vector<48x32xf32>
    %c2_237 = arith.constant 2 : index
    %c0_238 = arith.constant 0 : index
    %c0_239 = arith.constant 0 : index
    %464 = vector.load %arg9[%c2_237, %c0_238, %c0_239] : memref<5x32x32xf32, #tpu.memory_space<vmem>>, vector<1x32x32xf32>
    %465 = vector.shape_cast %464 : vector<1x32x32xf32> to vector<32x32xf32>
    %cst_240 = arith.constant dense<0.000000e+00> : vector<48x32xf32>
    %466 = tpu.matmul %460, %465, %cst_240 {dimension_numbers = #tpu.dot_dimension_numbers<[1], [0], [0], [1], [0, 0, 1, 1], [], []>} : vector<48x32xf32>, vector<32x32xf32>, vector<48x32xf32> -> vector<48x32xf32>
    %467 = arith.addf %463, %466 : vector<48x32xf32>
    %c2_241 = arith.constant 2 : index
    %c0_242 = arith.constant 0 : index
    %c0_243 = arith.constant 0 : index
    %468 = vector.load %arg10[%c2_241, %c0_242, %c0_243] : memref<5x8x32xf32, #tpu.memory_space<vmem>>, vector<1x8x32xf32>
    %469 = vector.shape_cast %468 : vector<1x8x32xf32> to vector<8x32xf32>
    %cst_244 = arith.constant dense<0.000000e+00> : vector<48x32xf32>
    %470 = tpu.matmul %458, %469, %cst_244 {dimension_numbers = #tpu.dot_dimension_numbers<[1], [0], [0], [1], [0, 0, 1, 1], [], []>} : vector<48x8xf32>, vector<8x32xf32>, vector<48x32xf32> -> vector<48x32xf32>
    %471 = arith.addf %467, %470 : vector<48x32xf32>
    %c2_245 = arith.constant 2 : index
    %c0_246 = arith.constant 0 : index
    %c0_247 = arith.constant 0 : index
    %472 = vector.load %arg11[%c2_245, %c0_246, %c0_247] : memref<5x1x32xf32, #tpu.memory_space<vmem>>, vector<1x1x32xf32>
    %473 = vector.shape_cast %472 : vector<1x1x32xf32> to vector<1x32xf32>
    %474 = vector.broadcast %473 : vector<1x32xf32> to vector<48x32xf32>
    %475 = arith.addf %471, %474 : vector<48x32xf32>
    %cst_248 = arith.constant dense<0.000000e+00> : vector<16x32xf32>
    %476 = tpu.matmul %19, %475, %cst_248 {dimension_numbers = #tpu.dot_dimension_numbers<[1], [0], [0], [1], [0, 0, 1, 1], [], []>} : vector<16x48xf32>, vector<48x32xf32>, vector<16x32xf32> -> vector<16x32xf32>
    %477 = vector.broadcast %25 : vector<16x1xf32> to vector<16x32xf32>
    %478 = arith.mulf %476, %477 : vector<16x32xf32>
    %479 = vector.extract_strided_slice %9 {offsets = [0, 0], sizes = [48, 1], strides = [1, 1]} : vector<48x16xf32> to vector<48x1xf32>
    %cst_249 = arith.constant 0.000000e+00 : f32
    %480 = vector.broadcast %cst_249 : f32 to vector<48x1xf32>
    %481 = arith.cmpf ogt, %479, %480 : vector<48x1xf32>
    %cst_250 = arith.constant -1.000000e+30 : f32
    %482 = vector.shape_cast %481 : vector<48x1xi1> to vector<48x1xi1>
    %483 = vector.broadcast %482 : vector<48x1xi1> to vector<48x32xi1>
    %484 = vector.broadcast %cst_250 : f32 to vector<48x32xf32>
    %485 = arith.select %483, %475, %484 : vector<48x32xi1>, vector<48x32xf32>
    %cst_251 = arith.constant dense<0xFF800000> : vector<32xf32>
    %486 = vector.multi_reduction <maximumf>, %485, %cst_251 [0] : vector<48x32xf32> to vector<32xf32>
    %487 = vector.shape_cast %486 : vector<32xf32> to vector<1x32xf32>
    %488 = vector.extract_strided_slice %9 {offsets = [0, 1], sizes = [48, 1], strides = [1, 1]} : vector<48x16xf32> to vector<48x1xf32>
    %cst_252 = arith.constant 0.000000e+00 : f32
    %489 = vector.broadcast %cst_252 : f32 to vector<48x1xf32>
    %490 = arith.cmpf ogt, %488, %489 : vector<48x1xf32>
    %cst_253 = arith.constant -1.000000e+30 : f32
    %491 = vector.shape_cast %490 : vector<48x1xi1> to vector<48x1xi1>
    %492 = vector.broadcast %491 : vector<48x1xi1> to vector<48x32xi1>
    %493 = vector.broadcast %cst_253 : f32 to vector<48x32xf32>
    %494 = arith.select %492, %475, %493 : vector<48x32xi1>, vector<48x32xf32>
    %cst_254 = arith.constant dense<0xFF800000> : vector<32xf32>
    %495 = vector.multi_reduction <maximumf>, %494, %cst_254 [0] : vector<48x32xf32> to vector<32xf32>
    %496 = vector.shape_cast %495 : vector<32xf32> to vector<1x32xf32>
    %497 = vector.extract_strided_slice %9 {offsets = [0, 2], sizes = [48, 1], strides = [1, 1]} : vector<48x16xf32> to vector<48x1xf32>
    %cst_255 = arith.constant 0.000000e+00 : f32
    %498 = vector.broadcast %cst_255 : f32 to vector<48x1xf32>
    %499 = arith.cmpf ogt, %497, %498 : vector<48x1xf32>
    %cst_256 = arith.constant -1.000000e+30 : f32
    %500 = vector.shape_cast %499 : vector<48x1xi1> to vector<48x1xi1>
    %501 = vector.broadcast %500 : vector<48x1xi1> to vector<48x32xi1>
    %502 = vector.broadcast %cst_256 : f32 to vector<48x32xf32>
    %503 = arith.select %501, %475, %502 : vector<48x32xi1>, vector<48x32xf32>
    %cst_257 = arith.constant dense<0xFF800000> : vector<32xf32>
    %504 = vector.multi_reduction <maximumf>, %503, %cst_257 [0] : vector<48x32xf32> to vector<32xf32>
    %505 = vector.shape_cast %504 : vector<32xf32> to vector<1x32xf32>
    %506 = vector.extract_strided_slice %9 {offsets = [0, 3], sizes = [48, 1], strides = [1, 1]} : vector<48x16xf32> to vector<48x1xf32>
    %cst_258 = arith.constant 0.000000e+00 : f32
    %507 = vector.broadcast %cst_258 : f32 to vector<48x1xf32>
    %508 = arith.cmpf ogt, %506, %507 : vector<48x1xf32>
    %cst_259 = arith.constant -1.000000e+30 : f32
    %509 = vector.shape_cast %508 : vector<48x1xi1> to vector<48x1xi1>
    %510 = vector.broadcast %509 : vector<48x1xi1> to vector<48x32xi1>
    %511 = vector.broadcast %cst_259 : f32 to vector<48x32xf32>
    %512 = arith.select %510, %475, %511 : vector<48x32xi1>, vector<48x32xf32>
    %cst_260 = arith.constant dense<0xFF800000> : vector<32xf32>
    %513 = vector.multi_reduction <maximumf>, %512, %cst_260 [0] : vector<48x32xf32> to vector<32xf32>
    %514 = vector.shape_cast %513 : vector<32xf32> to vector<1x32xf32>
    %515 = vector.extract_strided_slice %9 {offsets = [0, 4], sizes = [48, 1], strides = [1, 1]} : vector<48x16xf32> to vector<48x1xf32>
    %cst_261 = arith.constant 0.000000e+00 : f32
    %516 = vector.broadcast %cst_261 : f32 to vector<48x1xf32>
    %517 = arith.cmpf ogt, %515, %516 : vector<48x1xf32>
    %cst_262 = arith.constant -1.000000e+30 : f32
    %518 = vector.shape_cast %517 : vector<48x1xi1> to vector<48x1xi1>
    %519 = vector.broadcast %518 : vector<48x1xi1> to vector<48x32xi1>
    %520 = vector.broadcast %cst_262 : f32 to vector<48x32xf32>
    %521 = arith.select %519, %475, %520 : vector<48x32xi1>, vector<48x32xf32>
    %cst_263 = arith.constant dense<0xFF800000> : vector<32xf32>
    %522 = vector.multi_reduction <maximumf>, %521, %cst_263 [0] : vector<48x32xf32> to vector<32xf32>
    %523 = vector.shape_cast %522 : vector<32xf32> to vector<1x32xf32>
    %524 = vector.extract_strided_slice %9 {offsets = [0, 5], sizes = [48, 1], strides = [1, 1]} : vector<48x16xf32> to vector<48x1xf32>
    %cst_264 = arith.constant 0.000000e+00 : f32
    %525 = vector.broadcast %cst_264 : f32 to vector<48x1xf32>
    %526 = arith.cmpf ogt, %524, %525 : vector<48x1xf32>
    %cst_265 = arith.constant -1.000000e+30 : f32
    %527 = vector.shape_cast %526 : vector<48x1xi1> to vector<48x1xi1>
    %528 = vector.broadcast %527 : vector<48x1xi1> to vector<48x32xi1>
    %529 = vector.broadcast %cst_265 : f32 to vector<48x32xf32>
    %530 = arith.select %528, %475, %529 : vector<48x32xi1>, vector<48x32xf32>
    %cst_266 = arith.constant dense<0xFF800000> : vector<32xf32>
    %531 = vector.multi_reduction <maximumf>, %530, %cst_266 [0] : vector<48x32xf32> to vector<32xf32>
    %532 = vector.shape_cast %531 : vector<32xf32> to vector<1x32xf32>
    %533 = vector.extract_strided_slice %9 {offsets = [0, 6], sizes = [48, 1], strides = [1, 1]} : vector<48x16xf32> to vector<48x1xf32>
    %cst_267 = arith.constant 0.000000e+00 : f32
    %534 = vector.broadcast %cst_267 : f32 to vector<48x1xf32>
    %535 = arith.cmpf ogt, %533, %534 : vector<48x1xf32>
    %cst_268 = arith.constant -1.000000e+30 : f32
    %536 = vector.shape_cast %535 : vector<48x1xi1> to vector<48x1xi1>
    %537 = vector.broadcast %536 : vector<48x1xi1> to vector<48x32xi1>
    %538 = vector.broadcast %cst_268 : f32 to vector<48x32xf32>
    %539 = arith.select %537, %475, %538 : vector<48x32xi1>, vector<48x32xf32>
    %cst_269 = arith.constant dense<0xFF800000> : vector<32xf32>
    %540 = vector.multi_reduction <maximumf>, %539, %cst_269 [0] : vector<48x32xf32> to vector<32xf32>
    %541 = vector.shape_cast %540 : vector<32xf32> to vector<1x32xf32>
    %542 = vector.extract_strided_slice %9 {offsets = [0, 7], sizes = [48, 1], strides = [1, 1]} : vector<48x16xf32> to vector<48x1xf32>
    %cst_270 = arith.constant 0.000000e+00 : f32
    %543 = vector.broadcast %cst_270 : f32 to vector<48x1xf32>
    %544 = arith.cmpf ogt, %542, %543 : vector<48x1xf32>
    %cst_271 = arith.constant -1.000000e+30 : f32
    %545 = vector.shape_cast %544 : vector<48x1xi1> to vector<48x1xi1>
    %546 = vector.broadcast %545 : vector<48x1xi1> to vector<48x32xi1>
    %547 = vector.broadcast %cst_271 : f32 to vector<48x32xf32>
    %548 = arith.select %546, %475, %547 : vector<48x32xi1>, vector<48x32xf32>
    %cst_272 = arith.constant dense<0xFF800000> : vector<32xf32>
    %549 = vector.multi_reduction <maximumf>, %548, %cst_272 [0] : vector<48x32xf32> to vector<32xf32>
    %550 = vector.shape_cast %549 : vector<32xf32> to vector<1x32xf32>
    %551 = vector.extract_strided_slice %9 {offsets = [0, 8], sizes = [48, 1], strides = [1, 1]} : vector<48x16xf32> to vector<48x1xf32>
    %cst_273 = arith.constant 0.000000e+00 : f32
    %552 = vector.broadcast %cst_273 : f32 to vector<48x1xf32>
    %553 = arith.cmpf ogt, %551, %552 : vector<48x1xf32>
    %cst_274 = arith.constant -1.000000e+30 : f32
    %554 = vector.shape_cast %553 : vector<48x1xi1> to vector<48x1xi1>
    %555 = vector.broadcast %554 : vector<48x1xi1> to vector<48x32xi1>
    %556 = vector.broadcast %cst_274 : f32 to vector<48x32xf32>
    %557 = arith.select %555, %475, %556 : vector<48x32xi1>, vector<48x32xf32>
    %cst_275 = arith.constant dense<0xFF800000> : vector<32xf32>
    %558 = vector.multi_reduction <maximumf>, %557, %cst_275 [0] : vector<48x32xf32> to vector<32xf32>
    %559 = vector.shape_cast %558 : vector<32xf32> to vector<1x32xf32>
    %560 = vector.extract_strided_slice %9 {offsets = [0, 9], sizes = [48, 1], strides = [1, 1]} : vector<48x16xf32> to vector<48x1xf32>
    %cst_276 = arith.constant 0.000000e+00 : f32
    %561 = vector.broadcast %cst_276 : f32 to vector<48x1xf32>
    %562 = arith.cmpf ogt, %560, %561 : vector<48x1xf32>
    %cst_277 = arith.constant -1.000000e+30 : f32
    %563 = vector.shape_cast %562 : vector<48x1xi1> to vector<48x1xi1>
    %564 = vector.broadcast %563 : vector<48x1xi1> to vector<48x32xi1>
    %565 = vector.broadcast %cst_277 : f32 to vector<48x32xf32>
    %566 = arith.select %564, %475, %565 : vector<48x32xi1>, vector<48x32xf32>
    %cst_278 = arith.constant dense<0xFF800000> : vector<32xf32>
    %567 = vector.multi_reduction <maximumf>, %566, %cst_278 [0] : vector<48x32xf32> to vector<32xf32>
    %568 = vector.shape_cast %567 : vector<32xf32> to vector<1x32xf32>
    %569 = vector.extract_strided_slice %9 {offsets = [0, 10], sizes = [48, 1], strides = [1, 1]} : vector<48x16xf32> to vector<48x1xf32>
    %cst_279 = arith.constant 0.000000e+00 : f32
    %570 = vector.broadcast %cst_279 : f32 to vector<48x1xf32>
    %571 = arith.cmpf ogt, %569, %570 : vector<48x1xf32>
    %cst_280 = arith.constant -1.000000e+30 : f32
    %572 = vector.shape_cast %571 : vector<48x1xi1> to vector<48x1xi1>
    %573 = vector.broadcast %572 : vector<48x1xi1> to vector<48x32xi1>
    %574 = vector.broadcast %cst_280 : f32 to vector<48x32xf32>
    %575 = arith.select %573, %475, %574 : vector<48x32xi1>, vector<48x32xf32>
    %cst_281 = arith.constant dense<0xFF800000> : vector<32xf32>
    %576 = vector.multi_reduction <maximumf>, %575, %cst_281 [0] : vector<48x32xf32> to vector<32xf32>
    %577 = vector.shape_cast %576 : vector<32xf32> to vector<1x32xf32>
    %578 = vector.extract_strided_slice %9 {offsets = [0, 11], sizes = [48, 1], strides = [1, 1]} : vector<48x16xf32> to vector<48x1xf32>
    %cst_282 = arith.constant 0.000000e+00 : f32
    %579 = vector.broadcast %cst_282 : f32 to vector<48x1xf32>
    %580 = arith.cmpf ogt, %578, %579 : vector<48x1xf32>
    %cst_283 = arith.constant -1.000000e+30 : f32
    %581 = vector.shape_cast %580 : vector<48x1xi1> to vector<48x1xi1>
    %582 = vector.broadcast %581 : vector<48x1xi1> to vector<48x32xi1>
    %583 = vector.broadcast %cst_283 : f32 to vector<48x32xf32>
    %584 = arith.select %582, %475, %583 : vector<48x32xi1>, vector<48x32xf32>
    %cst_284 = arith.constant dense<0xFF800000> : vector<32xf32>
    %585 = vector.multi_reduction <maximumf>, %584, %cst_284 [0] : vector<48x32xf32> to vector<32xf32>
    %586 = vector.shape_cast %585 : vector<32xf32> to vector<1x32xf32>
    %587 = vector.extract_strided_slice %9 {offsets = [0, 12], sizes = [48, 1], strides = [1, 1]} : vector<48x16xf32> to vector<48x1xf32>
    %cst_285 = arith.constant 0.000000e+00 : f32
    %588 = vector.broadcast %cst_285 : f32 to vector<48x1xf32>
    %589 = arith.cmpf ogt, %587, %588 : vector<48x1xf32>
    %cst_286 = arith.constant -1.000000e+30 : f32
    %590 = vector.shape_cast %589 : vector<48x1xi1> to vector<48x1xi1>
    %591 = vector.broadcast %590 : vector<48x1xi1> to vector<48x32xi1>
    %592 = vector.broadcast %cst_286 : f32 to vector<48x32xf32>
    %593 = arith.select %591, %475, %592 : vector<48x32xi1>, vector<48x32xf32>
    %cst_287 = arith.constant dense<0xFF800000> : vector<32xf32>
    %594 = vector.multi_reduction <maximumf>, %593, %cst_287 [0] : vector<48x32xf32> to vector<32xf32>
    %595 = vector.shape_cast %594 : vector<32xf32> to vector<1x32xf32>
    %596 = vector.extract_strided_slice %9 {offsets = [0, 13], sizes = [48, 1], strides = [1, 1]} : vector<48x16xf32> to vector<48x1xf32>
    %cst_288 = arith.constant 0.000000e+00 : f32
    %597 = vector.broadcast %cst_288 : f32 to vector<48x1xf32>
    %598 = arith.cmpf ogt, %596, %597 : vector<48x1xf32>
    %cst_289 = arith.constant -1.000000e+30 : f32
    %599 = vector.shape_cast %598 : vector<48x1xi1> to vector<48x1xi1>
    %600 = vector.broadcast %599 : vector<48x1xi1> to vector<48x32xi1>
    %601 = vector.broadcast %cst_289 : f32 to vector<48x32xf32>
    %602 = arith.select %600, %475, %601 : vector<48x32xi1>, vector<48x32xf32>
    %cst_290 = arith.constant dense<0xFF800000> : vector<32xf32>
    %603 = vector.multi_reduction <maximumf>, %602, %cst_290 [0] : vector<48x32xf32> to vector<32xf32>
    %604 = vector.shape_cast %603 : vector<32xf32> to vector<1x32xf32>
    %605 = vector.extract_strided_slice %9 {offsets = [0, 14], sizes = [48, 1], strides = [1, 1]} : vector<48x16xf32> to vector<48x1xf32>
    %cst_291 = arith.constant 0.000000e+00 : f32
    %606 = vector.broadcast %cst_291 : f32 to vector<48x1xf32>
    %607 = arith.cmpf ogt, %605, %606 : vector<48x1xf32>
    %cst_292 = arith.constant -1.000000e+30 : f32
    %608 = vector.shape_cast %607 : vector<48x1xi1> to vector<48x1xi1>
    %609 = vector.broadcast %608 : vector<48x1xi1> to vector<48x32xi1>
    %610 = vector.broadcast %cst_292 : f32 to vector<48x32xf32>
    %611 = arith.select %609, %475, %610 : vector<48x32xi1>, vector<48x32xf32>
    %cst_293 = arith.constant dense<0xFF800000> : vector<32xf32>
    %612 = vector.multi_reduction <maximumf>, %611, %cst_293 [0] : vector<48x32xf32> to vector<32xf32>
    %613 = vector.shape_cast %612 : vector<32xf32> to vector<1x32xf32>
    %614 = vector.extract_strided_slice %9 {offsets = [0, 15], sizes = [48, 1], strides = [1, 1]} : vector<48x16xf32> to vector<48x1xf32>
    %cst_294 = arith.constant 0.000000e+00 : f32
    %615 = vector.broadcast %cst_294 : f32 to vector<48x1xf32>
    %616 = arith.cmpf ogt, %614, %615 : vector<48x1xf32>
    %cst_295 = arith.constant -1.000000e+30 : f32
    %617 = vector.shape_cast %616 : vector<48x1xi1> to vector<48x1xi1>
    %618 = vector.broadcast %617 : vector<48x1xi1> to vector<48x32xi1>
    %619 = vector.broadcast %cst_295 : f32 to vector<48x32xf32>
    %620 = arith.select %618, %475, %619 : vector<48x32xi1>, vector<48x32xf32>
    %cst_296 = arith.constant dense<0xFF800000> : vector<32xf32>
    %621 = vector.multi_reduction <maximumf>, %620, %cst_296 [0] : vector<48x32xf32> to vector<32xf32>
    %622 = vector.shape_cast %621 : vector<32xf32> to vector<1x32xf32>
    %623 = tpu.concatenate %487, %496, %505, %514, %523, %532, %541, %550, %559, %568, %577, %586, %595, %604, %613, %622 in 0 : vector<1x32xf32>, vector<1x32xf32>, vector<1x32xf32>, vector<1x32xf32>, vector<1x32xf32>, vector<1x32xf32>, vector<1x32xf32>, vector<1x32xf32>, vector<1x32xf32>, vector<1x32xf32>, vector<1x32xf32>, vector<1x32xf32>, vector<1x32xf32>, vector<1x32xf32>, vector<1x32xf32>, vector<1x32xf32> -> vector<16x32xf32>
    %cst_297 = arith.constant 0.000000e+00 : f32
    %624 = vector.shape_cast %27 : vector<16x1xi1> to vector<16x1xi1>
    %625 = vector.broadcast %624 : vector<16x1xi1> to vector<16x32xi1>
    %626 = vector.broadcast %cst_297 : f32 to vector<16x32xf32>
    %627 = arith.select %625, %623, %626 : vector<16x32xi1>, vector<16x32xf32>
    %c2_298 = arith.constant 2 : index
    %c0_299 = arith.constant 0 : index
    %c0_300 = arith.constant 0 : index
    %628 = vector.load %arg12[%c2_298, %c0_299, %c0_300] : memref<5x32x32xf32, #tpu.memory_space<vmem>>, vector<1x32x32xf32>
    %629 = vector.shape_cast %628 : vector<1x32x32xf32> to vector<32x32xf32>
    %cst_301 = arith.constant dense<0.000000e+00> : vector<16x32xf32>
    %630 = tpu.matmul %451, %629, %cst_301 {dimension_numbers = #tpu.dot_dimension_numbers<[1], [0], [0], [1], [0, 0, 1, 1], [], []>} : vector<16x32xf32>, vector<32x32xf32>, vector<16x32xf32> -> vector<16x32xf32>
    %c2_302 = arith.constant 2 : index
    %c0_303 = arith.constant 0 : index
    %c0_304 = arith.constant 0 : index
    %631 = vector.load %arg13[%c2_302, %c0_303, %c0_304] : memref<5x32x32xf32, #tpu.memory_space<vmem>>, vector<1x32x32xf32>
    %632 = vector.shape_cast %631 : vector<1x32x32xf32> to vector<32x32xf32>
    %cst_305 = arith.constant dense<0.000000e+00> : vector<16x32xf32>
    %633 = tpu.matmul %478, %632, %cst_305 {dimension_numbers = #tpu.dot_dimension_numbers<[1], [0], [0], [1], [0, 0, 1, 1], [], []>} : vector<16x32xf32>, vector<32x32xf32>, vector<16x32xf32> -> vector<16x32xf32>
    %634 = arith.addf %630, %633 : vector<16x32xf32>
    %c2_306 = arith.constant 2 : index
    %c0_307 = arith.constant 0 : index
    %c0_308 = arith.constant 0 : index
    %635 = vector.load %arg14[%c2_306, %c0_307, %c0_308] : memref<5x32x32xf32, #tpu.memory_space<vmem>>, vector<1x32x32xf32>
    %636 = vector.shape_cast %635 : vector<1x32x32xf32> to vector<32x32xf32>
    %cst_309 = arith.constant dense<0.000000e+00> : vector<16x32xf32>
    %637 = tpu.matmul %476, %636, %cst_309 {dimension_numbers = #tpu.dot_dimension_numbers<[1], [0], [0], [1], [0, 0, 1, 1], [], []>} : vector<16x32xf32>, vector<32x32xf32>, vector<16x32xf32> -> vector<16x32xf32>
    %638 = arith.addf %634, %637 : vector<16x32xf32>
    %c2_310 = arith.constant 2 : index
    %c0_311 = arith.constant 0 : index
    %c0_312 = arith.constant 0 : index
    %639 = vector.load %arg15[%c2_310, %c0_311, %c0_312] : memref<5x32x32xf32, #tpu.memory_space<vmem>>, vector<1x32x32xf32>
    %640 = vector.shape_cast %639 : vector<1x32x32xf32> to vector<32x32xf32>
    %cst_313 = arith.constant dense<0.000000e+00> : vector<16x32xf32>
    %641 = tpu.matmul %627, %640, %cst_313 {dimension_numbers = #tpu.dot_dimension_numbers<[1], [0], [0], [1], [0, 0, 1, 1], [], []>} : vector<16x32xf32>, vector<32x32xf32>, vector<16x32xf32> -> vector<16x32xf32>
    %642 = arith.addf %638, %641 : vector<16x32xf32>
    %c2_314 = arith.constant 2 : index
    %c0_315 = arith.constant 0 : index
    %c0_316 = arith.constant 0 : index
    %643 = vector.load %arg16[%c2_314, %c0_315, %c0_316] : memref<5x1x32xf32, #tpu.memory_space<vmem>>, vector<1x1x32xf32>
    %644 = vector.shape_cast %643 : vector<1x1x32xf32> to vector<1x32xf32>
    %645 = vector.broadcast %644 : vector<1x32xf32> to vector<16x32xf32>
    %646 = arith.addf %642, %645 : vector<16x32xf32>
    %c2_317 = arith.constant 2 : index
    %c0_318 = arith.constant 0 : index
    %c0_319 = arith.constant 0 : index
    %647 = vector.load %arg17[%c2_317, %c0_318, %c0_319] : memref<5x32x32xf32, #tpu.memory_space<vmem>>, vector<1x32x32xf32>
    %648 = vector.shape_cast %647 : vector<1x32x32xf32> to vector<32x32xf32>
    %cst_320 = arith.constant dense<0.000000e+00> : vector<16x32xf32>
    %649 = tpu.matmul %646, %648, %cst_320 {dimension_numbers = #tpu.dot_dimension_numbers<[1], [0], [0], [1], [0, 0, 1, 1], [], []>} : vector<16x32xf32>, vector<32x32xf32>, vector<16x32xf32> -> vector<16x32xf32>
    %c2_321 = arith.constant 2 : index
    %c0_322 = arith.constant 0 : index
    %c0_323 = arith.constant 0 : index
    %650 = vector.load %arg18[%c2_321, %c0_322, %c0_323] : memref<5x1x32xf32, #tpu.memory_space<vmem>>, vector<1x1x32xf32>
    %651 = vector.shape_cast %650 : vector<1x1x32xf32> to vector<1x32xf32>
    %652 = vector.broadcast %651 : vector<1x32xf32> to vector<16x32xf32>
    %653 = arith.addf %649, %652 : vector<16x32xf32>
    %cst_324 = arith.constant 0.000000e+00 : f32
    %654 = vector.broadcast %cst_324 : f32 to vector<16x32xf32>
    %655 = arith.maximumf %653, %654 : vector<16x32xf32>
    %c2_325 = arith.constant 2 : index
    %c0_326 = arith.constant 0 : index
    %c0_327 = arith.constant 0 : index
    %656 = vector.load %arg5[%c2_325, %c0_326, %c0_327] : memref<5x16x32xf32, #tpu.memory_space<vmem>>, vector<1x16x32xf32>
    %657 = vector.shape_cast %656 : vector<1x16x32xf32> to vector<16x32xf32>
    %cst_328 = arith.constant 1.000000e-01 : f32
    %658 = vector.broadcast %cst_328 : f32 to vector<16x32xf32>
    %659 = arith.cmpf oge, %657, %658 : vector<16x32xf32>
    %cst_329 = arith.constant 1.11111116 : f32
    %660 = vector.broadcast %cst_329 : f32 to vector<16x32xf32>
    %661 = arith.mulf %655, %660 : vector<16x32xf32>
    %cst_330 = arith.constant 0.000000e+00 : f32
    %662 = vector.broadcast %cst_330 : f32 to vector<16x32xf32>
    %663 = arith.select %659, %661, %662 : vector<16x32xi1>, vector<16x32xf32>
    %c3 = arith.constant 3 : index
    %c0_331 = arith.constant 0 : index
    %c0_332 = arith.constant 0 : index
    %664 = vector.load %arg6[%c3, %c0_331, %c0_332] : memref<5x16x8xf32, #tpu.memory_space<vmem>>, vector<1x16x8xf32>
    %665 = vector.shape_cast %664 : vector<1x16x8xf32> to vector<16x8xf32>
    %cst_333 = arith.constant dense<0.000000e+00> : vector<48x8xf32>
    %666 = tpu.matmul %1, %665, %cst_333 {dimension_numbers = #tpu.dot_dimension_numbers<[1], [0], [0], [1], [0, 0, 1, 1], [], []>} : vector<48x16xf32>, vector<16x8xf32>, vector<48x8xf32> -> vector<48x8xf32>
    %c3_334 = arith.constant 3 : index
    %c0_335 = arith.constant 0 : index
    %c0_336 = arith.constant 0 : index
    %667 = vector.load %arg7[%c3_334, %c0_335, %c0_336] : memref<5x1x8xf32, #tpu.memory_space<vmem>>, vector<1x1x8xf32>
    %668 = vector.shape_cast %667 : vector<1x1x8xf32> to vector<1x8xf32>
    %669 = vector.broadcast %668 : vector<1x8xf32> to vector<48x8xf32>
    %670 = arith.addf %666, %669 : vector<48x8xf32>
    %cst_337 = arith.constant dense<0.000000e+00> : vector<48x32xf32>
    %671 = tpu.matmul %9, %663, %cst_337 {dimension_numbers = #tpu.dot_dimension_numbers<[1], [0], [0], [1], [0, 0, 1, 1], [], []>} : vector<48x16xf32>, vector<16x32xf32>, vector<48x32xf32> -> vector<48x32xf32>
    %cst_338 = arith.constant dense<0.000000e+00> : vector<48x32xf32>
    %672 = tpu.matmul %14, %663, %cst_338 {dimension_numbers = #tpu.dot_dimension_numbers<[1], [0], [0], [1], [0, 0, 1, 1], [], []>} : vector<48x16xf32>, vector<16x32xf32>, vector<48x32xf32> -> vector<48x32xf32>
    %c3_339 = arith.constant 3 : index
    %c0_340 = arith.constant 0 : index
    %c0_341 = arith.constant 0 : index
    %673 = vector.load %arg8[%c3_339, %c0_340, %c0_341] : memref<5x32x32xf32, #tpu.memory_space<vmem>>, vector<1x32x32xf32>
    %674 = vector.shape_cast %673 : vector<1x32x32xf32> to vector<32x32xf32>
    %cst_342 = arith.constant dense<0.000000e+00> : vector<48x32xf32>
    %675 = tpu.matmul %671, %674, %cst_342 {dimension_numbers = #tpu.dot_dimension_numbers<[1], [0], [0], [1], [0, 0, 1, 1], [], []>} : vector<48x32xf32>, vector<32x32xf32>, vector<48x32xf32> -> vector<48x32xf32>
    %c3_343 = arith.constant 3 : index
    %c0_344 = arith.constant 0 : index
    %c0_345 = arith.constant 0 : index
    %676 = vector.load %arg9[%c3_343, %c0_344, %c0_345] : memref<5x32x32xf32, #tpu.memory_space<vmem>>, vector<1x32x32xf32>
    %677 = vector.shape_cast %676 : vector<1x32x32xf32> to vector<32x32xf32>
    %cst_346 = arith.constant dense<0.000000e+00> : vector<48x32xf32>
    %678 = tpu.matmul %672, %677, %cst_346 {dimension_numbers = #tpu.dot_dimension_numbers<[1], [0], [0], [1], [0, 0, 1, 1], [], []>} : vector<48x32xf32>, vector<32x32xf32>, vector<48x32xf32> -> vector<48x32xf32>
    %679 = arith.addf %675, %678 : vector<48x32xf32>
    %c3_347 = arith.constant 3 : index
    %c0_348 = arith.constant 0 : index
    %c0_349 = arith.constant 0 : index
    %680 = vector.load %arg10[%c3_347, %c0_348, %c0_349] : memref<5x8x32xf32, #tpu.memory_space<vmem>>, vector<1x8x32xf32>
    %681 = vector.shape_cast %680 : vector<1x8x32xf32> to vector<8x32xf32>
    %cst_350 = arith.constant dense<0.000000e+00> : vector<48x32xf32>
    %682 = tpu.matmul %670, %681, %cst_350 {dimension_numbers = #tpu.dot_dimension_numbers<[1], [0], [0], [1], [0, 0, 1, 1], [], []>} : vector<48x8xf32>, vector<8x32xf32>, vector<48x32xf32> -> vector<48x32xf32>
    %683 = arith.addf %679, %682 : vector<48x32xf32>
    %c3_351 = arith.constant 3 : index
    %c0_352 = arith.constant 0 : index
    %c0_353 = arith.constant 0 : index
    %684 = vector.load %arg11[%c3_351, %c0_352, %c0_353] : memref<5x1x32xf32, #tpu.memory_space<vmem>>, vector<1x1x32xf32>
    %685 = vector.shape_cast %684 : vector<1x1x32xf32> to vector<1x32xf32>
    %686 = vector.broadcast %685 : vector<1x32xf32> to vector<48x32xf32>
    %687 = arith.addf %683, %686 : vector<48x32xf32>
    %cst_354 = arith.constant dense<0.000000e+00> : vector<16x32xf32>
    %688 = tpu.matmul %19, %687, %cst_354 {dimension_numbers = #tpu.dot_dimension_numbers<[1], [0], [0], [1], [0, 0, 1, 1], [], []>} : vector<16x48xf32>, vector<48x32xf32>, vector<16x32xf32> -> vector<16x32xf32>
    %689 = vector.broadcast %25 : vector<16x1xf32> to vector<16x32xf32>
    %690 = arith.mulf %688, %689 : vector<16x32xf32>
    %691 = vector.extract_strided_slice %9 {offsets = [0, 0], sizes = [48, 1], strides = [1, 1]} : vector<48x16xf32> to vector<48x1xf32>
    %cst_355 = arith.constant 0.000000e+00 : f32
    %692 = vector.broadcast %cst_355 : f32 to vector<48x1xf32>
    %693 = arith.cmpf ogt, %691, %692 : vector<48x1xf32>
    %cst_356 = arith.constant -1.000000e+30 : f32
    %694 = vector.shape_cast %693 : vector<48x1xi1> to vector<48x1xi1>
    %695 = vector.broadcast %694 : vector<48x1xi1> to vector<48x32xi1>
    %696 = vector.broadcast %cst_356 : f32 to vector<48x32xf32>
    %697 = arith.select %695, %687, %696 : vector<48x32xi1>, vector<48x32xf32>
    %cst_357 = arith.constant dense<0xFF800000> : vector<32xf32>
    %698 = vector.multi_reduction <maximumf>, %697, %cst_357 [0] : vector<48x32xf32> to vector<32xf32>
    %699 = vector.shape_cast %698 : vector<32xf32> to vector<1x32xf32>
    %700 = vector.extract_strided_slice %9 {offsets = [0, 1], sizes = [48, 1], strides = [1, 1]} : vector<48x16xf32> to vector<48x1xf32>
    %cst_358 = arith.constant 0.000000e+00 : f32
    %701 = vector.broadcast %cst_358 : f32 to vector<48x1xf32>
    %702 = arith.cmpf ogt, %700, %701 : vector<48x1xf32>
    %cst_359 = arith.constant -1.000000e+30 : f32
    %703 = vector.shape_cast %702 : vector<48x1xi1> to vector<48x1xi1>
    %704 = vector.broadcast %703 : vector<48x1xi1> to vector<48x32xi1>
    %705 = vector.broadcast %cst_359 : f32 to vector<48x32xf32>
    %706 = arith.select %704, %687, %705 : vector<48x32xi1>, vector<48x32xf32>
    %cst_360 = arith.constant dense<0xFF800000> : vector<32xf32>
    %707 = vector.multi_reduction <maximumf>, %706, %cst_360 [0] : vector<48x32xf32> to vector<32xf32>
    %708 = vector.shape_cast %707 : vector<32xf32> to vector<1x32xf32>
    %709 = vector.extract_strided_slice %9 {offsets = [0, 2], sizes = [48, 1], strides = [1, 1]} : vector<48x16xf32> to vector<48x1xf32>
    %cst_361 = arith.constant 0.000000e+00 : f32
    %710 = vector.broadcast %cst_361 : f32 to vector<48x1xf32>
    %711 = arith.cmpf ogt, %709, %710 : vector<48x1xf32>
    %cst_362 = arith.constant -1.000000e+30 : f32
    %712 = vector.shape_cast %711 : vector<48x1xi1> to vector<48x1xi1>
    %713 = vector.broadcast %712 : vector<48x1xi1> to vector<48x32xi1>
    %714 = vector.broadcast %cst_362 : f32 to vector<48x32xf32>
    %715 = arith.select %713, %687, %714 : vector<48x32xi1>, vector<48x32xf32>
    %cst_363 = arith.constant dense<0xFF800000> : vector<32xf32>
    %716 = vector.multi_reduction <maximumf>, %715, %cst_363 [0] : vector<48x32xf32> to vector<32xf32>
    %717 = vector.shape_cast %716 : vector<32xf32> to vector<1x32xf32>
    %718 = vector.extract_strided_slice %9 {offsets = [0, 3], sizes = [48, 1], strides = [1, 1]} : vector<48x16xf32> to vector<48x1xf32>
    %cst_364 = arith.constant 0.000000e+00 : f32
    %719 = vector.broadcast %cst_364 : f32 to vector<48x1xf32>
    %720 = arith.cmpf ogt, %718, %719 : vector<48x1xf32>
    %cst_365 = arith.constant -1.000000e+30 : f32
    %721 = vector.shape_cast %720 : vector<48x1xi1> to vector<48x1xi1>
    %722 = vector.broadcast %721 : vector<48x1xi1> to vector<48x32xi1>
    %723 = vector.broadcast %cst_365 : f32 to vector<48x32xf32>
    %724 = arith.select %722, %687, %723 : vector<48x32xi1>, vector<48x32xf32>
    %cst_366 = arith.constant dense<0xFF800000> : vector<32xf32>
    %725 = vector.multi_reduction <maximumf>, %724, %cst_366 [0] : vector<48x32xf32> to vector<32xf32>
    %726 = vector.shape_cast %725 : vector<32xf32> to vector<1x32xf32>
    %727 = vector.extract_strided_slice %9 {offsets = [0, 4], sizes = [48, 1], strides = [1, 1]} : vector<48x16xf32> to vector<48x1xf32>
    %cst_367 = arith.constant 0.000000e+00 : f32
    %728 = vector.broadcast %cst_367 : f32 to vector<48x1xf32>
    %729 = arith.cmpf ogt, %727, %728 : vector<48x1xf32>
    %cst_368 = arith.constant -1.000000e+30 : f32
    %730 = vector.shape_cast %729 : vector<48x1xi1> to vector<48x1xi1>
    %731 = vector.broadcast %730 : vector<48x1xi1> to vector<48x32xi1>
    %732 = vector.broadcast %cst_368 : f32 to vector<48x32xf32>
    %733 = arith.select %731, %687, %732 : vector<48x32xi1>, vector<48x32xf32>
    %cst_369 = arith.constant dense<0xFF800000> : vector<32xf32>
    %734 = vector.multi_reduction <maximumf>, %733, %cst_369 [0] : vector<48x32xf32> to vector<32xf32>
    %735 = vector.shape_cast %734 : vector<32xf32> to vector<1x32xf32>
    %736 = vector.extract_strided_slice %9 {offsets = [0, 5], sizes = [48, 1], strides = [1, 1]} : vector<48x16xf32> to vector<48x1xf32>
    %cst_370 = arith.constant 0.000000e+00 : f32
    %737 = vector.broadcast %cst_370 : f32 to vector<48x1xf32>
    %738 = arith.cmpf ogt, %736, %737 : vector<48x1xf32>
    %cst_371 = arith.constant -1.000000e+30 : f32
    %739 = vector.shape_cast %738 : vector<48x1xi1> to vector<48x1xi1>
    %740 = vector.broadcast %739 : vector<48x1xi1> to vector<48x32xi1>
    %741 = vector.broadcast %cst_371 : f32 to vector<48x32xf32>
    %742 = arith.select %740, %687, %741 : vector<48x32xi1>, vector<48x32xf32>
    %cst_372 = arith.constant dense<0xFF800000> : vector<32xf32>
    %743 = vector.multi_reduction <maximumf>, %742, %cst_372 [0] : vector<48x32xf32> to vector<32xf32>
    %744 = vector.shape_cast %743 : vector<32xf32> to vector<1x32xf32>
    %745 = vector.extract_strided_slice %9 {offsets = [0, 6], sizes = [48, 1], strides = [1, 1]} : vector<48x16xf32> to vector<48x1xf32>
    %cst_373 = arith.constant 0.000000e+00 : f32
    %746 = vector.broadcast %cst_373 : f32 to vector<48x1xf32>
    %747 = arith.cmpf ogt, %745, %746 : vector<48x1xf32>
    %cst_374 = arith.constant -1.000000e+30 : f32
    %748 = vector.shape_cast %747 : vector<48x1xi1> to vector<48x1xi1>
    %749 = vector.broadcast %748 : vector<48x1xi1> to vector<48x32xi1>
    %750 = vector.broadcast %cst_374 : f32 to vector<48x32xf32>
    %751 = arith.select %749, %687, %750 : vector<48x32xi1>, vector<48x32xf32>
    %cst_375 = arith.constant dense<0xFF800000> : vector<32xf32>
    %752 = vector.multi_reduction <maximumf>, %751, %cst_375 [0] : vector<48x32xf32> to vector<32xf32>
    %753 = vector.shape_cast %752 : vector<32xf32> to vector<1x32xf32>
    %754 = vector.extract_strided_slice %9 {offsets = [0, 7], sizes = [48, 1], strides = [1, 1]} : vector<48x16xf32> to vector<48x1xf32>
    %cst_376 = arith.constant 0.000000e+00 : f32
    %755 = vector.broadcast %cst_376 : f32 to vector<48x1xf32>
    %756 = arith.cmpf ogt, %754, %755 : vector<48x1xf32>
    %cst_377 = arith.constant -1.000000e+30 : f32
    %757 = vector.shape_cast %756 : vector<48x1xi1> to vector<48x1xi1>
    %758 = vector.broadcast %757 : vector<48x1xi1> to vector<48x32xi1>
    %759 = vector.broadcast %cst_377 : f32 to vector<48x32xf32>
    %760 = arith.select %758, %687, %759 : vector<48x32xi1>, vector<48x32xf32>
    %cst_378 = arith.constant dense<0xFF800000> : vector<32xf32>
    %761 = vector.multi_reduction <maximumf>, %760, %cst_378 [0] : vector<48x32xf32> to vector<32xf32>
    %762 = vector.shape_cast %761 : vector<32xf32> to vector<1x32xf32>
    %763 = vector.extract_strided_slice %9 {offsets = [0, 8], sizes = [48, 1], strides = [1, 1]} : vector<48x16xf32> to vector<48x1xf32>
    %cst_379 = arith.constant 0.000000e+00 : f32
    %764 = vector.broadcast %cst_379 : f32 to vector<48x1xf32>
    %765 = arith.cmpf ogt, %763, %764 : vector<48x1xf32>
    %cst_380 = arith.constant -1.000000e+30 : f32
    %766 = vector.shape_cast %765 : vector<48x1xi1> to vector<48x1xi1>
    %767 = vector.broadcast %766 : vector<48x1xi1> to vector<48x32xi1>
    %768 = vector.broadcast %cst_380 : f32 to vector<48x32xf32>
    %769 = arith.select %767, %687, %768 : vector<48x32xi1>, vector<48x32xf32>
    %cst_381 = arith.constant dense<0xFF800000> : vector<32xf32>
    %770 = vector.multi_reduction <maximumf>, %769, %cst_381 [0] : vector<48x32xf32> to vector<32xf32>
    %771 = vector.shape_cast %770 : vector<32xf32> to vector<1x32xf32>
    %772 = vector.extract_strided_slice %9 {offsets = [0, 9], sizes = [48, 1], strides = [1, 1]} : vector<48x16xf32> to vector<48x1xf32>
    %cst_382 = arith.constant 0.000000e+00 : f32
    %773 = vector.broadcast %cst_382 : f32 to vector<48x1xf32>
    %774 = arith.cmpf ogt, %772, %773 : vector<48x1xf32>
    %cst_383 = arith.constant -1.000000e+30 : f32
    %775 = vector.shape_cast %774 : vector<48x1xi1> to vector<48x1xi1>
    %776 = vector.broadcast %775 : vector<48x1xi1> to vector<48x32xi1>
    %777 = vector.broadcast %cst_383 : f32 to vector<48x32xf32>
    %778 = arith.select %776, %687, %777 : vector<48x32xi1>, vector<48x32xf32>
    %cst_384 = arith.constant dense<0xFF800000> : vector<32xf32>
    %779 = vector.multi_reduction <maximumf>, %778, %cst_384 [0] : vector<48x32xf32> to vector<32xf32>
    %780 = vector.shape_cast %779 : vector<32xf32> to vector<1x32xf32>
    %781 = vector.extract_strided_slice %9 {offsets = [0, 10], sizes = [48, 1], strides = [1, 1]} : vector<48x16xf32> to vector<48x1xf32>
    %cst_385 = arith.constant 0.000000e+00 : f32
    %782 = vector.broadcast %cst_385 : f32 to vector<48x1xf32>
    %783 = arith.cmpf ogt, %781, %782 : vector<48x1xf32>
    %cst_386 = arith.constant -1.000000e+30 : f32
    %784 = vector.shape_cast %783 : vector<48x1xi1> to vector<48x1xi1>
    %785 = vector.broadcast %784 : vector<48x1xi1> to vector<48x32xi1>
    %786 = vector.broadcast %cst_386 : f32 to vector<48x32xf32>
    %787 = arith.select %785, %687, %786 : vector<48x32xi1>, vector<48x32xf32>
    %cst_387 = arith.constant dense<0xFF800000> : vector<32xf32>
    %788 = vector.multi_reduction <maximumf>, %787, %cst_387 [0] : vector<48x32xf32> to vector<32xf32>
    %789 = vector.shape_cast %788 : vector<32xf32> to vector<1x32xf32>
    %790 = vector.extract_strided_slice %9 {offsets = [0, 11], sizes = [48, 1], strides = [1, 1]} : vector<48x16xf32> to vector<48x1xf32>
    %cst_388 = arith.constant 0.000000e+00 : f32
    %791 = vector.broadcast %cst_388 : f32 to vector<48x1xf32>
    %792 = arith.cmpf ogt, %790, %791 : vector<48x1xf32>
    %cst_389 = arith.constant -1.000000e+30 : f32
    %793 = vector.shape_cast %792 : vector<48x1xi1> to vector<48x1xi1>
    %794 = vector.broadcast %793 : vector<48x1xi1> to vector<48x32xi1>
    %795 = vector.broadcast %cst_389 : f32 to vector<48x32xf32>
    %796 = arith.select %794, %687, %795 : vector<48x32xi1>, vector<48x32xf32>
    %cst_390 = arith.constant dense<0xFF800000> : vector<32xf32>
    %797 = vector.multi_reduction <maximumf>, %796, %cst_390 [0] : vector<48x32xf32> to vector<32xf32>
    %798 = vector.shape_cast %797 : vector<32xf32> to vector<1x32xf32>
    %799 = vector.extract_strided_slice %9 {offsets = [0, 12], sizes = [48, 1], strides = [1, 1]} : vector<48x16xf32> to vector<48x1xf32>
    %cst_391 = arith.constant 0.000000e+00 : f32
    %800 = vector.broadcast %cst_391 : f32 to vector<48x1xf32>
    %801 = arith.cmpf ogt, %799, %800 : vector<48x1xf32>
    %cst_392 = arith.constant -1.000000e+30 : f32
    %802 = vector.shape_cast %801 : vector<48x1xi1> to vector<48x1xi1>
    %803 = vector.broadcast %802 : vector<48x1xi1> to vector<48x32xi1>
    %804 = vector.broadcast %cst_392 : f32 to vector<48x32xf32>
    %805 = arith.select %803, %687, %804 : vector<48x32xi1>, vector<48x32xf32>
    %cst_393 = arith.constant dense<0xFF800000> : vector<32xf32>
    %806 = vector.multi_reduction <maximumf>, %805, %cst_393 [0] : vector<48x32xf32> to vector<32xf32>
    %807 = vector.shape_cast %806 : vector<32xf32> to vector<1x32xf32>
    %808 = vector.extract_strided_slice %9 {offsets = [0, 13], sizes = [48, 1], strides = [1, 1]} : vector<48x16xf32> to vector<48x1xf32>
    %cst_394 = arith.constant 0.000000e+00 : f32
    %809 = vector.broadcast %cst_394 : f32 to vector<48x1xf32>
    %810 = arith.cmpf ogt, %808, %809 : vector<48x1xf32>
    %cst_395 = arith.constant -1.000000e+30 : f32
    %811 = vector.shape_cast %810 : vector<48x1xi1> to vector<48x1xi1>
    %812 = vector.broadcast %811 : vector<48x1xi1> to vector<48x32xi1>
    %813 = vector.broadcast %cst_395 : f32 to vector<48x32xf32>
    %814 = arith.select %812, %687, %813 : vector<48x32xi1>, vector<48x32xf32>
    %cst_396 = arith.constant dense<0xFF800000> : vector<32xf32>
    %815 = vector.multi_reduction <maximumf>, %814, %cst_396 [0] : vector<48x32xf32> to vector<32xf32>
    %816 = vector.shape_cast %815 : vector<32xf32> to vector<1x32xf32>
    %817 = vector.extract_strided_slice %9 {offsets = [0, 14], sizes = [48, 1], strides = [1, 1]} : vector<48x16xf32> to vector<48x1xf32>
    %cst_397 = arith.constant 0.000000e+00 : f32
    %818 = vector.broadcast %cst_397 : f32 to vector<48x1xf32>
    %819 = arith.cmpf ogt, %817, %818 : vector<48x1xf32>
    %cst_398 = arith.constant -1.000000e+30 : f32
    %820 = vector.shape_cast %819 : vector<48x1xi1> to vector<48x1xi1>
    %821 = vector.broadcast %820 : vector<48x1xi1> to vector<48x32xi1>
    %822 = vector.broadcast %cst_398 : f32 to vector<48x32xf32>
    %823 = arith.select %821, %687, %822 : vector<48x32xi1>, vector<48x32xf32>
    %cst_399 = arith.constant dense<0xFF800000> : vector<32xf32>
    %824 = vector.multi_reduction <maximumf>, %823, %cst_399 [0] : vector<48x32xf32> to vector<32xf32>
    %825 = vector.shape_cast %824 : vector<32xf32> to vector<1x32xf32>
    %826 = vector.extract_strided_slice %9 {offsets = [0, 15], sizes = [48, 1], strides = [1, 1]} : vector<48x16xf32> to vector<48x1xf32>
    %cst_400 = arith.constant 0.000000e+00 : f32
    %827 = vector.broadcast %cst_400 : f32 to vector<48x1xf32>
    %828 = arith.cmpf ogt, %826, %827 : vector<48x1xf32>
    %cst_401 = arith.constant -1.000000e+30 : f32
    %829 = vector.shape_cast %828 : vector<48x1xi1> to vector<48x1xi1>
    %830 = vector.broadcast %829 : vector<48x1xi1> to vector<48x32xi1>
    %831 = vector.broadcast %cst_401 : f32 to vector<48x32xf32>
    %832 = arith.select %830, %687, %831 : vector<48x32xi1>, vector<48x32xf32>
    %cst_402 = arith.constant dense<0xFF800000> : vector<32xf32>
    %833 = vector.multi_reduction <maximumf>, %832, %cst_402 [0] : vector<48x32xf32> to vector<32xf32>
    %834 = vector.shape_cast %833 : vector<32xf32> to vector<1x32xf32>
    %835 = tpu.concatenate %699, %708, %717, %726, %735, %744, %753, %762, %771, %780, %789, %798, %807, %816, %825, %834 in 0 : vector<1x32xf32>, vector<1x32xf32>, vector<1x32xf32>, vector<1x32xf32>, vector<1x32xf32>, vector<1x32xf32>, vector<1x32xf32>, vector<1x32xf32>, vector<1x32xf32>, vector<1x32xf32>, vector<1x32xf32>, vector<1x32xf32>, vector<1x32xf32>, vector<1x32xf32>, vector<1x32xf32>, vector<1x32xf32> -> vector<16x32xf32>
    %cst_403 = arith.constant 0.000000e+00 : f32
    %836 = vector.shape_cast %27 : vector<16x1xi1> to vector<16x1xi1>
    %837 = vector.broadcast %836 : vector<16x1xi1> to vector<16x32xi1>
    %838 = vector.broadcast %cst_403 : f32 to vector<16x32xf32>
    %839 = arith.select %837, %835, %838 : vector<16x32xi1>, vector<16x32xf32>
    %c3_404 = arith.constant 3 : index
    %c0_405 = arith.constant 0 : index
    %c0_406 = arith.constant 0 : index
    %840 = vector.load %arg12[%c3_404, %c0_405, %c0_406] : memref<5x32x32xf32, #tpu.memory_space<vmem>>, vector<1x32x32xf32>
    %841 = vector.shape_cast %840 : vector<1x32x32xf32> to vector<32x32xf32>
    %cst_407 = arith.constant dense<0.000000e+00> : vector<16x32xf32>
    %842 = tpu.matmul %663, %841, %cst_407 {dimension_numbers = #tpu.dot_dimension_numbers<[1], [0], [0], [1], [0, 0, 1, 1], [], []>} : vector<16x32xf32>, vector<32x32xf32>, vector<16x32xf32> -> vector<16x32xf32>
    %c3_408 = arith.constant 3 : index
    %c0_409 = arith.constant 0 : index
    %c0_410 = arith.constant 0 : index
    %843 = vector.load %arg13[%c3_408, %c0_409, %c0_410] : memref<5x32x32xf32, #tpu.memory_space<vmem>>, vector<1x32x32xf32>
    %844 = vector.shape_cast %843 : vector<1x32x32xf32> to vector<32x32xf32>
    %cst_411 = arith.constant dense<0.000000e+00> : vector<16x32xf32>
    %845 = tpu.matmul %690, %844, %cst_411 {dimension_numbers = #tpu.dot_dimension_numbers<[1], [0], [0], [1], [0, 0, 1, 1], [], []>} : vector<16x32xf32>, vector<32x32xf32>, vector<16x32xf32> -> vector<16x32xf32>
    %846 = arith.addf %842, %845 : vector<16x32xf32>
    %c3_412 = arith.constant 3 : index
    %c0_413 = arith.constant 0 : index
    %c0_414 = arith.constant 0 : index
    %847 = vector.load %arg14[%c3_412, %c0_413, %c0_414] : memref<5x32x32xf32, #tpu.memory_space<vmem>>, vector<1x32x32xf32>
    %848 = vector.shape_cast %847 : vector<1x32x32xf32> to vector<32x32xf32>
    %cst_415 = arith.constant dense<0.000000e+00> : vector<16x32xf32>
    %849 = tpu.matmul %688, %848, %cst_415 {dimension_numbers = #tpu.dot_dimension_numbers<[1], [0], [0], [1], [0, 0, 1, 1], [], []>} : vector<16x32xf32>, vector<32x32xf32>, vector<16x32xf32> -> vector<16x32xf32>
    %850 = arith.addf %846, %849 : vector<16x32xf32>
    %c3_416 = arith.constant 3 : index
    %c0_417 = arith.constant 0 : index
    %c0_418 = arith.constant 0 : index
    %851 = vector.load %arg15[%c3_416, %c0_417, %c0_418] : memref<5x32x32xf32, #tpu.memory_space<vmem>>, vector<1x32x32xf32>
    %852 = vector.shape_cast %851 : vector<1x32x32xf32> to vector<32x32xf32>
    %cst_419 = arith.constant dense<0.000000e+00> : vector<16x32xf32>
    %853 = tpu.matmul %839, %852, %cst_419 {dimension_numbers = #tpu.dot_dimension_numbers<[1], [0], [0], [1], [0, 0, 1, 1], [], []>} : vector<16x32xf32>, vector<32x32xf32>, vector<16x32xf32> -> vector<16x32xf32>
    %854 = arith.addf %850, %853 : vector<16x32xf32>
    %c3_420 = arith.constant 3 : index
    %c0_421 = arith.constant 0 : index
    %c0_422 = arith.constant 0 : index
    %855 = vector.load %arg16[%c3_420, %c0_421, %c0_422] : memref<5x1x32xf32, #tpu.memory_space<vmem>>, vector<1x1x32xf32>
    %856 = vector.shape_cast %855 : vector<1x1x32xf32> to vector<1x32xf32>
    %857 = vector.broadcast %856 : vector<1x32xf32> to vector<16x32xf32>
    %858 = arith.addf %854, %857 : vector<16x32xf32>
    %c3_423 = arith.constant 3 : index
    %c0_424 = arith.constant 0 : index
    %c0_425 = arith.constant 0 : index
    %859 = vector.load %arg17[%c3_423, %c0_424, %c0_425] : memref<5x32x32xf32, #tpu.memory_space<vmem>>, vector<1x32x32xf32>
    %860 = vector.shape_cast %859 : vector<1x32x32xf32> to vector<32x32xf32>
    %cst_426 = arith.constant dense<0.000000e+00> : vector<16x32xf32>
    %861 = tpu.matmul %858, %860, %cst_426 {dimension_numbers = #tpu.dot_dimension_numbers<[1], [0], [0], [1], [0, 0, 1, 1], [], []>} : vector<16x32xf32>, vector<32x32xf32>, vector<16x32xf32> -> vector<16x32xf32>
    %c3_427 = arith.constant 3 : index
    %c0_428 = arith.constant 0 : index
    %c0_429 = arith.constant 0 : index
    %862 = vector.load %arg18[%c3_427, %c0_428, %c0_429] : memref<5x1x32xf32, #tpu.memory_space<vmem>>, vector<1x1x32xf32>
    %863 = vector.shape_cast %862 : vector<1x1x32xf32> to vector<1x32xf32>
    %864 = vector.broadcast %863 : vector<1x32xf32> to vector<16x32xf32>
    %865 = arith.addf %861, %864 : vector<16x32xf32>
    %cst_430 = arith.constant 0.000000e+00 : f32
    %866 = vector.broadcast %cst_430 : f32 to vector<16x32xf32>
    %867 = arith.maximumf %865, %866 : vector<16x32xf32>
    %c3_431 = arith.constant 3 : index
    %c0_432 = arith.constant 0 : index
    %c0_433 = arith.constant 0 : index
    %868 = vector.load %arg5[%c3_431, %c0_432, %c0_433] : memref<5x16x32xf32, #tpu.memory_space<vmem>>, vector<1x16x32xf32>
    %869 = vector.shape_cast %868 : vector<1x16x32xf32> to vector<16x32xf32>
    %cst_434 = arith.constant 1.000000e-01 : f32
    %870 = vector.broadcast %cst_434 : f32 to vector<16x32xf32>
    %871 = arith.cmpf oge, %869, %870 : vector<16x32xf32>
    %cst_435 = arith.constant 1.11111116 : f32
    %872 = vector.broadcast %cst_435 : f32 to vector<16x32xf32>
    %873 = arith.mulf %867, %872 : vector<16x32xf32>
    %cst_436 = arith.constant 0.000000e+00 : f32
    %874 = vector.broadcast %cst_436 : f32 to vector<16x32xf32>
    %875 = arith.select %871, %873, %874 : vector<16x32xi1>, vector<16x32xf32>
    %c4 = arith.constant 4 : index
    %c0_437 = arith.constant 0 : index
    %c0_438 = arith.constant 0 : index
    %876 = vector.load %arg6[%c4, %c0_437, %c0_438] : memref<5x16x8xf32, #tpu.memory_space<vmem>>, vector<1x16x8xf32>
    %877 = vector.shape_cast %876 : vector<1x16x8xf32> to vector<16x8xf32>
    %cst_439 = arith.constant dense<0.000000e+00> : vector<48x8xf32>
    %878 = tpu.matmul %1, %877, %cst_439 {dimension_numbers = #tpu.dot_dimension_numbers<[1], [0], [0], [1], [0, 0, 1, 1], [], []>} : vector<48x16xf32>, vector<16x8xf32>, vector<48x8xf32> -> vector<48x8xf32>
    %c4_440 = arith.constant 4 : index
    %c0_441 = arith.constant 0 : index
    %c0_442 = arith.constant 0 : index
    %879 = vector.load %arg7[%c4_440, %c0_441, %c0_442] : memref<5x1x8xf32, #tpu.memory_space<vmem>>, vector<1x1x8xf32>
    %880 = vector.shape_cast %879 : vector<1x1x8xf32> to vector<1x8xf32>
    %881 = vector.broadcast %880 : vector<1x8xf32> to vector<48x8xf32>
    %882 = arith.addf %878, %881 : vector<48x8xf32>
    %cst_443 = arith.constant dense<0.000000e+00> : vector<48x32xf32>
    %883 = tpu.matmul %9, %875, %cst_443 {dimension_numbers = #tpu.dot_dimension_numbers<[1], [0], [0], [1], [0, 0, 1, 1], [], []>} : vector<48x16xf32>, vector<16x32xf32>, vector<48x32xf32> -> vector<48x32xf32>
    %cst_444 = arith.constant dense<0.000000e+00> : vector<48x32xf32>
    %884 = tpu.matmul %14, %875, %cst_444 {dimension_numbers = #tpu.dot_dimension_numbers<[1], [0], [0], [1], [0, 0, 1, 1], [], []>} : vector<48x16xf32>, vector<16x32xf32>, vector<48x32xf32> -> vector<48x32xf32>
    %c4_445 = arith.constant 4 : index
    %c0_446 = arith.constant 0 : index
    %c0_447 = arith.constant 0 : index
    %885 = vector.load %arg8[%c4_445, %c0_446, %c0_447] : memref<5x32x32xf32, #tpu.memory_space<vmem>>, vector<1x32x32xf32>
    %886 = vector.shape_cast %885 : vector<1x32x32xf32> to vector<32x32xf32>
    %cst_448 = arith.constant dense<0.000000e+00> : vector<48x32xf32>
    %887 = tpu.matmul %883, %886, %cst_448 {dimension_numbers = #tpu.dot_dimension_numbers<[1], [0], [0], [1], [0, 0, 1, 1], [], []>} : vector<48x32xf32>, vector<32x32xf32>, vector<48x32xf32> -> vector<48x32xf32>
    %c4_449 = arith.constant 4 : index
    %c0_450 = arith.constant 0 : index
    %c0_451 = arith.constant 0 : index
    %888 = vector.load %arg9[%c4_449, %c0_450, %c0_451] : memref<5x32x32xf32, #tpu.memory_space<vmem>>, vector<1x32x32xf32>
    %889 = vector.shape_cast %888 : vector<1x32x32xf32> to vector<32x32xf32>
    %cst_452 = arith.constant dense<0.000000e+00> : vector<48x32xf32>
    %890 = tpu.matmul %884, %889, %cst_452 {dimension_numbers = #tpu.dot_dimension_numbers<[1], [0], [0], [1], [0, 0, 1, 1], [], []>} : vector<48x32xf32>, vector<32x32xf32>, vector<48x32xf32> -> vector<48x32xf32>
    %891 = arith.addf %887, %890 : vector<48x32xf32>
    %c4_453 = arith.constant 4 : index
    %c0_454 = arith.constant 0 : index
    %c0_455 = arith.constant 0 : index
    %892 = vector.load %arg10[%c4_453, %c0_454, %c0_455] : memref<5x8x32xf32, #tpu.memory_space<vmem>>, vector<1x8x32xf32>
    %893 = vector.shape_cast %892 : vector<1x8x32xf32> to vector<8x32xf32>
    %cst_456 = arith.constant dense<0.000000e+00> : vector<48x32xf32>
    %894 = tpu.matmul %882, %893, %cst_456 {dimension_numbers = #tpu.dot_dimension_numbers<[1], [0], [0], [1], [0, 0, 1, 1], [], []>} : vector<48x8xf32>, vector<8x32xf32>, vector<48x32xf32> -> vector<48x32xf32>
    %895 = arith.addf %891, %894 : vector<48x32xf32>
    %c4_457 = arith.constant 4 : index
    %c0_458 = arith.constant 0 : index
    %c0_459 = arith.constant 0 : index
    %896 = vector.load %arg11[%c4_457, %c0_458, %c0_459] : memref<5x1x32xf32, #tpu.memory_space<vmem>>, vector<1x1x32xf32>
    %897 = vector.shape_cast %896 : vector<1x1x32xf32> to vector<1x32xf32>
    %898 = vector.broadcast %897 : vector<1x32xf32> to vector<48x32xf32>
    %899 = arith.addf %895, %898 : vector<48x32xf32>
    %cst_460 = arith.constant dense<0.000000e+00> : vector<16x32xf32>
    %900 = tpu.matmul %19, %899, %cst_460 {dimension_numbers = #tpu.dot_dimension_numbers<[1], [0], [0], [1], [0, 0, 1, 1], [], []>} : vector<16x48xf32>, vector<48x32xf32>, vector<16x32xf32> -> vector<16x32xf32>
    %901 = vector.broadcast %25 : vector<16x1xf32> to vector<16x32xf32>
    %902 = arith.mulf %900, %901 : vector<16x32xf32>
    %903 = vector.extract_strided_slice %9 {offsets = [0, 0], sizes = [48, 1], strides = [1, 1]} : vector<48x16xf32> to vector<48x1xf32>
    %cst_461 = arith.constant 0.000000e+00 : f32
    %904 = vector.broadcast %cst_461 : f32 to vector<48x1xf32>
    %905 = arith.cmpf ogt, %903, %904 : vector<48x1xf32>
    %cst_462 = arith.constant -1.000000e+30 : f32
    %906 = vector.shape_cast %905 : vector<48x1xi1> to vector<48x1xi1>
    %907 = vector.broadcast %906 : vector<48x1xi1> to vector<48x32xi1>
    %908 = vector.broadcast %cst_462 : f32 to vector<48x32xf32>
    %909 = arith.select %907, %899, %908 : vector<48x32xi1>, vector<48x32xf32>
    %cst_463 = arith.constant dense<0xFF800000> : vector<32xf32>
    %910 = vector.multi_reduction <maximumf>, %909, %cst_463 [0] : vector<48x32xf32> to vector<32xf32>
    %911 = vector.shape_cast %910 : vector<32xf32> to vector<1x32xf32>
    %912 = vector.extract_strided_slice %9 {offsets = [0, 1], sizes = [48, 1], strides = [1, 1]} : vector<48x16xf32> to vector<48x1xf32>
    %cst_464 = arith.constant 0.000000e+00 : f32
    %913 = vector.broadcast %cst_464 : f32 to vector<48x1xf32>
    %914 = arith.cmpf ogt, %912, %913 : vector<48x1xf32>
    %cst_465 = arith.constant -1.000000e+30 : f32
    %915 = vector.shape_cast %914 : vector<48x1xi1> to vector<48x1xi1>
    %916 = vector.broadcast %915 : vector<48x1xi1> to vector<48x32xi1>
    %917 = vector.broadcast %cst_465 : f32 to vector<48x32xf32>
    %918 = arith.select %916, %899, %917 : vector<48x32xi1>, vector<48x32xf32>
    %cst_466 = arith.constant dense<0xFF800000> : vector<32xf32>
    %919 = vector.multi_reduction <maximumf>, %918, %cst_466 [0] : vector<48x32xf32> to vector<32xf32>
    %920 = vector.shape_cast %919 : vector<32xf32> to vector<1x32xf32>
    %921 = vector.extract_strided_slice %9 {offsets = [0, 2], sizes = [48, 1], strides = [1, 1]} : vector<48x16xf32> to vector<48x1xf32>
    %cst_467 = arith.constant 0.000000e+00 : f32
    %922 = vector.broadcast %cst_467 : f32 to vector<48x1xf32>
    %923 = arith.cmpf ogt, %921, %922 : vector<48x1xf32>
    %cst_468 = arith.constant -1.000000e+30 : f32
    %924 = vector.shape_cast %923 : vector<48x1xi1> to vector<48x1xi1>
    %925 = vector.broadcast %924 : vector<48x1xi1> to vector<48x32xi1>
    %926 = vector.broadcast %cst_468 : f32 to vector<48x32xf32>
    %927 = arith.select %925, %899, %926 : vector<48x32xi1>, vector<48x32xf32>
    %cst_469 = arith.constant dense<0xFF800000> : vector<32xf32>
    %928 = vector.multi_reduction <maximumf>, %927, %cst_469 [0] : vector<48x32xf32> to vector<32xf32>
    %929 = vector.shape_cast %928 : vector<32xf32> to vector<1x32xf32>
    %930 = vector.extract_strided_slice %9 {offsets = [0, 3], sizes = [48, 1], strides = [1, 1]} : vector<48x16xf32> to vector<48x1xf32>
    %cst_470 = arith.constant 0.000000e+00 : f32
    %931 = vector.broadcast %cst_470 : f32 to vector<48x1xf32>
    %932 = arith.cmpf ogt, %930, %931 : vector<48x1xf32>
    %cst_471 = arith.constant -1.000000e+30 : f32
    %933 = vector.shape_cast %932 : vector<48x1xi1> to vector<48x1xi1>
    %934 = vector.broadcast %933 : vector<48x1xi1> to vector<48x32xi1>
    %935 = vector.broadcast %cst_471 : f32 to vector<48x32xf32>
    %936 = arith.select %934, %899, %935 : vector<48x32xi1>, vector<48x32xf32>
    %cst_472 = arith.constant dense<0xFF800000> : vector<32xf32>
    %937 = vector.multi_reduction <maximumf>, %936, %cst_472 [0] : vector<48x32xf32> to vector<32xf32>
    %938 = vector.shape_cast %937 : vector<32xf32> to vector<1x32xf32>
    %939 = vector.extract_strided_slice %9 {offsets = [0, 4], sizes = [48, 1], strides = [1, 1]} : vector<48x16xf32> to vector<48x1xf32>
    %cst_473 = arith.constant 0.000000e+00 : f32
    %940 = vector.broadcast %cst_473 : f32 to vector<48x1xf32>
    %941 = arith.cmpf ogt, %939, %940 : vector<48x1xf32>
    %cst_474 = arith.constant -1.000000e+30 : f32
    %942 = vector.shape_cast %941 : vector<48x1xi1> to vector<48x1xi1>
    %943 = vector.broadcast %942 : vector<48x1xi1> to vector<48x32xi1>
    %944 = vector.broadcast %cst_474 : f32 to vector<48x32xf32>
    %945 = arith.select %943, %899, %944 : vector<48x32xi1>, vector<48x32xf32>
    %cst_475 = arith.constant dense<0xFF800000> : vector<32xf32>
    %946 = vector.multi_reduction <maximumf>, %945, %cst_475 [0] : vector<48x32xf32> to vector<32xf32>
    %947 = vector.shape_cast %946 : vector<32xf32> to vector<1x32xf32>
    %948 = vector.extract_strided_slice %9 {offsets = [0, 5], sizes = [48, 1], strides = [1, 1]} : vector<48x16xf32> to vector<48x1xf32>
    %cst_476 = arith.constant 0.000000e+00 : f32
    %949 = vector.broadcast %cst_476 : f32 to vector<48x1xf32>
    %950 = arith.cmpf ogt, %948, %949 : vector<48x1xf32>
    %cst_477 = arith.constant -1.000000e+30 : f32
    %951 = vector.shape_cast %950 : vector<48x1xi1> to vector<48x1xi1>
    %952 = vector.broadcast %951 : vector<48x1xi1> to vector<48x32xi1>
    %953 = vector.broadcast %cst_477 : f32 to vector<48x32xf32>
    %954 = arith.select %952, %899, %953 : vector<48x32xi1>, vector<48x32xf32>
    %cst_478 = arith.constant dense<0xFF800000> : vector<32xf32>
    %955 = vector.multi_reduction <maximumf>, %954, %cst_478 [0] : vector<48x32xf32> to vector<32xf32>
    %956 = vector.shape_cast %955 : vector<32xf32> to vector<1x32xf32>
    %957 = vector.extract_strided_slice %9 {offsets = [0, 6], sizes = [48, 1], strides = [1, 1]} : vector<48x16xf32> to vector<48x1xf32>
    %cst_479 = arith.constant 0.000000e+00 : f32
    %958 = vector.broadcast %cst_479 : f32 to vector<48x1xf32>
    %959 = arith.cmpf ogt, %957, %958 : vector<48x1xf32>
    %cst_480 = arith.constant -1.000000e+30 : f32
    %960 = vector.shape_cast %959 : vector<48x1xi1> to vector<48x1xi1>
    %961 = vector.broadcast %960 : vector<48x1xi1> to vector<48x32xi1>
    %962 = vector.broadcast %cst_480 : f32 to vector<48x32xf32>
    %963 = arith.select %961, %899, %962 : vector<48x32xi1>, vector<48x32xf32>
    %cst_481 = arith.constant dense<0xFF800000> : vector<32xf32>
    %964 = vector.multi_reduction <maximumf>, %963, %cst_481 [0] : vector<48x32xf32> to vector<32xf32>
    %965 = vector.shape_cast %964 : vector<32xf32> to vector<1x32xf32>
    %966 = vector.extract_strided_slice %9 {offsets = [0, 7], sizes = [48, 1], strides = [1, 1]} : vector<48x16xf32> to vector<48x1xf32>
    %cst_482 = arith.constant 0.000000e+00 : f32
    %967 = vector.broadcast %cst_482 : f32 to vector<48x1xf32>
    %968 = arith.cmpf ogt, %966, %967 : vector<48x1xf32>
    %cst_483 = arith.constant -1.000000e+30 : f32
    %969 = vector.shape_cast %968 : vector<48x1xi1> to vector<48x1xi1>
    %970 = vector.broadcast %969 : vector<48x1xi1> to vector<48x32xi1>
    %971 = vector.broadcast %cst_483 : f32 to vector<48x32xf32>
    %972 = arith.select %970, %899, %971 : vector<48x32xi1>, vector<48x32xf32>
    %cst_484 = arith.constant dense<0xFF800000> : vector<32xf32>
    %973 = vector.multi_reduction <maximumf>, %972, %cst_484 [0] : vector<48x32xf32> to vector<32xf32>
    %974 = vector.shape_cast %973 : vector<32xf32> to vector<1x32xf32>
    %975 = vector.extract_strided_slice %9 {offsets = [0, 8], sizes = [48, 1], strides = [1, 1]} : vector<48x16xf32> to vector<48x1xf32>
    %cst_485 = arith.constant 0.000000e+00 : f32
    %976 = vector.broadcast %cst_485 : f32 to vector<48x1xf32>
    %977 = arith.cmpf ogt, %975, %976 : vector<48x1xf32>
    %cst_486 = arith.constant -1.000000e+30 : f32
    %978 = vector.shape_cast %977 : vector<48x1xi1> to vector<48x1xi1>
    %979 = vector.broadcast %978 : vector<48x1xi1> to vector<48x32xi1>
    %980 = vector.broadcast %cst_486 : f32 to vector<48x32xf32>
    %981 = arith.select %979, %899, %980 : vector<48x32xi1>, vector<48x32xf32>
    %cst_487 = arith.constant dense<0xFF800000> : vector<32xf32>
    %982 = vector.multi_reduction <maximumf>, %981, %cst_487 [0] : vector<48x32xf32> to vector<32xf32>
    %983 = vector.shape_cast %982 : vector<32xf32> to vector<1x32xf32>
    %984 = vector.extract_strided_slice %9 {offsets = [0, 9], sizes = [48, 1], strides = [1, 1]} : vector<48x16xf32> to vector<48x1xf32>
    %cst_488 = arith.constant 0.000000e+00 : f32
    %985 = vector.broadcast %cst_488 : f32 to vector<48x1xf32>
    %986 = arith.cmpf ogt, %984, %985 : vector<48x1xf32>
    %cst_489 = arith.constant -1.000000e+30 : f32
    %987 = vector.shape_cast %986 : vector<48x1xi1> to vector<48x1xi1>
    %988 = vector.broadcast %987 : vector<48x1xi1> to vector<48x32xi1>
    %989 = vector.broadcast %cst_489 : f32 to vector<48x32xf32>
    %990 = arith.select %988, %899, %989 : vector<48x32xi1>, vector<48x32xf32>
    %cst_490 = arith.constant dense<0xFF800000> : vector<32xf32>
    %991 = vector.multi_reduction <maximumf>, %990, %cst_490 [0] : vector<48x32xf32> to vector<32xf32>
    %992 = vector.shape_cast %991 : vector<32xf32> to vector<1x32xf32>
    %993 = vector.extract_strided_slice %9 {offsets = [0, 10], sizes = [48, 1], strides = [1, 1]} : vector<48x16xf32> to vector<48x1xf32>
    %cst_491 = arith.constant 0.000000e+00 : f32
    %994 = vector.broadcast %cst_491 : f32 to vector<48x1xf32>
    %995 = arith.cmpf ogt, %993, %994 : vector<48x1xf32>
    %cst_492 = arith.constant -1.000000e+30 : f32
    %996 = vector.shape_cast %995 : vector<48x1xi1> to vector<48x1xi1>
    %997 = vector.broadcast %996 : vector<48x1xi1> to vector<48x32xi1>
    %998 = vector.broadcast %cst_492 : f32 to vector<48x32xf32>
    %999 = arith.select %997, %899, %998 : vector<48x32xi1>, vector<48x32xf32>
    %cst_493 = arith.constant dense<0xFF800000> : vector<32xf32>
    %1000 = vector.multi_reduction <maximumf>, %999, %cst_493 [0] : vector<48x32xf32> to vector<32xf32>
    %1001 = vector.shape_cast %1000 : vector<32xf32> to vector<1x32xf32>
    %1002 = vector.extract_strided_slice %9 {offsets = [0, 11], sizes = [48, 1], strides = [1, 1]} : vector<48x16xf32> to vector<48x1xf32>
    %cst_494 = arith.constant 0.000000e+00 : f32
    %1003 = vector.broadcast %cst_494 : f32 to vector<48x1xf32>
    %1004 = arith.cmpf ogt, %1002, %1003 : vector<48x1xf32>
    %cst_495 = arith.constant -1.000000e+30 : f32
    %1005 = vector.shape_cast %1004 : vector<48x1xi1> to vector<48x1xi1>
    %1006 = vector.broadcast %1005 : vector<48x1xi1> to vector<48x32xi1>
    %1007 = vector.broadcast %cst_495 : f32 to vector<48x32xf32>
    %1008 = arith.select %1006, %899, %1007 : vector<48x32xi1>, vector<48x32xf32>
    %cst_496 = arith.constant dense<0xFF800000> : vector<32xf32>
    %1009 = vector.multi_reduction <maximumf>, %1008, %cst_496 [0] : vector<48x32xf32> to vector<32xf32>
    %1010 = vector.shape_cast %1009 : vector<32xf32> to vector<1x32xf32>
    %1011 = vector.extract_strided_slice %9 {offsets = [0, 12], sizes = [48, 1], strides = [1, 1]} : vector<48x16xf32> to vector<48x1xf32>
    %cst_497 = arith.constant 0.000000e+00 : f32
    %1012 = vector.broadcast %cst_497 : f32 to vector<48x1xf32>
    %1013 = arith.cmpf ogt, %1011, %1012 : vector<48x1xf32>
    %cst_498 = arith.constant -1.000000e+30 : f32
    %1014 = vector.shape_cast %1013 : vector<48x1xi1> to vector<48x1xi1>
    %1015 = vector.broadcast %1014 : vector<48x1xi1> to vector<48x32xi1>
    %1016 = vector.broadcast %cst_498 : f32 to vector<48x32xf32>
    %1017 = arith.select %1015, %899, %1016 : vector<48x32xi1>, vector<48x32xf32>
    %cst_499 = arith.constant dense<0xFF800000> : vector<32xf32>
    %1018 = vector.multi_reduction <maximumf>, %1017, %cst_499 [0] : vector<48x32xf32> to vector<32xf32>
    %1019 = vector.shape_cast %1018 : vector<32xf32> to vector<1x32xf32>
    %1020 = vector.extract_strided_slice %9 {offsets = [0, 13], sizes = [48, 1], strides = [1, 1]} : vector<48x16xf32> to vector<48x1xf32>
    %cst_500 = arith.constant 0.000000e+00 : f32
    %1021 = vector.broadcast %cst_500 : f32 to vector<48x1xf32>
    %1022 = arith.cmpf ogt, %1020, %1021 : vector<48x1xf32>
    %cst_501 = arith.constant -1.000000e+30 : f32
    %1023 = vector.shape_cast %1022 : vector<48x1xi1> to vector<48x1xi1>
    %1024 = vector.broadcast %1023 : vector<48x1xi1> to vector<48x32xi1>
    %1025 = vector.broadcast %cst_501 : f32 to vector<48x32xf32>
    %1026 = arith.select %1024, %899, %1025 : vector<48x32xi1>, vector<48x32xf32>
    %cst_502 = arith.constant dense<0xFF800000> : vector<32xf32>
    %1027 = vector.multi_reduction <maximumf>, %1026, %cst_502 [0] : vector<48x32xf32> to vector<32xf32>
    %1028 = vector.shape_cast %1027 : vector<32xf32> to vector<1x32xf32>
    %1029 = vector.extract_strided_slice %9 {offsets = [0, 14], sizes = [48, 1], strides = [1, 1]} : vector<48x16xf32> to vector<48x1xf32>
    %cst_503 = arith.constant 0.000000e+00 : f32
    %1030 = vector.broadcast %cst_503 : f32 to vector<48x1xf32>
    %1031 = arith.cmpf ogt, %1029, %1030 : vector<48x1xf32>
    %cst_504 = arith.constant -1.000000e+30 : f32
    %1032 = vector.shape_cast %1031 : vector<48x1xi1> to vector<48x1xi1>
    %1033 = vector.broadcast %1032 : vector<48x1xi1> to vector<48x32xi1>
    %1034 = vector.broadcast %cst_504 : f32 to vector<48x32xf32>
    %1035 = arith.select %1033, %899, %1034 : vector<48x32xi1>, vector<48x32xf32>
    %cst_505 = arith.constant dense<0xFF800000> : vector<32xf32>
    %1036 = vector.multi_reduction <maximumf>, %1035, %cst_505 [0] : vector<48x32xf32> to vector<32xf32>
    %1037 = vector.shape_cast %1036 : vector<32xf32> to vector<1x32xf32>
    %1038 = vector.extract_strided_slice %9 {offsets = [0, 15], sizes = [48, 1], strides = [1, 1]} : vector<48x16xf32> to vector<48x1xf32>
    %cst_506 = arith.constant 0.000000e+00 : f32
    %1039 = vector.broadcast %cst_506 : f32 to vector<48x1xf32>
    %1040 = arith.cmpf ogt, %1038, %1039 : vector<48x1xf32>
    %cst_507 = arith.constant -1.000000e+30 : f32
    %1041 = vector.shape_cast %1040 : vector<48x1xi1> to vector<48x1xi1>
    %1042 = vector.broadcast %1041 : vector<48x1xi1> to vector<48x32xi1>
    %1043 = vector.broadcast %cst_507 : f32 to vector<48x32xf32>
    %1044 = arith.select %1042, %899, %1043 : vector<48x32xi1>, vector<48x32xf32>
    %cst_508 = arith.constant dense<0xFF800000> : vector<32xf32>
    %1045 = vector.multi_reduction <maximumf>, %1044, %cst_508 [0] : vector<48x32xf32> to vector<32xf32>
    %1046 = vector.shape_cast %1045 : vector<32xf32> to vector<1x32xf32>
    %1047 = tpu.concatenate %911, %920, %929, %938, %947, %956, %965, %974, %983, %992, %1001, %1010, %1019, %1028, %1037, %1046 in 0 : vector<1x32xf32>, vector<1x32xf32>, vector<1x32xf32>, vector<1x32xf32>, vector<1x32xf32>, vector<1x32xf32>, vector<1x32xf32>, vector<1x32xf32>, vector<1x32xf32>, vector<1x32xf32>, vector<1x32xf32>, vector<1x32xf32>, vector<1x32xf32>, vector<1x32xf32>, vector<1x32xf32>, vector<1x32xf32> -> vector<16x32xf32>
    %cst_509 = arith.constant 0.000000e+00 : f32
    %1048 = vector.shape_cast %27 : vector<16x1xi1> to vector<16x1xi1>
    %1049 = vector.broadcast %1048 : vector<16x1xi1> to vector<16x32xi1>
    %1050 = vector.broadcast %cst_509 : f32 to vector<16x32xf32>
    %1051 = arith.select %1049, %1047, %1050 : vector<16x32xi1>, vector<16x32xf32>
    %c4_510 = arith.constant 4 : index
    %c0_511 = arith.constant 0 : index
    %c0_512 = arith.constant 0 : index
    %1052 = vector.load %arg12[%c4_510, %c0_511, %c0_512] : memref<5x32x32xf32, #tpu.memory_space<vmem>>, vector<1x32x32xf32>
    %1053 = vector.shape_cast %1052 : vector<1x32x32xf32> to vector<32x32xf32>
    %cst_513 = arith.constant dense<0.000000e+00> : vector<16x32xf32>
    %1054 = tpu.matmul %875, %1053, %cst_513 {dimension_numbers = #tpu.dot_dimension_numbers<[1], [0], [0], [1], [0, 0, 1, 1], [], []>} : vector<16x32xf32>, vector<32x32xf32>, vector<16x32xf32> -> vector<16x32xf32>
    %c4_514 = arith.constant 4 : index
    %c0_515 = arith.constant 0 : index
    %c0_516 = arith.constant 0 : index
    %1055 = vector.load %arg13[%c4_514, %c0_515, %c0_516] : memref<5x32x32xf32, #tpu.memory_space<vmem>>, vector<1x32x32xf32>
    %1056 = vector.shape_cast %1055 : vector<1x32x32xf32> to vector<32x32xf32>
    %cst_517 = arith.constant dense<0.000000e+00> : vector<16x32xf32>
    %1057 = tpu.matmul %902, %1056, %cst_517 {dimension_numbers = #tpu.dot_dimension_numbers<[1], [0], [0], [1], [0, 0, 1, 1], [], []>} : vector<16x32xf32>, vector<32x32xf32>, vector<16x32xf32> -> vector<16x32xf32>
    %1058 = arith.addf %1054, %1057 : vector<16x32xf32>
    %c4_518 = arith.constant 4 : index
    %c0_519 = arith.constant 0 : index
    %c0_520 = arith.constant 0 : index
    %1059 = vector.load %arg14[%c4_518, %c0_519, %c0_520] : memref<5x32x32xf32, #tpu.memory_space<vmem>>, vector<1x32x32xf32>
    %1060 = vector.shape_cast %1059 : vector<1x32x32xf32> to vector<32x32xf32>
    %cst_521 = arith.constant dense<0.000000e+00> : vector<16x32xf32>
    %1061 = tpu.matmul %900, %1060, %cst_521 {dimension_numbers = #tpu.dot_dimension_numbers<[1], [0], [0], [1], [0, 0, 1, 1], [], []>} : vector<16x32xf32>, vector<32x32xf32>, vector<16x32xf32> -> vector<16x32xf32>
    %1062 = arith.addf %1058, %1061 : vector<16x32xf32>
    %c4_522 = arith.constant 4 : index
    %c0_523 = arith.constant 0 : index
    %c0_524 = arith.constant 0 : index
    %1063 = vector.load %arg15[%c4_522, %c0_523, %c0_524] : memref<5x32x32xf32, #tpu.memory_space<vmem>>, vector<1x32x32xf32>
    %1064 = vector.shape_cast %1063 : vector<1x32x32xf32> to vector<32x32xf32>
    %cst_525 = arith.constant dense<0.000000e+00> : vector<16x32xf32>
    %1065 = tpu.matmul %1051, %1064, %cst_525 {dimension_numbers = #tpu.dot_dimension_numbers<[1], [0], [0], [1], [0, 0, 1, 1], [], []>} : vector<16x32xf32>, vector<32x32xf32>, vector<16x32xf32> -> vector<16x32xf32>
    %1066 = arith.addf %1062, %1065 : vector<16x32xf32>
    %c4_526 = arith.constant 4 : index
    %c0_527 = arith.constant 0 : index
    %c0_528 = arith.constant 0 : index
    %1067 = vector.load %arg16[%c4_526, %c0_527, %c0_528] : memref<5x1x32xf32, #tpu.memory_space<vmem>>, vector<1x1x32xf32>
    %1068 = vector.shape_cast %1067 : vector<1x1x32xf32> to vector<1x32xf32>
    %1069 = vector.broadcast %1068 : vector<1x32xf32> to vector<16x32xf32>
    %1070 = arith.addf %1066, %1069 : vector<16x32xf32>
    %c4_529 = arith.constant 4 : index
    %c0_530 = arith.constant 0 : index
    %c0_531 = arith.constant 0 : index
    %1071 = vector.load %arg17[%c4_529, %c0_530, %c0_531] : memref<5x32x32xf32, #tpu.memory_space<vmem>>, vector<1x32x32xf32>
    %1072 = vector.shape_cast %1071 : vector<1x32x32xf32> to vector<32x32xf32>
    %cst_532 = arith.constant dense<0.000000e+00> : vector<16x32xf32>
    %1073 = tpu.matmul %1070, %1072, %cst_532 {dimension_numbers = #tpu.dot_dimension_numbers<[1], [0], [0], [1], [0, 0, 1, 1], [], []>} : vector<16x32xf32>, vector<32x32xf32>, vector<16x32xf32> -> vector<16x32xf32>
    %c4_533 = arith.constant 4 : index
    %c0_534 = arith.constant 0 : index
    %c0_535 = arith.constant 0 : index
    %1074 = vector.load %arg18[%c4_533, %c0_534, %c0_535] : memref<5x1x32xf32, #tpu.memory_space<vmem>>, vector<1x1x32xf32>
    %1075 = vector.shape_cast %1074 : vector<1x1x32xf32> to vector<1x32xf32>
    %1076 = vector.broadcast %1075 : vector<1x32xf32> to vector<16x32xf32>
    %1077 = arith.addf %1073, %1076 : vector<16x32xf32>
    %cst_536 = arith.constant 0.000000e+00 : f32
    %1078 = vector.broadcast %cst_536 : f32 to vector<16x32xf32>
    %1079 = arith.maximumf %1077, %1078 : vector<16x32xf32>
    %c4_537 = arith.constant 4 : index
    %c0_538 = arith.constant 0 : index
    %c0_539 = arith.constant 0 : index
    %1080 = vector.load %arg5[%c4_537, %c0_538, %c0_539] : memref<5x16x32xf32, #tpu.memory_space<vmem>>, vector<1x16x32xf32>
    %1081 = vector.shape_cast %1080 : vector<1x16x32xf32> to vector<16x32xf32>
    %cst_540 = arith.constant 1.000000e-01 : f32
    %1082 = vector.broadcast %cst_540 : f32 to vector<16x32xf32>
    %1083 = arith.cmpf oge, %1081, %1082 : vector<16x32xf32>
    %cst_541 = arith.constant 1.11111116 : f32
    %1084 = vector.broadcast %cst_541 : f32 to vector<16x32xf32>
    %1085 = arith.mulf %1079, %1084 : vector<16x32xf32>
    %cst_542 = arith.constant 0.000000e+00 : f32
    %1086 = vector.broadcast %cst_542 : f32 to vector<16x32xf32>
    %1087 = arith.select %1083, %1085, %1086 : vector<16x32xi1>, vector<16x32xf32>
    %c0_543 = arith.constant 0 : index
    %c0_544 = arith.constant 0 : index
    %1088 = vector.load %arg19[%c0_543, %c0_544] : memref<16x32xf32, #tpu.memory_space<vmem>>, vector<16x32xf32>
    tpu.vector_store %arg19[%c0_543, %c0_544], %1087 {strides = array<i32>} : memref<16x32xf32, #tpu.memory_space<vmem>>, vector<16x32xf32>,
    return
  }
}

</mosaic_0001>

<bundles_post_ra>
// kernel: tpu_custom_call.1
= control target key start
LH: loop header
LB: loop body
LE: loop exit
PB: predicated region body
PF: predicated region fallthrough
CT: control target
= control target key end

     0   :  { %s15274_s0 = inlined_call_operand.hbm [shape: f32[16,32], index: 0, kind: input, shape index: {}]   ;;  %s15275_s1 = inlined_call_operand.vmem [shape: f32[48,16], index: 1, kind: input, shape index: {}]   ;;  %s15276_s2 = inlined_call_operand.vmem [shape: s32[48,1], index: 2, kind: input, shape index: {}]   ;;  %s15277_s3 = inlined_call_operand.vmem [shape: s32[48,1], index: 3, kind: input, shape index: {}]   ;;  %s15278_s4 = inlined_call_operand.vmem [shape: s32[1,48], index: 4, kind: input, shape index: {}]   ;;  %s15279_s5 = inlined_call_operand.hbm [shape: f32[5,16,32], index: 5, kind: input, shape index: {}]   ;;  %s15280_s6 = inlined_call_operand.vmem [shape: f32[5,16,8], index: 6, kind: input, shape index: {}]   ;;  %s15281_s7 = inlined_call_operand.hbm [shape: f32[5,1,8], index: 7, kind: input, shape index: {}]   ;;  %s15282_s8 = inlined_call_operand.vmem [shape: f32[5,32,32], index: 8, kind: input, shape index: {}]   ;;  %s15283_s9 = inlined_call_operand.hbm [shape: f32[5,32,32], index: 9, kind: input, shape index: {}]   ;;  %s15284_s10 = inlined_call_operand.hbm [shape: f32[5,8,32], index: 10, kind: input, shape index: {}]   ;;  %s15285_s11 = inlined_call_operand.hbm [shape: f32[5,1,32], index: 11, kind: input, shape index: {}]   ;;  %s15286_s12 = inlined_call_operand.vmem [shape: f32[5,32,32], index: 12, kind: input, shape index: {}]   ;;  %s15287_s13 = inlined_call_operand.hbm [shape: f32[5,32,32], index: 13, kind: input, shape index: {}]   ;;  %s15288_s14 = inlined_call_operand.hbm [shape: f32[5,32,32], index: 14, kind: input, shape index: {}]   ;;  %s15289_s15 = inlined_call_operand.hbm [shape: f32[5,32,32], index: 15, kind: input, shape index: {}]   ;;  %s15290_s16 = inlined_call_operand.vmem [shape: f32[5,1,32], index: 16, kind: input, shape index: {}]   ;;  %s15291_s17 = inlined_call_operand.hbm [shape: f32[5,32,32], index: 17, kind: input, shape index: {}]   ;;  %s15292_s18 = inlined_call_operand.vmem [shape: f32[5,1,32], index: 18, kind: input, shape index: {}]   ;;  %s15293_s19 = inlined_call_operand.hbm [shape: f32[16,32], index: 19, kind: output, shape index: {}]  }
   0x1   :  { %15615 = sst [smem:[#allocation137_spill]] %s15274_s0 }
   0x2   :  { %15616 = sst [smem:[#allocation138_spill]] %s15275_s1 }
   0x3   :  { %15617 = sst [smem:[#allocation139_spill]] %s15276_s2 }
   0x4   :  { %15618 = sst [smem:[#allocation140_spill]] %s15277_s3 }
   0x5   :  { %24 = vsyncpa [#allocation3], 0 }
   0x6   :  { %25 = vsyncpa [#allocation6], 0 }
   0x7   :  { %26 = vsyncpa [#allocation9], 0 }
   0x8   :  { %27 = vsyncpa [#allocation12], 0 }
   0x9   :  { %28 = vsyncpa [#allocation15], 0 }
   0xa   :  { %29 = vsyncpa [#allocation18], 0 }
   0xb   :  { %30 = vsyncpa [#allocation4], 0  ;;  %s11189_s0 = smov [#allocation5]   ;;  %s11190_s20 = smov [#allocation8]  }
   0xc   :  { %s56_s30 = sshll.u32 %s11189_s0, 4  ;;  %s84_s21 = sshll.u32 %s11190_s20, 4  ;;  %s57_s30 = int_to_ptr.vmem [resolvable:$true] %s56_s30  ;;  %s11321_s21 = int_to_ptr.vmem [resolvable:$true] %s84_s21 }
   0xd   :  { %s10933_s2 = scalar_lea.hbm %s15279_s5, 1280 }
   0xe   :  { %p10934_p0 = scmp.ne.s32.totalorder %s15279_s5, %s10933_s2  ;;  %p10937_p1 = scmp.lt.u32.totalorder %s10933_s2, %s15279_s5 }
  0x10   :  { %p10939_p2 = pnand %p10937_p1, %p10934_p0 }
  0x12   :  { %10942 = shalt.err (!%p10939_p2)
}
  0x13   :  { %s10943_s26 = scalar_lea.vmem %s57_s30, 1280  ;;  %p10948_p4 = scmp.lt.s32.totalorder %s57_s30, %s57_s30 }
  0x14   :  { %p10944_p3 = scmp.ne.s32.totalorder %s57_s30, %s10943_s26  ;;  %p10949_p5 = scmp.lt.s32.totalorder %s10943_s26, %s10943_s26 }
  0x16   :  { %p10950_p6 = por %p10949_p5, %p10948_p4 }
  0x18   :  { %p10951_p7 = pnand %p10950_p6, %p10944_p3 }
  0x1a   :  { %10954 = shalt.err (!%p10951_p7)
}
  0x1b   :  { %s11191_s27 = smov 128   ;;  %s11192_s28 = smov 8  }
  0x1c   :  { %62 = dma.hbm_to_vmem [thread:$0]  %s15279_s5, 1280, %s57_s30, [#allocation6], %s11191_s27, %s11191_s27, %s11192_s28  }
  0x1d   :  { %s10955_s22 = scalar_lea.hbm %s15283_s9, 2560 }
  0x1e   :  { %p10956_p8 = scmp.ne.s32.totalorder %s15283_s9, %s10955_s22  ;;  %p10959_p9 = scmp.lt.u32.totalorder %s10955_s22, %s15283_s9 }
  0x20   :  { %p10961_p10 = pnand %p10959_p9, %p10956_p8 }
  0x22   :  { %10964 = shalt.err (!%p10961_p10)
}
  0x23   :  { %s10965_s3 = scalar_lea.vmem %s11321_s21, 2560  ;;  %p10970_p12 = scmp.lt.s32.totalorder %s11321_s21, %s11321_s21 }
  0x24   :  { %p10966_p11 = scmp.ne.s32.totalorder %s11321_s21, %s10965_s3  ;;  %p10971_p13 = scmp.lt.s32.totalorder %s10965_s3, %s10965_s3 }
  0x26   :  { %p10972_p0 = por %p10971_p13, %p10970_p12 }
  0x28   :  { %p10973_p1 = pnand %p10972_p0, %p10966_p11 }
  0x2a   :  { %10976 = shalt.err (!%p10973_p1)
}
  0x2b   :  { %90 = dma.hbm_to_vmem [thread:$0]  %s15283_s9, 2560, %s11321_s21, [#allocation9], %s11191_s27, %s11191_s27, %s11192_s28  }
  0x2c   :  { %s11193_s26 = smov [#allocation11]   ;;  %s11194_s0 = smov [#allocation14]  }
  0x2d   :  { %s108_s29 = sshll.u32 %s11193_s26, 4  ;;  %s134_s20 = sshll.u32 %s11194_s0, 4  ;;  %s109_s29 = int_to_ptr.vmem [resolvable:$true] %s108_s29  ;;  %s11358_s20 = int_to_ptr.vmem [resolvable:$true] %s134_s20 }
  0x2e   :  { %s10977_s2 = scalar_lea.hbm %s15285_s11, 80 }
  0x2f   :  { %p10978_p2 = scmp.ne.s32.totalorder %s15285_s11, %s10977_s2  ;;  %p10981_p3 = scmp.lt.u32.totalorder %s10977_s2, %s15285_s11 }
  0x31   :  { %p10983_p4 = pnand %p10981_p3, %p10978_p2 }
  0x33   :  { %10986 = shalt.err (!%p10983_p4)
}
  0x34   :  { %s10987_s9 = scalar_lea.vmem %s109_s29, 80  ;;  %s10991_s21 = scalar_lea.vmem %s109_s29, 96 }
  0x35   :  { %p10988_p5 = scmp.ne.s32.totalorder %s109_s29, %s10987_s9  ;;  %p10992_p6 = scmp.lt.s32.totalorder %s109_s29, %s109_s29 }
  0x36   :  { %p10993_p7 = scmp.lt.s32.totalorder %s10991_s21, %s10987_s9 }
  0x38   :  { %p10994_p8 = por %p10993_p7, %p10992_p6 }
  0x3a   :  { %p10995_p9 = pnand %p10994_p8, %p10988_p5 }
  0x3c   :  { %10998 = shalt.err (!%p10995_p9)
}
  0x3d   :  { %s15298_s5 = smov 16   ;;  %s11196_s30 = smov 1  }
  0x3e   :  { %114 = dma.hbm_to_vmem [thread:$0]  %s15285_s11, 80, %s109_s29, [#allocation12], %s15298_s5, %s15298_s5, %s11196_s30  }
  0x3f   :  { %s10999_s2 = scalar_lea.hbm %s15288_s14, 2560 }
  0x40   :  { %p11000_p10 = scmp.ne.s32.totalorder %s15288_s14, %s10999_s2  ;;  %p11003_p11 = scmp.lt.u32.totalorder %s10999_s2, %s15288_s14 }
  0x42   :  { %p11005_p12 = pnand %p11003_p11, %p11000_p10 }
  0x44   :  { %11008 = shalt.err (!%p11005_p12)
}
  0x45   :  { %s11009_s9 = scalar_lea.vmem %s11358_s20, 2560  ;;  %p11014_p0 = scmp.lt.s32.totalorder %s11358_s20, %s11358_s20 }
  0x46   :  { %p11010_p13 = scmp.ne.s32.totalorder %s11358_s20, %s11009_s9  ;;  %p11015_p1 = scmp.lt.s32.totalorder %s11009_s9, %s11009_s9 }
  0x48   :  { %p11016_p2 = por %p11015_p1, %p11014_p0 }
  0x4a   :  { %p11017_p3 = pnand %p11016_p2, %p11010_p13 }
  0x4c   :  { %11020 = shalt.err (!%p11017_p3)
}
  0x4d   :  { %140 = dma.hbm_to_vmem [thread:$0]  %s15288_s14, 2560, %s11358_s20, [#allocation15], %s11191_s27, %s11191_s27, %s11192_s28  }
  0x4e   :  { %s11197_s21 = smov [#allocation2]   ;;  %s11198_s0 = smov [#allocation7]  }
  0x4f   :  { %s36_s26 = sshll.u32 %s11197_s21, 4  ;;  %s70_s1 = sshll.u32 %s11198_s0, 4  ;;  %s37_s26 = int_to_ptr.vmem [resolvable:$true] %s36_s26  ;;  %s11395_s1 = int_to_ptr.vmem [resolvable:$true] %s70_s1 }
  0x50   :  { %s15619_s23 = sld [smem:[#allocation137_spill]] }
  0x56   :  { %s11021_s24 = scalar_lea.hbm %s15619_s23, 256 }
  0x57   :  { %p11022_p4 = scmp.ne.s32.totalorder %s15619_s23, %s11021_s24  ;;  %p11025_p5 = scmp.lt.u32.totalorder %s11021_s24, %s15619_s23 }
  0x59   :  { %p11027_p6 = pnand %p11025_p5, %p11022_p4 }
  0x5b   :  { %11030 = shalt.err (!%p11027_p6)
}
  0x5c   :  { %s11031_s14 = scalar_lea.vmem %s37_s26, 256  ;;  %p11036_p8 = scmp.lt.s32.totalorder %s37_s26, %s37_s26 }
  0x5d   :  { %p11032_p7 = scmp.ne.s32.totalorder %s37_s26, %s11031_s14  ;;  %p11037_p9 = scmp.lt.s32.totalorder %s11031_s14, %s11031_s14 }
  0x5f   :  { %p11038_p10 = por %p11037_p9, %p11036_p8 }
  0x61   :  { %p11039_p11 = pnand %p11038_p10, %p11032_p7 }
  0x63   :  { %11042 = shalt.err (!%p11039_p11)
}
  0x64   :  { %42 = dma.hbm_to_vmem [thread:$0]  %s15619_s23, 256, %s37_s26, [#allocation3], %s11191_s27, %s11191_s27, %s11192_s28  }
  0x65   :  { %s11043_s5 = scalar_lea.hbm %s15281_s7, 80 }
  0x66   :  { %p11044_p12 = scmp.ne.s32.totalorder %s15281_s7, %s11043_s5  ;;  %p11047_p13 = scmp.lt.u32.totalorder %s11043_s5, %s15281_s7 }
  0x68   :  { %p11049_p0 = pnand %p11047_p13, %p11044_p12 }
  0x6a   :  { %11052 = shalt.err (!%p11049_p0)
}
  0x6b   :  { %s11053_s25 = scalar_lea.vmem %s11395_s1, 80  ;;  %s11057_s26 = scalar_lea.vmem %s11395_s1, 96 }
  0x6c   :  { %p11054_p1 = scmp.ne.s32.totalorder %s11395_s1, %s11053_s25  ;;  %p11058_p2 = scmp.lt.s32.totalorder %s11395_s1, %s11395_s1 }
  0x6d   :  { %p11059_p3 = scmp.lt.s32.totalorder %s11057_s26, %s11053_s25 }
  0x6f   :  { %p11060_p4 = por %p11059_p3, %p11058_p2 }
  0x71   :  { %p11061_p5 = pnand %p11060_p4, %p11054_p1 }
  0x73   :  { %11064 = shalt.err (!%p11061_p5)
}
  0x74   :  { %s15620_s23 = smov 16   ;;  %s11199_s14 = smov [#allocation10]  }
  0x75   :  { %76 = dma.hbm_to_vmem [thread:$0]  %s15281_s7, 80, %s11395_s1, [#allocation6], %s15620_s23, %s15620_s23, %s11196_s30  }
  0x76   :  { %s96_s20 = sshll.u32 %s11199_s14, 4  ;;  %s11200_s11 = smov [#allocation13]   ;;  %s97_s20 = int_to_ptr.vmem [resolvable:$true] %s96_s20 }
  0x77   :  { %s122_s29 = sshll.u32 %s11200_s11, 4  ;;  %s11065_s0 = scalar_lea.hbm %s15284_s10, 640  ;;  %s11433_s29 = int_to_ptr.vmem [resolvable:$true] %s122_s29 }
  0x78   :  { %p11066_p6 = scmp.ne.s32.totalorder %s15284_s10, %s11065_s0  ;;  %p11069_p7 = scmp.lt.u32.totalorder %s11065_s0, %s15284_s10 }
  0x7a   :  { %p11071_p8 = pnand %p11069_p7, %p11066_p6 }
  0x7c   :  { %11074 = shalt.err (!%p11071_p8)
}
  0x7d   :  { %s11075_s7 = scalar_lea.vmem %s97_s20, 640  ;;  %p11080_p10 = scmp.lt.s32.totalorder %s97_s20, %s97_s20 }
  0x7e   :  { %p11076_p9 = scmp.ne.s32.totalorder %s97_s20, %s11075_s7  ;;  %p11081_p11 = scmp.lt.s32.totalorder %s11075_s7, %s11075_s7 }
  0x80   :  { %p11082_p12 = por %p11081_p11, %p11080_p10 }
  0x82   :  { %p11083_p13 = pnand %p11082_p12, %p11076_p9 }
  0x84   :  { %11086 = shalt.err (!%p11083_p13)
}
  0x85   :  { %102 = dma.hbm_to_vmem [thread:$0]  %s15284_s10, 640, %s97_s20, [#allocation9], %s11191_s27, %s11191_s27, %s11192_s28  }
  0x86   :  { %s11087_s3 = scalar_lea.hbm %s15287_s13, 2560 }
  0x87   :  { %p11088_p0 = scmp.ne.s32.totalorder %s15287_s13, %s11087_s3  ;;  %p11091_p1 = scmp.lt.u32.totalorder %s11087_s3, %s15287_s13 }
  0x89   :  { %p11093_p2 = pnand %p11091_p1, %p11088_p0 }
  0x8b   :  { %11096 = shalt.err (!%p11093_p2)
}
  0x8c   :  { %s11097_s5 = scalar_lea.vmem %s11433_s29, 2560  ;;  %p11102_p4 = scmp.lt.s32.totalorder %s11433_s29, %s11433_s29 }
  0x8d   :  { %p11098_p3 = scmp.ne.s32.totalorder %s11433_s29, %s11097_s5  ;;  %p11103_p5 = scmp.lt.s32.totalorder %s11097_s5, %s11097_s5 }
  0x8f   :  { %p11104_p6 = por %p11103_p5, %p11102_p4 }
  0x91   :  { %p11105_p7 = pnand %p11104_p6, %p11098_p3 }
  0x93   :  { %11108 = shalt.err (!%p11105_p7)
}
  0x94   :  { %128 = dma.hbm_to_vmem [thread:$0]  %s15287_s13, 2560, %s11433_s29, [#allocation12], %s11191_s27, %s11191_s27, %s11192_s28  }
  0x95   :  { %s11201_s0 = smov [#allocation16]   ;;  %s11202_s2 = smov [#allocation17]  }
  0x96   :  { %s146_s22 = sshll.u32 %s11201_s0, 4  ;;  %s160_s24 = sshll.u32 %s11202_s2, 4  ;;  %s147_s22 = int_to_ptr.vmem [resolvable:$true] %s146_s22  ;;  %s11470_s24 = int_to_ptr.vmem [resolvable:$true] %s160_s24 }
  0x97   :  { %s11109_s30 = scalar_lea.hbm %s15289_s15, 2560 }
  0x98   :  { %p11110_p8 = scmp.ne.s32.totalorder %s15289_s15, %s11109_s30  ;;  %p11113_p9 = scmp.lt.u32.totalorder %s11109_s30, %s15289_s15 }
  0x9a   :  { %p11115_p10 = pnand %p11113_p9, %p11110_p8 }
  0x9c   :  { %11118 = shalt.err (!%p11115_p10)
}
  0x9d   :  { %s11119_s13 = scalar_lea.vmem %s147_s22, 2560  ;;  %p11124_p12 = scmp.lt.s32.totalorder %s147_s22, %s147_s22 }
  0x9e   :  { %p11120_p11 = scmp.ne.s32.totalorder %s147_s22, %s11119_s13  ;;  %p11125_p13 = scmp.lt.s32.totalorder %s11119_s13, %s11119_s13 }
  0xa0   :  { %p11126_p0 = por %p11125_p13, %p11124_p12 }
  0xa2   :  { %p11127_p1 = pnand %p11126_p0, %p11120_p11 }
  0xa4   :  { %11130 = shalt.err (!%p11127_p1)
}
  0xa5   :  { %152 = dma.hbm_to_vmem [thread:$0]  %s15289_s15, 2560, %s147_s22, [#allocation15], %s11191_s27, %s11191_s27, %s11192_s28  }
  0xa6   :  { %s11131_s21 = scalar_lea.hbm %s15291_s17, 2560 }
  0xa7   :  { %p11132_p2 = scmp.ne.s32.totalorder %s15291_s17, %s11131_s21  ;;  %p11135_p3 = scmp.lt.u32.totalorder %s11131_s21, %s15291_s17 }
  0xa9   :  { %p11137_p4 = pnand %p11135_p3, %p11132_p2 }
  0xab   :  { %11140 = shalt.err (!%p11137_p4)
}
  0xac   :  { %s11141_s2 = scalar_lea.vmem %s11470_s24, 2560  ;;  %p11146_p6 = scmp.lt.s32.totalorder %s11470_s24, %s11470_s24 }
  0xad   :  { %p11142_p5 = scmp.ne.s32.totalorder %s11470_s24, %s11141_s2  ;;  %p11147_p7 = scmp.lt.s32.totalorder %s11141_s2, %s11141_s2 }
  0xaf   :  { %p11148_p8 = por %p11147_p7, %p11146_p6 }
  0xb1   :  { %p11149_p9 = pnand %p11148_p8, %p11142_p5 }
  0xb3   :  { %11152 = shalt.err (!%p11149_p9)
}
  0xb4   :  { %166 = dma.hbm_to_vmem [thread:$0]  %s15291_s17, 2560, %s11470_s24, [#allocation18], %s11191_s27, %s11191_s27, %s11192_s28  }
  0xb5   :  { %11175 = dma.done.wait [#allocation3], 256  }
  0xb6   :  { %11176 = vsyncadd [#allocation3], 4294967040 }
  0xb7   :  { %11177 = dma.done.wait [#allocation6], 1360  }
  0xb8   :  { %11178 = vsyncadd [#allocation6], 4294965936 }
  0xb9   :  { %11179 = dma.done.wait [#allocation9], 3200  }
  0xba   :  { %11180 = vsyncadd [#allocation9], 4294964096 }
  0xbb   :  { %11181 = dma.done.wait [#allocation12], 2640  }
  0xbc   :  { %11182 = vsyncadd [#allocation12], 4294964656 }
  0xbd   :  { %11183 = dma.done.wait [#allocation15], 5120  }
  0xbe   :  { %11184 = vsyncadd [#allocation15], 4294962176 }
  0xbf   :  { %11185 = dma.done.wait [#allocation18], 2560  }
  0xc0   :  { %11186 = vsyncadd [#allocation18], 4294964736  ;;  %v11203_v0 = vmov 0   ;;  %s15621_s17 = sld [smem:[#allocation139_spill]]  ;;  %vm15351_vm0 = vcmask 130048   ;;  %v322_v5 = vld [vmem:[%s15280_s6] sm:$0xff]  ;;  %v220_v25 = vlaneseq }
  0xc1   :  { %10852 = vset.pattern.permute.xlu1 %v11203_v0  ;;  %10851 = vset.pattern.permute.xlu0 %v11203_v0  ;;  %v323_v6 = vld [vmem:[%s15280_s6 + $0x8] sm:$0xff]  ;;  %s15622_s20 = sld [smem:[#allocation138_spill]]  ;;  %v199_v11 = vld [vmem:[#allocation2] sm:$0xff]  ;;  %s15623_s30 = sld [smem:[#allocation140_spill]]  ;;  %v11204_v29 = vmov 0.0   ;;  %vm15350_vm2 = vcmask 392192  }
  0xc2   :  { %v10311_v8 = vpack.c.bf16 %v323_v6, %v322_v5  ;;  %v200_v12 = vld [vmem:[#allocation2 + $0x8] sm:$0xff]  ;;  %v295_v26 = vshrl.u32 %v220_v25, 7  ;;  %v8769_v27 = vld [vmem:[%s15278_s4] ss:$0 sm:$0xff]  ;;  %v221_v34 = vand.u32 127, %v220_v25  ;;  %v11205_v63 = vmov 1  }
  0xc3   :  { %v10315_v13 = vpack.c.bf16 %v200_v12, %v199_v11  ;;  %v11208_v5 = vmov 9   ;;  %v11209_v6 = vmov 3   ;;  %v11210_v12 = vmov 10  }
  0xc4   :  { %10312 = vmatprep.subr.bf16.mxu0 %v10311_v8  ;;  %10727 = vmatprep.subr.bf16.mxu1 %v10311_v8  ;;  %vm301_vm1 = vcmp.eq.s32.totalorder %v295_v26, %v8769_v27  ;;  %v296_v28 = vadd.s32 8, %v295_v26  ;;  %v11214_v25 = vmov 5   ;;  %v11215_v26 = vmov 12  }
  0xc5   :  { %10314 = vmatpush3.bf16.msra.mxu0 %v10311_v8  ;;  %10728 = vmatpush3.bf16.msra.mxu1 %v10311_v8  ;;  %v11578_v30 = vsel %vm301_vm1, 1.0, %v11204_v29  ;;  %v676_v8 = vld [vmem:[#allocation8 + $0x8] sm:$0xff] }
  0xc6   :  { %v209_v1 = vld [vmem:[%s15621_s17 + $0x10] sm:$0xff]  ;;  %v207_v2 = vld [vmem:[%s15621_s17] sm:$0xff]  ;;  %v210_v3 = vld [vmem:[%s15621_s17 + $0x18] sm:$0xff]  ;;  %10320 = vmatprep.subr.bf16.mxu0 %v10315_v13  ;;  %10316 = vmatprep.subr.bf16.mxu1 %v10315_v13  ;;  %15624 = vst [vmem:[#allocation27_spill] sm:$0xff] %v11578_v30  ;;  %vm302_vm3 = vcmp.eq.s32.totalorder %v296_v28, %v8769_v27  ;;  %v308_v31 = vsel %vm15350_vm2, %v11578_v30, 0.0  ;;  %v11216_v27 = vmov 14  }
  0xc7   :  { %265 = vperm.xlu1 %10852, %v209_v1   ;;  %259 = vperm.xlu0 %10851, %v207_v2   ;;  %v208_v4 = vld [vmem:[%s15621_s17 + $0x8] sm:$0xff]  ;;  %v201_v9 = vld [vmem:[%s15622_s20] sm:$0xff]  ;;  %v203_v15 = vld [vmem:[%s15622_s20 + $0x10] sm:$0xff]  ;;  %v11582_v32 = vsel %vm302_vm3, 1.0, %v11204_v29  ;;  %v11206_v1 = vmov 2   ;;  %v11207_v2 = vmov 8  }
  0xc8   :  { %v212_v7 = vld [vmem:[%s15621_s17 + $0x28] sm:$0xff]  ;;  %v211_v10 = vld [vmem:[%s15621_s17 + $0x20] sm:$0xff]  ;;  %9545 = vmatprep.mubr.msk.f32.mxu0 %vm15351_vm0, %v201_v9  ;;  %v204_v20 = vld [vmem:[%s15622_s20 + $0x18] sm:$0xff]  ;;  %15625 = vst [vmem:[#allocation28_spill] sm:$0xff] %v11582_v32  ;;  %v311_v33 = vsel %vm15350_vm2, %v11582_v32, 0.0  ;;  %v11217_v28 = vmov 6  }
  0xc9   :  { %v202_v14 = vld [vmem:[%s15622_s20 + $0x8] sm:$0xff]  ;;  %v213_v17 = vld [vmem:[%s15623_s30] sm:$0xff]  ;;  %v216_v21 = vld [vmem:[%s15623_s30 + $0x18] sm:$0xff] }
  0xca   :  { %v214_v16 = vld [vmem:[%s15623_s30 + $0x8] sm:$0xff]  ;;  %v205_v18 = vld [vmem:[%s15622_s20 + $0x20] sm:$0xff]  ;;  %9546 = vmatmul.mubr.msk.f32.vlgmr.msra.gmra.mrb[0].mxu0 %vm15351_vm0, %v202_v14  ;;  %v215_v22 = vld [vmem:[%s15623_s30 + $0x10] sm:$0xff] }
  0xcb   :  { %268 = vperm.xlu1 %10852, %v210_v3   ;;  %262 = vperm.xlu0 %10851, %v208_v4   ;;  %v206_v19 = vld [vmem:[%s15622_s20 + $0x28] sm:$0xff]  ;;  %v217_v24 = vld [vmem:[%s15623_s30 + $0x20] sm:$0xff] }
  0xcc   :  { %9551 = vmatprep.mubr.msk.f32.mxu1 %vm15351_vm0, %v205_v18  ;;  %9548 = vmatprep.mubr.msk.f32.mxu0 %vm15351_vm0, %v203_v15  ;;  %v218_v23 = vld [vmem:[%s15623_s30 + $0x28] sm:$0xff]  ;;  %v671_v14 = vld [vmem:[%s15282_s8] sm:$0xff] }
  0xcd   :  { %10322 = vmatpush3.bf16.msra.mxu0 %v10315_v13  ;;  %9552 = vmatmul.mubr.msk.f32.vlgmr.msra.gmra.mrb[0].mxu1 %vm15351_vm0, %v206_v19  ;;  %v672_v15 = vld [vmem:[%s15282_s8 + $0x8] sm:$0xff] }
  0xce   :  { %9549 = vmatmul.mubr.msk.f32.gmra.mrb[2].mxu0 %vm15351_vm0, %v204_v20  ;;  %10318 = vmatpush3.bf16.msra.mxu1 %v10315_v13 }
  0xcf   :  { %274 = vperm.xlu1 %10852, %v212_v7   ;;  %271 = vperm.xlu0 %10851, %v211_v10   ;;  %v675_v7 = vld [vmem:[#allocation8] sm:$0xff]  ;;  %v678_v10 = vld [vmem:[#allocation8 + $0x18] sm:$0xff] }
  0xd0   :  { %v10323_v9 = vpack.c.bf16 %v676_v8, %v675_v7  ;;  %v8772_v8 = vld [vmem:[#allocation7] ss:$0 sm:$0xff] }
  0xd2   :  { %10324 = vmatprep.subr.bf16.mxu1 %v10323_v9 }
  0xd3   :  { %226 = vperm.xlu1 %10852, %v214_v16   ;;  %223 = vperm.xlu0 %10851, %v213_v17   ;;  %v11717_v17 = vpack.c.bf16 %v672_v15, %v671_v14 }
  0xd7   :  { %232 = vperm.xlu1 %10852, %v216_v21   ;;  %229 = vperm.xlu0 %10851, %v215_v22   ;;  %v11211_v21 = vmov 4  }
  0xdb   :  { %238 = vperm.xlu1 %10852, %v218_v23   ;;  %235 = vperm.xlu0 %10851, %v217_v24   ;;  %v11212_v23 = vmov 11   ;;  %v11213_v24 = vmov 13  }
  0xfa   :  { %309 = vadd.xlane.f32.xlu0 %v308_v31  ;;  %v11219_v31 = vmov 15  }
  0xff   :  { %312 = vadd.xlane.f32.xlu1 %v311_v33  ;;  %v673_v33 = vld [vmem:[%s15282_s8 + $0x10] sm:$0xff] }
 0x146   :  { %v266_v35 = vpop.permute.xlu1 %265  ;;  %v260_v36 = vpop.permute.xlu0 %259 }
 0x147   :  { %vm276_vm4 = vcmp.eq.s32.totalorder %v221_v34, %v260_v36  ;;  %vm278_vm5 = vcmp.eq.s32.totalorder %v221_v34, %v266_v35 }
 0x148   :  { %v11586_v37 = vsel %vm276_vm4, 1.0, %v11204_v29  ;;  %v11590_v40 = vsel %vm278_vm5, 1.0, %v11204_v29 }
 0x149   :  { %15626 = vst [vmem:[#allocation29_spill] sm:$0xff] %v11586_v37  ;;  %9571 = vmatprep.mubr.msk.f32.mxu0 %vm15351_vm0, %v11586_v37  ;;  %15627 = vst [vmem:[#allocation30_spill] sm:$0xff] %v11590_v40 }
 0x14a   :  { %v269_v38 = vpop.permute.xlu1 %268  ;;  %v263_v39 = vpop.permute.xlu0 %262 }
 0x14b   :  { %vm277_vm6 = vcmp.eq.s32.totalorder %v221_v34, %v263_v39  ;;  %vm279_vm7 = vcmp.eq.s32.totalorder %v221_v34, %v269_v38 }
 0x14c   :  { %v11592_v41 = vsel %vm277_vm6, 1.0, %v11204_v29  ;;  %v11598_v44 = vsel %vm279_vm7, 1.0, %v11204_v29 }
 0x14d   :  { %15628 = vst [vmem:[#allocation31_spill] sm:$0xff] %v11592_v41  ;;  %9572 = vmatmul.mubr.msk.f32.vlgmr.msra.gmra.mrb[4].mxu0 %vm15351_vm0, %v11592_v41  ;;  %15629 = vst [vmem:[#allocation32_spill] sm:$0xff] %v11598_v44 }
 0x14e   :  { %v275_v42 = vpop.permute.xlu1 %274  ;;  %v272_v43 = vpop.permute.xlu0 %271  ;;  %9574 = vmatprep.mubr.msk.f32.mxu0 %vm15351_vm0, %v11590_v40 }
 0x14f   :  { %vm280_vm8 = vcmp.eq.s32.totalorder %v221_v34, %v272_v43  ;;  %vm281_vm9 = vcmp.eq.s32.totalorder %v221_v34, %v275_v42 }
 0x150   :  { %v11600_v45 = vsel %vm280_vm8, 1.0, %v11204_v29  ;;  %v11606_v48 = vsel %vm281_vm9, 1.0, %v11204_v29  ;;  %vm679_vm8 = vcmask 261120   ;;  %vm15349_vm9 = vcmask 64512  }
 0x151   :  { %15630 = vst [vmem:[#allocation33_spill] sm:$0xff] %v11600_v45  ;;  %9575 = vmatmul.mubr.msk.f32.gmra.mrb[6].mxu0 %vm15351_vm0, %v11598_v44  ;;  %15631 = vst [vmem:[#allocation34_spill] sm:$0xff] %v11606_v48 }
 0x152   :  { %v227_v46 = vpop.permute.xlu1 %226  ;;  %v224_v47 = vpop.permute.xlu0 %223  ;;  %9577 = vmatprep.mubr.msk.f32.mxu0 %vm15351_vm0, %v11600_v45 }
 0x153   :  { %vm241_vm10 = vcmp.eq.s32.totalorder %v221_v34, %v227_v46  ;;  %vm240_vm11 = vcmp.eq.s32.totalorder %v221_v34, %v224_v47  ;;  %v906_v46 = vld [vmem:[#allocation10] sm:$0xff] }
 0x154   :  { %v11608_v49 = vsel %vm241_vm10, 1.0, %v11204_v29  ;;  %v11610_v50 = vsel %vm240_vm11, 1.0, %v11204_v29 }
 0x155   :  { %15632 = vst [vmem:[#allocation35_spill] sm:$0xff] %v11608_v49  ;;  %15633 = vst [vmem:[#allocation36_spill] sm:$0xff] %v11610_v50  ;;  %vm1124_vm12 = vcmp.gt.f32.partialorder %v11608_v49, 0.0  ;;  %vm1123_vm13 = vcmp.gt.f32.partialorder %v11610_v50, 0.0  ;;  %9558 = vmatprep.mubr.msk.f32.mxu1 %vm15351_vm0, %v11610_v50  ;;  %9578 = vmatmul.mubr.msk.f32.gmra.mrb[8].mxu0 %vm15351_vm0, %v11606_v48 }
 0x156   :  { %v11619_v51 = vsel %vm1124_vm12, 1, %v11203_v0  ;;  %v11622_v52 = vsel %vm1123_vm13, 1, %v11203_v0  ;;  %v233_v53 = vpop.permute.xlu1 %232  ;;  %v230_v54 = vpop.permute.xlu0 %229  ;;  %9559 = vmatmul.mubr.msk.f32.vlgmr.msra.gmra.mrb[2].mxu1 %vm15351_vm0, %v11608_v49  ;;  %9637 = vmatprep.mubr.msk.f32.mxu0 %vm15350_vm2, %v11578_v30 }
 0x157   :  { %vm243_vm14 = vcmp.eq.s32.totalorder %v221_v34, %v233_v53  ;;  %vm242_vm15 = vcmp.eq.s32.totalorder %v221_v34, %v230_v54  ;;  %1139 = vperm.xlu1 %10852, %v11619_v51   ;;  %1136 = vperm.xlu0 %10851, %v11622_v52  }
 0x158   :  { %v11630_v55 = vsel %vm243_vm14, 1.0, %v11204_v29  ;;  %v11632_v56 = vsel %vm242_vm15, 1.0, %v11204_v29  ;;  %10326 = vmatpush3.bf16.msra.mxu1 %v10323_v9 }
 0x159   :  { %15634 = vst [vmem:[#allocation37_spill] sm:$0xff] %v11630_v55  ;;  %15635 = vst [vmem:[#allocation38_spill] sm:$0xff] %v11632_v56  ;;  %9561 = vmatprep.mubr.msk.f32.mxu1 %vm15351_vm0, %v11632_v56  ;;  %vm1125_vm6 = vcmp.gt.f32.partialorder %v11632_v56, 0.0  ;;  %vm1126_vm7 = vcmp.gt.f32.partialorder %v11630_v55, 0.0 }
 0x15a   :  { %v239_v57 = vpop.permute.xlu1 %238  ;;  %v236_v58 = vpop.permute.xlu0 %235  ;;  %9562 = vmatmul.mubr.msk.f32.gmra.mrb[4].mxu1 %vm15351_vm0, %v11630_v55  ;;  %v11672_v3 = vsel %vm1125_vm6, 1, %v11203_v0  ;;  %v11680_v4 = vsel %vm1126_vm7, 1, %v11203_v0 }
 0x15b   :  { %vm245_vm1 = vcmp.eq.s32.totalorder %v221_v34, %v239_v57  ;;  %vm244_vm3 = vcmp.eq.s32.totalorder %v221_v34, %v236_v58  ;;  %v674_v34 = vld [vmem:[%s15282_s8 + $0x18] sm:$0xff] }
 0x15c   :  { %v11638_v59 = vsel %vm245_vm1, 1.0, %v11204_v29  ;;  %v11640_v60 = vsel %vm244_vm3, 1.0, %v11204_v29  ;;  %v11218_v29 = vmov 7   ;;  %v10335_v38 = vpack.c.bf16 %v674_v34, %v673_v33 }
 0x15d   :  { %15636 = vst [vmem:[#allocation39_spill] sm:$0xff] %v11638_v59  ;;  %15637 = vst [vmem:[#allocation40_spill] sm:$0xff] %v11640_v60  ;;  %vm1128_vm4 = vcmp.gt.f32.partialorder %v11638_v59, 0.0  ;;  %vm1127_vm5 = vcmp.gt.f32.partialorder %v11640_v60, 0.0  ;;  %9564 = vmatprep.mubr.msk.f32.mxu1 %vm15351_vm0, %v11640_v60 }
 0x15e   :  { %v11647_v61 = vsel %vm1128_vm4, 1, %v11203_v0  ;;  %v11650_v62 = vsel %vm1127_vm5, 1, %v11203_v0  ;;  %9565 = vmatmul.mubr.msk.f32.gmra.mrb[6].mxu1 %vm15351_vm0, %v11638_v59 }
 0x15f   :  { %1151 = vperm.xlu1 %10852, %v11647_v61   ;;  %1148 = vperm.xlu0 %10851, %v11650_v62  }
 0x163   :  { %10854 = vset.pattern.permute.xlu1 %v11205_v63  ;;  %10853 = vset.pattern.permute.xlu0 %v11205_v63 }
 0x164   :  { %1186 = vperm.xlu1 %10854, %v11619_v51   ;;  %1183 = vperm.xlu0 %10853, %v11622_v52  }
 0x168   :  { %1195 = vperm.xlu1 %10854, %v11650_v62   ;;  %1198 = vperm.xlu0 %10853, %v11647_v61  }
 0x16c   :  { %10855 = vset.pattern.permute.xlu1 %v11206_v1  ;;  %10856 = vset.pattern.permute.xlu0 %v11206_v1 }
 0x16d   :  { %1230 = vperm.xlu1 %10855, %v11622_v52   ;;  %1233 = vperm.xlu0 %10856, %v11619_v51  }
 0x171   :  { %1242 = vperm.xlu1 %10855, %v11650_v62   ;;  %10857 = vset.pattern.permute.xlu0 %v11207_v2 }
 0x172   :  { %1512 = vperm.xlu0 %10857, %v11622_v52  }
 0x175   :  { %1245 = vperm.xlu1 %10855, %v11647_v61  }
 0x176   :  { %1527 = vperm.xlu0 %10857, %v11647_v61  }
 0x179   :  { %10858 = vset.pattern.permute.xlu1 %v11207_v2 }
 0x17a   :  { %1515 = vperm.xlu1 %10858, %v11619_v51   ;;  %10860 = vset.pattern.permute.xlu0 %v11203_v0 }
 0x17b   :  { %1142 = vperm.xlu0 %10860, %v11672_v3  }
 0x17e   :  { %1524 = vperm.xlu1 %10858, %v11650_v62  }
 0x17f   :  { %10863 = vset.pattern.permute.xlu0 %v11205_v63 }
 0x180   :  { %1192 = vperm.xlu0 %10863, %v11680_v4  }
 0x182   :  { %10859 = vset.pattern.permute.xlu1 %v11208_v5 }
 0x183   :  { %1559 = vperm.xlu1 %10859, %v11622_v52  }
 0x184   :  { %10866 = vset.pattern.permute.xlu0 %v11206_v1 }
 0x185   :  { %1236 = vperm.xlu0 %10866, %v11672_v3  }
 0x187   :  { %1571 = vperm.xlu1 %10859, %v11650_v62  }
 0x189   :  { %10869 = vset.pattern.permute.xlu0 %v11207_v2 }
 0x18a   :  { %1518 = vperm.xlu0 %10869, %v11672_v3  }
 0x18b   :  { %1574 = vperm.xlu1 %10859, %v11647_v61  }
 0x18c   :  { %v11799_v39 = vpop.xlane.xlu1 %312 }
 0x18d   :  { %15638 = vst [vmem:[#allocation41_spill] sm:$0xff] %v11799_v39 }
 0x18e   :  { %10870 = vset.pattern.permute.xlu0 %v11208_v5 }
 0x18f   :  { %10861 = vset.pattern.permute.xlu1 %v11203_v0  ;;  %1562 = vperm.xlu0 %10870, %v11619_v51   ;;  %v677_v0 = vld [vmem:[#allocation8 + $0x10] sm:$0xff] }
 0x190   :  { %1145 = vperm.xlu1 %10861, %v11680_v4   ;;  %v10327_v11 = vpack.c.bf16 %v678_v10, %v677_v0 }
 0x192   :  { %10328 = vmatprep.subr.bf16.mxu1 %v10327_v11 }
 0x193   :  { %1568 = vperm.xlu0 %10870, %v11680_v4   ;;  %10330 = vmatpush3.bf16.msra.mxu1 %v10327_v11 }
 0x194   :  { %10862 = vset.pattern.permute.xlu1 %v11205_v63  ;;  %10332 = vmatprep.subr.bf16.mxu1 %v11717_v17 }
 0x195   :  { %1189 = vperm.xlu1 %10862, %v11672_v3  }
 0x197   :  { %10873 = vset.pattern.permute.xlu0 %v11209_v6 }
 0x198   :  { %1289 = vperm.xlu0 %10873, %v11650_v62  }
 0x199   :  { %10864 = vset.pattern.permute.xlu1 %v11209_v6 }
 0x19a   :  { %1277 = vperm.xlu1 %10864, %v11622_v52  }
 0x19c   :  { %1286 = vperm.xlu0 %10873, %v11680_v4  }
 0x19d   :  { %v11706_v13 = vpop.f32.mrb[0].mxu0 }
 0x19e   :  { %1280 = vperm.xlu1 %10864, %v11619_v51   ;;  %v11715_v16 = vpop.f32.mrb[1].mxu0  ;;  %v422_v10 = vadd.f32 %v11706_v13, %v8772_v8 }
 0x19f   :  { %v417_v9 = vadd.f32 %v8772_v8, %v11715_v16 }
 0x1a0   :  { %10876 = vset.pattern.permute.xlu0 %v11210_v12  ;;  %v11721_v18 = vpop.f32.mrb[0].mxu1 }
 0x1a1   :  { %1609 = vperm.xlu0 %10876, %v11619_v51   ;;  %v11724_v19 = vpop.f32.mrb[2].mxu0  ;;  %v11726_v20 = vpop.f32.mrb[1].mxu1  ;;  %v442_v13 = vadd.f32 %v11721_v18, %v8772_v8 }
 0x1a2   :  { %1292 = vperm.xlu1 %10864, %v11647_v61   ;;  %v11729_v22 = vpop.f32.mrb[3].mxu0  ;;  %v432_v14 = vadd.f32 %v11724_v19, %v8772_v8  ;;  %v437_v15 = vadd.f32 %v8772_v8, %v11726_v20 }
 0x1a3   :  { %v427_v11 = vadd.f32 %v8772_v8, %v11729_v22 }
 0x1a5   :  { %1615 = vperm.xlu0 %10876, %v11680_v4  }
 0x1a6   :  { %10865 = vset.pattern.permute.xlu1 %v11210_v12 }
 0x1a7   :  { %1606 = vperm.xlu1 %10865, %v11622_v52  }
 0x1a9   :  { %10879 = vset.pattern.permute.xlu0 %v11211_v21 }
 0x1aa   :  { %1327 = vperm.xlu0 %10879, %v11619_v51  }
 0x1ab   :  { %1618 = vperm.xlu1 %10865, %v11650_v62  }
 0x1ae   :  { %1333 = vperm.xlu0 %10879, %v11680_v4  }
 0x1af   :  { %1621 = vperm.xlu1 %10865, %v11647_v61  }
 0x1b2   :  { %10882 = vset.pattern.permute.xlu0 %v11212_v23 }
 0x1b3   :  { %10867 = vset.pattern.permute.xlu1 %v11206_v1  ;;  %1665 = vperm.xlu0 %10882, %v11650_v62  }
 0x1b4   :  { %1239 = vperm.xlu1 %10867, %v11680_v4  }
 0x1b7   :  { %1662 = vperm.xlu0 %10882, %v11680_v4  }
 0x1b8   :  { %10868 = vset.pattern.permute.xlu1 %v11211_v21 }
 0x1b9   :  { %1324 = vperm.xlu1 %10868, %v11622_v52  }
 0x1bb   :  { %10886 = vset.pattern.permute.xlu0 %v11213_v24 }
 0x1bc   :  { %1759 = vperm.xlu0 %10886, %v11650_v62  }
 0x1bd   :  { %1336 = vperm.xlu1 %10868, %v11650_v62  }
 0x1c0   :  { %10887 = vset.pattern.permute.xlu0 %v11214_v25 }
 0x1c1   :  { %1339 = vperm.xlu1 %10868, %v11647_v61   ;;  %1383 = vperm.xlu0 %10887, %v11650_v62  }
 0x1c5   :  { %10871 = vset.pattern.permute.xlu1 %v11207_v2  ;;  %1380 = vperm.xlu0 %10887, %v11680_v4  }
 0x1c6   :  { %1521 = vperm.xlu1 %10871, %v11680_v4  }
 0x1c9   :  { %10889 = vset.pattern.permute.xlu0 %v11215_v26 }
 0x1ca   :  { %10872 = vset.pattern.permute.xlu1 %v11208_v5  ;;  %1712 = vperm.xlu0 %10889, %v11650_v62  }
 0x1cb   :  { %1565 = vperm.xlu1 %10872, %v11672_v3  }
 0x1ce   :  { %1709 = vperm.xlu0 %10889, %v11680_v4  }
 0x1cf   :  { %10874 = vset.pattern.permute.xlu1 %v11212_v23 }
 0x1d0   :  { %1653 = vperm.xlu1 %10874, %v11622_v52  }
 0x1d2   :  { %10893 = vset.pattern.permute.xlu0 %v11216_v27 }
 0x1d3   :  { %1806 = vperm.xlu0 %10893, %v11650_v62  }
 0x1d4   :  { %1656 = vperm.xlu1 %10874, %v11619_v51  }
 0x1d6   :  { %v11808_v47 = vpop.permute.xlu1 %1139 }
 0x1d7   :  { %10894 = vset.pattern.permute.xlu0 %v11217_v28  ;;  %15639 = vst [vmem:[#allocation42_spill] sm:$0xff] %v11808_v47  ;;  %vm15436_vm10 = vcmp.eq.s32.totalorder %v11808_v47, 1 }
 0x1d8   :  { %1668 = vperm.xlu1 %10874, %v11647_v61   ;;  %1430 = vperm.xlu0 %10894, %v11650_v62  }
 0x1dc   :  { %10875 = vset.pattern.permute.xlu1 %v11209_v6  ;;  %1427 = vperm.xlu0 %10894, %v11680_v4  }
 0x1dd   :  { %1283 = vperm.xlu1 %10875, %v11672_v3  }
 0x1de   :  { %v11813_v63 = vpop.permute.xlu1 %1151 }
 0x1df   :  { %15640 = vst [vmem:[#allocation43_spill] sm:$0xff] %v11813_v63  ;;  %vm15439_vm12 = vcmp.eq.s32.totalorder %v11813_v63, 1 }
 0x1e0   :  { %10896 = vset.pattern.permute.xlu0 %v11218_v29 }
 0x1e1   :  { %10877 = vset.pattern.permute.xlu1 %v11214_v25  ;;  %1477 = vperm.xlu0 %10896, %v11650_v62  }
 0x1e2   :  { %1371 = vperm.xlu1 %10877, %v11622_v52  }
 0x1e3   :  { %v11820_v6 = vpop.permute.xlu1 %1186 }
 0x1e4   :  { %15641 = vst [vmem:[#allocation44_spill] sm:$0xff] %v11820_v6  ;;  %vm15379_vm14 = vcmp.eq.s32.totalorder %v11820_v6, 1 }
 0x1e5   :  { %1474 = vperm.xlu0 %10896, %v11680_v4  }
 0x1e6   :  { %1374 = vperm.xlu1 %10877, %v11619_v51  }
 0x1e7   :  { %v11828_v0 = vpop.permute.xlu1 %1195 }
 0x1e8   :  { %15642 = vst [vmem:[#allocation45_spill] sm:$0xff] %v11828_v0  ;;  %vm15402_vm1 = vcmp.eq.s32.totalorder %v11828_v0, 1 }
 0x1e9   :  { %10900 = vset.pattern.permute.xlu0 %v11219_v31 }
 0x1ea   :  { %1386 = vperm.xlu1 %10877, %v11647_v61   ;;  %1841 = vperm.xlu0 %10900, %v11622_v52  }
 0x1ee   :  { %10878 = vset.pattern.permute.xlu1 %v11210_v12  ;;  %1856 = vperm.xlu0 %10900, %v11647_v61   ;;  %v11838_v12 = vpop.permute.xlu1 %1230 }
 0x1ef   :  { %1612 = vperm.xlu1 %10878, %v11672_v3   ;;  %15643 = vst [vmem:[#allocation46_spill] sm:$0xff] %v11838_v12 }
 0x1f2   :  { %1847 = vperm.xlu0 %10900, %v11672_v3   ;;  %v11846_v16 = vpop.permute.xlu1 %1242 }
 0x1f3   :  { %10880 = vset.pattern.permute.xlu1 %v11215_v26  ;;  %15644 = vst [vmem:[#allocation47_spill] sm:$0xff] %v11846_v16  ;;  %vm15401_vm6 = vcmp.eq.s32.totalorder %v11846_v16, 1 }
 0x1f4   :  { %1700 = vperm.xlu1 %10880, %v11622_v52  }
 0x1f8   :  { %1703 = vperm.xlu1 %10880, %v11619_v51  }
 0x1fc   :  { %1715 = vperm.xlu1 %10880, %v11647_v61  }
 0x200   :  { %10881 = vset.pattern.permute.xlu1 %v11211_v21 }
 0x201   :  { %1330 = vperm.xlu1 %10881, %v11672_v3  }
 0x205   :  { %10883 = vset.pattern.permute.xlu1 %v11217_v28 }
 0x206   :  { %1418 = vperm.xlu1 %10883, %v11622_v52  }
 0x20a   :  { %1421 = vperm.xlu1 %10883, %v11619_v51  }
 0x20e   :  { %1433 = vperm.xlu1 %10883, %v11647_v61  }
 0x212   :  { %10884 = vset.pattern.permute.xlu1 %v11212_v23 }
 0x213   :  { %1659 = vperm.xlu1 %10884, %v11672_v3  }
 0x217   :  { %10885 = vset.pattern.permute.xlu1 %v11213_v24 }
 0x218   :  { %1747 = vperm.xlu1 %10885, %v11622_v52  }
 0x21c   :  { %1750 = vperm.xlu1 %10885, %v11619_v51  }
 0x220   :  { %1762 = vperm.xlu1 %10885, %v11647_v61   ;;  %v9573_v35 = vpop.f32.mrb[4].mxu0 }
 0x221   :  { %v642_v36 = vpop.f32.mrb[5].mxu0 }
 0x222   :  { %9588 = vmatprep.mubr.msk.f32.mxu1 %vm679_vm8, %v642_v36  ;;  %v8809_v36 = vld [vmem:[#allocation11] ss:$0 sm:$0xff] }
 0x223   :  { %9589 = vmatmul.mubr.msk.f32.vlgmr.msra.gmra.mrb[8].mxu1 %vm679_vm8, %v9573_v35  ;;  %v11909_v35 = vpop.xlane.xlu0 %309 }
 0x224   :  { %10888 = vset.pattern.permute.xlu1 %v11214_v25  ;;  %v9576_v42 = vpop.f32.mrb[6].mxu0  ;;  %10334 = vmatpush3.bf16.msra.mxu1 %v11717_v17 }
 0x225   :  { %1377 = vperm.xlu1 %10888, %v11672_v3   ;;  %v652_v43 = vpop.f32.mrb[7].mxu0  ;;  %10336 = vmatprep.subr.bf16.mxu1 %v10335_v38 }
 0x226   :  { %9591 = vmatprep.mubr.msk.f32.mxu1 %vm679_vm8, %v652_v43 }
 0x227   :  { %9592 = vmatmul.mubr.msk.f32.gmra.mrb[10].mxu1 %vm679_vm8, %v9576_v42  ;;  %v11913_v42 = vpop.permute.xlu0 %1136 }
 0x228   :  { %v9579_v53 = vpop.f32.mrb[8].mxu0  ;;  %10338 = vmatpush3.bf16.msra.mxu1 %v10335_v38  ;;  %15668 = vst [vmem:[#allocation71_spill] sm:$0xff] %v11913_v42  ;;  %vm15438_vm11 = vcmp.eq.s32.totalorder %v11913_v42, 1 }
 0x229   :  { %10890 = vset.pattern.permute.xlu1 %v11218_v29  ;;  %v9560_v54 = vpop.f32.mrb[2].mxu1  ;;  %9614 = vmatprep.subr.mxu1 %v906_v46  ;;  %v662_v57 = vpop.f32.mrb[9].mxu0 }
 0x22a   :  { %1465 = vperm.xlu1 %10890, %v11622_v52   ;;  %v529_v58 = vpop.f32.mrb[3].mxu1  ;;  %9594 = vmatprep.mubr.msk.f32.mxu1 %vm679_vm8, %v662_v57 }
 0x22b   :  { %9595 = vmatmul.mubr.msk.f32.gmra.mrb[12].mxu1 %vm679_vm8, %v9579_v53  ;;  %v11919_v57 = vpop.permute.xlu0 %1148 }
 0x22c   :  { %9605 = vmatprep.mubr.msk.f32.mxu1 %vm679_vm8, %v529_v58  ;;  %15669 = vst [vmem:[#allocation72_spill] sm:$0xff] %v11919_v57  ;;  %vm15440_vm13 = vcmp.eq.s32.totalorder %v11919_v57, 1 }
 0x22d   :  { %v9563_v1 = vpop.f32.mrb[4].mxu1 }
 0x22e   :  { %1468 = vperm.xlu1 %10890, %v11619_v51   ;;  %v539_v2 = vpop.f32.mrb[5].mxu1 }
 0x22f   :  { %9606 = vmatmul.mubr.msk.f32.vlgmr.msra.gmra.mrb[8].mxu1 %vm679_vm8, %v9560_v54 }
 0x230   :  { %9608 = vmatprep.mubr.msk.f32.mxu1 %vm679_vm8, %v539_v2  ;;  %9615 = vmatpush3.msra.mxu1 %v906_v46 }
 0x231   :  { %v9566_v5 = vpop.f32.mrb[6].mxu1 }
 0x232   :  { %1480 = vperm.xlu1 %10890, %v11647_v61   ;;  %v549_v7 = vpop.f32.mrb[7].mxu1 }
 0x233   :  { %9609 = vmatmul.mubr.msk.f32.gmra.mrb[10].mxu1 %vm679_vm8, %v9563_v1 }
 0x234   :  { %9611 = vmatprep.mubr.msk.f32.mxu1 %vm679_vm8, %v549_v7 }
 0x236   :  { %10891 = vset.pattern.permute.xlu1 %v11215_v26 }
 0x237   :  { %1706 = vperm.xlu1 %10891, %v11672_v3   ;;  %9612 = vmatmul.mubr.msk.f32.gmra.mrb[12].mxu1 %vm679_vm8, %v9566_v5 }
 0x238   :  { %9616 = vmatprep.mubr.msk.f32.mxu1 %vm15349_vm9, %v417_v9 }
 0x23b   :  { %10892 = vset.pattern.permute.xlu1 %v11216_v27  ;;  %9617 = vmatmul.mubr.msk.f32.vlgmr.msra.gmra.mrb[8].mxu1 %vm15349_vm9, %v422_v10 }
 0x23c   :  { %1794 = vperm.xlu1 %10892, %v11622_v52   ;;  %9619 = vmatprep.mubr.msk.f32.mxu1 %vm15349_vm9, %v427_v11  ;;  %v11852_v52 = vpop.permute.xlu1 %1245 }
 0x23d   :  { %15645 = vst [vmem:[#allocation48_spill] sm:$0xff] %v11852_v52 }
 0x23f   :  { %9620 = vmatmul.mubr.msk.f32.gmra.mrb[10].mxu1 %vm15349_vm9, %v432_v14 }
 0x240   :  { %1797 = vperm.xlu1 %10892, %v11619_v51   ;;  %9622 = vmatprep.mubr.msk.f32.mxu1 %vm15349_vm9, %v437_v15  ;;  %v11856_v17 = vpop.permute.xlu1 %1515  ;;  %v1918_v15 = vld [vmem:[#allocation13] sm:$0xff] }
 0x241   :  { %15646 = vst [vmem:[#allocation49_spill] sm:$0xff] %v11856_v17 }
 0x243   :  { %9623 = vmatmul.mubr.msk.f32.gmra.mrb[12].mxu1 %vm15349_vm9, %v442_v13  ;;  %v1919_v13 = vld [vmem:[#allocation13 + $0x8] sm:$0xff] }
 0x244   :  { %1809 = vperm.xlu1 %10892, %v11647_v61   ;;  %v11859_v18 = vpop.permute.xlu1 %1524 }
 0x245   :  { %15647 = vst [vmem:[#allocation50_spill] sm:$0xff] %v11859_v18 }
 0x248   :  { %10895 = vset.pattern.permute.xlu1 %v11217_v28  ;;  %v11864_v61 = vpop.permute.xlu1 %1559 }
 0x249   :  { %1424 = vperm.xlu1 %10895, %v11672_v3   ;;  %15648 = vst [vmem:[#allocation51_spill] sm:$0xff] %v11864_v61 }
 0x24c   :  { %v11868_v19 = vpop.permute.xlu1 %1571 }
 0x24d   :  { %10897 = vset.pattern.permute.xlu1 %v11213_v24  ;;  %15649 = vst [vmem:[#allocation52_spill] sm:$0xff] %v11868_v19 }
 0x24e   :  { %1753 = vperm.xlu1 %10897, %v11672_v3  }
 0x250   :  { %v11872_v20 = vpop.permute.xlu1 %1574 }
 0x251   :  { %15650 = vst [vmem:[#allocation53_spill] sm:$0xff] %v11872_v20 }
 0x252   :  { %1756 = vperm.xlu1 %10897, %v11680_v4  }
 0x256   :  { %10898 = vset.pattern.permute.xlu1 %v11219_v31 }
 0x257   :  { %1844 = vperm.xlu1 %10898, %v11619_v51   ;;  %v11876_v51 = vpop.permute.xlu1 %1145 }
 0x258   :  { %15651 = vst [vmem:[#allocation54_spill] sm:$0xff] %v11876_v51  ;;  %vm15400_vm0 = vcmp.eq.s32.totalorder %v11876_v51, 1 }
 0x25b   :  { %1853 = vperm.xlu1 %10898, %v11650_v62   ;;  %v11879_v62 = vpop.permute.xlu1 %1189 }
 0x25c   :  { %15652 = vst [vmem:[#allocation55_spill] sm:$0xff] %v11879_v62  ;;  %vm15399_vm7 = vcmp.eq.s32.totalorder %v11879_v62, 1 }
 0x25f   :  { %10899 = vset.pattern.permute.xlu1 %v11218_v29  ;;  %v11881_v21 = vpop.permute.xlu1 %1277 }
 0x260   :  { %1471 = vperm.xlu1 %10899, %v11672_v3   ;;  %15653 = vst [vmem:[#allocation56_spill] sm:$0xff] %v11881_v21 }
 0x263   :  { %v11883_v22 = vpop.permute.xlu1 %1280 }
 0x264   :  { %10901 = vset.pattern.permute.xlu1 %v11216_v27  ;;  %15654 = vst [vmem:[#allocation57_spill] sm:$0xff] %v11883_v22 }
 0x265   :  { %1800 = vperm.xlu1 %10901, %v11672_v3  }
 0x267   :  { %v11885_v23 = vpop.permute.xlu1 %1292 }
 0x268   :  { %15655 = vst [vmem:[#allocation58_spill] sm:$0xff] %v11885_v23 }
 0x269   :  { %1803 = vperm.xlu1 %10901, %v11680_v4  }
 0x26b   :  { %v11887_v24 = vpop.permute.xlu1 %1606 }
 0x26c   :  { %15656 = vst [vmem:[#allocation59_spill] sm:$0xff] %v11887_v24  ;;  %v1921_v24 = vld [vmem:[#allocation13 + $0x18] sm:$0xff] }
 0x26d   :  { %10902 = vset.pattern.permute.xlu1 %v11219_v31 }
 0x26e   :  { %1850 = vperm.xlu1 %10902, %v11680_v4  }
 0x26f   :  { %v11889_v3 = vpop.permute.xlu1 %1618 }
 0x270   :  { %15657 = vst [vmem:[#allocation60_spill] sm:$0xff] %v11889_v3 }
 0x273   :  { %v11891_v25 = vpop.permute.xlu1 %1621 }
 0x274   :  { %15658 = vst [vmem:[#allocation61_spill] sm:$0xff] %v11891_v25 }
 0x277   :  { %v11893_v26 = vpop.permute.xlu1 %1239 }
 0x278   :  { %15659 = vst [vmem:[#allocation62_spill] sm:$0xff] %v11893_v26  ;;  %vm15397_vm9 = vcmp.eq.s32.totalorder %v11893_v26, 1 }
 0x27b   :  { %v11895_v27 = vpop.permute.xlu1 %1324 }
 0x27c   :  { %15660 = vst [vmem:[#allocation63_spill] sm:$0xff] %v11895_v27 }
 0x27f   :  { %v11897_v28 = vpop.permute.xlu1 %1336 }
 0x280   :  { %15661 = vst [vmem:[#allocation64_spill] sm:$0xff] %v11897_v28 }
 0x283   :  { %v11899_v4 = vpop.permute.xlu1 %1339 }
 0x284   :  { %15662 = vst [vmem:[#allocation65_spill] sm:$0xff] %v11899_v4 }
 0x287   :  { %v11901_v29 = vpop.permute.xlu1 %1521 }
 0x288   :  { %15663 = vst [vmem:[#allocation66_spill] sm:$0xff] %v11901_v29 }
 0x28b   :  { %v11903_v31 = vpop.permute.xlu1 %1565 }
 0x28c   :  { %15664 = vst [vmem:[#allocation67_spill] sm:$0xff] %v11903_v31 }
 0x28f   :  { %v11905_v33 = vpop.permute.xlu1 %1653 }
 0x290   :  { %15665 = vst [vmem:[#allocation68_spill] sm:$0xff] %v11905_v33 }
 0x293   :  { %v11907_v34 = vpop.permute.xlu1 %1656 }
 0x294   :  { %15666 = vst [vmem:[#allocation69_spill] sm:$0xff] %v11907_v34 }
 0x297   :  { %v11911_v38 = vpop.permute.xlu1 %1668 }
 0x298   :  { %15667 = vst [vmem:[#allocation70_spill] sm:$0xff] %v11911_v38 }
 0x29b   :  { %v11923_v2 = vpop.permute.xlu1 %1283 }
 0x29c   :  { %15670 = vst [vmem:[#allocation73_spill] sm:$0xff] %v11923_v2 }
 0x30e   :  { %v9618_v43 = vpop.f32.mrb[8].mxu1 }
 0x30f   :  { %v11915_v46 = vadd.f32 %v9618_v43, %v8809_v36  ;;  %v992_v53 = vpop.f32.mrb[9].mxu1  ;;  %v11933_v43 = vpop.permute.xlu0 %1183 }
 0x310   :  { %v11917_v54 = vadd.f32 %v8809_v36, %v992_v53  ;;  %15671 = vst [vmem:[#allocation74_spill] sm:$0xff] %v11933_v43  ;;  %vm15435_vm15 = vcmp.eq.s32.totalorder %v11933_v43, 1 }
 0x311   :  { %v1160_v57 = vsel %vm15436_vm10, %v11915_v46, -1e+30  ;;  %v1207_v47 = vsel %vm15379_vm14, %v11915_v46, -1e+30  ;;  %vm15482_vm10 = vcmp.eq.s32.totalorder %v11872_v20, 1 }
 0x312   :  { %v9621_v58 = vpop.f32.mrb[10].mxu1  ;;  %v10339_v1 = vpack.c.bf16 %v11915_v46, %v11917_v54  ;;  %v1206_v63 = vsel %vm15435_vm15, %v11917_v54, -1e+30  ;;  %v1166_v0 = vsel %vm679_vm8, %v1160_v57, -inf  ;;  %vm15485_vm15 = vcmp.eq.s32.totalorder %v11868_v19, 1 }
 0x313   :  { %v11925_v5 = vadd.f32 %v9621_v58, %v8809_v36  ;;  %v1002_v7 = vpop.f32.mrb[11].mxu1  ;;  %v11937_v58 = vpop.permute.xlu1 %1371 }
 0x314   :  { %v11927_v8 = vadd.f32 %v8809_v36, %v1002_v7  ;;  %10340 = vmatprep.subr.bf16.mxu0 %v10339_v1  ;;  %15672 = vst [vmem:[#allocation75_spill] sm:$0xff] %v11937_v58  ;;  %v10351_v7 = vpack.c.bf16 %v1919_v13, %v1918_v15  ;;  %v11941_v30 = vpop.permute.xlu0 %1198 }
 0x315   :  { %10342 = vmatpush3.bf16.msra.mxu0 %v10339_v1  ;;  %15673 = vst [vmem:[#allocation76_spill] sm:$0xff] %v11941_v30  ;;  %vm15372_vm3 = vcmp.eq.s32.totalorder %v11941_v30, 1 }
 0x316   :  { %v9624_v9 = vpop.f32.mrb[12].mxu1  ;;  %v10343_v10 = vpack.c.bf16 %v11925_v5, %v11927_v8 }
 0x317   :  { %v11931_v11 = vadd.f32 %v9624_v9, %v8809_v36  ;;  %v1012_v14 = vpop.f32.mrb[13].mxu1  ;;  %v11943_v9 = vpop.permute.xlu1 %1374 }
 0x318   :  { %v11935_v53 = vadd.f32 %v8809_v36, %v1012_v14  ;;  %10344 = vmatprep.subr.bf16.mxu0 %v10343_v10  ;;  %15674 = vst [vmem:[#allocation77_spill] sm:$0xff] %v11943_v9  ;;  %v11947_v36 = vpop.permute.xlu0 %1233 }
 0x319   :  { %10346 = vmatpush3.bf16.msra.mxu0 %v10343_v10  ;;  %15675 = vst [vmem:[#allocation78_spill] sm:$0xff] %v11947_v36  ;;  %vm15376_vm5 = vcmp.eq.s32.totalorder %v11947_v36, 1 }
 0x31a   :  { %v10347_v1 = vpack.c.bf16 %v11931_v11, %v11935_v53  ;;  %v1254_v43 = vsel %vm15376_vm5, %v11915_v46, -1e+30  ;;  %v1257_v30 = vsel %vm15401_vm6, %v11935_v53, -1e+30  ;;  %vm15717_vm5 = vcmp.eq.s32.totalorder %v11838_v12, 1 }
 0x31b   :  { %v11949_v14 = vpop.permute.xlu1 %1386  ;;  %v1263_v12 = vsel %vm679_vm8, %v1257_v30, -inf  ;;  %v1256_v30 = vsel %vm15397_vm9, %v11925_v5, -1e+30  ;;  %vm15431_vm9 = vcmp.eq.s32.totalorder %v11885_v23, 1  ;;  %vm15426_vm6 = vcmp.eq.s32.totalorder %v11899_v4, 1 }
 0x31c   :  { %10348 = vmatprep.subr.bf16.mxu0 %v10347_v1  ;;  %15676 = vst [vmem:[#allocation79_spill] sm:$0xff] %v11949_v14  ;;  %v11951_v10 = vpop.permute.xlu0 %1512 }
 0x31d   :  { %10350 = vmatpush3.bf16.msra.mxu0 %v10347_v1  ;;  %15677 = vst [vmem:[#allocation80_spill] sm:$0xff] %v11951_v10 }
 0x31e   :  { %10352 = vmatprep.subr.bf16.mxu0 %v10351_v7 }
 0x31f   :  { %v11953_v48 = vpop.permute.xlu1 %1612 }
 0x320   :  { %9638 = vmatmul.mubr.msk.f32.vlgmr.msra.gmra.mrb[10].mxu0 %vm15350_vm2, %v11582_v32  ;;  %15678 = vst [vmem:[#allocation81_spill] sm:$0xff] %v11953_v48  ;;  %v11955_v15 = vpop.permute.xlu0 %1527  ;;  %v1920_v48 = vld [vmem:[#allocation13 + $0x10] sm:$0xff] }
 0x321   :  { %10354 = vmatpush3.bf16.msra.mxu0 %v10351_v7  ;;  %15679 = vst [vmem:[#allocation82_spill] sm:$0xff] %v11955_v15  ;;  %v10355_v3 = vpack.c.bf16 %v1921_v24, %v1920_v48 }
 0x323   :  { %v11957_v13 = vpop.permute.xlu1 %1700  ;;  %10356 = vmatprep.subr.bf16.mxu0 %v10355_v3 }
 0x324   :  { %15680 = vst [vmem:[#allocation83_spill] sm:$0xff] %v11957_v13  ;;  %v11959_v1 = vpop.permute.xlu0 %1142 }
 0x325   :  { %15681 = vst [vmem:[#allocation84_spill] sm:$0xff] %v11959_v1  ;;  %10358 = vmatpush3.bf16.msra.mxu0 %v10355_v3  ;;  %vm15719_vm14 = vcmp.eq.s32.totalorder %v11959_v1, 1  ;;  %v1208_v1 = vsel %vm15399_vm7, %v11927_v8, -1e+30 }
 0x326   :  { %v1161_v57 = vsel %vm15719_vm14, %v11927_v8, -1e+30 }
 0x327   :  { %v11961_v59 = vpop.permute.xlu1 %1703 }
 0x328   :  { %15682 = vst [vmem:[#allocation85_spill] sm:$0xff] %v11961_v59  ;;  %v11963_v45 = vpop.permute.xlu0 %1192 }
 0x329   :  { %15683 = vst [vmem:[#allocation86_spill] sm:$0xff] %v11963_v45  ;;  %vm15398_vm2 = vcmp.eq.s32.totalorder %v11963_v45, 1 }
 0x32a   :  { %v1209_v51 = vsel %vm15398_vm2, %v11925_v5, -1e+30 }
 0x32b   :  { %v11965_v32 = vpop.permute.xlu1 %1715 }
 0x32c   :  { %15684 = vst [vmem:[#allocation87_spill] sm:$0xff] %v11965_v32  ;;  %v11967_v7 = vpop.permute.xlu0 %1236 }
 0x32d   :  { %15685 = vst [vmem:[#allocation88_spill] sm:$0xff] %v11967_v7  ;;  %vm15396_vm4 = vcmp.eq.s32.totalorder %v11967_v7, 1 }
 0x32f   :  { %v11969_v60 = vpop.permute.xlu1 %1330 }
 0x330   :  { %15686 = vst [vmem:[#allocation89_spill] sm:$0xff] %v11969_v60  ;;  %v11971_v44 = vpop.permute.xlu0 %1518 }
 0x331   :  { %15687 = vst [vmem:[#allocation90_spill] sm:$0xff] %v11971_v44  ;;  %v2267_v44 = vld [vmem:[#allocation17] sm:$0xff] }
 0x333   :  { %v11973_v55 = vpop.permute.xlu1 %1418 }
 0x334   :  { %15688 = vst [vmem:[#allocation91_spill] sm:$0xff] %v11973_v55  ;;  %v11975_v40 = vpop.permute.xlu0 %1562 }
 0x335   :  { %15689 = vst [vmem:[#allocation92_spill] sm:$0xff] %v11975_v40 }
 0x337   :  { %v11977_v56 = vpop.permute.xlu1 %1421 }
 0x338   :  { %15690 = vst [vmem:[#allocation93_spill] sm:$0xff] %v11977_v56  ;;  %v11979_v41 = vpop.permute.xlu0 %1568 }
 0x339   :  { %15691 = vst [vmem:[#allocation94_spill] sm:$0xff] %v11979_v41 }
 0x33b   :  { %v11981_v49 = vpop.permute.xlu1 %1433 }
 0x33c   :  { %15692 = vst [vmem:[#allocation95_spill] sm:$0xff] %v11981_v49  ;;  %v11983_v37 = vpop.permute.xlu0 %1289 }
 0x33d   :  { %15693 = vst [vmem:[#allocation96_spill] sm:$0xff] %v11983_v37  ;;  %vm15432_vm14 = vcmp.eq.s32.totalorder %v11983_v37, 1 }
 0x33f   :  { %v11985_v50 = vpop.permute.xlu1 %1659 }
 0x340   :  { %15694 = vst [vmem:[#allocation97_spill] sm:$0xff] %v11985_v50  ;;  %v11987_v59 = vpop.permute.xlu0 %1286 }
 0x341   :  { %15695 = vst [vmem:[#allocation98_spill] sm:$0xff] %v11987_v59 }
 0x343   :  { %v11989_v13 = vpop.permute.xlu1 %1747 }
 0x344   :  { %15696 = vst [vmem:[#allocation99_spill] sm:$0xff] %v11989_v13  ;;  %v11991_v32 = vpop.permute.xlu0 %1609  ;;  %v1914_v13 = vld [vmem:[%s15286_s12] sm:$0xff] }
 0x345   :  { %15697 = vst [vmem:[#allocation100_spill] sm:$0xff] %v11991_v32 }
 0x347   :  { %v11993_v34 = vpop.permute.xlu1 %1750 }
 0x348   :  { %15698 = vst [vmem:[#allocation101_spill] sm:$0xff] %v11993_v34  ;;  %v11995_v33 = vpop.permute.xlu0 %1615  ;;  %v1915_v34 = vld [vmem:[%s15286_s12 + $0x8] sm:$0xff] }
 0x349   :  { %15699 = vst [vmem:[#allocation102_spill] sm:$0xff] %v11995_v33  ;;  %v12009_v50 = vpack.c.bf16 %v1915_v34, %v1914_v13 }
 0x34b   :  { %v11997_v38 = vpop.permute.xlu1 %1762  ;;  %15703 = vst [vmem:[#allocation106_spill] sm:$0xff] %v12009_v50  ;;  %10360 = vmatprep.subr.bf16.mxu0 %v12009_v50  ;;  %v2268_v50 = vld [vmem:[#allocation17 + $0x8] sm:$0xff] }
 0x34c   :  { %15700 = vst [vmem:[#allocation103_spill] sm:$0xff] %v11997_v38  ;;  %v11999_v25 = vpop.permute.xlu0 %1327 }
 0x34d   :  { %15701 = vst [vmem:[#allocation104_spill] sm:$0xff] %v11999_v25  ;;  %vm15423_vm2 = vcmp.eq.s32.totalorder %v11999_v25, 1 }
 0x34f   :  { %v12001_v31 = vpop.permute.xlu1 %1377 }
 0x350   :  { %15702 = vst [vmem:[#allocation105_spill] sm:$0xff] %v12001_v31  ;;  %v12011_v38 = vpop.permute.xlu0 %1333 }
 0x351   :  { %15704 = vst [vmem:[#allocation107_spill] sm:$0xff] %v12011_v38  ;;  %vm15421_vm7 = vcmp.eq.s32.totalorder %v12011_v38, 1 }
 0x353   :  { %v12014_v33 = vpop.permute.xlu1 %1465 }
 0x354   :  { %15705 = vst [vmem:[#allocation108_spill] sm:$0xff] %v12014_v33  ;;  %v12016_v48 = vpop.permute.xlu0 %1665  ;;  %v10383_v33 = vpack.c.bf16 %v2268_v50, %v2267_v44  ;;  %v1163_v50 = vsel %vm15440_vm13, %v11935_v53, -1e+30 }
 0x355   :  { %15706 = vst [vmem:[#allocation109_spill] sm:$0xff] %v12016_v48 }
 0x356   :  { %10384 = vmatprep.subr.bf16.mxu1 %v10383_v33 }
 0x357   :  { %v12018_v24 = vpop.permute.xlu1 %1468  ;;  %10386 = vmatpush3.bf16.msra.mxu1 %v10383_v33 }
 0x358   :  { %15707 = vst [vmem:[#allocation110_spill] sm:$0xff] %v12018_v24  ;;  %v12020_v3 = vpop.permute.xlu0 %1662 }
 0x359   :  { %15708 = vst [vmem:[#allocation111_spill] sm:$0xff] %v12020_v3  ;;  %v1169_v3 = vsel %vm679_vm8, %v1163_v50, -inf  ;;  %v1212_v50 = vsel %vm679_vm8, %v1206_v63, -inf }
 0x35b   :  { %v12022_v32 = vpop.permute.xlu1 %1480 }
 0x35c   :  { %15709 = vst [vmem:[#allocation112_spill] sm:$0xff] %v12022_v32  ;;  %v12024_v41 = vpop.permute.xlu0 %1759 }
 0x35d   :  { %15710 = vst [vmem:[#allocation113_spill] sm:$0xff] %v12024_v41  ;;  %v1159_v41 = vsel %vm15438_vm11, %v11917_v54, -1e+30 }
 0x35e   :  { %v1165_v48 = vsel %vm679_vm8, %v1159_v41, -inf  ;;  %v1253_v41 = vsel %vm15717_vm5, %v11917_v54, -1e+30  ;;  %vm15406_vm5 = vcmp.eq.s32.totalorder %v11987_v59, 1 }
 0x35f   :  { %v12026_v29 = vpop.permute.xlu1 %1706  ;;  %v1170_v16 = vmax.f32 %v1165_v48, %v1169_v3 }
 0x360   :  { %15711 = vst [vmem:[#allocation114_spill] sm:$0xff] %v12026_v29  ;;  %v12028_v34 = vpop.permute.xlu0 %1383  ;;  %v1210_v29 = vsel %vm15402_vm1, %v11935_v53, -1e+30  ;;  %vm15425_vm1 = vcmp.eq.s32.totalorder %v11923_v2, 1  ;;  %v15758_v37 = vld [vmem:[#allocation111_spill] sm:$0xff] }
 0x361   :  { %15712 = vst [vmem:[#allocation115_spill] sm:$0xff] %v12028_v34  ;;  %v1216_v6 = vsel %vm679_vm8, %v1210_v29, -inf  ;;  %v1213_v29 = vsel %vm679_vm8, %v1207_v47, -inf }
 0x362   :  { %v1217_v48 = vmax.f32 %v1212_v50, %v1216_v6  ;;  %v1214_v6 = vsel %vm679_vm8, %v1208_v1, -inf }
 0x363   :  { %v12030_v13 = vpop.permute.xlu1 %1794 }
 0x364   :  { %15713 = vst [vmem:[#allocation116_spill] sm:$0xff] %v12030_v13  ;;  %v12047_v44 = vpop.permute.xlu0 %1380  ;;  %v1164_v13 = vsel %vm15439_vm12, %v11931_v11, -1e+30 }
 0x365   :  { %15714 = vst [vmem:[#allocation117_spill] sm:$0xff] %v12047_v44  ;;  %v1171_v42 = vsel %vm679_vm8, %v1164_v13, -inf }
 0x366   :  { %v1172_v63 = vmax.f32 %v1166_v0, %v1171_v42  ;;  %v1167_v42 = vsel %vm679_vm8, %v1161_v57, -inf }
 0x367   :  { %v12058_v33 = vpop.permute.xlu1 %1797 }
 0x368   :  { %15715 = vst [vmem:[#allocation118_spill] sm:$0xff] %v12058_v33  ;;  %v1211_v33 = vsel %vm15372_vm3, %v11931_v11, -1e+30  ;;  %vm15716_vm3 = vcmp.eq.s32.totalorder %v11852_v52, 1  ;;  %v12097_v36 = vpop.permute.xlu0 %1712  ;;  %v1162_v52 = vsel %vm15400_vm0, %v11925_v5, -1e+30  ;;  %v1173_v3 = vmax.f32 %v1170_v16, %v1172_v63 }
 0x369   :  { %v1258_v13 = vsel %vm15716_vm3, %v11931_v11, -1e+30  ;;  %v1218_v32 = vsel %vm679_vm8, %v1211_v33, -inf  ;;  %15718 = vst [vmem:[#allocation119_spill] sm:$0xff] %v12097_v36  ;;  %v1260_v33 = vsel %vm679_vm8, %v1254_v43, -inf  ;;  %v1168_v47 = vsel %vm679_vm8, %v1162_v52, -inf }
 0x36a   :  { %v1265_v36 = vsel %vm679_vm8, %v1258_v13, -inf  ;;  %v1219_v0 = vmax.f32 %v1213_v29, %v1218_v32  ;;  %v1259_v43 = vsel %vm679_vm8, %v1253_v41, -inf  ;;  %v1255_v13 = vsel %vm15396_vm4, %v11927_v8, -1e+30 }
 0x36b   :  { %v12105_v24 = vpop.permute.xlu1 %1809  ;;  %v1264_v62 = vmax.f32 %v1259_v43, %v1263_v12  ;;  %v1266_v45 = vmax.f32 %v1260_v33, %v1265_v36  ;;  %v1215_v32 = vsel %vm679_vm8, %v1209_v51, -inf  ;;  %v1174_v52 = vmax.f32 %v1167_v42, %v1168_v47 }
 0x36c   :  { %15720 = vst [vmem:[#allocation120_spill] sm:$0xff] %v12105_v24  ;;  %v12128_v50 = vpop.permute.xlu0 %1709  ;;  %v1220_v57 = vmax.f32 %v1217_v48, %v1219_v0  ;;  %v1261_v16 = vsel %vm679_vm8, %v1255_v13, -inf  ;;  %v1262_v63 = vsel %vm679_vm8, %v1256_v30, -inf  ;;  %vm15403_vm3 = vcmp.eq.s32.totalorder %v11881_v21, 1  ;;  %v15750_v21 = vld [vmem:[#allocation109_spill] sm:$0xff] }
 0x36d   :  { %15721 = vst [vmem:[#allocation121_spill] sm:$0xff] %v12128_v50  ;;  %v1175_v12 = vmax.f32 %v1173_v3, %v1174_v52  ;;  %v1221_v36 = vmax.f32 %v1214_v6, %v1215_v32  ;;  %v1267_v1 = vmax.f32 %v1264_v62, %v1266_v45  ;;  %vm15428_vm4 = vcmp.eq.s32.totalorder %v11883_v22, 1 }
 0x36e   :  { %v1268_v33 = vmax.f32 %v1261_v16, %v1262_v63  ;;  %v1304_v48 = vsel %vm15432_vm14, %v11935_v53, -1e+30  ;;  %v1305_v0 = vsel %vm15431_vm9, %v11931_v11, -1e+30  ;;  %vm15427_vm0 = vcmp.eq.s32.totalorder %v11897_v28, 1 }
 0x36f   :  { %v12132_v41 = vpop.permute.xlu1 %1424  ;;  %v1222_v51 = vmax.f32 %v1220_v57, %v1221_v36  ;;  %v1176_v62 = vrot.slane %v1175_v12, 4  ;;  %v1300_v47 = vsel %vm15403_vm3, %v11917_v54, -1e+30  ;;  %v1301_v30 = vsel %vm15428_vm4, %v11915_v46, -1e+30 }
 0x370   :  { %15722 = vst [vmem:[#allocation122_spill] sm:$0xff] %v12132_v41  ;;  %v12151_v45 = vpop.permute.xlu0 %1806  ;;  %v1269_v42 = vmax.f32 %v1267_v1, %v1268_v33  ;;  %v1310_v3 = vsel %vm679_vm8, %v1304_v48, -inf  ;;  %v1312_v13 = vsel %vm679_vm8, %v1305_v0, -inf  ;;  %v1351_v6 = vsel %vm15427_vm0, %v11935_v53, -1e+30 }
 0x371   :  { %15723 = vst [vmem:[#allocation123_spill] sm:$0xff] %v12151_v45  ;;  %v1352_v32 = vsel %vm15426_vm6, %v11931_v11, -1e+30  ;;  %vm15424_vm3 = vcmp.eq.s32.totalorder %v11895_v27, 1  ;;  %v1223_v52 = vrot.slane %v1222_v51, 4  ;;  %v1306_v63 = vsel %vm679_vm8, %v1300_v47, -inf }
 0x372   :  { %v1302_v57 = vsel %vm15425_vm1, %v11927_v8, -1e+30  ;;  %v1303_v16 = vsel %vm15406_vm5, %v11925_v5, -1e+30  ;;  %v1307_v36 = vsel %vm679_vm8, %v1301_v30, -inf  ;;  %v1311_v48 = vmax.f32 %v1306_v63, %v1310_v3 }
 0x373   :  { %v12159_v43 = vpop.permute.xlu1 %1753  ;;  %v1347_v1 = vsel %vm15424_vm3, %v11917_v54, -1e+30  ;;  %v1348_v33 = vsel %vm15423_vm2, %v11915_v46, -1e+30  ;;  %v1313_v0 = vmax.f32 %v1307_v36, %v1312_v13  ;;  %v1357_v29 = vsel %vm679_vm8, %v1351_v6, -inf }
 0x374   :  { %15724 = vst [vmem:[#allocation124_spill] sm:$0xff] %v12159_v43  ;;  %v1359_v2 = vsel %vm679_vm8, %v1352_v32, -inf  ;;  %vm15422_vm5 = vcmp.eq.s32.totalorder %v11969_v60, 1  ;;  %v1177_v59 = vmax.f32 %v1175_v12, %v1176_v62  ;;  %v1270_v47 = vrot.slane %v1269_v42, 4  ;;  %v12188_v4 = vpop.permute.xlu0 %1430 }
 0x375   :  { %v1308_v30 = vsel %vm679_vm8, %v1302_v57, -inf  ;;  %15725 = vst [vmem:[#allocation125_spill] sm:$0xff] %v12188_v4  ;;  %v1224_v27 = vmax.f32 %v1222_v51, %v1223_v52  ;;  %v1309_v28 = vsel %vm679_vm8, %v1303_v16, -inf  ;;  %v1353_v25 = vsel %vm679_vm8, %v1347_v1, -inf }
 0x376   :  { %v1354_v3 = vsel %vm679_vm8, %v1348_v33, -inf  ;;  %v1349_v6 = vsel %vm15422_vm5, %v11927_v8, -1e+30  ;;  %v1350_v12 = vsel %vm15421_vm7, %v11925_v5, -1e+30  ;;  %v1358_v62 = vmax.f32 %v1353_v25, %v1357_v29 }
 0x377   :  { %v12193_v13 = vpop.permute.xlu1 %1756  ;;  %v1360_v32 = vmax.f32 %v1354_v3, %v1359_v2  ;;  %v315_v51 = vmax.f32 %v11799_v39, 1.0  ;;  %v1314_v52 = vmax.f32 %v1311_v48, %v1313_v0  ;;  %v1178_v57 = vrot.slane %v1177_v59, 2  ;;  %v15760_v39 = vld [vmem:[#allocation85_spill] sm:$0xff] }
 0x378   :  { %15726 = vst [vmem:[#allocation126_spill] sm:$0xff] %v12193_v13  ;;  %v1271_v16 = vmax.f32 %v1269_v42, %v1270_v47  ;;  %v1225_v63 = vrot.slane %v1224_v27, 2  ;;  %v1315_v36 = vmax.f32 %v1308_v30, %v1309_v28  ;;  %v1355_v1 = vsel %vm679_vm8, %v1349_v6, -inf  ;;  %v12208_v25 = vpop.permute.xlu0 %1427 }
 0x379   :  { %v1356_v33 = vsel %vm679_vm8, %v1350_v12, -inf  ;;  %v15727_v60 = vmax.f32 %v11909_v35, 1.0  ;;  %v1361_v22 = vmax.f32 %v1358_v62, %v1360_v32  ;;  %vm15430_vm7 = vcmp.eq.s32.totalorder %v12028_v34, 1  ;;  %15728 = vst [vmem:[#allocation127_spill] sm:$0xff] %v12208_v25 }
 0x37a   :  { %vm15441_vm5 = vcmp.eq.s32.totalorder %v12047_v44, 1  ;;  %v1316_v2 = vmax.f32 %v1314_v52, %v1315_v36  ;;  %vm15429_vm2 = vcmp.eq.s32.totalorder %v11949_v14, 1  ;;  %v1179_v28 = vmax.f32 %v1177_v59, %v1178_v57 }
 0x37b   :  { %10903 = vrcp.f32 %v15727_v60  ;;  %v12211_v29 = vpop.permute.xlu1 %1844  ;;  %v1272_v42 = vrot.slane %v1271_v16, 2  ;;  %v1362_v48 = vmax.f32 %v1355_v1, %v1356_v33  ;;  %vm15469_vm3 = vcmp.eq.s32.totalorder %v12188_v4, 1 }
 0x37c   :  { %10905 = vrcp.f32 %v315_v51  ;;  %15729 = vst [vmem:[#allocation128_spill] sm:$0xff] %v12211_v29  ;;  %v1226_v0 = vmax.f32 %v1224_v27, %v1225_v63  ;;  %v1398_v60 = vsel %vm15430_vm7, %v11935_v53, -1e+30  ;;  %v1399_v47 = vsel %vm15429_vm2, %v11931_v11, -1e+30  ;;  %v12243_v52 = vpop.permute.xlu0 %1477 }
 0x37d   :  { %vm15454_vm1 = vcmp.eq.s32.totalorder %v12208_v25, 1  ;;  %vm15433_vm6 = vcmp.eq.s32.totalorder %v11937_v58, 1  ;;  %vm15434_vm0 = vcmp.eq.s32.totalorder %v11943_v9, 1  ;;  %v1363_v59 = vmax.f32 %v1361_v22, %v1362_v48  ;;  %15730 = vst [vmem:[#allocation129_spill] sm:$0xff] %v12243_v52 }
 0x37e   :  { %vm15437_vm4 = vcmp.eq.s32.totalorder %v12001_v31, 1  ;;  %v1317_v30 = vrot.slane %v1316_v2, 4  ;;  %v1394_v27 = vsel %vm15433_vm6, %v11917_v54, -1e+30  ;;  %v1395_v3 = vsel %vm15434_vm0, %v11915_v46, -1e+30 }
 0x37f   :  { %vm15487_vm2 = vcmp.eq.s32.totalorder %v11955_v15, 1  ;;  %vm15470_vm7 = vcmp.eq.s32.totalorder %v11859_v18, 1  ;;  %v1180_v6 = vrot.slane %v1179_v28, 1  ;;  %v1273_v12 = vmax.f32 %v1271_v16, %v1272_v42  ;;  %v12245_v57 = vpop.permute.xlu1 %1853 }
 0x380   :  { %v1404_v62 = vsel %vm679_vm8, %v1398_v60, -inf  ;;  %v1406_v22 = vsel %vm679_vm8, %v1399_v47, -inf  ;;  %vm15475_vm9 = vcmp.eq.s32.totalorder %v11951_v10, 1  ;;  %vm15446_vm14 = vcmp.eq.s32.totalorder %v11973_v55, 1  ;;  %15731 = vst [vmem:[#allocation130_spill] sm:$0xff] %v12245_v57  ;;  %v15732_v47 = vld [vmem:[#allocation108_spill] sm:$0xff]  ;;  %v12296_v4 = vpop.permute.xlu0 %1474 }
 0x381   :  { %vm15463_vm6 = vcmp.eq.s32.totalorder %v11977_v56, 1  ;;  %v1227_v32 = vrot.slane %v1226_v0, 1  ;;  %v1396_v51 = vsel %vm15437_vm4, %v11927_v8, -1e+30  ;;  %vm15486_vm0 = vcmp.eq.s32.totalorder %v11856_v17, 1  ;;  %v15735_v55 = vld [vmem:[#allocation94_spill] sm:$0xff] }
 0x382   :  { %v1364_v16 = vrot.slane %v1363_v59, 4  ;;  %v1397_v63 = vsel %vm15441_vm5, %v11925_v5, -1e+30  ;;  %v1400_v36 = vsel %vm679_vm8, %v1394_v27, -inf  ;;  %v1401_v1 = vsel %vm679_vm8, %v1395_v3, -inf  ;;  %15739 = vst [vmem:[#allocation131_spill] sm:$0xff] %v12296_v4 }
 0x383   :  { %vm15468_vm4 = vcmp.eq.s32.totalorder %v11981_v49, 1  ;;  %v12253_v33 = vmax.f32 %v1316_v2, %v1317_v30  ;;  %v1405_v42 = vmax.f32 %v1400_v36, %v1404_v62  ;;  %v1407_v48 = vmax.f32 %v1401_v1, %v1406_v22  ;;  %v15733_v36 = vld [vmem:[#allocation90_spill] sm:$0xff]  ;;  %v12298_v25 = vpop.permute.xlu1 %1471 }
 0x384   :  { %vm15489_vm13 = vcmp.eq.s32.totalorder %v15732_v47, 1  ;;  %vm15449_vm5 = vcmp.eq.s32.totalorder %v12132_v41, 1  ;;  %v12261_v44 = vmax.f32 %v1179_v28, %v1180_v6  ;;  %v1274_v27 = vrot.slane %v1273_v12, 1  ;;  %v15734_v1 = vld [vmem:[#allocation66_spill] sm:$0xff]  ;;  %v15736_v41 = vld [vmem:[#allocation67_spill] sm:$0xff]  ;;  %15740 = vst [vmem:[#allocation132_spill] sm:$0xff] %v12298_v25 }
 0x385   :  { %v12255_v60 = vpop.eup %10903  ;;  %v1402_v2 = vsel %vm679_vm8, %v1396_v51, -inf  ;;  %v1403_v30 = vsel %vm679_vm8, %v1397_v63, -inf  ;;  %v1441_v62 = vsel %vm15446_vm14, %v11917_v54, -1e+30  ;;  %v1443_v22 = vsel %vm15449_vm5, %v11927_v8, -1e+30 }
 0x386   :  { %v12263_v3 = vpop.eup %10905  ;;  %vm15549_vm12 = vcmp.eq.s32.totalorder %v15733_v36, 1  ;;  %v12275_v28 = vmax.f32 %v1226_v0, %v1227_v32  ;;  %v12277_v6 = vmax.f32 %v1363_v59, %v1364_v16  ;;  %v1444_v51 = vsel %vm15454_vm1, %v11925_v5, -1e+30  ;;  %v15737_v32 = vld [vmem:[#allocation60_spill] sm:$0xff]  ;;  %v15738_v16 = vld [vmem:[#allocation61_spill] sm:$0xff]  ;;  %v15741_v56 = vld [vmem:[#allocation110_spill] sm:$0xff] }
 0x387   :  { %v1445_v63 = vsel %vm15469_vm3, %v11935_v53, -1e+30  ;;  %vm15506_vm14 = vcmp.eq.s32.totalorder %v15735_v55, 1  ;;  %vm15504_vm5 = vcmp.eq.s32.totalorder %v15736_v41, 1  ;;  %v1408_v9 = vmax.f32 %v1405_v42, %v1407_v48  ;;  %v15748_v47 = vld [vmem:[#allocation112_spill] sm:$0xff] }
 0x388   :  { %v1442_v0 = vsel %vm15463_vm6, %v11915_v46, -1e+30  ;;  %v1446_v59 = vsel %vm15468_vm4, %v11931_v11, -1e+30  ;;  %vm15533_vm1 = vcmp.eq.s32.totalorder %v15737_v32, 1  ;;  %vm15508_vm11 = vcmp.eq.s32.totalorder %v15738_v16, 1 }
 0x389   :  { %v12300_v58 = vmax.f32 %v1273_v12, %v1274_v27  ;;  %v1409_v31 = vmax.f32 %v1402_v2, %v1403_v30  ;;  %v12303_v42 = vsel %vm679_vm8, %v1441_v62, -inf  ;;  %v12306_v48 = vsel %vm679_vm8, %v1443_v22, -inf  ;;  %v15742_v2 = vld [vmem:[#allocation100_spill] sm:$0xff]  ;;  %v15743_v30 = vld [vmem:[#allocation59_spill] sm:$0xff]  ;;  %v15755_v16 = vld [vmem:[#allocation97_spill] sm:$0xff] }
 0x38a   :  { %v12310_v49 = vsel %vm679_vm8, %v1444_v51, -inf  ;;  %v12313_v14 = vsel %vm679_vm8, %v1445_v63, -inf  ;;  %v1539_v12 = vsel %vm15470_vm7, %v11935_v53, -1e+30  ;;  %v1540_v27 = vsel %vm15487_vm2, %v11931_v11, -1e+30 }
 0x38b   :  { %vm15529_vm4 = vcmp.eq.s32.totalorder %v15742_v2, 1  ;;  %vm15511_vm3 = vcmp.eq.s32.totalorder %v15743_v30, 1  ;;  %v1448_v22 = vsel %vm679_vm8, %v1442_v0, -inf  ;;  %v1453_v51 = vsel %vm679_vm8, %v1446_v59, -inf  ;;  %v15756_v30 = vld [vmem:[#allocation119_spill] sm:$0xff] }
 0x38c   :  { %v1535_v63 = vsel %vm15475_vm9, %v11917_v54, -1e+30  ;;  %vm15526_vm7 = vcmp.eq.s32.totalorder %v12296_v4, 1  ;;  %vm15519_vm6 = vcmp.eq.s32.totalorder %v12298_v25, 1  ;;  %v12331_v15 = vmax.f32 %v1408_v9, %v1409_v31  ;;  %v15747_v31 = vld [vmem:[#allocation81_spill] sm:$0xff] }
 0x38d   :  { %v1536_v18 = vsel %vm15486_vm0, %v11915_v46, -1e+30  ;;  %v1586_v0 = vsel %vm15485_vm15, %v11935_v53, -1e+30  ;;  %v1587_v59 = vsel %vm15482_vm10, %v11931_v11, -1e+30  ;;  %v1452_v62 = vmax.f32 %v12303_v42, %v12313_v14 }
 0x38e   :  { %vm15530_vm9 = vcmp.eq.s32.totalorder %v12243_v52, 1  ;;  %v1545_v9 = vsel %vm679_vm8, %v1539_v12, -inf  ;;  %v1547_v17 = vsel %vm679_vm8, %v1540_v27, -inf  ;;  %v1454_v10 = vmax.f32 %v1448_v22, %v1453_v51  ;;  %v15746_v42 = vld [vmem:[#allocation102_spill] sm:$0xff] }
 0x38f   :  { %v1488_v19 = vsel %vm15489_vm13, %v11917_v54, -1e+30  ;;  %vm15744_vm10 = vcmp.eq.s32.totalorder %v11864_v61, 1  ;;  %vm15745_vm15 = vcmp.eq.s32.totalorder %v11975_v40, 1  ;;  %vm15531_vm2 = vcmp.eq.s32.totalorder %v15747_v31, 1 }
 0x390   :  { %v1582_v20 = vsel %vm15744_vm10, %v11917_v54, -1e+30  ;;  %v1583_v14 = vsel %vm15745_vm15, %v11915_v46, -1e+30  ;;  %v1541_v12 = vsel %vm679_vm8, %v1535_v63, -inf  ;;  %v1542_v27 = vsel %vm679_vm8, %v1536_v18, -inf }
 0x391   :  { %v1592_v22 = vsel %vm679_vm8, %v1586_v0, -inf  ;;  %v1594_v51 = vsel %vm679_vm8, %v1587_v59, -inf  ;;  %vm15532_vm13 = vcmp.eq.s32.totalorder %v15748_v47, 1  ;;  %v1537_v61 = vsel %vm15549_vm12, %v11927_v8, -1e+30  ;;  %v15751_v63 = vld [vmem:[#allocation70_spill] sm:$0xff] }
 0x392   :  { %vm15749_vm10 = vcmp.eq.s32.totalorder %v15734_v1, 1  ;;  %v1546_v34 = vmax.f32 %v1541_v12, %v1545_v9  ;;  %v1548_v38 = vmax.f32 %v1542_v27, %v1547_v17  ;;  %vm15537_vm15 = vcmp.eq.s32.totalorder %v15750_v21, 1  ;;  %v15752_v12 = vld [vmem:[#allocation68_spill] sm:$0xff]  ;;  %v15753_v27 = vld [vmem:[#allocation69_spill] sm:$0xff] }
 0x393   :  { %v1538_v40 = vsel %vm15749_vm10, %v11925_v5, -1e+30  ;;  %vm15536_vm0 = vcmp.eq.s32.totalorder %v15751_v63, 1  ;;  %v1584_v18 = vsel %vm15504_vm5, %v11927_v8, -1e+30  ;;  %v1588_v59 = vsel %vm679_vm8, %v1582_v20, -inf }
 0x394   :  { %v1585_v0 = vsel %vm15506_vm14, %v11925_v5, -1e+30  ;;  %v1589_v36 = vsel %vm679_vm8, %v1583_v14, -inf  ;;  %v1593_v1 = vmax.f32 %v1588_v59, %v1592_v22  ;;  %v1633_v17 = vsel %vm15533_vm1, %v11935_v53, -1e+30 }
 0x395   :  { %v1595_v23 = vmax.f32 %v1589_v36, %v1594_v51  ;;  %v1634_v9 = vsel %vm15508_vm11, %v11931_v11, -1e+30  ;;  %vm15541_vm10 = vcmp.eq.s32.totalorder %v15752_v12, 1  ;;  %vm15540_vm5 = vcmp.eq.s32.totalorder %v15753_v27, 1 }
 0x396   :  { %vm15754_vm14 = vcmp.eq.s32.totalorder %v15741_v56, 1  ;;  %v1543_v36 = vsel %vm679_vm8, %v1537_v61, -inf  ;;  %v1544_v14 = vsel %vm679_vm8, %v1538_v40, -inf  ;;  %v1590_v22 = vsel %vm679_vm8, %v1584_v18, -inf  ;;  %v15757_v56 = vld [vmem:[#allocation87_spill] sm:$0xff] }
 0x397   :  { %v1489_v20 = vsel %vm15754_vm14, %v11915_v46, -1e+30  ;;  %v1591_v51 = vsel %vm679_vm8, %v1585_v0, -inf  ;;  %v1629_v59 = vsel %vm15511_vm3, %v11917_v54, -1e+30  ;;  %vm15543_vm11 = vcmp.eq.s32.totalorder %v15755_v16, 1 }
 0x398   :  { %v1630_v55 = vsel %vm15529_vm4, %v11915_v46, -1e+30  ;;  %v1490_v61 = vsel %vm15519_vm6, %v11927_v8, -1e+30  ;;  %v1491_v40 = vsel %vm15526_vm7, %v11925_v5, -1e+30  ;;  %v1455_v2 = vmax.f32 %v1452_v62, %v1454_v10 }
 0x399   :  { %v1639_v18 = vsel %vm679_vm8, %v1633_v17, -inf  ;;  %v1641_v0 = vsel %vm679_vm8, %v1634_v9, -inf  ;;  %vm15542_vm14 = vcmp.eq.s32.totalorder %v15756_v30, 1  ;;  %vm15548_vm3 = vcmp.eq.s32.totalorder %v15757_v56, 1  ;;  %v15759_v9 = vld [vmem:[#allocation83_spill] sm:$0xff] }
 0x39a   :  { %v1492_v32 = vsel %vm15530_vm9, %v11935_v53, -1e+30  ;;  %v1549_v41 = vmax.f32 %v1546_v34, %v1548_v38  ;;  %v1596_v25 = vmax.f32 %v1593_v1, %v1595_v23  ;;  %vm15547_vm6 = vcmp.eq.s32.totalorder %v15758_v37, 1 }
 0x39b   :  { %v1550_v7 = vmax.f32 %v1543_v36, %v1544_v14  ;;  %v1597_v4 = vmax.f32 %v1590_v22, %v1591_v51  ;;  %v1635_v26 = vsel %vm679_vm8, %v1629_v59, -inf  ;;  %v1636_v17 = vsel %vm679_vm8, %v1630_v55, -inf  ;;  %v12441_v14 = vpop.permute.xlu0 %1841  ;;  %v15763_v22 = vld [vmem:[#allocation114_spill] sm:$0xff] }
 0x39c   :  { %vm15550_vm7 = vcmp.eq.s32.totalorder %v15759_v9, 1  ;;  %vm15552_vm4 = vcmp.eq.s32.totalorder %v15760_v39, 1  ;;  %v1631_v10 = vsel %vm15531_vm2, %v11927_v8, -1e+30  ;;  %vm15761_vm9 = vcmp.eq.s32.totalorder %v15746_v42, 1  ;;  %15762 = vst [vmem:[#allocation133_spill] sm:$0xff] %v12441_v14 }
 0x39d   :  { %v1632_v23 = vsel %vm15761_vm9, %v11925_v5, -1e+30  ;;  %v1640_v38 = vmax.f32 %v1635_v26, %v1639_v18  ;;  %v1642_v34 = vmax.f32 %v1636_v17, %v1641_v0  ;;  %v1493_v1 = vsel %vm15532_vm13, %v11931_v11, -1e+30  ;;  %v12444_v26 = vpop.permute.xlu1 %1800 }
 0x39e   :  { %v12432_v55 = vsel %vm679_vm8, %v1488_v19, -inf  ;;  %v12435_v62 = vsel %vm679_vm8, %v1489_v20, -inf  ;;  %v12438_v36 = vsel %vm679_vm8, %v1492_v32, -inf  ;;  %vm1720_vm2 = vcmp.eq.s32.totalorder %v12128_v50, 1  ;;  %15764 = vst [vmem:[#allocation134_spill] sm:$0xff] %v12444_v26 }
 0x39f   :  { %vm1719_vm9 = vcmp.eq.s32.totalorder %v15763_v22, 1  ;;  %v1551_v51 = vmax.f32 %v1549_v41, %v1550_v7  ;;  %v1598_v59 = vmax.f32 %v1596_v25, %v1597_v4  ;;  %v1680_v19 = vsel %vm15537_vm15, %v11935_v53, -1e+30  ;;  %v15765_v7 = vld [vmem:[#allocation113_spill] sm:$0xff]  ;;  %v15766_v4 = vld [vmem:[#allocation103_spill] sm:$0xff] }
 0x3a0   :  { %v1681_v20 = vsel %vm15536_vm0, %v11931_v11, -1e+30  ;;  %v12453_v32 = vsel %vm679_vm8, %v1490_v61, -inf  ;;  %v12456_v18 = vsel %vm679_vm8, %v1491_v40, -inf  ;;  %v1637_v0 = vsel %vm679_vm8, %v1631_v10, -inf }
 0x3a1   :  { %v1638_v17 = vsel %vm679_vm8, %v1632_v23, -inf  ;;  %vm15559_vm13 = vcmp.eq.s32.totalorder %v15765_v7, 1  ;;  %vm15558_vm1 = vcmp.eq.s32.totalorder %v15766_v4, 1  ;;  %v15767_v41 = vmax.f32 %v12306_v48, %v12310_v49  ;;  %v15768_v48 = vld [vmem:[#allocation99_spill] sm:$0xff] }
 0x3a2   :  { %v1643_v63 = vmax.f32 %v1640_v38, %v1642_v34  ;;  %v1676_v61 = vsel %vm15541_vm10, %v11917_v54, -1e+30  ;;  %v1677_v40 = vsel %vm15540_vm5, %v11915_v46, -1e+30  ;;  %v1499_v10 = vmax.f32 %v12432_v55, %v12438_v36 }
 0x3a3   :  { %v12465_v25 = vmax.f32 %v1455_v2, %v15767_v41  ;;  %v1500_v23 = vsel %vm679_vm8, %v1493_v1, -inf  ;;  %v1686_v21 = vsel %vm679_vm8, %v1680_v19, -inf  ;;  %v1688_v49 = vsel %vm679_vm8, %v1681_v20, -inf  ;;  %v15769_v2 = vld [vmem:[#allocation101_spill] sm:$0xff]  ;;  %v12492_v19 = vpop.permute.xlu0 %1856  ;;  %v12495_v20 = vpop.permute.xlu1 %1803 }
 0x3a4   :  { %vm1764_vm0 = vcmp.eq.s32.totalorder %v15768_v48, 1  ;;  %vm1765_vm15 = vcmp.eq.s32.totalorder %v15769_v2, 1  ;;  %v1552_v38 = vrot.slane %v1551_v51, 4  ;;  %v1599_v34 = vrot.slane %v1598_v59, 4  ;;  %15770 = vst [vmem:[#allocation135_spill] sm:$0xff] %v12492_v19  ;;  %15771 = vst [vmem:[#allocation136_spill] sm:$0xff] %v12495_v20 }
 0x3a5   :  { %v1644_v41 = vmax.f32 %v1637_v0, %v1638_v17  ;;  %v1678_v27 = vsel %vm15543_vm11, %v11927_v8, -1e+30  ;;  %v1682_v12 = vsel %vm679_vm8, %v1676_v61, -inf  ;;  %v1683_v55 = vsel %vm679_vm8, %v1677_v40, -inf }
 0x3a6   :  { %v1727_v1 = vsel %vm15542_vm14, %v11935_v53, -1e+30  ;;  %v1728_v36 = vsel %vm15548_vm3, %v11931_v11, -1e+30  ;;  %vm15561_vm5 = vcmp.eq.s32.totalorder %v12151_v45, 1  ;;  %vm15560_vm10 = vcmp.eq.s32.totalorder %v12105_v24, 1 }
 0x3a7   :  { %v1645_v0 = vmax.f32 %v1643_v63, %v1644_v41  ;;  %v1679_v17 = vsel %vm15547_vm6, %v11925_v5, -1e+30  ;;  %v1687_v61 = vmax.f32 %v1682_v12, %v1686_v21  ;;  %v1689_v40 = vmax.f32 %v1683_v55, %v1688_v49  ;;  %v15772_v41 = vld [vmem:[#allocation116_spill] sm:$0xff]  ;;  %v15773_v21 = vld [vmem:[#allocation118_spill] sm:$0xff]  ;;  %v12541_v22 = vpop.permute.xlu0 %1847 }
 0x3a8   :  { %vm15565_vm14 = vcmp.eq.s32.totalorder %v12159_v43, 1  ;;  %vm15564_vm11 = vcmp.eq.s32.totalorder %v12193_v13, 1  ;;  %v1501_v56 = vmax.f32 %v12435_v62, %v1500_v23  ;;  %v1723_v16 = vsel %vm15550_vm7, %v11917_v54, -1e+30 }
 0x3a9   :  { %v1724_v63 = vsel %vm15552_vm4, %v11915_v46, -1e+30  ;;  %vm1811_vm6 = vcmp.eq.s32.totalorder %v15772_v41, 1  ;;  %v12513_v12 = vmax.f32 %v1551_v51, %v1552_v38  ;;  %v12515_v49 = vmax.f32 %v1598_v59, %v1599_v34 }
 0x3aa   :  { %v1733_v62 = vsel %vm679_vm8, %v1727_v1, -inf  ;;  %v1735_v23 = vsel %vm679_vm8, %v1728_v36, -inf  ;;  %v1684_v55 = vsel %vm679_vm8, %v1678_v27, -inf  ;;  %v1685_v30 = vsel %vm679_vm8, %v1679_v17, -inf }
 0x3ab   :  { %v1725_v39 = vsel %vm1719_vm9, %v11927_v8, -1e+30  ;;  %v1726_v51 = vsel %vm1720_vm2, %v11925_v5, -1e+30  ;;  %vm1813_vm4 = vcmp.eq.s32.totalorder %v12444_v26, 1  ;;  %vm1814_vm3 = vcmp.eq.s32.totalorder %v12495_v20, 1 }
 0x3ac   :  { %v1646_v59 = vrot.slane %v1645_v0, 4  ;;  %v1690_v38 = vmax.f32 %v1687_v61, %v1689_v40  ;;  %v1729_v34 = vsel %vm679_vm8, %v1723_v16, -inf  ;;  %v1730_v27 = vsel %vm679_vm8, %v1724_v63, -inf  ;;  %v12543_v61 = vpop.permute.xlu1 %1850 }
 0x3ad   :  { %vm1858_vm12 = vcmp.eq.s32.totalorder %v12441_v14, 1  ;;  %vm15592_vm7 = vcmp.eq.s32.totalorder %v12211_v29, 1  ;;  %v1734_v1 = vmax.f32 %v1729_v34, %v1733_v62  ;;  %v1736_v36 = vmax.f32 %v1730_v27, %v1735_v23 }
 0x3ae   :  { %v1774_v17 = vsel %vm15559_vm13, %v11935_v53, -1e+30  ;;  %v1775_v50 = vsel %vm15558_vm1, %v11931_v11, -1e+30  ;;  %v1502_v16 = vmax.f32 %v1499_v10, %v1501_v56  ;;  %v1691_v40 = vmax.f32 %v1684_v55, %v1685_v30 }
 0x3af   :  { %v1731_v63 = vsel %vm679_vm8, %v1725_v39, -inf  ;;  %v1732_v9 = vsel %vm679_vm8, %v1726_v51, -inf  ;;  %v1554_v62 = vrot.slane %v12513_v12, 2  ;;  %v1601_v23 = vrot.slane %v12515_v49, 2 }
 0x3b0   :  { %v1770_v34 = vsel %vm1764_vm0, %v11917_v54, -1e+30  ;;  %v1771_v27 = vsel %vm1765_vm15, %v11915_v46, -1e+30  ;;  %v12555_v4 = vmax.f32 %v1645_v0, %v1646_v59  ;;  %v1692_v56 = vmax.f32 %v1690_v38, %v1691_v40 }
 0x3b1   :  { %v1780_v30 = vsel %vm679_vm8, %v1774_v17, -inf  ;;  %v1782_v39 = vsel %vm679_vm8, %v1775_v50, -inf  ;;  %vm15591_vm1 = vcmp.eq.s32.totalorder %v12541_v22, 1  ;;  %vm15579_vm13 = vcmp.eq.s32.totalorder %v12543_v61, 1 }
 0x3b2   :  { %v1737_v10 = vmax.f32 %v1734_v1, %v1736_v36  ;;  %v1738_v55 = vmax.f32 %v1731_v63, %v1732_v9  ;;  %v1821_v51 = vsel %vm15561_vm5, %v11935_v53, -1e+30  ;;  %v1822_v0 = vsel %vm15560_vm10, %v11931_v11, -1e+30 }
 0x3b3   :  { %v1772_v59 = vsel %vm15565_vm14, %v11927_v8, -1e+30  ;;  %v1773_v50 = vsel %vm15564_vm11, %v11925_v5, -1e+30  ;;  %v1776_v38 = vsel %vm679_vm8, %v1770_v34, -inf  ;;  %v1777_v9 = vsel %vm679_vm8, %v1771_v27, -inf }
 0x3b4   :  { %v1781_v1 = vmax.f32 %v1776_v38, %v1780_v30  ;;  %v1783_v36 = vmax.f32 %v1777_v9, %v1782_v39  ;;  %v1817_v17 = vsel %vm1811_vm6, %v11917_v54, -1e+30  ;;  %vm15774_vm10 = vcmp.eq.s32.totalorder %v15773_v21, 1 }
 0x3b5   :  { %v1818_v40 = vsel %vm15774_vm10, %v11915_v46, -1e+30  ;;  %vm15580_vm5 = vcmask 1040384   ;;  %v1827_v63 = vsel %vm679_vm8, %v1821_v51, -inf  ;;  %v1829_v13 = vsel %vm679_vm8, %v1822_v0, -inf }
 0x3b6   :  { %vm15775_vm11 = vcmp.eq.s32.totalorder %v12245_v57, 1  ;;  %vm15776_vm14 = vcmp.eq.s32.totalorder %v12492_v19, 1  ;;  %v1778_v30 = vsel %vm679_vm8, %v1772_v59, -inf  ;;  %v1779_v39 = vsel %vm679_vm8, %v1773_v50, -inf }
 0x3b7   :  { %v1868_v34 = vsel %vm15775_vm11, %v11935_v53, -1e+30  ;;  %v1869_v27 = vsel %vm15776_vm14, %v11931_v11, -1e+30  ;;  %v1819_v38 = vsel %vm1813_vm4, %v11927_v8, -1e+30  ;;  %v1739_v57 = vmax.f32 %v1737_v10, %v1738_v55 }
 0x3b8   :  { %v1820_v51 = vsel %vm1814_vm3, %v11925_v5, -1e+30  ;;  %v1823_v0 = vsel %vm679_vm8, %v1817_v17, -inf  ;;  %v1824_v53 = vsel %vm679_vm8, %v1818_v40, -inf  ;;  %v1864_v11 = vsel %vm1858_vm12, %v11917_v54, -1e+30 }
 0x3b9   :  { %v1865_v59 = vsel %vm15592_vm7, %v11915_v46, -1e+30  ;;  %v1828_v50 = vmax.f32 %v1823_v0, %v1827_v63  ;;  %v1830_v9 = vmax.f32 %v1824_v53, %v1829_v13  ;;  %v1874_v26 = vsel %vm679_vm8, %v1868_v34, -inf }
 0x3ba   :  { %v1876_v19 = vsel %vm679_vm8, %v1869_v27, -inf  ;;  %vm15581_vm11 = vcmask 1041408   ;;  %v1693_v20 = vrot.slane %v1692_v56, 4  ;;  %v1784_v17 = vmax.f32 %v1781_v1, %v1783_v36 }
 0x3bb   :  { %v1785_v21 = vmax.f32 %v1778_v30, %v1779_v39  ;;  %v1825_v40 = vsel %vm679_vm8, %v1819_v38, -inf  ;;  %v1826_v14 = vsel %vm679_vm8, %v1820_v51, -inf  ;;  %v1870_v54 = vsel %vm679_vm8, %v1864_v11, -inf }
 0x3bc   :  { %v1871_v29 = vsel %vm679_vm8, %v1865_v59, -inf  ;;  %v1866_v46 = vsel %vm15591_vm1, %v11927_v8, -1e+30  ;;  %v1867_v13 = vsel %vm15579_vm13, %v11925_v5, -1e+30  ;;  %v1875_v63 = vmax.f32 %v1870_v54, %v1874_v26 }
 0x3bd   :  { %v1877_v10 = vmax.f32 %v1871_v29, %v1876_v19  ;;  %v15777_v55 = vrot.slane %v12331_v15, 4  ;;  %v1458_v36 = vrot.slane %v12465_v25, 4  ;;  %v15778_v34 = vmax.f32 %v12453_v32, %v12456_v18 }
 0x3be   :  { %v1831_v30 = vmax.f32 %v1828_v50, %v1830_v9  ;;  %v1555_v39 = vmax.f32 %v12513_v12, %v1554_v62  ;;  %v1602_v8 = vmax.f32 %v12515_v49, %v1601_v23  ;;  %v1648_v38 = vrot.slane %v12555_v4, 2 }
 0x3bf   :  { %v1412_v1 = vmax.f32 %v12331_v15, %v15777_v55  ;;  %v1504_v27 = vmax.f32 %v1502_v16, %v15778_v34  ;;  %v1786_v5 = vmax.f32 %v1784_v17, %v1785_v21  ;;  %v1740_v26 = vrot.slane %v1739_v57, 4 }
 0x3c0   :  { %v1832_v29 = vmax.f32 %v1825_v40, %v1826_v14  ;;  %v1872_v19 = vsel %vm679_vm8, %v1866_v46, -inf  ;;  %v1873_v15 = vsel %vm679_vm8, %v1867_v13, -inf  ;;  %v15779_v51 = vrot.slane %v12253_v33, 2 }
 0x3c1   :  { %v15780_v32 = vrot.slane %v12277_v6, 2  ;;  %v1694_v12 = vmax.f32 %v1692_v56, %v1693_v20  ;;  %v1878_v16 = vmax.f32 %v1875_v63, %v1877_v10  ;;  %v1413_v49 = vrot.slane %v1412_v1, 2 }
 0x3c2   :  { %v1320_v0 = vmax.f32 %v12253_v33, %v15779_v51  ;;  %v1505_v62 = vrot.slane %v1504_v27, 4  ;;  %v1888_v14 = vsel %vm15580_vm5, %v12261_v44, %v12275_v28  ;;  %v1833_v21 = vmax.f32 %v1831_v30, %v1832_v29  ;;  %v1916_v44 = vld [vmem:[%s15286_s12 + $0x10] sm:$0xff]  ;;  %v1917_v28 = vld [vmem:[%s15286_s12 + $0x18] sm:$0xff] }
 0x3c3   :  { %v1367_v18 = vmax.f32 %v12277_v6, %v15780_v32  ;;  %v1459_v23 = vmax.f32 %v12465_v25, %v1458_v36  ;;  %v1556_v53 = vrot.slane %v1555_v39, 1  ;;  %v1787_v11 = vrot.slane %v1786_v5, 4  ;;  %v15781_v32 = vld [vmem:[#allocation106_spill] sm:$0xff] }
 0x3c4   :  { %v1879_v59 = vmax.f32 %v1872_v19, %v1873_v15  ;;  %v1603_v50 = vrot.slane %v1602_v8, 1  ;;  %v1649_v33 = vmax.f32 %v12555_v4, %v1648_v38  ;;  %v1741_v9 = vmax.f32 %v1739_v57, %v1740_v26  ;;  %v2085_v19 = vld [vmem:[#allocation14 + $0x8] sm:$0xff] }
 0x3c5   :  { %v1321_v17 = vrot.slane %v1320_v0, 1  ;;  %vm15582_vm10 = vcmask 1042432   ;;  %v1695_v6 = vrot.slane %v1694_v12, 2  ;;  %v1368_v25 = vrot.slane %v1367_v18, 1 }
 0x3c6   :  { %v1880_v20 = vmax.f32 %v1878_v16, %v1879_v59  ;;  %v1506_v40 = vmax.f32 %v1504_v27, %v1505_v62  ;;  %v1890_v4 = vsel %vm15581_vm11, %v1888_v14, %v12300_v58  ;;  %v1834_v57 = vrot.slane %v1833_v21, 4  ;;  %v2084_v58 = vld [vmem:[#allocation14] sm:$0xff]  ;;  %v10907_v16 = vld [vmem:[#allocation2] sm:$0xff] }
 0x3c7   :  { %v1414_v46 = vmax.f32 %v1412_v1, %v1413_v49  ;;  %v1460_v13 = vrot.slane %v1459_v23, 2  ;;  %v1557_v63 = vmax.f32 %v1555_v39, %v1556_v53  ;;  %v1788_v10 = vmax.f32 %v1786_v5, %v1787_v11 }
 0x3c8   :  { %v1604_v36 = vmax.f32 %v1602_v8, %v1603_v50  ;;  %v1650_v34 = vrot.slane %v1649_v33, 1  ;;  %v1742_v30 = vrot.slane %v1741_v9, 2  ;;  %v10363_v27 = vpack.c.bf16 %v1917_v28, %v1916_v44 }
 0x3c9   :  { %v1696_v26 = vmax.f32 %v1694_v12, %v1695_v6  ;;  %v1881_v29 = vrot.slane %v1880_v20, 4  ;;  %v1322_v1 = vmax.f32 %v1320_v0, %v1321_v17  ;;  %v1507_v15 = vrot.slane %v1506_v40, 2 }
 0x3ca   :  { %v1835_v39 = vmax.f32 %v1833_v21, %v1834_v57  ;;  %v1369_v5 = vmax.f32 %v1367_v18, %v1368_v25  ;;  %v1461_v51 = vmax.f32 %v1459_v23, %v1460_v13  ;;  %vm15583_vm14 = vcmask 1043456   ;;  %v2086_v18 = vld [vmem:[#allocation14 + $0x10] sm:$0xff]  ;;  %v2087_v23 = vld [vmem:[#allocation14 + $0x18] sm:$0xff]  ;;  %v2171_v57 = vld [vmem:[#allocation16] sm:$0xff] }
 0x3cb   :  { %v1789_v8 = vrot.slane %v1788_v10, 2  ;;  %v1415_v12 = vrot.slane %v1414_v46, 1  ;;  %v1892_v49 = vsel %vm15582_vm10, %v1890_v4, %v1322_v1  ;;  %v1651_v62 = vmax.f32 %v1649_v33, %v1650_v34  ;;  %v2172_v13 = vld [vmem:[#allocation16 + $0x8] sm:$0xff] }
 0x3cc   :  { %v1743_v14 = vmax.f32 %v1741_v9, %v1742_v30  ;;  %v10367_v0 = vpack.c.bf16 %v2085_v19, %v2084_v58  ;;  %v1697_v53 = vrot.slane %v1696_v26, 1  ;;  %v1882_v21 = vmax.f32 %v1880_v20, %v1881_v29  ;;  %v2173_v58 = vld [vmem:[#allocation16 + $0x10] sm:$0xff]  ;;  %v2174_v19 = vld [vmem:[#allocation16 + $0x18] sm:$0xff] }
 0x3cd   :  { %v1901_v11 = vsel %vm15580_vm5, %v1557_v63, %v1604_v36  ;;  %v1508_v59 = vmax.f32 %v1506_v40, %v1507_v15  ;;  %v1836_v50 = vrot.slane %v1835_v39, 2  ;;  %v1462_v17 = vrot.slane %v1461_v51, 1  ;;  %v10908_v36 = vld [vmem:[#allocation2 + $0x8] sm:$0xff] }
 0x3ce   :  { %v1894_v6 = vsel %vm15583_vm14, %v1892_v49, %v1369_v5  ;;  %vm15584_vm13 = vcmask 1044480   ;;  %v1790_v44 = vmax.f32 %v1788_v10, %v1789_v8  ;;  %v1416_v28 = vmax.f32 %v1414_v46, %v1415_v12 }
 0x3cf   :  { %v1744_v25 = vrot.slane %v1743_v14, 1  ;;  %v1902_v33 = vsel %vm15581_vm11, %v1901_v11, %v1651_v62  ;;  %v10371_v9 = vpack.c.bf16 %v2087_v23, %v2086_v18  ;;  %v1698_v4 = vmax.f32 %v1696_v26, %v1697_v53  ;;  %v2269_v53 = vld [vmem:[#allocation17 + $0x10] sm:$0xff]  ;;  %v8824_v18 = vld [vmem:[%s15280_s6 + $0x10] sm:$0xff]  ;;  %v8825_v23 = vld [vmem:[%s15280_s6 + $0x18] sm:$0xff] }
 0x3d0   :  { %v1883_v20 = vrot.slane %v1882_v21, 2  ;;  %v1509_v63 = vrot.slane %v1508_v59, 1  ;;  %v1896_v40 = vsel %vm15584_vm13, %v1894_v6, %v1416_v28  ;;  %vm15588_vm5 = vcmask 1045504  }
 0x3d1   :  { %v1463_v10 = vmax.f32 %v1461_v51, %v1462_v17  ;;  %v1791_v34 = vrot.slane %v1790_v44, 1  ;;  %v1903_v46 = vsel %vm15582_vm10, %v1902_v33, %v1698_v4  ;;  %v1745_v30 = vmax.f32 %v1743_v14, %v1744_v25  ;;  %v15782_v14 = vld [vmem:[#allocation41_spill] sm:$0xff]  ;;  %v10909_v25 = vld [vmem:[%s15622_s20] sm:$0xff]  ;;  %v10910_v33 = vld [vmem:[%s15622_s20 + $0x8] sm:$0xff] }
 0x3d2   :  { %vm15587_vm11 = vcmask 1046528   ;;  %v1884_v26 = vmax.f32 %v1882_v21, %v1883_v20  ;;  %v1510_v29 = vmax.f32 %v1508_v59, %v1509_v63  ;;  %vm15586_vm10 = vcmp.gt.f32.partialorder %v11909_v35, 0.0  ;;  %v2270_v21 = vld [vmem:[#allocation17 + $0x18] sm:$0xff]  ;;  %v10912_v4 = vld [vmem:[%s15622_s20 + $0x18] sm:$0xff]  ;;  %v10913_v20 = vld [vmem:[%s15622_s20 + $0x20] sm:$0xff] }
 0x3d3   :  { %v1904_v15 = vsel %vm15583_vm14, %v1903_v46, %v1745_v30  ;;  %vm15585_vm14 = vcmp.gt.f32.partialorder %v15782_v14, 0.0  ;;  %v10387_v11 = vpack.c.bf16 %v2270_v21, %v2269_v53  ;;  %v10391_v59 = vpack.c.bf16 %v8825_v23, %v8824_v18  ;;  %v8821_v63 = vld [vmem:[%s15292_s18] ss:$0 sm:$0xff]  ;;  %v12729_v30 = vld [vmem:[#allocation5 + $0x8] sm:$0xff]  ;;  %v15802_v18 = vld [vmem:[#allocation40_spill] sm:$0xff] }
 0x3d4   :  { %v1885_v51 = vrot.slane %v1884_v26, 1  ;;  %v15796_v53 = vld [vmem:[#allocation30_spill] sm:$0xff]  ;;  %v15798_v21 = vld [vmem:[#allocation37_spill] sm:$0xff] }
 0x3d5   :  { %10388 = vmatprep.subr.bf16.mxu1 %v10387_v11  ;;  %v15804_v23 = vld [vmem:[#allocation33_spill] sm:$0xff] }
 0x3d6   :  { %v1886_v49 = vmax.f32 %v1884_v26, %v1885_v51  ;;  %10390 = vmatpush3.bf16.msra.mxu1 %v10387_v11  ;;  %v2673_v51 = vld [vmem:[#allocation8 + $0x30] sm:$0xff]  ;;  %v15800_v11 = vld [vmem:[#allocation32_spill] sm:$0xff] }
 0x3d7   :  { %10392 = vmatprep.subr.bf16.mxu1 %v10391_v59 }
 0x3f3   :  { %v12640_v56 = vpop.f32.mrb[10].mxu0 }
 0x3f4   :  { %v12650_v54 = vpop.f32.mrb[11].mxu0  ;;  %v1122_v38 = vmul.f32 %v12263_v3, %v12640_v56 }
 0x3f5   :  { %v1121_v55 = vmul.f32 %v12255_v60, %v12650_v54 }
 0x3f7   :  { %9648 = vmatprep.mubr.msk.f32.mxu0 %vm679_vm8, %v1121_v55  ;;  %v1837_v55 = vmax.f32 %v1835_v39, %v1836_v50  ;;  %v1792_v39 = vmax.f32 %v1790_v44, %v1791_v34  ;;  %v8820_v50 = vld [vmem:[%s15290_s16] ss:$0 sm:$0xff] }
 0x3f8   :  { %9649 = vmatmul.mubr.msk.f32.vlgmr.msra.gmra.mrb[12].mxu0 %vm679_vm8, %v1122_v38  ;;  %v10375_v38 = vpack.c.bf16 %v2172_v13, %v2171_v57  ;;  %v10914_v57 = vld [vmem:[%s15622_s20 + $0x28] sm:$0xff]  ;;  %v15790_v13 = vld [vmem:[#allocation29_spill] sm:$0xff] }
 0x3f9   :  { %10362 = vmatpush3.bf16.msra.mxu0 %v15781_v32  ;;  %9659 = vmatprep.mubr.msk.f32.mxu0 %vm679_vm8, %v10907_v16  ;;  %v1838_v1 = vrot.slane %v1837_v55, 1  ;;  %v1905_v8 = vsel %vm15584_vm13, %v1904_v15, %v1792_v39  ;;  %vm15784_vm13 = vcmask 130048  }
 0x3fa   :  { %10364 = vmatprep.subr.bf16.mxu0 %v10363_v27 }
 0x3fb   :  { %v1839_v32 = vmax.f32 %v1837_v55, %v1838_v1 }
 0x3fd   :  { %10366 = vmatpush3.bf16.msra.mxu0 %v10363_v27  ;;  %v1898_v27 = vsel %vm15588_vm5, %v1896_v40, %v1463_v10  ;;  %v1906_v12 = vsel %vm15588_vm5, %v1905_v8, %v1839_v32  ;;  %v12727_v10 = vld [vmem:[#allocation5] sm:$0xff]  ;;  %v2674_v8 = vld [vmem:[#allocation8 + $0x38] sm:$0xff] }
 0x3fe   :  { %10368 = vmatprep.subr.bf16.mxu0 %v10367_v0  ;;  %v1900_v5 = vsel %vm15587_vm11, %v1898_v27, %v1510_v29  ;;  %v1907_v62 = vsel %vm15587_vm11, %v1906_v12, %v1886_v49  ;;  %v10411_v12 = vpack.c.bf16 %v2674_v8, %v2673_v51  ;;  %v15791_v49 = vld [vmem:[#allocation35_spill] sm:$0xff] }
 0x3ff   :  { %v1912_v16 = vsel %vm15586_vm10, %v1900_v5, 0.0  ;;  %vm15786_vm10 = vmmov %vm15784_vm13 }
 0x400   :  { %9660 = vmatmul.mubr.msk.f32.vlgmr.msra.gmra.mrb[12].mxu0 %vm679_vm8, %v10908_v36  ;;  %vm15787_vm11 = vmmov %vm15786_vm10 }
 0x401   :  { %10370 = vmatpush3.bf16.msra.mxu0 %v10367_v0  ;;  %9670 = vmatprep.mubr.msk.f32.mxu0 %vm679_vm8, %v12650_v54  ;;  %v10379_v54 = vpack.c.bf16 %v2174_v19, %v2173_v58  ;;  %v1913_v0 = vsel %vm15585_vm14, %v1907_v62, 0.0  ;;  %vm15785_vm14 = vmmov %vm15784_vm13  ;;  %v2671_v58 = vld [vmem:[#allocation8 + $0x20] sm:$0xff]  ;;  %v2672_v19 = vld [vmem:[#allocation8 + $0x28] sm:$0xff] }
 0x402   :  { %10372 = vmatprep.subr.bf16.mxu0 %v10371_v9  ;;  %v10407_v5 = vpack.c.bf16 %v2672_v19, %v2671_v58  ;;  %v15792_v62 = vld [vmem:[#allocation31_spill] sm:$0xff]  ;;  %vm15793_vm5 = vmmov %vm15786_vm10 }
 0x403   :  { %vm15801_vm1 = vmmov %vm15793_vm5 }
 0x404   :  { %vm15803_vm7 = vmmov %vm15801_vm1 }
 0x405   :  { %10374 = vmatpush3.bf16.msra.mxu0 %v10371_v9  ;;  %v10911_v9 = vld [vmem:[%s15622_s20 + $0x10] sm:$0xff] }
 0x406   :  { %10376 = vmatprep.subr.bf16.mxu0 %v10375_v38 }
 0x408   :  { %9671 = vmatmul.mubr.msk.f32.vlgmr.msra.gmra.mrb[12].mxu0 %vm679_vm8, %v12640_v56  ;;  %v15783_v56 = vld [vmem:[#allocation36_spill] sm:$0xff] }
 0x409   :  { %10378 = vmatpush3.bf16.msra.mxu0 %v10375_v38  ;;  %9681 = vmatprep.mubr.msk.f32.mxu0 %vm679_vm8, %v1912_v16 }
 0x40a   :  { %10380 = vmatprep.subr.bf16.mxu0 %v10379_v54 }
 0x40d   :  { %10382 = vmatpush3.bf16.msra.mxu0 %v10379_v54 }
 0x410   :  { %9682 = vmatmul.mubr.msk.f32.vlgmr.msra.gmra.mrb[12].mxu0 %vm679_vm8, %v1913_v0  ;;  %v15794_v0 = vld [vmem:[#allocation38_spill] sm:$0xff] }
 0x411   :  { %9712 = vmatprep.mubr.msk.f32.mxu0 %vm15784_vm13, %v15783_v56 }
 0x4e3   :  { %v9683_v17 = vpop.f32.mrb[12].mxu0 }
 0x4e4   :  { %v2247_v6 = vpop.f32.mrb[13].mxu0  ;;  %v2266_v28 = vadd.f32 %v9683_v17, %v8820_v50  ;;  %v15810_v17 = vld [vmem:[#allocation27_spill] sm:$0xff] }
 0x4e5   :  { %v2265_v44 = vadd.f32 %v8820_v50, %v2247_v6  ;;  %v15808_v50 = vld [vmem:[#allocation34_spill] sm:$0xff] }
 0x4e6   :  { %v8849_v6 = vld [vmem:[%s15282_s8 + $0x20] sm:$0xff] }
 0x4e7   :  { %9692 = vmatprep.mubr.msk.f32.mxu1 %vm679_vm8, %v2265_v44  ;;  %v8850_v44 = vld [vmem:[%s15282_s8 + $0x28] sm:$0xff] }
 0x4e8   :  { %9693 = vmatmul.mubr.msk.f32.vlgmr.msra.gmra.mrb[14].mxu1 %vm679_vm8, %v2266_v28  ;;  %v10415_v28 = vpack.c.bf16 %v8850_v44, %v8849_v6 }
 0x4e9   :  { %10394 = vmatpush3.bf16.msra.mxu1 %v10391_v59  ;;  %9699 = vmatprep.mubr.msk.f32.mxu1 %vm15784_vm13, %v10909_v25  ;;  %vm15788_vm13 = vmmov %vm15786_vm10  ;;  %v15806_v59 = vld [vmem:[#allocation39_spill] sm:$0xff]  ;;  %v8851_v25 = vld [vmem:[%s15282_s8 + $0x30] sm:$0xff] }
 0x4ec   :  { %9700 = vmatmul.mubr.msk.f32.vlgmr.msra.gmra.mrb[16].mxu1 %vm15785_vm14, %v10910_v33  ;;  %vm15789_vm14 = vmmov %vm15786_vm10  ;;  %v8852_v33 = vld [vmem:[%s15282_s8 + $0x38] sm:$0xff] }
 0x4ed   :  { %9702 = vmatprep.mubr.msk.f32.mxu1 %vm15786_vm10, %v10911_v9 }
 0x4f0   :  { %9703 = vmatmul.mubr.msk.f32.gmra.mrb[18].mxu1 %vm15787_vm11, %v10912_v4  ;;  %vm15590_vm11 = vcmp.ge.f32.partialorder %v12727_v10, 0.1 }
 0x4f1   :  { %9705 = vmatprep.mubr.msk.f32.mxu1 %vm15788_vm13, %v10913_v20  ;;  %vm15589_vm13 = vcmp.ge.f32.partialorder %v12729_v30, 0.1 }
 0x4f4   :  { %9706 = vmatmul.mubr.msk.f32.gmra.mrb[20].mxu1 %vm15789_vm14, %v10914_v57  ;;  %vm10396_vm14 = vmpackc.low %vm15589_vm13, %vm15590_vm11 }
 0x4f5   :  { %9725 = vmatprep.mubr.msk.f32.mxu1 %vm15786_vm10, %v15790_v13  ;;  %vm15795_vm13 = vmmov %vm15793_vm5 }
 0x4f6   :  { %vm15797_vm11 = vmmov %vm15793_vm5 }
 0x5bb   :  { %v9694_v40 = vpop.f32.mrb[14].mxu1 }
 0x5bc   :  { %v2356_v55 = vadd.f32 %v9694_v40, %v8821_v63  ;;  %v2350_v36 = vpop.f32.mrb[15].mxu1 }
 0x5bd   :  { %v2351_v34 = vadd.f32 %v8821_v63, %v2350_v36  ;;  %v10419_v63 = vpack.c.bf16 %v8852_v33, %v8851_v25 }
 0x5be   :  { %v2360_v46 = vmax.f32 %v2356_v55, 0.0 }
 0x5bf   :  { %v2359_v38 = vmax.f32 %v2351_v34, 0.0  ;;  %v12732_v27 = vpop.f32.mrb[16].mxu1 }
 0x5c0   :  { %v12734_v26 = vmul.f32 1.1111112, %v2360_v46  ;;  %v12736_v29 = vpop.f32.mrb[17].mxu1  ;;  %v2902_v46 = vld [vmem:[#allocation10 + $0x8] sm:$0xff] }
 0x5c1   :  { %v12739_v1 = vmul.f32 1.1111112, %v2359_v38 }
 0x5c3   :  { %v10395_v15 = vpack.c.bf16 %v12734_v26, %v12739_v1  ;;  %v12747_v39 = vpop.f32.mrb[18].mxu1 }
 0x5c4   :  { %v12749_v54 = vpop.f32.mrb[19].mxu1 }
 0x5c5   :  { %10397 = vmatprep.subr.msk.bf16.mxu0 %vm10396_vm14, %v10395_v15  ;;  %10403 = vmatprep.subr.msk.bf16.mxu1 %vm10396_vm14, %v10395_v15 }
 0x5c6   :  { %10400 = vmatpush3.bf16.msk.msra.mxu0 %vm10396_vm14, %v10395_v15  ;;  %10406 = vmatpush3.bf16.msk.msra.mxu1 %vm10396_vm14, %v10395_v15  ;;  %vm15799_vm14 = vmmov %vm15793_vm5 }
 0x5c7   :  { %v12751_v32 = vpop.f32.mrb[20].mxu1  ;;  %10408 = vmatprep.subr.bf16.mxu0 %v10407_v5 }
 0x5c8   :  { %v2466_v16 = vpop.f32.mrb[21].mxu1 }
 0x5c9   :  { %9713 = vmatmul.mubr.msk.f32.vlgmr.msra.gmra.mrb[14].mxu0 %vm15786_vm10, %v15791_v49  ;;  %9726 = vmatmul.mubr.msk.f32.vlgmr.msra.gmra.mrb[22].mxu1 %vm15793_vm5, %v15792_v62  ;;  %vm15805_vm10 = vmmov %vm15801_vm1  ;;  %v15929_v62 = vld [vmem:[#allocation60_spill] sm:$0xff] }
 0x5ca   :  { %9715 = vmatprep.mubr.msk.f32.mxu0 %vm15795_vm13, %v15794_v0  ;;  %9728 = vmatprep.mubr.msk.f32.mxu1 %vm15797_vm11, %v15796_v53  ;;  %vm15807_vm5 = vmmov %vm15801_vm1  ;;  %vm15811_vm13 = vcmask 392192  }
 0x5cb   :  { %10410 = vmatpush3.bf16.msra.mxu0 %v10407_v5  ;;  %vm15809_vm11 = vmmov %vm15801_vm1  ;;  %v8826_v5 = vld [vmem:[#allocation7 + $0x1] ss:$0 sm:$0xff] }
 0x5cc   :  { %10412 = vmatprep.subr.bf16.mxu0 %v10411_v12  ;;  %v2447_v51 = vadd.f32 %v8826_v5, %v12736_v29  ;;  %v2452_v8 = vadd.f32 %v12732_v27, %v8826_v5  ;;  %v2462_v6 = vadd.f32 %v12747_v39, %v8826_v5  ;;  %v2467_v44 = vadd.f32 %v8826_v5, %v2466_v16 }
 0x5cd   :  { %9716 = vmatmul.mubr.msk.f32.gmra.mrb[16].mxu0 %vm15799_vm14, %v15798_v21  ;;  %9729 = vmatmul.mubr.msk.f32.gmra.mrb[24].mxu1 %vm15801_vm1, %v15800_v11  ;;  %vm15812_vm1 = vcmask 64512   ;;  %v2472_v29 = vadd.f32 %v12751_v32, %v8826_v5 }
 0x5ce   :  { %9718 = vmatprep.mubr.msk.f32.mxu0 %vm15803_vm7, %v15802_v18  ;;  %9731 = vmatprep.mubr.msk.f32.mxu1 %vm15805_vm10, %v15804_v23  ;;  %vm15813_vm7 = vmmov %vm15812_vm1 }
 0x5cf   :  { %10414 = vmatpush3.bf16.msra.mxu0 %v10411_v12  ;;  %v2457_v12 = vadd.f32 %v8826_v5, %v12749_v54  ;;  %vm15814_vm14 = vmmov %vm15812_vm1 }
 0x5d0   :  { %10416 = vmatprep.subr.bf16.mxu0 %v10415_v28  ;;  %vm15815_vm10 = vmmov %vm15812_vm1 }
 0x5d1   :  { %9719 = vmatmul.mubr.msk.f32.gmra.mrb[18].mxu0 %vm15807_vm5, %v15806_v59  ;;  %9732 = vmatmul.mubr.msk.f32.gmra.mrb[26].mxu1 %vm15809_vm11, %v15808_v50  ;;  %vm15816_vm5 = vmmov %vm15812_vm1 }
 0x5d2   :  { %9791 = vmatprep.mubr.msk.f32.mxu1 %vm15811_vm13, %v15810_v17  ;;  %vm15817_vm11 = vmmov %vm15812_vm1 }
 0x69c   :  { %v9714_v9 = vpop.f32.mrb[14].mxu0  ;;  %v9727_v4 = vpop.f32.mrb[22].mxu1 }
 0x69d   :  { %v2541_v20 = vpop.f32.mrb[15].mxu0  ;;  %v2636_v57 = vpop.f32.mrb[23].mxu1 }
 0x69e   :  { %9742 = vmatprep.mubr.msk.f32.mxu0 %vm679_vm8, %v2636_v57 }
 0x69f   :  { %9743 = vmatmul.mubr.msk.f32.vlgmr.msra.gmra.mrb[20].mxu0 %vm679_vm8, %v9727_v4 }
 0x6a0   :  { %v9717_v40 = vpop.f32.mrb[16].mxu0  ;;  %v9730_v55 = vpop.f32.mrb[24].mxu1  ;;  %10418 = vmatpush3.bf16.msra.mxu0 %v10415_v28  ;;  %v8871_v28 = vld [vmem:[#allocation11 + $0x1] ss:$0 sm:$0xff] }
 0x6a1   :  { %v2551_v36 = vpop.f32.mrb[17].mxu0  ;;  %v2646_v34 = vpop.f32.mrb[25].mxu1  ;;  %10420 = vmatprep.subr.bf16.mxu0 %v10419_v63 }
 0x6a2   :  { %9745 = vmatprep.mubr.msk.f32.mxu0 %vm679_vm8, %v2646_v34 }
 0x6a3   :  { %9746 = vmatmul.mubr.msk.f32.gmra.mrb[22].mxu0 %vm679_vm8, %v9730_v55  ;;  %v3503_v55 = vld [vmem:[#allocation13 + $0x20] sm:$0xff] }
 0x6a4   :  { %v9720_v38 = vpop.f32.mrb[18].mxu0  ;;  %v9733_v58 = vpop.f32.mrb[26].mxu1  ;;  %10422 = vmatpush3.bf16.msra.mxu0 %v10419_v63 }
 0x6a5   :  { %v2561_v19 = vpop.f32.mrb[19].mxu0  ;;  %v2656_v15 = vpop.f32.mrb[27].mxu1  ;;  %9768 = vmatprep.subr.mxu0 %v2902_v46 }
 0x6a6   :  { %9748 = vmatprep.mubr.msk.f32.mxu0 %vm679_vm8, %v2656_v15  ;;  %v3506_v15 = vld [vmem:[#allocation13 + $0x38] sm:$0xff] }
 0x6a7   :  { %9749 = vmatmul.mubr.msk.f32.gmra.mrb[24].mxu0 %vm679_vm8, %v9733_v58  ;;  %v15818_v58 = vld [vmem:[#allocation28_spill] sm:$0xff] }
 0x6a8   :  { %9759 = vmatprep.mubr.msk.f32.mxu0 %vm679_vm8, %v2541_v20 }
 0x6ab   :  { %9760 = vmatmul.mubr.msk.f32.vlgmr.msra.gmra.mrb[20].mxu0 %vm679_vm8, %v9714_v9 }
 0x6ac   :  { %9762 = vmatprep.mubr.msk.f32.mxu0 %vm679_vm8, %v2551_v36  ;;  %9769 = vmatpush3.msra.mxu0 %v2902_v46  ;;  %v3504_v36 = vld [vmem:[#allocation13 + $0x28] sm:$0xff] }
 0x6af   :  { %9763 = vmatmul.mubr.msk.f32.gmra.mrb[22].mxu0 %vm679_vm8, %v9717_v40 }
 0x6b0   :  { %9765 = vmatprep.mubr.msk.f32.mxu0 %vm679_vm8, %v2561_v19  ;;  %v3505_v19 = vld [vmem:[#allocation13 + $0x30] sm:$0xff] }
 0x6b1   :  { %v10439_v5 = vpack.c.bf16 %v3506_v15, %v3505_v19 }
 0x6b3   :  { %9766 = vmatmul.mubr.msk.f32.gmra.mrb[24].mxu0 %vm679_vm8, %v9720_v38  ;;  %v10435_v38 = vpack.c.bf16 %v3504_v36, %v3503_v55  ;;  %v15829_v36 = vld [vmem:[#allocation45_spill] sm:$0xff] }
 0x6b4   :  { %9770 = vmatprep.mubr.msk.f32.mxu0 %vm15812_vm1, %v2447_v51  ;;  %v8874_v51 = vld [vmem:[%s15286_s12 + $0x20] sm:$0xff] }
 0x6b7   :  { %9771 = vmatmul.mubr.msk.f32.vlgmr.msra.gmra.mrb[20].mxu0 %vm15813_vm7, %v2452_v8  ;;  %v8875_v8 = vld [vmem:[%s15286_s12 + $0x28] sm:$0xff] }
 0x6b8   :  { %9773 = vmatprep.mubr.msk.f32.mxu0 %vm15814_vm14, %v2457_v12  ;;  %v12836_v12 = vpack.c.bf16 %v8875_v8, %v8874_v51  ;;  %v15833_v51 = vld [vmem:[#allocation44_spill] sm:$0xff] }
 0x6bb   :  { %9774 = vmatmul.mubr.msk.f32.gmra.mrb[22].mxu0 %vm15815_vm10, %v2462_v6  ;;  %v3856_v6 = vld [vmem:[#allocation17 + $0x20] sm:$0xff] }
 0x6bc   :  { %9776 = vmatprep.mubr.msk.f32.mxu0 %vm15816_vm5, %v2467_v44  ;;  %v3857_v44 = vld [vmem:[#allocation17 + $0x28] sm:$0xff] }
 0x6bf   :  { %9777 = vmatmul.mubr.msk.f32.gmra.mrb[24].mxu0 %vm15817_vm11, %v2472_v29  ;;  %v10467_v29 = vpack.c.bf16 %v3857_v44, %v3856_v6  ;;  %vm15830_vm11 = vcmp.eq.s32.totalorder %v15829_v36, 1  ;;  %v15835_v6 = vld [vmem:[#allocation78_spill] sm:$0xff] }
 0x6c1   :  { %10468 = vmatprep.subr.bf16.mxu0 %v10467_v29 }
 0x6c2   :  { %10470 = vmatpush3.bf16.msra.mxu0 %v10467_v29 }
 0x78a   :  { %v9772_v25 = vpop.f32.mrb[20].mxu0 }
 0x78b   :  { %v12810_v27 = vadd.f32 %v9772_v25, %v8871_v28  ;;  %v2987_v54 = vpop.f32.mrb[21].mxu0 }
 0x78c   :  { %v12812_v33 = vadd.f32 %v8871_v28, %v2987_v54  ;;  %v15821_v54 = vld [vmem:[#allocation43_spill] sm:$0xff] }
 0x78d   :  { %vm15822_vm7 = vcmp.eq.s32.totalorder %v15821_v54, 1 }
 0x78e   :  { %v9775_v9 = vpop.f32.mrb[22].mxu0  ;;  %v10423_v39 = vpack.c.bf16 %v12810_v27, %v12812_v33 }
 0x78f   :  { %v12816_v16 = vadd.f32 %v9775_v9, %v8871_v28  ;;  %v2997_v4 = vpop.f32.mrb[23].mxu0 }
 0x790   :  { %v12818_v20 = vadd.f32 %v8871_v28, %v2997_v4  ;;  %10424 = vmatprep.subr.bf16.mxu1 %v10423_v39 }
 0x791   :  { %10426 = vmatpush3.bf16.msra.mxu1 %v10423_v39  ;;  %v15823_v39 = vld [vmem:[#allocation71_spill] sm:$0xff] }
 0x792   :  { %v9778_v32 = vpop.f32.mrb[24].mxu0  ;;  %v10427_v57 = vpack.c.bf16 %v12816_v16, %v12818_v20  ;;  %vm15824_vm14 = vcmp.eq.s32.totalorder %v15823_v39, 1 }
 0x793   :  { %v12822_v63 = vadd.f32 %v9778_v32, %v8871_v28  ;;  %v3007_v40 = vpop.f32.mrb[25].mxu0  ;;  %v3113_v4 = vsel %vm15824_vm14, %v12812_v33, -1e+30  ;;  %v15825_v32 = vld [vmem:[#allocation42_spill] sm:$0xff] }
 0x794   :  { %v12824_v34 = vadd.f32 %v8871_v28, %v3007_v40  ;;  %10428 = vmatprep.subr.bf16.mxu1 %v10427_v57  ;;  %v15819_v28 = vld [vmem:[#allocation72_spill] sm:$0xff]  ;;  %vm15826_vm10 = vcmp.eq.s32.totalorder %v15825_v32, 1  ;;  %v15827_v40 = vld [vmem:[#allocation74_spill] sm:$0xff]  ;;  %v3119_v29 = vsel %vm679_vm8, %v3113_v4, -inf }
 0x795   :  { %10430 = vmatpush3.bf16.msra.mxu1 %v10427_v57  ;;  %vm15820_vm1 = vcmp.eq.s32.totalorder %v15819_v28, 1  ;;  %v3118_v9 = vsel %vm15822_vm7, %v12822_v63, -1e+30  ;;  %v3114_v57 = vsel %vm15826_vm10, %v12810_v27, -1e+30  ;;  %vm15828_vm5 = vcmp.eq.s32.totalorder %v15827_v40, 1 }
 0x796   :  { %v10431_v46 = vpack.c.bf16 %v12822_v63, %v12824_v34  ;;  %v3117_v25 = vsel %vm15820_vm1, %v12824_v34, -1e+30  ;;  %v3136_v55 = vsel %vm15828_vm5, %v12812_v33, -1e+30  ;;  %vm15834_vm1 = vcmp.eq.s32.totalorder %v15833_v51, 1  ;;  %v15837_v40 = vld [vmem:[#allocation47_spill] sm:$0xff] }
 0x797   :  { %v3123_v15 = vsel %vm679_vm8, %v3117_v25, -inf  ;;  %v3137_v8 = vsel %vm15834_vm1, %v12810_v27, -1e+30  ;;  %vm15836_vm7 = vcmp.eq.s32.totalorder %v15835_v6, 1  ;;  %v3120_v36 = vsel %vm679_vm8, %v3114_v57, -inf  ;;  %v15839_v25 = vld [vmem:[#allocation48_spill] sm:$0xff] }
 0x798   :  { %10432 = vmatprep.subr.bf16.mxu1 %v10431_v46  ;;  %v3160_v44 = vsel %vm15836_vm7, %v12810_v27, -1e+30  ;;  %vm15838_vm14 = vcmp.eq.s32.totalorder %v15837_v40, 1  ;;  %vm15840_vm10 = vcmp.eq.s32.totalorder %v15839_v25, 1  ;;  %v3142_v32 = vsel %vm679_vm8, %v3136_v55, -inf  ;;  %v15841_v6 = vld [vmem:[#allocation46_spill] sm:$0xff] }
 0x799   :  { %10434 = vmatpush3.bf16.msra.mxu1 %v10431_v46  ;;  %v3140_v46 = vsel %vm15830_vm11, %v12824_v34, -1e+30  ;;  %vm15842_vm5 = vcmp.eq.s32.totalorder %v15841_v6, 1  ;;  %v15843_v57 = vld [vmem:[#allocation84_spill] sm:$0xff]  ;;  %v15845_v40 = vld [vmem:[#allocation54_spill] sm:$0xff]  ;;  %v3124_v25 = vmax.f32 %v3119_v29, %v3123_v15  ;;  %v3143_v55 = vsel %vm679_vm8, %v3137_v8, -inf }
 0x79a   :  { %10436 = vmatprep.subr.bf16.mxu1 %v10435_v38  ;;  %v3146_v51 = vsel %vm679_vm8, %v3140_v46, -inf  ;;  %v3159_v4 = vsel %vm15842_vm5, %v12812_v33, -1e+30  ;;  %vm15844_vm11 = vcmp.eq.s32.totalorder %v15843_v57, 1  ;;  %v3166_v46 = vsel %vm679_vm8, %v3160_v44, -inf  ;;  %v15847_v6 = vld [vmem:[#allocation55_spill] sm:$0xff] }
 0x79b   :  { %v3115_v54 = vsel %vm15844_vm11, %v12818_v20, -1e+30  ;;  %vm15848_vm1 = vcmp.eq.s32.totalorder %v15847_v6, 1  ;;  %v15849_v57 = vld [vmem:[#allocation86_spill] sm:$0xff]  ;;  %v3165_v8 = vsel %vm679_vm8, %v3159_v4, -inf  ;;  %v15853_v29 = vld [vmem:[#allocation88_spill] sm:$0xff] }
 0x79c   :  { %9792 = vmatmul.mubr.msk.f32.vlgmr.msra.gmra.mrb[28].mxu1 %vm15811_vm13, %v15818_v58  ;;  %v3138_v50 = vsel %vm15848_vm1, %v12818_v20, -1e+30  ;;  %vm15850_vm7 = vcmp.eq.s32.totalorder %v15849_v57, 1 }
 0x79d   :  { %10438 = vmatpush3.bf16.msra.mxu1 %v10435_v38  ;;  %v15831_v38 = vld [vmem:[#allocation76_spill] sm:$0xff]  ;;  %v3139_v59 = vsel %vm15850_vm7, %v12816_v16, -1e+30 }
 0x79e   :  { %10440 = vmatprep.subr.bf16.mxu1 %v10439_v5  ;;  %vm15832_vm13 = vcmp.eq.s32.totalorder %v15831_v38, 1  ;;  %v3163_v38 = vsel %vm15838_vm14, %v12824_v34, -1e+30 }
 0x79f   :  { %v3141_v19 = vsel %vm15832_vm13, %v12822_v63, -1e+30  ;;  %vm15846_vm13 = vcmp.eq.s32.totalorder %v15845_v40, 1  ;;  %v3147_v40 = vmax.f32 %v3142_v32, %v3146_v51  ;;  %v3144_v32 = vsel %vm679_vm8, %v3138_v50, -inf }
 0x7a0   :  { %v3148_v39 = vsel %vm679_vm8, %v3141_v19, -inf  ;;  %v3116_v28 = vsel %vm15846_vm13, %v12816_v16, -1e+30  ;;  %v3169_v19 = vsel %vm679_vm8, %v3163_v38, -inf }
 0x7a1   :  { %10442 = vmatpush3.bf16.msra.mxu1 %v10439_v5  ;;  %v3125_v5 = vsel %vm679_vm8, %v3118_v9, -inf  ;;  %v3164_v9 = vsel %vm15840_vm10, %v12822_v63, -1e+30  ;;  %v3149_v23 = vmax.f32 %v3143_v55, %v3148_v39  ;;  %v3122_v15 = vsel %vm679_vm8, %v3116_v28, -inf }
 0x7a2   :  { %10444 = vmatprep.subr.bf16.mxu1 %v12836_v12  ;;  %v3126_v58 = vmax.f32 %v3120_v36, %v3125_v5  ;;  %v3171_v17 = vsel %vm679_vm8, %v3164_v9, -inf  ;;  %v3121_v36 = vsel %vm679_vm8, %v3115_v54, -inf  ;;  %v15851_v5 = vld [vmem:[#allocation62_spill] sm:$0xff]  ;;  %vm15854_vm10 = vcmp.eq.s32.totalorder %v15853_v29, 1  ;;  %v15855_v29 = vld [vmem:[#allocation96_spill] sm:$0xff] }
 0x7a3   :  { %vm15852_vm14 = vcmp.eq.s32.totalorder %v15851_v5, 1  ;;  %v3161_v9 = vsel %vm15854_vm10, %v12818_v20, -1e+30  ;;  %v3170_v6 = vmax.f32 %v3165_v8, %v3169_v19  ;;  %v3172_v57 = vmax.f32 %v3166_v46, %v3171_v17  ;;  %v15857_v17 = vld [vmem:[#allocation58_spill] sm:$0xff]  ;;  %v15865_v8 = vld [vmem:[#allocation65_spill] sm:$0xff] }
 0x7a4   :  { %v3162_v38 = vsel %vm15852_vm14, %v12816_v16, -1e+30  ;;  %v3127_v44 = vmax.f32 %v3124_v25, %v3126_v58  ;;  %v3145_v39 = vsel %vm679_vm8, %v3139_v59, -inf  ;;  %v3128_v54 = vmax.f32 %v3121_v36, %v3122_v15  ;;  %v15861_v36 = vld [vmem:[#allocation57_spill] sm:$0xff]  ;;  %v15863_v15 = vld [vmem:[#allocation64_spill] sm:$0xff] }
 0x7a5   :  { %v3150_v51 = vmax.f32 %v3147_v40, %v3149_v23  ;;  %v3167_v28 = vsel %vm679_vm8, %v3161_v9, -inf  ;;  %v3168_v55 = vsel %vm679_vm8, %v3162_v38, -inf  ;;  %v3151_v18 = vmax.f32 %v3144_v32, %v3145_v39  ;;  %v15859_v23 = vld [vmem:[#allocation56_spill] sm:$0xff]  ;;  %v15867_v32 = vld [vmem:[#allocation73_spill] sm:$0xff] }
 0x7a6   :  { %v3129_v5 = vmax.f32 %v3127_v44, %v3128_v54  ;;  %v3173_v4 = vmax.f32 %v3170_v6, %v3172_v57  ;;  %v3174_v25 = vmax.f32 %v3167_v28, %v3168_v55  ;;  %vm15856_vm5 = vcmp.eq.s32.totalorder %v15855_v29, 1  ;;  %v15869_v54 = vld [vmem:[#allocation98_spill] sm:$0xff] }
 0x7a7   :  { %v3152_v58 = vmax.f32 %v3150_v51, %v3151_v18  ;;  %v3186_v19 = vsel %vm15856_vm5, %v12824_v34, -1e+30  ;;  %vm15858_vm11 = vcmp.eq.s32.totalorder %v15857_v17, 1  ;;  %vm15860_vm13 = vcmp.eq.s32.totalorder %v15859_v23, 1 }
 0x7a8   :  { %v3187_v50 = vsel %vm15858_vm11, %v12822_v63, -1e+30  ;;  %v3130_v59 = vrot.slane %v3129_v5, 4  ;;  %v3175_v46 = vmax.f32 %v3173_v4, %v3174_v25  ;;  %v3182_v40 = vsel %vm15860_vm13, %v12812_v33, -1e+30  ;;  %v15871_v4 = vld [vmem:[#allocation63_spill] sm:$0xff] }
 0x7a9   :  { %vm15862_vm1 = vcmp.eq.s32.totalorder %v15861_v36, 1  ;;  %v3192_v18 = vsel %vm679_vm8, %v3186_v19, -inf  ;;  %v3194_v57 = vsel %vm679_vm8, %v3187_v50, -inf  ;;  %vm15864_vm7 = vcmp.eq.s32.totalorder %v15863_v15, 1  ;;  %v15873_v19 = vld [vmem:[#allocation104_spill] sm:$0xff] }
 0x7aa   :  { %v3183_v6 = vsel %vm15862_vm1, %v12810_v27, -1e+30  ;;  %v3209_v38 = vsel %vm15864_vm7, %v12824_v34, -1e+30  ;;  %vm15866_vm14 = vcmp.eq.s32.totalorder %v15865_v8, 1  ;;  %v3153_v9 = vrot.slane %v3152_v58, 4 }
 0x7ab   :  { %v3210_v44 = vsel %vm15866_vm14, %v12822_v63, -1e+30  ;;  %vm15868_vm10 = vcmp.eq.s32.totalorder %v15867_v32, 1  ;;  %vm15870_vm5 = vcmp.eq.s32.totalorder %v15869_v54, 1  ;;  %v3188_v28 = vsel %vm679_vm8, %v3182_v40, -inf }
 0x7ac   :  { %v3184_v39 = vsel %vm15868_vm10, %v12818_v20, -1e+30  ;;  %v3185_v51 = vsel %vm15870_vm5, %v12816_v16, -1e+30  ;;  %v3189_v55 = vsel %vm679_vm8, %v3183_v6, -inf  ;;  %vm15872_vm11 = vcmp.eq.s32.totalorder %v15871_v4, 1 }
 0x7ad   :  { %v3205_v25 = vsel %vm15872_vm11, %v12812_v33, -1e+30  ;;  %vm15874_vm13 = vcmp.eq.s32.totalorder %v15873_v19, 1  ;;  %v3193_v8 = vmax.f32 %v3188_v28, %v3192_v18  ;;  %v3195_v15 = vmax.f32 %v3189_v55, %v3194_v57  ;;  %v15875_v19 = vld [vmem:[#allocation89_spill] sm:$0xff]  ;;  %v15877_v57 = vld [vmem:[#allocation107_spill] sm:$0xff] }
 0x7ae   :  { %v3206_v50 = vsel %vm15874_vm13, %v12810_v27, -1e+30  ;;  %v3215_v32 = vsel %vm679_vm8, %v3209_v38, -inf  ;;  %v3217_v36 = vsel %vm679_vm8, %v3210_v44, -inf  ;;  %v3131_v54 = vmax.f32 %v3129_v5, %v3130_v59 }
 0x7af   :  { %v3176_v23 = vrot.slane %v3175_v46, 4  ;;  %v3190_v40 = vsel %vm679_vm8, %v3184_v39, -inf  ;;  %v3154_v17 = vmax.f32 %v3152_v58, %v3153_v9  ;;  %v3191_v6 = vsel %vm679_vm8, %v3185_v51, -inf }
 0x7b0   :  { %v3211_v4 = vsel %vm679_vm8, %v3205_v25, -inf  ;;  %v3212_v29 = vsel %vm679_vm8, %v3206_v50, -inf  ;;  %vm15876_vm1 = vcmp.eq.s32.totalorder %v15875_v19, 1  ;;  %vm15878_vm7 = vcmp.eq.s32.totalorder %v15877_v57, 1  ;;  %v15879_v57 = vld [vmem:[#allocation115_spill] sm:$0xff] }
 0x7b1   :  { %v3207_v18 = vsel %vm15876_vm1, %v12818_v20, -1e+30  ;;  %v3208_v38 = vsel %vm15878_vm7, %v12816_v16, -1e+30  ;;  %v3216_v44 = vmax.f32 %v3211_v4, %v3215_v32  ;;  %v3218_v5 = vmax.f32 %v3212_v29, %v3217_v36  ;;  %v15881_v29 = vld [vmem:[#allocation79_spill] sm:$0xff]  ;;  %v15885_v4 = vld [vmem:[#allocation77_spill] sm:$0xff] }
 0x7b2   :  { %v3196_v59 = vmax.f32 %v3193_v8, %v3195_v15  ;;  %v3132_v28 = vrot.slane %v3131_v54, 2  ;;  %v3177_v39 = vmax.f32 %v3175_v46, %v3176_v23  ;;  %v3155_v58 = vrot.slane %v3154_v17, 2  ;;  %v15883_v15 = vld [vmem:[#allocation75_spill] sm:$0xff] }
 0x7b3   :  { %v3197_v9 = vmax.f32 %v3190_v40, %v3191_v6  ;;  %v3213_v51 = vsel %vm679_vm8, %v3207_v18, -inf  ;;  %v3214_v55 = vsel %vm679_vm8, %v3208_v38, -inf  ;;  %v3219_v25 = vmax.f32 %v3216_v44, %v3218_v5  ;;  %v15887_v44 = vld [vmem:[#allocation105_spill] sm:$0xff] }
 0x7b4   :  { %v3133_v11 = vmax.f32 %v3131_v54, %v3132_v28  ;;  %v3178_v19 = vrot.slane %v3177_v39, 2  ;;  %v3220_v21 = vmax.f32 %v3213_v51, %v3214_v55  ;;  %v3156_v53 = vmax.f32 %v3154_v17, %v3155_v58 }
 0x7b5   :  { %v3198_v50 = vmax.f32 %v3196_v59, %v3197_v9  ;;  %vm15880_vm14 = vcmp.eq.s32.totalorder %v15879_v57, 1  ;;  %vm15882_vm10 = vcmp.eq.s32.totalorder %v15881_v29, 1  ;;  %vm15884_vm5 = vcmp.eq.s32.totalorder %v15883_v15, 1  ;;  %v15889_v59 = vld [vmem:[#allocation117_spill] sm:$0xff] }
 0x7b6   :  { %v3232_v32 = vsel %vm15880_vm14, %v12824_v34, -1e+30  ;;  %v3233_v46 = vsel %vm15882_vm10, %v12822_v63, -1e+30  ;;  %v3221_v23 = vmax.f32 %v3219_v25, %v3220_v21  ;;  %v3228_v8 = vsel %vm15884_vm5, %v12812_v33, -1e+30 }
 0x7b7   :  { %v3199_v36 = vrot.slane %v3198_v50, 4  ;;  %vm15886_vm11 = vcmp.eq.s32.totalorder %v15885_v4, 1  ;;  %v3134_v40 = vrot.slane %v3133_v11, 1  ;;  %v3179_v17 = vmax.f32 %v3177_v39, %v3178_v19  ;;  %v15893_v4 = vld [vmem:[#allocation122_spill] sm:$0xff] }
 0x7b8   :  { %v3229_v54 = vsel %vm15886_vm11, %v12810_v27, -1e+30  ;;  %v3238_v6 = vsel %vm679_vm8, %v3232_v32, -inf  ;;  %v3240_v18 = vsel %vm679_vm8, %v3233_v46, -inf  ;;  %v3157_v38 = vrot.slane %v3156_v53, 1 }
 0x7b9   :  { %vm15888_vm13 = vcmp.eq.s32.totalorder %v15887_v44, 1  ;;  %v3222_v5 = vrot.slane %v3221_v23, 4  ;;  %vm15890_vm1 = vcmp.eq.s32.totalorder %v15889_v59, 1  ;;  %v3234_v58 = vsel %vm679_vm8, %v3228_v8, -inf  ;;  %v15891_v44 = vld [vmem:[#allocation91_spill] sm:$0xff] }
 0x7ba   :  { %v3230_v21 = vsel %vm15888_vm13, %v12818_v20, -1e+30  ;;  %v3231_v28 = vsel %vm15890_vm1, %v12816_v16, -1e+30  ;;  %v3235_v9 = vsel %vm679_vm8, %v3229_v54, -inf  ;;  %v12981_v51 = vmax.f32 %v3198_v50, %v3199_v36 }
 0x7bb   :  { %v3239_v19 = vmax.f32 %v3234_v58, %v3238_v6  ;;  %v3241_v39 = vmax.f32 %v3235_v9, %v3240_v18  ;;  %v12983_v55 = vmax.f32 %v3133_v11, %v3134_v40  ;;  %v3180_v25 = vrot.slane %v3179_v17, 1  ;;  %v15895_v11 = vld [vmem:[#allocation127_spill] sm:$0xff]  ;;  %v15897_v40 = vld [vmem:[#allocation125_spill] sm:$0xff] }
 0x7bc   :  { %v3236_v32 = vsel %vm679_vm8, %v3230_v21, -inf  ;;  %v3237_v46 = vsel %vm679_vm8, %v3231_v28, -inf  ;;  %vm15892_vm7 = vcmp.eq.s32.totalorder %v15891_v44, 1  ;;  %vm15894_vm14 = vcmp.eq.s32.totalorder %v15893_v4, 1  ;;  %v15899_v28 = vld [vmem:[#allocation93_spill] sm:$0xff] }
 0x7bd   :  { %v3251_v59 = vsel %vm15892_vm7, %v12812_v33, -1e+30  ;;  %v3253_v8 = vsel %vm15894_vm14, %v12818_v20, -1e+30  ;;  %v12993_v54 = vmax.f32 %v3156_v53, %v3157_v38  ;;  %v12995_v50 = vmax.f32 %v3221_v23, %v3222_v5  ;;  %v15901_v53 = vld [vmem:[#allocation95_spill] sm:$0xff] }
 0x7be   :  { %vm15896_vm10 = vcmp.eq.s32.totalorder %v15895_v11, 1  ;;  %vm15898_vm5 = vcmp.eq.s32.totalorder %v15897_v40, 1  ;;  %v3242_v21 = vmax.f32 %v3239_v19, %v3241_v39  ;;  %vm15900_vm11 = vcmp.eq.s32.totalorder %v15899_v28, 1  ;;  %v15903_v39 = vld [vmem:[#allocation50_spill] sm:$0xff]  ;;  %v15911_v28 = vld [vmem:[#allocation52_spill] sm:$0xff] }
 0x7bf   :  { %v3254_v36 = vsel %vm15896_vm10, %v12816_v16, -1e+30  ;;  %v3255_v6 = vsel %vm15898_vm5, %v12824_v34, -1e+30  ;;  %v3252_v58 = vsel %vm15900_vm11, %v12810_v27, -1e+30  ;;  %v13010_v38 = vmax.f32 %v3179_v17, %v3180_v25 }
 0x7c0   :  { %vm15902_vm13 = vcmp.eq.s32.totalorder %v15901_v53, 1  ;;  %v3243_v5 = vmax.f32 %v3236_v32, %v3237_v46  ;;  %v3257_v9 = vsel %vm679_vm8, %v3251_v59, -inf  ;;  %v13014_v11 = vsel %vm679_vm8, %v3253_v8, -inf  ;;  %v15905_v53 = vld [vmem:[#allocation82_spill] sm:$0xff]  ;;  %v15907_v46 = vld [vmem:[#allocation80_spill] sm:$0xff]  ;;  %v15913_v25 = vld [vmem:[#allocation53_spill] sm:$0xff] }
 0x7c1   :  { %v3256_v23 = vsel %vm15902_vm13, %v12822_v63, -1e+30  ;;  %v13017_v40 = vsel %vm679_vm8, %v3254_v36, -inf  ;;  %v3261_v19 = vsel %vm679_vm8, %v3255_v6, -inf  ;;  %vm15904_vm1 = vcmp.eq.s32.totalorder %v15903_v39, 1  ;;  %v15909_v6 = vld [vmem:[#allocation49_spill] sm:$0xff] }
 0x7c2   :  { %v3301_v18 = vsel %vm15904_vm1, %v12824_v34, -1e+30  ;;  %vm15906_vm7 = vcmp.eq.s32.totalorder %v15905_v53, 1  ;;  %v3258_v59 = vsel %vm679_vm8, %v3252_v58, -inf  ;;  %v3263_v32 = vsel %vm679_vm8, %v3256_v23, -inf }
 0x7c3   :  { %v3302_v17 = vsel %vm15906_vm7, %v12822_v63, -1e+30  ;;  %vm15908_vm14 = vcmp.eq.s32.totalorder %v15907_v46, 1  ;;  %v13032_v36 = vmax.f32 %v3242_v21, %v3243_v5  ;;  %vm15910_vm10 = vcmp.eq.s32.totalorder %v15909_v6, 1  ;;  %v15915_v6 = vld [vmem:[#allocation108_spill] sm:$0xff] }
 0x7c4   :  { %v3297_v8 = vsel %vm15908_vm14, %v12812_v33, -1e+30  ;;  %v3298_v39 = vsel %vm15910_vm10, %v12810_v27, -1e+30  ;;  %vm15912_vm5 = vcmp.eq.s32.totalorder %v15911_v28, 1  ;;  %vm15914_vm11 = vcmp.eq.s32.totalorder %v15913_v25, 1 }
 0x7c5   :  { %v3324_v53 = vsel %vm15912_vm5, %v12824_v34, -1e+30  ;;  %v3325_v58 = vsel %vm15914_vm11, %v12822_v63, -1e+30  ;;  %v3262_v4 = vmax.f32 %v3257_v9, %v3261_v19  ;;  %v3266_v23 = vmax.f32 %v13014_v11, %v13017_v40  ;;  %v15917_v28 = vld [vmem:[#allocation51_spill] sm:$0xff]  ;;  %v15919_v25 = vld [vmem:[#allocation92_spill] sm:$0xff] }
 0x7c6   :  { %v3307_v46 = vsel %vm679_vm8, %v3301_v18, -inf  ;;  %v3309_v21 = vsel %vm679_vm8, %v3302_v17, -inf  ;;  %v3264_v5 = vmax.f32 %v3258_v59, %v3263_v32  ;;  %vm15916_vm13 = vcmp.eq.s32.totalorder %v15915_v6, 1  ;;  %v15921_v17 = vld [vmem:[#allocation90_spill] sm:$0xff] }
 0x7c7   :  { %v3274_v44 = vsel %vm15916_vm13, %v12812_v33, -1e+30  ;;  %vm15918_vm1 = vcmp.eq.s32.totalorder %v15917_v28, 1  ;;  %vm15920_vm7 = vcmp.eq.s32.totalorder %v15919_v25, 1  ;;  %v3303_v19 = vsel %vm679_vm8, %v3297_v8, -inf  ;;  %v15923_v32 = vld [vmem:[#allocation66_spill] sm:$0xff] }
 0x7c8   :  { %v3320_v15 = vsel %vm15918_vm1, %v12812_v33, -1e+30  ;;  %v3321_v9 = vsel %vm15920_vm7, %v12810_v27, -1e+30  ;;  %v3304_v11 = vsel %vm679_vm8, %v3298_v39, -inf  ;;  %v3330_v40 = vsel %vm679_vm8, %v3324_v53, -inf }
 0x7c9   :  { %v3332_v18 = vsel %vm679_vm8, %v3325_v58, -inf  ;;  %vm15922_vm14 = vcmp.eq.s32.totalorder %v15921_v17, 1  ;;  %vm15924_vm10 = vcmp.eq.s32.totalorder %v15923_v32, 1  ;;  %v3308_v6 = vmax.f32 %v3303_v19, %v3307_v46  ;;  %v15925_v25 = vld [vmem:[#allocation67_spill] sm:$0xff]  ;;  %v15927_v39 = vld [vmem:[#allocation94_spill] sm:$0xff]  ;;  %v15931_v46 = vld [vmem:[#allocation61_spill] sm:$0xff] }
 0x7ca   :  { %v3299_v59 = vsel %vm15922_vm14, %v12818_v20, -1e+30  ;;  %v3300_v28 = vsel %vm15924_vm10, %v12816_v16, -1e+30  ;;  %v3310_v29 = vmax.f32 %v3304_v11, %v3309_v21  ;;  %vm15926_vm5 = vcmp.eq.s32.totalorder %v15925_v25, 1  ;;  %v15933_v11 = vld [vmem:[#allocation110_spill] sm:$0xff] }
 0x7cb   :  { %v3322_v8 = vsel %vm15926_vm5, %v12818_v20, -1e+30  ;;  %vm15928_vm11 = vcmp.eq.s32.totalorder %v15927_v39, 1  ;;  %v3326_v58 = vsel %vm679_vm8, %v3320_v15, -inf  ;;  %v3327_v57 = vsel %vm679_vm8, %v3321_v9, -inf }
 0x7cc   :  { %v3323_v53 = vsel %vm15928_vm11, %v12816_v16, -1e+30  ;;  %v3331_v17 = vmax.f32 %v3326_v58, %v3330_v40  ;;  %v3333_v0 = vmax.f32 %v3327_v57, %v3332_v18  ;;  %vm15930_vm13 = vcmp.eq.s32.totalorder %v15929_v62, 1  ;;  %v15935_v18 = vld [vmem:[#allocation59_spill] sm:$0xff]  ;;  %v15939_v62 = vld [vmem:[#allocation132_spill] sm:$0xff] }
 0x7cd   :  { %v3347_v32 = vsel %vm15930_vm13, %v12824_v34, -1e+30  ;;  %vm15932_vm1 = vcmp.eq.s32.totalorder %v15931_v46, 1  ;;  %vm15934_vm7 = vcmp.eq.s32.totalorder %v15933_v11, 1  ;;  %v3305_v15 = vsel %vm679_vm8, %v3299_v59, -inf  ;;  %v15937_v46 = vld [vmem:[#allocation100_spill] sm:$0xff] }
 0x7ce   :  { %v3348_v21 = vsel %vm15932_vm1, %v12822_v63, -1e+30  ;;  %v3275_v39 = vsel %vm15934_vm7, %v12810_v27, -1e+30  ;;  %v3306_v9 = vsel %vm679_vm8, %v3300_v28, -inf  ;;  %v3328_v57 = vsel %vm679_vm8, %v3322_v8, -inf }
 0x7cf   :  { %v3329_v40 = vsel %vm679_vm8, %v3323_v53, -inf  ;;  %vm15936_vm14 = vcmp.eq.s32.totalorder %v15935_v18, 1  ;;  %vm15938_vm10 = vcmp.eq.s32.totalorder %v15937_v46, 1  ;;  %vm15940_vm5 = vcmp.eq.s32.totalorder %v15939_v62, 1  ;;  %v15941_v59 = vld [vmem:[#allocation131_spill] sm:$0xff] }
 0x7d0   :  { %v3343_v58 = vsel %vm15936_vm14, %v12812_v33, -1e+30  ;;  %v3344_v19 = vsel %vm15938_vm10, %v12810_v27, -1e+30  ;;  %v3276_v11 = vsel %vm15940_vm5, %v12818_v20, -1e+30  ;;  %v3265_v25 = vmax.f32 %v3262_v4, %v3264_v5 }
 0x7d1   :  { %vm15942_vm11 = vcmp.eq.s32.totalorder %v15941_v59, 1  ;;  %v3353_v8 = vsel %vm679_vm8, %v3347_v32, -inf  ;;  %v3355_v53 = vsel %vm679_vm8, %v3348_v21, -inf  ;;  %vm15943_vm13 = vcmp.eq.s32.totalorder %v12243_v52, 1 }
 0x7d2   :  { %v3277_v28 = vsel %vm15942_vm11, %v12816_v16, -1e+30  ;;  %v3278_v18 = vsel %vm15943_vm13, %v12824_v34, -1e+30  ;;  %v3311_v49 = vmax.f32 %v3308_v6, %v3310_v29  ;;  %v3334_v46 = vmax.f32 %v3331_v17, %v3333_v0 }
 0x7d3   :  { %v3312_v13 = vmax.f32 %v3305_v15, %v3306_v9  ;;  %v3335_v56 = vmax.f32 %v3328_v57, %v3329_v40  ;;  %v3349_v62 = vsel %vm679_vm8, %v3343_v58, -inf  ;;  %v3350_v14 = vsel %vm679_vm8, %v3344_v19, -inf  ;;  %v15947_v15 = vld [vmem:[#allocation109_spill] sm:$0xff]  ;;  %v15949_v57 = vld [vmem:[#allocation70_spill] sm:$0xff] }
 0x7d4   :  { %vm15944_vm1 = vcmp.eq.s32.totalorder %v15747_v31, 1  ;;  %vm15945_vm7 = vcmp.eq.s32.totalorder %v15746_v42, 1  ;;  %v3354_v5 = vmax.f32 %v3349_v62, %v3353_v8  ;;  %v3356_v32 = vmax.f32 %v3350_v14, %v3355_v53 }
 0x7d5   :  { %v3345_v59 = vsel %vm15944_vm1, %v12818_v20, -1e+30  ;;  %v3346_v4 = vsel %vm15945_vm7, %v12816_v16, -1e+30  ;;  %vm15946_vm14 = vcmp.eq.s32.totalorder %v15748_v47, 1  ;;  %v3280_v29 = vsel %vm679_vm8, %v3274_v44, -inf }
 0x7d6   :  { %v3279_v0 = vsel %vm15946_vm14, %v12822_v63, -1e+30  ;;  %v3281_v6 = vsel %vm679_vm8, %v3275_v39, -inf  ;;  %v3284_v17 = vsel %vm679_vm8, %v3278_v18, -inf  ;;  %v3313_v21 = vmax.f32 %v3311_v49, %v3312_v13  ;;  %v15951_v49 = vld [vmem:[#allocation68_spill] sm:$0xff]  ;;  %v15953_v18 = vld [vmem:[#allocation69_spill] sm:$0xff] }
 0x7d7   :  { %v3336_v19 = vmax.f32 %v3334_v46, %v3335_v56  ;;  %vm15948_vm10 = vcmp.eq.s32.totalorder %v15947_v15, 1  ;;  %vm15950_vm5 = vcmp.eq.s32.totalorder %v15949_v57, 1  ;;  %v13126_v62 = vsel %vm679_vm8, %v3276_v11, -inf  ;;  %v15964_v57 = vld [vmem:[#allocation85_spill] sm:$0xff] }
 0x7d8   :  { %v3370_v9 = vsel %vm15948_vm10, %v12824_v34, -1e+30  ;;  %v3371_v14 = vsel %vm15950_vm5, %v12822_v63, -1e+30  ;;  %v13129_v40 = vsel %vm679_vm8, %v3277_v28, -inf  ;;  %v3351_v44 = vsel %vm679_vm8, %v3345_v59, -inf }
 0x7d9   :  { %v3352_v39 = vsel %vm679_vm8, %v3346_v4, -inf  ;;  %v13133_v13 = vmax.f32 %v3265_v25, %v3266_v23  ;;  %v3357_v56 = vmax.f32 %v3354_v5, %v3356_v32  ;;  %vm15952_vm11 = vcmp.eq.s32.totalorder %v15951_v49, 1  ;;  %v15955_v23 = vld [vmem:[#allocation97_spill] sm:$0xff] }
 0x7da   :  { %v3366_v46 = vsel %vm15952_vm11, %v12812_v33, -1e+30  ;;  %vm15954_vm13 = vcmp.eq.s32.totalorder %v15953_v18, 1  ;;  %v3285_v11 = vmax.f32 %v3280_v29, %v3284_v17  ;;  %v3286_v8 = vsel %vm679_vm8, %v3279_v0, -inf  ;;  %v15957_v18 = vld [vmem:[#allocation119_spill] sm:$0xff] }
 0x7db   :  { %v3367_v58 = vsel %vm15954_vm13, %v12810_v27, -1e+30  ;;  %v3376_v28 = vsel %vm679_vm8, %v3370_v9, -inf  ;;  %v3378_v59 = vsel %vm679_vm8, %v3371_v14, -inf  ;;  %v3314_v53 = vrot.slane %v3313_v21, 4  ;;  %v15959_v0 = vld [vmem:[#allocation87_spill] sm:$0xff] }
 0x7dc   :  { %v3337_v4 = vrot.slane %v3336_v19, 4  ;;  %v3358_v25 = vmax.f32 %v3351_v44, %v3352_v39  ;;  %vm15956_vm1 = vcmp.eq.s32.totalorder %v15955_v23, 1  ;;  %v3372_v32 = vsel %vm679_vm8, %v3366_v46, -inf }
 0x7dd   :  { %v3368_v5 = vsel %vm15956_vm1, %v12818_v20, -1e+30  ;;  %v3373_v49 = vsel %vm679_vm8, %v3367_v58, -inf  ;;  %vm15958_vm7 = vcmp.eq.s32.totalorder %v15957_v18, 1  ;;  %vm15960_vm14 = vcmp.eq.s32.totalorder %v15959_v0, 1  ;;  %v15962_v58 = vld [vmem:[#allocation83_spill] sm:$0xff] }
 0x7de   :  { %v3393_v29 = vsel %vm15958_vm7, %v12824_v34, -1e+30  ;;  %v3394_v17 = vsel %vm15960_vm14, %v12822_v63, -1e+30  ;;  %v3359_v9 = vmax.f32 %v3357_v56, %v3358_v25  ;;  %vm15961_vm10 = vcmp.eq.s32.totalorder %v15758_v37, 1 }
 0x7df   :  { %v3369_v14 = vsel %vm15961_vm10, %v12816_v16, -1e+30  ;;  %v3377_v44 = vmax.f32 %v3372_v32, %v3376_v28  ;;  %v3379_v39 = vmax.f32 %v3373_v49, %v3378_v59  ;;  %v3287_v23 = vmax.f32 %v3281_v6, %v3286_v8 }
 0x7e0   :  { %vm15963_vm5 = vcmp.eq.s32.totalorder %v15962_v58, 1  ;;  %vm15965_vm11 = vcmp.eq.s32.totalorder %v15964_v57, 1  ;;  %v13166_v15 = vmax.f32 %v3313_v21, %v3314_v53  ;;  %v13168_v56 = vmax.f32 %v3336_v19, %v3337_v4 }
 0x7e1   :  { %v3389_v18 = vsel %vm15963_vm5, %v12812_v33, -1e+30  ;;  %v3390_v0 = vsel %vm15965_vm11, %v12810_v27, -1e+30  ;;  %v3399_v25 = vsel %vm679_vm8, %v3393_v29, -inf  ;;  %v3401_v49 = vsel %vm679_vm8, %v3394_v17, -inf }
 0x7e2   :  { %v3374_v6 = vsel %vm679_vm8, %v3368_v5, -inf  ;;  %v3375_v8 = vsel %vm679_vm8, %v3369_v14, -inf  ;;  %v3391_v59 = vsel %vm1719_vm9, %v12818_v20, -1e+30  ;;  %v3392_v46 = vsel %vm1720_vm2, %v12816_v16, -1e+30 }
 0x7e3   :  { %v3360_v21 = vrot.slane %v3359_v9, 4  ;;  %v3380_v53 = vmax.f32 %v3377_v44, %v3379_v39  ;;  %v3395_v19 = vsel %vm679_vm8, %v3389_v18, -inf  ;;  %v3396_v4 = vsel %vm679_vm8, %v3390_v0, -inf  ;;  %v15969_v14 = vld [vmem:[#allocation103_spill] sm:$0xff] }
 0x7e4   :  { %v3400_v29 = vmax.f32 %v3395_v19, %v3399_v25  ;;  %v3402_v17 = vmax.f32 %v3396_v4, %v3401_v49  ;;  %vm15968_vm13 = vcmp.eq.s32.totalorder %v15765_v7, 1  ;;  %vm15970_vm1 = vcmp.eq.s32.totalorder %v15969_v14, 1 }
 0x7e5   :  { %v3416_v5 = vsel %vm15968_vm13, %v12824_v34, -1e+30  ;;  %v3417_v28 = vsel %vm15970_vm1, %v12822_v63, -1e+30  ;;  %v3288_v57 = vmax.f32 %v3285_v11, %v3287_v23  ;;  %v3381_v58 = vmax.f32 %v3374_v6, %v3375_v8 }
 0x7e6   :  { %v3397_v32 = vsel %vm679_vm8, %v3391_v59, -inf  ;;  %v3398_v44 = vsel %vm679_vm8, %v3392_v46, -inf  ;;  %v3316_v18 = vrot.slane %v13166_v15, 2  ;;  %v3339_v0 = vrot.slane %v13168_v56, 2 }
 0x7e7   :  { %v3412_v39 = vsel %vm1764_vm0, %v12812_v33, -1e+30  ;;  %v3413_v25 = vsel %vm1765_vm15, %v12810_v27, -1e+30  ;;  %v13198_v49 = vmax.f32 %v3359_v9, %v3360_v21  ;;  %v3382_v11 = vmax.f32 %v3380_v53, %v3381_v58  ;;  %v15974_v58 = vld [vmem:[#allocation126_spill] sm:$0xff] }
 0x7e8   :  { %v3422_v23 = vsel %vm679_vm8, %v3416_v5, -inf  ;;  %v3424_v6 = vsel %vm679_vm8, %v3417_v28, -inf  ;;  %v3403_v46 = vmax.f32 %v3400_v29, %v3402_v17  ;;  %v3404_v8 = vmax.f32 %v3397_v32, %v3398_v44  ;;  %v15976_v17 = vld [vmem:[#allocation118_spill] sm:$0xff] }
 0x7e9   :  { %vm15971_vm7 = vcmp.eq.s32.totalorder %v12151_v45, 1  ;;  %vm15972_vm14 = vcmp.eq.s32.totalorder %v12105_v24, 1  ;;  %vm15973_vm10 = vcmp.eq.s32.totalorder %v12159_v43, 1  ;;  %vm15975_vm5 = vcmp.eq.s32.totalorder %v15974_v58, 1  ;;  %v15978_v58 = vld [vmem:[#allocation130_spill] sm:$0xff] }
 0x7ea   :  { %v3439_v59 = vsel %vm15971_vm7, %v12824_v34, -1e+30  ;;  %v3440_v19 = vsel %vm15972_vm14, %v12822_v63, -1e+30  ;;  %v3414_v9 = vsel %vm15973_vm10, %v12818_v20, -1e+30  ;;  %v3405_v2 = vmax.f32 %v3403_v46, %v3404_v8 }
 0x7eb   :  { %v3415_v21 = vsel %vm15975_vm5, %v12816_v16, -1e+30  ;;  %v3418_v28 = vsel %vm679_vm8, %v3412_v39, -inf  ;;  %v3419_v32 = vsel %vm679_vm8, %v3413_v25, -inf  ;;  %v3435_v29 = vsel %vm1811_vm6, %v12812_v33, -1e+30 }
 0x7ec   :  { %v3423_v53 = vmax.f32 %v3418_v28, %v3422_v23  ;;  %v3425_v4 = vmax.f32 %v3419_v32, %v3424_v6  ;;  %vm15977_vm11 = vcmp.eq.s32.totalorder %v15976_v17, 1  ;;  %v3445_v44 = vsel %vm679_vm8, %v3439_v59, -inf  ;;  %v15980_v25 = vld [vmem:[#allocation135_spill] sm:$0xff] }
 0x7ed   :  { %v3436_v5 = vsel %vm15977_vm11, %v12810_v27, -1e+30  ;;  %v3447_v43 = vsel %vm679_vm8, %v3440_v19, -inf  ;;  %vm15979_vm13 = vcmp.eq.s32.totalorder %v15978_v58, 1  ;;  %vm15981_vm1 = vcmp.eq.s32.totalorder %v15980_v25, 1 }
 0x7ee   :  { %v3462_v39 = vsel %vm15979_vm13, %v12824_v34, -1e+30  ;;  %v3463_v23 = vsel %vm15981_vm1, %v12822_v63, -1e+30  ;;  %v3420_v6 = vsel %vm679_vm8, %v3414_v9, -inf  ;;  %v3421_v28 = vsel %vm679_vm8, %v3415_v21, -inf }
 0x7ef   :  { %v3437_v17 = vsel %vm1813_vm4, %v12818_v20, -1e+30  ;;  %v3438_v19 = vsel %vm1814_vm3, %v12816_v16, -1e+30  ;;  %v3441_v41 = vsel %vm679_vm8, %v3435_v29, -inf  ;;  %v3442_v34 = vsel %vm679_vm8, %v3436_v5, -inf }
 0x7f0   :  { %v3458_v63 = vsel %vm1858_vm12, %v12812_v33, -1e+30  ;;  %v15985_v9 = vld [vmem:[#allocation128_spill] sm:$0xff]  ;;  %v3446_v25 = vmax.f32 %v3441_v41, %v3445_v44  ;;  %v3448_v24 = vmax.f32 %v3442_v34, %v3447_v43  ;;  %v3468_v32 = vsel %vm679_vm8, %v3462_v39, -inf }
 0x7f1   :  { %vm15986_vm7 = vcmp.eq.s32.totalorder %v15985_v9, 1  ;;  %v3470_v45 = vsel %vm679_vm8, %v3463_v23, -inf  ;;  %v3383_v59 = vrot.slane %v3382_v11, 4  ;;  %v3426_v48 = vmax.f32 %v3423_v53, %v3425_v4 }
 0x7f2   :  { %v3459_v21 = vsel %vm15986_vm7, %v12810_v27, -1e+30  ;;  %v3427_v29 = vmax.f32 %v3420_v6, %v3421_v28  ;;  %v3443_v5 = vsel %vm679_vm8, %v3437_v17, -inf  ;;  %v3444_v14 = vsel %vm679_vm8, %v3438_v19, -inf }
 0x7f3   :  { %v3464_v33 = vsel %vm679_vm8, %v3458_v63, -inf  ;;  %v3465_v58 = vsel %vm679_vm8, %v3459_v21, -inf  ;;  %vm15987_vm14 = vcmp.eq.s32.totalorder %v12541_v22, 1  ;;  %vm15988_vm10 = vcmp.eq.s32.totalorder %v12543_v61, 1 }
 0x7f4   :  { %v3460_v43 = vsel %vm15987_vm14, %v12818_v20, -1e+30  ;;  %v3461_v41 = vsel %vm15988_vm10, %v12816_v16, -1e+30  ;;  %v3469_v27 = vmax.f32 %v3464_v33, %v3468_v32  ;;  %v3471_v46 = vmax.f32 %v3465_v58, %v3470_v45 }
 0x7f5   :  { %v15989_v8 = vrot.slane %v13032_v36, 4  ;;  %v3268_v4 = vrot.slane %v13133_v13, 4  ;;  %v15990_v17 = vmax.f32 %v13126_v62, %v13129_v40  ;;  %v3449_v39 = vmax.f32 %v3446_v25, %v3448_v24 }
 0x7f6   :  { %v3317_v23 = vmax.f32 %v13166_v15, %v3316_v18  ;;  %v3340_v20 = vmax.f32 %v13168_v56, %v3339_v0  ;;  %v3362_v6 = vrot.slane %v13198_v49, 2  ;;  %v3428_v16 = vmax.f32 %v3426_v48, %v3427_v29 }
 0x7f7   :  { %v3246_v53 = vmax.f32 %v13032_v36, %v15989_v8  ;;  %v3290_v44 = vmax.f32 %v3288_v57, %v15990_v17  ;;  %v3406_v28 = vrot.slane %v3405_v2, 4  ;;  %v3450_v45 = vmax.f32 %v3443_v5, %v3444_v14  ;;  %v8876_v5 = vld [vmem:[%s15286_s12 + $0x30] sm:$0xff] }
 0x7f8   :  { %v3466_v58 = vsel %vm679_vm8, %v3460_v43, -inf  ;;  %v3467_v36 = vsel %vm679_vm8, %v3461_v41, -inf  ;;  %v15991_v32 = vrot.slane %v12981_v51, 2  ;;  %v15992_v57 = vrot.slane %v12995_v50, 2 }
 0x7f9   :  { %v3384_v15 = vmax.f32 %v3382_v11, %v3383_v59  ;;  %v3472_v62 = vmax.f32 %v3469_v27, %v3471_v46  ;;  %v3247_v40 = vrot.slane %v3246_v53, 2  ;;  %v3291_v56 = vrot.slane %v3290_v44, 4 }
 0x7fa   :  { %v3202_v19 = vmax.f32 %v12981_v51, %v15991_v32  ;;  %v3225_v24 = vmax.f32 %v12995_v50, %v15992_v57  ;;  %vm15993_vm5 = vcmask 1040384   ;;  %v3451_v14 = vmax.f32 %v3449_v39, %v3450_v45 }
 0x7fb   :  { %v3481_v48 = vsel %vm15993_vm5, %v12983_v55, %v12993_v54  ;;  %v3269_v18 = vmax.f32 %v13133_v13, %v3268_v4  ;;  %v3318_v0 = vrot.slane %v3317_v23, 1  ;;  %v3429_v25 = vrot.slane %v3428_v16, 4  ;;  %v8877_v55 = vld [vmem:[%s15286_s12 + $0x38] sm:$0xff]  ;;  %vm15997_vm7 = vmmov %vm15993_vm5 }
 0x7fc   :  { %v3473_v34 = vmax.f32 %v3466_v58, %v3467_v36  ;;  %v3341_v63 = vrot.slane %v3340_v20, 1  ;;  %v3363_v51 = vmax.f32 %v13198_v49, %v3362_v6  ;;  %v3407_v21 = vmax.f32 %v3405_v2, %v3406_v28  ;;  %v3671_v58 = vld [vmem:[#allocation14 + $0x28] sm:$0xff] }
 0x7fd   :  { %v3203_v29 = vrot.slane %v3202_v19, 1  ;;  %v3385_v50 = vrot.slane %v3384_v15, 2  ;;  %v3226_v54 = vrot.slane %v3225_v24, 1  ;;  %v3292_v13 = vmax.f32 %v3290_v44, %v3291_v56 }
 0x7fe   :  { %v3474_v11 = vmax.f32 %v3472_v62, %v3473_v34  ;;  %vm15994_vm11 = vcmask 1041408   ;;  %v3452_v49 = vrot.slane %v3451_v14, 4  ;;  %v3248_v43 = vmax.f32 %v3246_v53, %v3247_v40 }
 0x7ff   :  { %v3482_v33 = vsel %vm15994_vm11, %v3481_v48, %v13010_v38  ;;  %v3270_v41 = vrot.slane %v3269_v18, 2  ;;  %v3319_v27 = vmax.f32 %v3317_v23, %v3318_v0  ;;  %v3430_v46 = vmax.f32 %v3428_v16, %v3429_v25  ;;  %v3670_v38 = vld [vmem:[#allocation14 + $0x20] sm:$0xff]  ;;  %vm15999_vm10 = vmmov %vm15994_vm11 }
 0x800   :  { %v3342_v4 = vmax.f32 %v3340_v20, %v3341_v63  ;;  %v3364_v17 = vrot.slane %v3363_v51, 1  ;;  %v3408_v39 = vrot.slane %v3407_v21, 2  ;;  %v10447_v28 = vpack.c.bf16 %v8877_v55, %v8876_v5  ;;  %v3758_v55 = vld [vmem:[#allocation16 + $0x20] sm:$0xff] }
 0x801   :  { %v3386_v45 = vmax.f32 %v3384_v15, %v3385_v50  ;;  %v3475_v44 = vrot.slane %v3474_v11, 4  ;;  %v3204_v36 = vmax.f32 %v3202_v19, %v3203_v29  ;;  %v3293_v53 = vrot.slane %v3292_v13, 2 }
 0x802   :  { %v3453_v32 = vmax.f32 %v3451_v14, %v3452_v49  ;;  %vm15995_vm13 = vcmp.ge.f32.partialorder %v12727_v10, 0.1  ;;  %v3227_v20 = vmax.f32 %v3225_v24, %v3226_v54  ;;  %v3271_v16 = vmax.f32 %v3269_v18, %v3270_v41  ;;  %v3672_v10 = vld [vmem:[#allocation14 + $0x30] sm:$0xff]  ;;  %v3759_v54 = vld [vmem:[#allocation16 + $0x28] sm:$0xff] }
 0x803   :  { %v2367_v23 = vsel %vm15995_vm13, %v12739_v1, 0.0  ;;  %v3431_v57 = vrot.slane %v3430_v46, 2  ;;  %v3249_v15 = vrot.slane %v3248_v43, 1  ;;  %vm15996_vm1 = vcmask 1042432   ;;  %v3673_v1 = vld [vmem:[#allocation14 + $0x38] sm:$0xff] }
 0x804   :  { %v3483_v62 = vsel %vm15996_vm1, %v3482_v33, %v3204_v36  ;;  %v3365_v40 = vmax.f32 %v3363_v51, %v3364_v17  ;;  %v3409_v19 = vmax.f32 %v3407_v21, %v3408_v39  ;;  %v10451_v56 = vpack.c.bf16 %v3671_v58, %v3670_v38  ;;  %vm16002_vm13 = vmmov %vm15996_vm1  ;;  %v3760_v17 = vld [vmem:[#allocation16 + $0x30] sm:$0xff]  ;;  %v3761_v39 = vld [vmem:[#allocation16 + $0x38] sm:$0xff] }
 0x805   :  { %v3387_v48 = vrot.slane %v3386_v45, 1  ;;  %v3476_v14 = vmax.f32 %v3474_v11, %v3475_v44  ;;  %v3488_v0 = vsel %vm15997_vm7, %v3319_v27, %v3342_v4  ;;  %v3294_v24 = vmax.f32 %v3292_v13, %v3293_v53 }
 0x806   :  { %v3454_v18 = vrot.slane %v3453_v32, 2  ;;  %v3272_v25 = vrot.slane %v3271_v16, 1  ;;  %vm15998_vm14 = vcmask 1043456   ;;  %v3432_v34 = vmax.f32 %v3430_v46, %v3431_v57 }
 0x807   :  { %v3250_v63 = vmax.f32 %v3248_v43, %v3249_v15  ;;  %v3410_v29 = vrot.slane %v3409_v19, 1  ;;  %v3489_v51 = vsel %vm15999_vm10, %v3488_v0, %v3365_v40  ;;  %v10455_v21 = vpack.c.bf16 %v3673_v1, %v3672_v10  ;;  %vm16004_vm7 = vmmov %vm15998_vm14  ;;  %v16012_v15 = vld [vmem:[#allocation36_spill] sm:$0xff] }
 0x808   :  { %v3388_v50 = vmax.f32 %v3386_v45, %v3387_v48  ;;  %v3477_v5 = vrot.slane %v3476_v14, 2  ;;  %vm16000_vm5 = vcmp.ge.f32.partialorder %v12729_v30, 0.1  ;;  %v3295_v13 = vrot.slane %v3294_v24, 1 }
 0x809   :  { %v2368_v11 = vsel %vm16000_vm5, %v12734_v26, 0.0  ;;  %vm16001_vm11 = vcmask 1044480   ;;  %v3455_v49 = vmax.f32 %v3453_v32, %v3454_v18  ;;  %v3273_v43 = vmax.f32 %v3271_v16, %v3272_v25  ;;  %v16010_v16 = vld [vmem:[#allocation41_spill] sm:$0xff]  ;;  %v10915_v18 = vld [vmem:[%s15622_s20] sm:$0xff]  ;;  %v10916_v25 = vld [vmem:[%s15622_s20 + $0x8] sm:$0xff] }
 0x80a   :  { %v3433_v41 = vrot.slane %v3432_v34, 1  ;;  %v3490_v27 = vsel %vm16002_vm13, %v3489_v51, %v3388_v50  ;;  %v3411_v46 = vmax.f32 %v3409_v19, %v3410_v29  ;;  %vm16003_vm1 = vcmask 1045504   ;;  %vm16006_vm10 = vmmov %vm16001_vm11  ;;  %v8892_v19 = vld [vmem:[%s15280_s6 + $0x20] sm:$0xff]  ;;  %v10920_v29 = vld [vmem:[%s15622_s20 + $0x28] sm:$0xff] }
 0x80b   :  { %v3478_v26 = vmax.f32 %v3476_v14, %v3477_v5  ;;  %v3296_v4 = vmax.f32 %v3294_v24, %v3295_v13  ;;  %v10463_v38 = vpack.c.bf16 %v3761_v39, %v3760_v17  ;;  %vm16007_vm5 = vcmp.gt.f32.partialorder %v11909_v35, 0.0  ;;  %v8887_v14 = vld [vmem:[%s15290_s16 + $0x1] ss:$0 sm:$0xff]  ;;  %v16020_v51 = vld [vmem:[#allocation29_spill] sm:$0xff] }
 0x80c   :  { %v3434_v45 = vmax.f32 %v3432_v34, %v3433_v41  ;;  %v10918_v34 = vld [vmem:[%s15622_s20 + $0x18] sm:$0xff] }
 0x80d   :  { %v3479_v58 = vrot.slane %v3478_v26, 1 }
 0x86f   :  { %v13281_v59 = vpop.f32.mrb[28].mxu1 }
 0x870   :  { %v3102_v2 = vpop.f32.mrb[29].mxu1  ;;  %v3112_v6 = vmul.f32 %v12263_v3, %v13281_v59 }
 0x871   :  { %v3111_v8 = vmul.f32 %v12255_v60, %v3102_v2 }
 0x873   :  { %9802 = vmatprep.mubr.msk.f32.mxu1 %vm679_vm8, %v3111_v8  ;;  %v10459_v8 = vpack.c.bf16 %v3759_v54, %v3758_v55  ;;  %v13368_v55 = vld [vmem:[#allocation5 + $0x10] sm:$0xff] }
 0x874   :  { %9803 = vmatmul.mubr.msk.f32.vlgmr.msra.gmra.mrb[30].mxu1 %vm679_vm8, %v3112_v6  ;;  %v3456_v6 = vrot.slane %v3455_v49, 1 }
 0x875   :  { %10446 = vmatpush3.bf16.msra.mxu1 %v12836_v12  ;;  %9813 = vmatprep.mubr.msk.f32.mxu1 %vm679_vm8, %v2367_v23  ;;  %v3484_v12 = vsel %vm15998_vm14, %v3483_v62, %v3227_v20  ;;  %vm16005_vm14 = vcmask 1046528   ;;  %v3480_v23 = vmax.f32 %v3478_v26, %v3479_v58  ;;  %v3859_v62 = vld [vmem:[#allocation17 + $0x38] sm:$0xff]  ;;  %v16022_v58 = vld [vmem:[#allocation35_spill] sm:$0xff] }
 0x876   :  { %10448 = vmatprep.subr.bf16.mxu1 %v10447_v28  ;;  %v3485_v33 = vsel %vm16001_vm11, %v3484_v12, %v3250_v63  ;;  %v3457_v36 = vmax.f32 %v3455_v49, %v3456_v6  ;;  %vm16008_vm11 = vmmov %vm16003_vm1  ;;  %v10917_v12 = vld [vmem:[%s15622_s20 + $0x10] sm:$0xff]  ;;  %v10919_v63 = vld [vmem:[%s15622_s20 + $0x20] sm:$0xff] }
 0x877   :  { %v3486_v30 = vsel %vm16003_vm1, %v3485_v33, %v3273_v43  ;;  %vm16009_vm13 = vmmov %vm16005_vm14  ;;  %vm16011_vm1 = vcmp.gt.f32.partialorder %v16010_v16, 0.0  ;;  %v13370_v33 = vld [vmem:[#allocation5 + $0x18] sm:$0xff]  ;;  %v4264_v6 = vld [vmem:[#allocation8 + $0x50] sm:$0xff] }
 0x878   :  { %v3487_v44 = vsel %vm16005_vm14, %v3486_v30, %v3296_v4 }
 0x879   :  { %10450 = vmatpush3.bf16.msra.mxu1 %v10447_v28  ;;  %v3491_v28 = vsel %vm16004_vm7, %v3490_v27, %v3411_v46  ;;  %v3495_v53 = vsel %vm16007_vm5, %v3487_v44, 0.0  ;;  %vm16013_vm7 = vcmask 130048   ;;  %v4262_v46 = vld [vmem:[#allocation8 + $0x40] sm:$0xff] }
 0x87a   :  { %10452 = vmatprep.subr.bf16.mxu1 %v10451_v56  ;;  %vm16014_vm14 = vmmov %vm16013_vm7 }
 0x87b   :  { %vm16016_vm5 = vmmov %vm16013_vm7 }
 0x87c   :  { %9814 = vmatmul.mubr.msk.f32.vlgmr.msra.gmra.mrb[30].mxu1 %vm679_vm8, %v2368_v11 }
 0x87d   :  { %10454 = vmatpush3.bf16.msra.mxu1 %v10451_v56  ;;  %9824 = vmatprep.mubr.msk.f32.mxu1 %vm679_vm8, %v3102_v2  ;;  %v3492_v2 = vsel %vm16006_vm10, %v3491_v28, %v3434_v45  ;;  %v8893_v56 = vld [vmem:[%s15280_s6 + $0x28] sm:$0xff]  ;;  %vm16015_vm10 = vmmov %vm16013_vm7  ;;  %v4265_v28 = vld [vmem:[#allocation8 + $0x58] sm:$0xff] }
 0x87e   :  { %10456 = vmatprep.subr.bf16.mxu1 %v10455_v21  ;;  %v3493_v32 = vsel %vm16008_vm11, %v3492_v2, %v3457_v36  ;;  %v10475_v48 = vpack.c.bf16 %v8893_v56, %v8892_v19  ;;  %vm16017_vm11 = vmmov %vm16016_vm5  ;;  %v16024_v2 = vld [vmem:[#allocation31_spill] sm:$0xff]  ;;  %v16026_v36 = vld [vmem:[#allocation38_spill] sm:$0xff] }
 0x87f   :  { %v3494_v20 = vsel %vm16009_vm13, %v3493_v32, %v3480_v23  ;;  %vm16018_vm13 = vmmov %vm16016_vm5  ;;  %v16029_v32 = vld [vmem:[#allocation37_spill] sm:$0xff]  ;;  %v16031_v23 = vld [vmem:[#allocation32_spill] sm:$0xff] }
 0x880   :  { %v3496_v57 = vsel %vm16011_vm1, %v3494_v20, 0.0  ;;  %vm16019_vm1 = vmmov %vm16016_vm5  ;;  %v16033_v20 = vld [vmem:[#allocation40_spill] sm:$0xff]  ;;  %v8917_v19 = vld [vmem:[%s15282_s8 + $0x40] sm:$0xff] }
 0x881   :  { %10458 = vmatpush3.bf16.msra.mxu1 %v10455_v21  ;;  %v8889_v21 = vld [vmem:[%s15292_s18 + $0x1] ss:$0 sm:$0xff]  ;;  %v8918_v56 = vld [vmem:[%s15282_s8 + $0x48] sm:$0xff] }
 0x882   :  { %10460 = vmatprep.subr.bf16.mxu1 %v10459_v8 }
 0x884   :  { %9825 = vmatmul.mubr.msk.f32.vlgmr.msra.gmra.mrb[30].mxu1 %vm679_vm8, %v13281_v59  ;;  %v3858_v59 = vld [vmem:[#allocation17 + $0x30] sm:$0xff] }
 0x885   :  { %10462 = vmatpush3.bf16.msra.mxu1 %v10459_v8  ;;  %9835 = vmatprep.mubr.msk.f32.mxu1 %vm679_vm8, %v3495_v53  ;;  %v10471_v40 = vpack.c.bf16 %v3859_v62, %v3858_v59  ;;  %v4263_v8 = vld [vmem:[#allocation8 + $0x48] sm:$0xff]  ;;  %v16027_v53 = vld [vmem:[#allocation30_spill] sm:$0xff]  ;;  %v16037_v59 = vld [vmem:[#allocation39_spill] sm:$0xff] }
 0x886   :  { %10464 = vmatprep.subr.bf16.mxu1 %v10463_v38  ;;  %v10491_v17 = vpack.c.bf16 %v4263_v8, %v4262_v46  ;;  %v16039_v62 = vld [vmem:[#allocation34_spill] sm:$0xff] }
 0x887   :  { %10472 = vmatprep.subr.bf16.mxu0 %v10471_v40 }
 0x888   :  { %10474 = vmatpush3.bf16.msra.mxu0 %v10471_v40  ;;  %v16040_v40 = vld [vmem:[#allocation27_spill] sm:$0xff] }
 0x889   :  { %10466 = vmatpush3.bf16.msra.mxu1 %v10463_v38  ;;  %10476 = vmatprep.subr.bf16.mxu0 %v10475_v48  ;;  %v10495_v38 = vpack.c.bf16 %v4265_v28, %v4264_v6  ;;  %v8939_v6 = vld [vmem:[#allocation11 + $0x2] ss:$0 sm:$0xff] }
 0x88c   :  { %9836 = vmatmul.mubr.msk.f32.vlgmr.msra.gmra.mrb[30].mxu1 %vm679_vm8, %v3496_v57  ;;  %v16035_v57 = vld [vmem:[#allocation33_spill] sm:$0xff] }
 0x88d   :  { %9866 = vmatprep.mubr.msk.f32.mxu1 %vm16013_vm7, %v16012_v15  ;;  %vm16021_vm7 = vmmov %vm16019_vm1 }
 0x95f   :  { %v9837_v0 = vpop.f32.mrb[30].mxu1 }
 0x960   :  { %v3834_v10 = vpop.f32.mrb[31].mxu1  ;;  %v3854_v24 = vadd.f32 %v9837_v0, %v8887_v14  ;;  %v8920_v0 = vld [vmem:[%s15282_s8 + $0x58] sm:$0xff] }
 0x961   :  { %v3853_v1 = vadd.f32 %v8887_v14, %v3834_v10  ;;  %v8919_v14 = vld [vmem:[%s15282_s8 + $0x50] sm:$0xff] }
 0x963   :  { %9846 = vmatprep.mubr.msk.f32.mxu0 %vm679_vm8, %v3853_v1 }
 0x964   :  { %9847 = vmatmul.mubr.msk.f32.vlgmr.msra.gmra.mrb[26].mxu0 %vm679_vm8, %v3854_v24 }
 0x965   :  { %10478 = vmatpush3.bf16.msra.mxu0 %v10475_v48  ;;  %9853 = vmatprep.mubr.msk.f32.mxu0 %vm16014_vm14, %v10915_v18  ;;  %vm15604_vm14 = vcmp.ge.f32.partialorder %v13368_v55, 0.1  ;;  %v10499_v48 = vpack.c.bf16 %v8918_v56, %v8917_v19 }
 0x968   :  { %9854 = vmatmul.mubr.msk.f32.vlgmr.msra.gmra.mrb[28].mxu0 %vm16015_vm10, %v10916_v25  ;;  %vm15603_vm10 = vcmp.ge.f32.partialorder %v13370_v33, 0.1  ;;  %v10503_v25 = vpack.c.bf16 %v8920_v0, %v8919_v14 }
 0x969   :  { %9856 = vmatprep.mubr.msk.f32.mxu0 %vm16016_vm5, %v10917_v12  ;;  %vm10480_vm5 = vmpackc.low %vm15603_vm10, %vm15604_vm14 }
 0x96a   :  { %vm16032_vm10 = vmmov %vm16019_vm1 }
 0x96b   :  { %vm16034_vm14 = vmmov %vm16019_vm1 }
 0x96c   :  { %9857 = vmatmul.mubr.msk.f32.gmra.mrb[30].mxu0 %vm16017_vm11, %v10918_v34  ;;  %vm16023_vm11 = vmmov %vm16019_vm1 }
 0x96d   :  { %9859 = vmatprep.mubr.msk.f32.mxu0 %vm16018_vm13, %v10919_v63  ;;  %vm16025_vm13 = vmmov %vm16019_vm1 }
 0x970   :  { %9860 = vmatmul.mubr.msk.f32.gmra.mrb[32].mxu0 %vm16019_vm1, %v10920_v29 }
 0x971   :  { %9879 = vmatprep.mubr.msk.f32.mxu0 %vm16021_vm7, %v16020_v51  ;;  %vm16028_vm7 = vmmov %vm16019_vm1 }
 0xa37   :  { %v9848_v50 = vpop.f32.mrb[26].mxu0 }
 0xa38   :  { %v3946_v5 = vadd.f32 %v9848_v50, %v8889_v21  ;;  %v3940_v11 = vpop.f32.mrb[27].mxu0 }
 0xa39   :  { %v3941_v54 = vadd.f32 %v8889_v21, %v3940_v11  ;;  %v4493_v21 = vld [vmem:[#allocation10 + $0x10] sm:$0xff] }
 0xa3a   :  { %v3950_v13 = vmax.f32 %v3946_v5, 0.0 }
 0xa3b   :  { %v3949_v49 = vmax.f32 %v3941_v54, 0.0  ;;  %v13373_v43 = vpop.f32.mrb[28].mxu0 }
 0xa3c   :  { %v13375_v41 = vmul.f32 1.1111112, %v3950_v13  ;;  %v13377_v27 = vpop.f32.mrb[29].mxu0  ;;  %v8894_v13 = vld [vmem:[#allocation7 + $0x2] ss:$0 sm:$0xff] }
 0xa3d   :  { %v13380_v30 = vmul.f32 1.1111112, %v3949_v49  ;;  %v4038_v49 = vadd.f32 %v8894_v13, %v13377_v27  ;;  %v4043_v46 = vadd.f32 %v13373_v43, %v8894_v13 }
 0xa3f   :  { %v10479_v26 = vpack.c.bf16 %v13375_v41, %v13380_v30  ;;  %v13388_v4 = vpop.f32.mrb[30].mxu0 }
 0xa40   :  { %v13390_v39 = vpop.f32.mrb[31].mxu0 }
 0xa41   :  { %10481 = vmatprep.subr.msk.bf16.mxu1 %vm10480_vm5, %v10479_v26  ;;  %10487 = vmatprep.subr.msk.bf16.mxu0 %vm10480_vm5, %v10479_v26  ;;  %v4048_v8 = vadd.f32 %v8894_v13, %v13390_v39 }
 0xa42   :  { %10484 = vmatpush3.bf16.msk.msra.mxu1 %vm10480_vm5, %v10479_v26  ;;  %10490 = vmatpush3.bf16.msk.msra.mxu0 %vm10480_vm5, %v10479_v26  ;;  %vm16030_vm5 = vmmov %vm16019_vm1  ;;  %v4053_v26 = vadd.f32 %v13388_v4, %v8894_v13 }
 0xa43   :  { %v13392_v45 = vpop.f32.mrb[32].mxu0  ;;  %10492 = vmatprep.subr.bf16.mxu1 %v10491_v17 }
 0xa44   :  { %v4057_v44 = vpop.f32.mrb[33].mxu0  ;;  %v4063_v27 = vadd.f32 %v13392_v45, %v8894_v13 }
 0xa45   :  { %9867 = vmatmul.mubr.msk.f32.vlgmr.msra.gmra.mrb[32].mxu1 %vm16023_vm11, %v16022_v58  ;;  %9880 = vmatmul.mubr.msk.f32.vlgmr.msra.gmra.mrb[34].mxu0 %vm16025_vm13, %v16024_v2  ;;  %vm16036_vm11 = vmmov %vm16019_vm1 }
 0xa46   :  { %9869 = vmatprep.mubr.msk.f32.mxu1 %vm16019_vm1, %v16026_v36  ;;  %9882 = vmatprep.mubr.msk.f32.mxu0 %vm16028_vm7, %v16027_v53  ;;  %vm16038_vm13 = vmmov %vm16019_vm1  ;;  %vm16041_vm7 = vcmask 392192  }
 0xa47   :  { %10494 = vmatpush3.bf16.msra.mxu1 %v10491_v17  ;;  %v4058_v17 = vadd.f32 %v8894_v13, %v4057_v44  ;;  %v5448_v13 = vld [vmem:[#allocation17 + $0x48] sm:$0xff] }
 0xa48   :  { %10496 = vmatprep.subr.bf16.mxu1 %v10495_v38 }
 0xa49   :  { %9870 = vmatmul.mubr.msk.f32.gmra.mrb[34].mxu1 %vm16030_vm5, %v16029_v32  ;;  %9883 = vmatmul.mubr.msk.f32.gmra.mrb[36].mxu0 %vm16032_vm10, %v16031_v23 }
 0xa4a   :  { %9872 = vmatprep.mubr.msk.f32.mxu1 %vm16034_vm14, %v16033_v20  ;;  %9885 = vmatprep.mubr.msk.f32.mxu0 %vm16036_vm11, %v16035_v57  ;;  %vm16042_vm14 = vcmask 64512   ;;  %v16159_v20 = vld [vmem:[#allocation60_spill] sm:$0xff] }
 0xa4b   :  { %10498 = vmatpush3.bf16.msra.mxu1 %v10495_v38  ;;  %vm16043_vm10 = vmmov %vm16042_vm14 }
 0xa4c   :  { %10500 = vmatprep.subr.bf16.mxu1 %v10499_v48  ;;  %vm16044_vm5 = vmmov %vm16043_vm10 }
 0xa4d   :  { %9873 = vmatmul.mubr.msk.f32.gmra.mrb[36].mxu1 %vm16038_vm13, %v16037_v59  ;;  %9886 = vmatmul.mubr.msk.f32.gmra.mrb[38].mxu0 %vm16019_vm1, %v16039_v62  ;;  %vm16045_vm11 = vmmov %vm16044_vm5 }
 0xa4e   :  { %9945 = vmatprep.mubr.msk.f32.mxu0 %vm16041_vm7, %v16040_v40  ;;  %vm16046_vm13 = vmmov %vm16044_vm5 }
 0xa4f   :  { %vm16047_vm1 = vmmov %vm16044_vm5 }
 0xb18   :  { %v9868_v10 = vpop.f32.mrb[32].mxu1  ;;  %v9881_v1 = vpop.f32.mrb[34].mxu0 }
 0xb19   :  { %v4132_v24 = vpop.f32.mrb[33].mxu1  ;;  %v4227_v18 = vpop.f32.mrb[35].mxu0 }
 0xb1a   :  { %9896 = vmatprep.mubr.msk.f32.mxu1 %vm679_vm8, %v4227_v18 }
 0xb1b   :  { %9897 = vmatmul.mubr.msk.f32.vlgmr.msra.gmra.mrb[38].mxu1 %vm679_vm8, %v9881_v1  ;;  %v5094_v1 = vld [vmem:[#allocation13 + $0x40] sm:$0xff] }
 0xb1c   :  { %v9871_v12 = vpop.f32.mrb[34].mxu1  ;;  %v9884_v34 = vpop.f32.mrb[36].mxu0  ;;  %10502 = vmatpush3.bf16.msra.mxu1 %v10499_v48 }
 0xb1d   :  { %v4142_v63 = vpop.f32.mrb[35].mxu1  ;;  %v4237_v29 = vpop.f32.mrb[37].mxu0  ;;  %10504 = vmatprep.subr.bf16.mxu1 %v10503_v25 }
 0xb1e   :  { %9899 = vmatprep.mubr.msk.f32.mxu1 %vm679_vm8, %v4237_v29  ;;  %v5097_v29 = vld [vmem:[#allocation13 + $0x58] sm:$0xff] }
 0xb1f   :  { %9900 = vmatmul.mubr.msk.f32.gmra.mrb[40].mxu1 %vm679_vm8, %v9884_v34  ;;  %v16048_v34 = vld [vmem:[#allocation28_spill] sm:$0xff] }
 0xb20   :  { %v9874_v50 = vpop.f32.mrb[36].mxu1  ;;  %v9887_v5 = vpop.f32.mrb[38].mxu0  ;;  %10506 = vmatpush3.bf16.msra.mxu1 %v10503_v25 }
 0xb21   :  { %v4152_v11 = vpop.f32.mrb[37].mxu1  ;;  %v4247_v54 = vpop.f32.mrb[39].mxu0  ;;  %9922 = vmatprep.subr.mxu1 %v4493_v21 }
 0xb22   :  { %9902 = vmatprep.mubr.msk.f32.mxu1 %vm679_vm8, %v4247_v54  ;;  %v5447_v54 = vld [vmem:[#allocation17 + $0x40] sm:$0xff] }
 0xb23   :  { %9903 = vmatmul.mubr.msk.f32.gmra.mrb[42].mxu1 %vm679_vm8, %v9887_v5  ;;  %v8943_v5 = vld [vmem:[%s15286_s12 + $0x48] sm:$0xff] }
 0xb24   :  { %9913 = vmatprep.mubr.msk.f32.mxu1 %vm679_vm8, %v4132_v24  ;;  %v5095_v24 = vld [vmem:[#allocation13 + $0x48] sm:$0xff] }
 0xb27   :  { %9914 = vmatmul.mubr.msk.f32.vlgmr.msra.gmra.mrb[38].mxu1 %vm679_vm8, %v9868_v10 }
 0xb28   :  { %9916 = vmatprep.mubr.msk.f32.mxu1 %vm679_vm8, %v4142_v63  ;;  %9923 = vmatpush3.msra.mxu1 %v4493_v21  ;;  %v5096_v63 = vld [vmem:[#allocation13 + $0x50] sm:$0xff] }
 0xb29   :  { %v10523_v21 = vpack.c.bf16 %v5097_v29, %v5096_v63  ;;  %v16065_v63 = vld [vmem:[#allocation78_spill] sm:$0xff] }
 0xb2b   :  { %9917 = vmatmul.mubr.msk.f32.gmra.mrb[40].mxu1 %vm679_vm8, %v9871_v12  ;;  %v10519_v12 = vpack.c.bf16 %v5095_v24, %v5094_v1 }
 0xb2c   :  { %9919 = vmatprep.mubr.msk.f32.mxu1 %vm679_vm8, %v4152_v11 }
 0xb2f   :  { %9920 = vmatmul.mubr.msk.f32.gmra.mrb[42].mxu1 %vm679_vm8, %v9874_v50  ;;  %v8942_v50 = vld [vmem:[%s15286_s12 + $0x40] sm:$0xff] }
 0xb30   :  { %9924 = vmatprep.mubr.msk.f32.mxu1 %vm16042_vm14, %v4038_v49  ;;  %v13477_v11 = vpack.c.bf16 %v8943_v5, %v8942_v50  ;;  %v10551_v49 = vpack.c.bf16 %v5448_v13, %v5447_v54  ;;  %v16067_v5 = vld [vmem:[#allocation47_spill] sm:$0xff]  ;;  %v16069_v13 = vld [vmem:[#allocation48_spill] sm:$0xff] }
 0xb32   :  { %10552 = vmatprep.subr.bf16.mxu1 %v10551_v49 }
 0xb33   :  { %9925 = vmatmul.mubr.msk.f32.vlgmr.msra.gmra.mrb[38].mxu1 %vm16043_vm10, %v4043_v46  ;;  %v16049_v46 = vld [vmem:[#allocation72_spill] sm:$0xff] }
 0xb34   :  { %9927 = vmatprep.mubr.msk.f32.mxu1 %vm16044_vm5, %v4048_v8  ;;  %10554 = vmatpush3.bf16.msra.mxu1 %v10551_v49  ;;  %vm16050_vm14 = vcmp.eq.s32.totalorder %v16049_v46, 1 }
 0xb37   :  { %9928 = vmatmul.mubr.msk.f32.gmra.mrb[40].mxu1 %vm16045_vm11, %v4053_v26  ;;  %v16051_v26 = vld [vmem:[#allocation43_spill] sm:$0xff] }
 0xb38   :  { %9930 = vmatprep.mubr.msk.f32.mxu1 %vm16046_vm13, %v4058_v17  ;;  %vm16052_vm10 = vcmp.eq.s32.totalorder %v16051_v26, 1 }
 0xb3b   :  { %9931 = vmatmul.mubr.msk.f32.gmra.mrb[42].mxu1 %vm16047_vm1, %v4063_v27  ;;  %v16053_v27 = vld [vmem:[#allocation71_spill] sm:$0xff] }
 0xb3c   :  { %vm16054_vm5 = vcmp.eq.s32.totalorder %v16053_v27, 1 }
 0xc06   :  { %v9926_v28 = vpop.f32.mrb[38].mxu1 }
 0xc07   :  { %v13451_v43 = vadd.f32 %v9926_v28, %v8939_v6  ;;  %v4578_v39 = vpop.f32.mrb[39].mxu1  ;;  %v16055_v28 = vld [vmem:[#allocation42_spill] sm:$0xff] }
 0xc08   :  { %v13453_v38 = vadd.f32 %v8939_v6, %v4578_v39  ;;  %vm16056_vm11 = vcmp.eq.s32.totalorder %v16055_v28, 1 }
 0xc09   :  { %v4705_v39 = vsel %vm16056_vm11, %v13451_v43, -1e+30  ;;  %vm16070_vm11 = vcmp.eq.s32.totalorder %v16069_v13, 1 }
 0xc0a   :  { %v9929_v19 = vpop.f32.mrb[40].mxu1  ;;  %v10507_v4 = vpack.c.bf16 %v13451_v43, %v13453_v38  ;;  %v4711_v50 = vsel %vm679_vm8, %v4705_v39, -inf  ;;  %v16073_v39 = vld [vmem:[#allocation84_spill] sm:$0xff] }
 0xc0b   :  { %v13457_v44 = vadd.f32 %v9929_v19, %v8939_v6  ;;  %v4588_v56 = vpop.f32.mrb[41].mxu1  ;;  %v16057_v19 = vld [vmem:[#allocation74_spill] sm:$0xff] }
 0xc0c   :  { %v13459_v48 = vadd.f32 %v8939_v6, %v4588_v56  ;;  %10508 = vmatprep.subr.bf16.mxu0 %v10507_v4  ;;  %vm16058_vm13 = vcmp.eq.s32.totalorder %v16057_v19, 1  ;;  %v16059_v56 = vld [vmem:[#allocation45_spill] sm:$0xff] }
 0xc0d   :  { %10510 = vmatpush3.bf16.msra.mxu0 %v10507_v4  ;;  %v4727_v4 = vsel %vm16058_vm13, %v13453_v38, -1e+30  ;;  %vm16060_vm1 = vcmp.eq.s32.totalorder %v16059_v56, 1 }
 0xc0e   :  { %v9932_v45 = vpop.f32.mrb[42].mxu1  ;;  %v10511_v14 = vpack.c.bf16 %v13457_v44, %v13459_v48 }
 0xc0f   :  { %v13463_v0 = vadd.f32 %v9932_v45, %v8939_v6  ;;  %v4598_v10 = vpop.f32.mrb[43].mxu1 }
 0xc10   :  { %v13465_v18 = vadd.f32 %v8939_v6, %v4598_v10  ;;  %10512 = vmatprep.subr.bf16.mxu0 %v10511_v14  ;;  %v4704_v6 = vsel %vm16054_vm5, %v13453_v38, -1e+30  ;;  %vm16068_vm5 = vcmp.eq.s32.totalorder %v16067_v5, 1  ;;  %v16075_v5 = vld [vmem:[#allocation54_spill] sm:$0xff] }
 0xc11   :  { %10514 = vmatpush3.bf16.msra.mxu0 %v10511_v14  ;;  %v4709_v17 = vsel %vm16052_vm10, %v13463_v0, -1e+30  ;;  %v16061_v14 = vld [vmem:[#allocation76_spill] sm:$0xff]  ;;  %vm16066_vm10 = vcmp.eq.s32.totalorder %v16065_v63, 1  ;;  %v4755_v49 = vsel %vm16070_vm11, %v13463_v0, -1e+30 }
 0xc12   :  { %v10515_v25 = vpack.c.bf16 %v13463_v0, %v13465_v18  ;;  %v4708_v8 = vsel %vm16050_vm14, %v13465_v18, -1e+30  ;;  %v4731_v45 = vsel %vm16060_vm1, %v13465_v18, -1e+30  ;;  %v4716_v24 = vsel %vm679_vm8, %v4709_v17, -inf  ;;  %v16071_v63 = vld [vmem:[#allocation46_spill] sm:$0xff] }
 0xc13   :  { %v4714_v1 = vsel %vm679_vm8, %v4708_v8, -inf  ;;  %v4751_v29 = vsel %vm16066_vm10, %v13451_v43, -1e+30  ;;  %v4754_v54 = vsel %vm16068_vm5, %v13465_v18, -1e+30  ;;  %v4733_v8 = vsel %vm679_vm8, %v4727_v4, -inf }
 0xc14   :  { %10516 = vmatprep.subr.bf16.mxu0 %v10515_v25  ;;  %v4737_v17 = vsel %vm679_vm8, %v4731_v45, -inf  ;;  %vm16072_vm13 = vcmp.eq.s32.totalorder %v16071_v63, 1  ;;  %vm16074_vm1 = vcmp.eq.s32.totalorder %v16073_v39, 1  ;;  %v4717_v19 = vmax.f32 %v4711_v50, %v4716_v24  ;;  %v16077_v63 = vld [vmem:[#allocation55_spill] sm:$0xff]  ;;  %v16079_v39 = vld [vmem:[#allocation86_spill] sm:$0xff] }
 0xc15   :  { %10518 = vmatpush3.bf16.msra.mxu0 %v10515_v25  ;;  %v16063_v25 = vld [vmem:[#allocation44_spill] sm:$0xff]  ;;  %v4757_v45 = vsel %vm679_vm8, %v4751_v29, -inf  ;;  %v4762_v28 = vsel %vm679_vm8, %v4755_v49, -inf  ;;  %vm16080_vm10 = vcmp.eq.s32.totalorder %v16079_v39, 1 }
 0xc16   :  { %10520 = vmatprep.subr.bf16.mxu0 %v10519_v12  ;;  %vm16064_vm14 = vcmp.eq.s32.totalorder %v16063_v25, 1  ;;  %v4730_v26 = vsel %vm16080_vm10, %v13457_v44, -1e+30  ;;  %v4763_v39 = vmax.f32 %v4757_v45, %v4762_v28  ;;  %v16087_v28 = vld [vmem:[#allocation58_spill] sm:$0xff] }
 0xc18   :  { %9946 = vmatmul.mubr.msk.f32.vlgmr.msra.gmra.mrb[40].mxu0 %vm16041_vm7, %v16048_v34  ;;  %vm16062_vm7 = vcmp.eq.s32.totalorder %v16061_v14, 1  ;;  %v4706_v14 = vsel %vm16074_vm1, %v13459_v48, -1e+30  ;;  %vm16088_vm1 = vcmp.eq.s32.totalorder %v16087_v28, 1 }
 0xc19   :  { %10522 = vmatpush3.bf16.msra.mxu0 %v10519_v12  ;;  %v4732_v10 = vsel %vm16062_vm7, %v13463_v0, -1e+30  ;;  %v4728_v12 = vsel %vm16064_vm14, %v13451_v43, -1e+30  ;;  %vm16076_vm7 = vcmp.eq.s32.totalorder %v16075_v5, 1  ;;  %vm16078_vm14 = vcmp.eq.s32.totalorder %v16077_v63, 1 }
 0xc1a   :  { %10524 = vmatprep.subr.bf16.mxu0 %v10523_v21  ;;  %v4739_v25 = vsel %vm679_vm8, %v4732_v10, -inf  ;;  %v4707_v56 = vsel %vm16076_vm7, %v13457_v44, -1e+30  ;;  %v4734_v4 = vsel %vm679_vm8, %v4728_v12, -inf  ;;  %v4760_v10 = vsel %vm679_vm8, %v4754_v54, -inf  ;;  %v16081_v12 = vld [vmem:[#allocation62_spill] sm:$0xff] }
 0xc1b   :  { %v4729_v27 = vsel %vm16078_vm14, %v13459_v48, -1e+30  ;;  %v4738_v5 = vmax.f32 %v4733_v8, %v4737_v17  ;;  %v4740_v46 = vmax.f32 %v4734_v4, %v4739_v25  ;;  %v4713_v24 = vsel %vm679_vm8, %v4707_v56, -inf  ;;  %v16083_v54 = vld [vmem:[#allocation88_spill] sm:$0xff] }
 0xc1c   :  { %vm16082_vm5 = vcmp.eq.s32.totalorder %v16081_v12, 1  ;;  %vm16084_vm11 = vcmp.eq.s32.totalorder %v16083_v54, 1  ;;  %v4735_v8 = vsel %vm679_vm8, %v4729_v27, -inf  ;;  %v4736_v25 = vsel %vm679_vm8, %v4730_v26, -inf  ;;  %v16085_v54 = vld [vmem:[#allocation96_spill] sm:$0xff] }
 0xc1d   :  { %10526 = vmatpush3.bf16.msra.mxu0 %v10523_v21  ;;  %v4710_v21 = vsel %vm679_vm8, %v4704_v6, -inf  ;;  %v4750_v6 = vsel %vm16072_vm13, %v13453_v38, -1e+30  ;;  %v4753_v29 = vsel %vm16082_vm5, %v13457_v44, -1e+30  ;;  %v4741_v17 = vmax.f32 %v4738_v5, %v4740_v46  ;;  %v16089_v46 = vld [vmem:[#allocation56_spill] sm:$0xff] }
 0xc1e   :  { %10528 = vmatprep.subr.bf16.mxu0 %v13477_v11  ;;  %v4715_v13 = vmax.f32 %v4710_v21, %v4714_v1  ;;  %v4712_v1 = vsel %vm679_vm8, %v4706_v14, -inf  ;;  %v4756_v21 = vsel %vm679_vm8, %v4750_v6, -inf  ;;  %v4752_v49 = vsel %vm16084_vm11, %v13459_v48, -1e+30 }
 0xc1f   :  { %v4761_v63 = vmax.f32 %v4756_v21, %v4760_v10  ;;  %v4719_v14 = vmax.f32 %v4712_v1, %v4713_v24  ;;  %v4758_v56 = vsel %vm679_vm8, %v4752_v49, -inf  ;;  %v4759_v4 = vsel %vm679_vm8, %v4753_v29, -inf  ;;  %v16091_v1 = vld [vmem:[#allocation57_spill] sm:$0xff]  ;;  %v16093_v24 = vld [vmem:[#allocation64_spill] sm:$0xff] }
 0xc20   :  { %v4718_v50 = vmax.f32 %v4715_v13, %v4717_v19  ;;  %v4742_v34 = vmax.f32 %v4735_v8, %v4736_v25  ;;  %v4765_v13 = vmax.f32 %v4758_v56, %v4759_v4  ;;  %vm16086_vm13 = vcmp.eq.s32.totalorder %v16085_v54, 1  ;;  %v16095_v21 = vld [vmem:[#allocation65_spill] sm:$0xff] }
 0xc21   :  { %v4764_v6 = vmax.f32 %v4761_v63, %v4763_v39  ;;  %v4777_v10 = vsel %vm16086_vm13, %v13465_v18, -1e+30  ;;  %v4778_v27 = vsel %vm16088_vm1, %v13463_v0, -1e+30  ;;  %vm16090_vm7 = vcmp.eq.s32.totalorder %v16089_v46, 1  ;;  %v16097_v8 = vld [vmem:[#allocation73_spill] sm:$0xff] }
 0xc22   :  { %v4720_v12 = vmax.f32 %v4718_v50, %v4719_v14  ;;  %v4743_v19 = vmax.f32 %v4741_v17, %v4742_v34  ;;  %v4773_v5 = vsel %vm16090_vm7, %v13453_v38, -1e+30  ;;  %vm16092_vm14 = vcmp.eq.s32.totalorder %v16091_v1, 1  ;;  %v16099_v14 = vld [vmem:[#allocation98_spill] sm:$0xff] }
 0xc23   :  { %v4766_v45 = vmax.f32 %v4764_v6, %v4765_v13  ;;  %v4774_v63 = vsel %vm16092_vm14, %v13451_v43, -1e+30  ;;  %v4783_v34 = vsel %vm679_vm8, %v4777_v10, -inf  ;;  %v4785_v39 = vsel %vm679_vm8, %v4778_v27, -inf  ;;  %v16101_v6 = vld [vmem:[#allocation63_spill] sm:$0xff]  ;;  %v16103_v10 = vld [vmem:[#allocation104_spill] sm:$0xff] }
 0xc24   :  { %v4721_v26 = vrot.slane %v4720_v12, 4  ;;  %vm16094_vm10 = vcmp.eq.s32.totalorder %v16093_v24, 1  ;;  %vm16096_vm5 = vcmp.eq.s32.totalorder %v16095_v21, 1  ;;  %v4744_v49 = vrot.slane %v4743_v19, 4 }
 0xc25   :  { %v4800_v29 = vsel %vm16094_vm10, %v13465_v18, -1e+30  ;;  %v4801_v50 = vsel %vm16096_vm5, %v13463_v0, -1e+30  ;;  %vm16098_vm11 = vcmp.eq.s32.totalorder %v16097_v8, 1  ;;  %vm16100_vm13 = vcmp.eq.s32.totalorder %v16099_v14, 1 }
 0xc26   :  { %v4775_v25 = vsel %vm16098_vm11, %v13459_v48, -1e+30  ;;  %v4776_v17 = vsel %vm16100_vm13, %v13457_v44, -1e+30  ;;  %v4779_v56 = vsel %vm679_vm8, %v4773_v5, -inf  ;;  %v4780_v4 = vsel %vm679_vm8, %v4774_v63, -inf }
 0xc27   :  { %vm16102_vm1 = vcmp.eq.s32.totalorder %v16101_v6, 1  ;;  %vm16104_vm7 = vcmp.eq.s32.totalorder %v16103_v10, 1  ;;  %v4784_v21 = vmax.f32 %v4779_v56, %v4783_v34  ;;  %v4786_v24 = vmax.f32 %v4780_v4, %v4785_v39  ;;  %v16105_v10 = vld [vmem:[#allocation89_spill] sm:$0xff]  ;;  %v16107_v39 = vld [vmem:[#allocation107_spill] sm:$0xff] }
 0xc28   :  { %v4796_v13 = vsel %vm16102_vm1, %v13453_v38, -1e+30  ;;  %v4797_v27 = vsel %vm16104_vm7, %v13451_v43, -1e+30  ;;  %v4806_v8 = vsel %vm679_vm8, %v4800_v29, -inf  ;;  %v4808_v1 = vsel %vm679_vm8, %v4801_v50, -inf }
 0xc29   :  { %v4722_v14 = vmax.f32 %v4720_v12, %v4721_v26  ;;  %v4767_v46 = vrot.slane %v4766_v45, 4  ;;  %v4781_v5 = vsel %vm679_vm8, %v4775_v25, -inf  ;;  %v4745_v28 = vmax.f32 %v4743_v19, %v4744_v49 }
 0xc2a   :  { %v4782_v63 = vsel %vm679_vm8, %v4776_v17, -inf  ;;  %v4802_v6 = vsel %vm679_vm8, %v4796_v13, -inf  ;;  %v4803_v54 = vsel %vm679_vm8, %v4797_v27, -inf  ;;  %vm16106_vm14 = vcmp.eq.s32.totalorder %v16105_v10, 1 }
 0xc2b   :  { %v4798_v34 = vsel %vm16106_vm14, %v13459_v48, -1e+30  ;;  %vm16108_vm10 = vcmp.eq.s32.totalorder %v16107_v39, 1  ;;  %v4807_v50 = vmax.f32 %v4802_v6, %v4806_v8  ;;  %v4809_v12 = vmax.f32 %v4803_v54, %v4808_v1  ;;  %v16109_v39 = vld [vmem:[#allocation115_spill] sm:$0xff]  ;;  %v16115_v6 = vld [vmem:[#allocation77_spill] sm:$0xff] }
 0xc2c   :  { %v4799_v29 = vsel %vm16108_vm10, %v13457_v44, -1e+30  ;;  %v4787_v26 = vmax.f32 %v4784_v21, %v4786_v24  ;;  %v4723_v56 = vrot.slane %v4722_v14, 2  ;;  %v4768_v25 = vmax.f32 %v4766_v45, %v4767_v46  ;;  %v16111_v54 = vld [vmem:[#allocation79_spill] sm:$0xff] }
 0xc2d   :  { %v4746_v19 = vrot.slane %v4745_v28, 2  ;;  %v4788_v49 = vmax.f32 %v4781_v5, %v4782_v63  ;;  %v4804_v17 = vsel %vm679_vm8, %v4798_v34, -inf  ;;  %v4805_v4 = vsel %vm679_vm8, %v4799_v29, -inf  ;;  %v16113_v24 = vld [vmem:[#allocation75_spill] sm:$0xff] }
 0xc2e   :  { %v4810_v13 = vmax.f32 %v4807_v50, %v4809_v12  ;;  %v4724_v40 = vmax.f32 %v4722_v14, %v4723_v56  ;;  %v4769_v10 = vrot.slane %v4768_v25, 2  ;;  %v4811_v62 = vmax.f32 %v4804_v17, %v4805_v4  ;;  %v16117_v50 = vld [vmem:[#allocation105_spill] sm:$0xff] }
 0xc2f   :  { %v4789_v27 = vmax.f32 %v4787_v26, %v4788_v49  ;;  %v4747_v59 = vmax.f32 %v4745_v28, %v4746_v19  ;;  %vm16110_vm5 = vcmp.eq.s32.totalorder %v16109_v39, 1  ;;  %vm16112_vm11 = vcmp.eq.s32.totalorder %v16111_v54, 1  ;;  %v16119_v26 = vld [vmem:[#allocation117_spill] sm:$0xff] }
 0xc30   :  { %v4823_v8 = vsel %vm16110_vm5, %v13465_v18, -1e+30  ;;  %v4824_v45 = vsel %vm16112_vm11, %v13463_v0, -1e+30  ;;  %v4812_v46 = vmax.f32 %v4810_v13, %v4811_v62  ;;  %vm16114_vm13 = vcmp.eq.s32.totalorder %v16113_v24, 1 }
 0xc31   :  { %v4790_v1 = vrot.slane %v4789_v27, 4  ;;  %v4819_v21 = vsel %vm16114_vm13, %v13453_v38, -1e+30  ;;  %vm16116_vm1 = vcmp.eq.s32.totalorder %v16115_v6, 1  ;;  %v4725_v5 = vrot.slane %v4724_v40, 1  ;;  %v16123_v6 = vld [vmem:[#allocation122_spill] sm:$0xff] }
 0xc32   :  { %v4820_v14 = vsel %vm16116_vm1, %v13451_v43, -1e+30  ;;  %v4770_v28 = vmax.f32 %v4768_v25, %v4769_v10  ;;  %v4829_v63 = vsel %vm679_vm8, %v4823_v8, -inf  ;;  %v4831_v34 = vsel %vm679_vm8, %v4824_v45, -inf }
 0xc33   :  { %v4748_v29 = vrot.slane %v4747_v59, 1  ;;  %vm16118_vm7 = vcmp.eq.s32.totalorder %v16117_v50, 1  ;;  %v4813_v12 = vrot.slane %v4812_v46, 4  ;;  %vm16120_vm14 = vcmp.eq.s32.totalorder %v16119_v26, 1  ;;  %v16121_v50 = vld [vmem:[#allocation91_spill] sm:$0xff] }
 0xc34   :  { %v4821_v62 = vsel %vm16118_vm7, %v13459_v48, -1e+30  ;;  %v4822_v56 = vsel %vm16120_vm14, %v13457_v44, -1e+30  ;;  %v4825_v19 = vsel %vm679_vm8, %v4819_v21, -inf  ;;  %v4826_v49 = vsel %vm679_vm8, %v4820_v14, -inf }
 0xc35   :  { %v13622_v17 = vmax.f32 %v4789_v27, %v4790_v1  ;;  %v4830_v10 = vmax.f32 %v4825_v19, %v4829_v63  ;;  %v4832_v25 = vmax.f32 %v4826_v49, %v4831_v34  ;;  %v13624_v4 = vmax.f32 %v4724_v40, %v4725_v5  ;;  %v16125_v40 = vld [vmem:[#allocation127_spill] sm:$0xff]  ;;  %v16127_v5 = vld [vmem:[#allocation125_spill] sm:$0xff] }
 0xc36   :  { %v4771_v13 = vrot.slane %v4770_v28, 1  ;;  %v4827_v8 = vsel %vm679_vm8, %v4821_v62, -inf  ;;  %v4828_v45 = vsel %vm679_vm8, %v4822_v56, -inf  ;;  %vm16122_vm10 = vcmp.eq.s32.totalorder %v16121_v50, 1  ;;  %v16129_v56 = vld [vmem:[#allocation93_spill] sm:$0xff] }
 0xc37   :  { %v4842_v26 = vsel %vm16122_vm10, %v13453_v38, -1e+30  ;;  %vm16124_vm5 = vcmp.eq.s32.totalorder %v16123_v6, 1  ;;  %v13634_v14 = vmax.f32 %v4747_v59, %v4748_v29  ;;  %v13636_v27 = vmax.f32 %v4812_v46, %v4813_v12  ;;  %v16131_v59 = vld [vmem:[#allocation95_spill] sm:$0xff] }
 0xc38   :  { %v4844_v21 = vsel %vm16124_vm5, %v13459_v48, -1e+30  ;;  %vm16126_vm11 = vcmp.eq.s32.totalorder %v16125_v40, 1  ;;  %vm16128_vm13 = vcmp.eq.s32.totalorder %v16127_v5, 1  ;;  %v4833_v62 = vmax.f32 %v4830_v10, %v4832_v25  ;;  %v16133_v25 = vld [vmem:[#allocation50_spill] sm:$0xff] }
 0xc39   :  { %v4845_v1 = vsel %vm16126_vm11, %v13457_v44, -1e+30  ;;  %v4846_v63 = vsel %vm16128_vm13, %v13465_v18, -1e+30  ;;  %vm16130_vm1 = vcmp.eq.s32.totalorder %v16129_v56, 1  ;;  %vm16132_vm7 = vcmp.eq.s32.totalorder %v16131_v59, 1 }
 0xc3a   :  { %v4843_v19 = vsel %vm16130_vm1, %v13451_v43, -1e+30  ;;  %v4847_v46 = vsel %vm16132_vm7, %v13463_v0, -1e+30  ;;  %v13651_v29 = vmax.f32 %v4770_v28, %v4771_v13  ;;  %v4834_v12 = vmax.f32 %v4827_v8, %v4828_v45  ;;  %v16135_v59 = vld [vmem:[#allocation82_spill] sm:$0xff]  ;;  %v16137_v45 = vld [vmem:[#allocation80_spill] sm:$0xff] }
 0xc3b   :  { %v4848_v49 = vsel %vm679_vm8, %v4842_v26, -inf  ;;  %v13655_v40 = vsel %vm679_vm8, %v4844_v21, -inf  ;;  %v13658_v5 = vsel %vm679_vm8, %v4845_v1, -inf  ;;  %v4852_v10 = vsel %vm679_vm8, %v4846_v63, -inf  ;;  %v16139_v63 = vld [vmem:[#allocation49_spill] sm:$0xff]  ;;  %v16141_v56 = vld [vmem:[#allocation52_spill] sm:$0xff] }
 0xc3c   :  { %vm16134_vm14 = vcmp.eq.s32.totalorder %v16133_v25, 1  ;;  %vm16136_vm10 = vcmp.eq.s32.totalorder %v16135_v59, 1  ;;  %v4849_v26 = vsel %vm679_vm8, %v4843_v19, -inf  ;;  %v4854_v8 = vsel %vm679_vm8, %v4847_v46, -inf  ;;  %v16143_v13 = vld [vmem:[#allocation53_spill] sm:$0xff] }
 0xc3d   :  { %v4892_v34 = vsel %vm16134_vm14, %v13465_v18, -1e+30  ;;  %v4893_v28 = vsel %vm16136_vm10, %v13463_v0, -1e+30  ;;  %vm16138_vm5 = vcmp.eq.s32.totalorder %v16137_v45, 1  ;;  %v13673_v1 = vmax.f32 %v4833_v62, %v4834_v12 }
 0xc3e   :  { %v4888_v21 = vsel %vm16138_vm5, %v13453_v38, -1e+30  ;;  %vm16140_vm11 = vcmp.eq.s32.totalorder %v16139_v63, 1  ;;  %vm16142_vm13 = vcmp.eq.s32.totalorder %v16141_v56, 1  ;;  %vm16144_vm1 = vcmp.eq.s32.totalorder %v16143_v13, 1  ;;  %v16145_v63 = vld [vmem:[#allocation108_spill] sm:$0xff] }
 0xc3f   :  { %v4889_v25 = vsel %vm16140_vm11, %v13451_v43, -1e+30  ;;  %v4915_v59 = vsel %vm16142_vm13, %v13465_v18, -1e+30  ;;  %v4916_v19 = vsel %vm16144_vm1, %v13463_v0, -1e+30  ;;  %v4853_v6 = vmax.f32 %v4848_v49, %v4852_v10 }
 0xc40   :  { %v4857_v46 = vmax.f32 %v13655_v40, %v13658_v5  ;;  %v4898_v45 = vsel %vm679_vm8, %v4892_v34, -inf  ;;  %v4900_v62 = vsel %vm679_vm8, %v4893_v28, -inf  ;;  %v4855_v12 = vmax.f32 %v4849_v26, %v4854_v8  ;;  %v16147_v56 = vld [vmem:[#allocation51_spill] sm:$0xff]  ;;  %v16149_v13 = vld [vmem:[#allocation92_spill] sm:$0xff]  ;;  %v16151_v28 = vld [vmem:[#allocation90_spill] sm:$0xff] }
 0xc41   :  { %vm16146_vm7 = vcmp.eq.s32.totalorder %v16145_v63, 1  ;;  %vm16148_vm14 = vcmp.eq.s32.totalorder %v16147_v56, 1  ;;  %vm16150_vm10 = vcmp.eq.s32.totalorder %v16149_v13, 1  ;;  %v4894_v10 = vsel %vm679_vm8, %v4888_v21, -inf  ;;  %v16153_v8 = vld [vmem:[#allocation66_spill] sm:$0xff]  ;;  %v16155_v13 = vld [vmem:[#allocation67_spill] sm:$0xff] }
 0xc42   :  { %v4865_v50 = vsel %vm16146_vm7, %v13453_v38, -1e+30  ;;  %v4911_v24 = vsel %vm16148_vm14, %v13453_v38, -1e+30  ;;  %v4912_v49 = vsel %vm16150_vm10, %v13451_v43, -1e+30  ;;  %v4899_v63 = vmax.f32 %v4894_v10, %v4898_v45 }
 0xc43   :  { %v4895_v40 = vsel %vm679_vm8, %v4889_v25, -inf  ;;  %v4921_v5 = vsel %vm679_vm8, %v4915_v59, -inf  ;;  %v4923_v34 = vsel %vm679_vm8, %v4916_v19, -inf  ;;  %vm16152_vm5 = vcmp.eq.s32.totalorder %v16151_v28, 1  ;;  %v16157_v25 = vld [vmem:[#allocation94_spill] sm:$0xff]  ;;  %v16161_v45 = vld [vmem:[#allocation61_spill] sm:$0xff] }
 0xc44   :  { %v4890_v26 = vsel %vm16152_vm5, %v13459_v48, -1e+30  ;;  %vm16154_vm11 = vcmp.eq.s32.totalorder %v16153_v8, 1  ;;  %v4901_v54 = vmax.f32 %v4895_v40, %v4900_v62  ;;  %vm16156_vm13 = vcmp.eq.s32.totalorder %v16155_v13, 1  ;;  %v16163_v40 = vld [vmem:[#allocation110_spill] sm:$0xff] }
 0xc45   :  { %v4891_v56 = vsel %vm16154_vm11, %v13457_v44, -1e+30  ;;  %v4913_v21 = vsel %vm16156_vm13, %v13459_v48, -1e+30  ;;  %vm16158_vm1 = vcmp.eq.s32.totalorder %v16157_v25, 1  ;;  %v4917_v19 = vsel %vm679_vm8, %v4911_v24, -inf }
 0xc46   :  { %v4914_v59 = vsel %vm16158_vm1, %v13457_v44, -1e+30  ;;  %v4918_v39 = vsel %vm679_vm8, %v4912_v49, -inf  ;;  %v4922_v28 = vmax.f32 %v4917_v19, %v4921_v5  ;;  %vm16160_vm7 = vcmp.eq.s32.totalorder %v16159_v20, 1  ;;  %v16169_v20 = vld [vmem:[#allocation132_spill] sm:$0xff] }
 0xc47   :  { %v4924_v57 = vmax.f32 %v4918_v39, %v4923_v34  ;;  %v4938_v8 = vsel %vm16160_vm7, %v13465_v18, -1e+30  ;;  %vm16162_vm14 = vcmp.eq.s32.totalorder %v16161_v45, 1  ;;  %vm16164_vm10 = vcmp.eq.s32.totalorder %v16163_v40, 1  ;;  %v16165_v34 = vld [vmem:[#allocation59_spill] sm:$0xff]  ;;  %v16167_v45 = vld [vmem:[#allocation100_spill] sm:$0xff] }
 0xc48   :  { %v4939_v62 = vsel %vm16162_vm14, %v13463_v0, -1e+30  ;;  %v4866_v25 = vsel %vm16164_vm10, %v13451_v43, -1e+30  ;;  %v4896_v24 = vsel %vm679_vm8, %v4890_v26, -inf  ;;  %v4897_v49 = vsel %vm679_vm8, %v4891_v56, -inf }
 0xc49   :  { %v4919_v39 = vsel %vm679_vm8, %v4913_v21, -inf  ;;  %v4920_v5 = vsel %vm679_vm8, %v4914_v59, -inf  ;;  %vm16166_vm5 = vcmp.eq.s32.totalorder %v16165_v34, 1  ;;  %vm16168_vm11 = vcmp.eq.s32.totalorder %v16167_v45, 1  ;;  %v16171_v26 = vld [vmem:[#allocation131_spill] sm:$0xff] }
 0xc4a   :  { %v4934_v19 = vsel %vm16166_vm5, %v13453_v38, -1e+30  ;;  %v4935_v10 = vsel %vm16168_vm11, %v13451_v43, -1e+30  ;;  %vm16170_vm13 = vcmp.eq.s32.totalorder %v16169_v20, 1  ;;  %vm16172_vm1 = vcmp.eq.s32.totalorder %v16171_v26, 1 }
 0xc4b   :  { %v4867_v40 = vsel %vm16170_vm13, %v13459_v48, -1e+30  ;;  %v4868_v56 = vsel %vm16172_vm1, %v13457_v44, -1e+30  ;;  %v4944_v21 = vsel %vm679_vm8, %v4938_v8, -inf  ;;  %v4946_v59 = vsel %vm679_vm8, %v4939_v62, -inf }
 0xc4c   :  { %v4856_v13 = vmax.f32 %v4853_v6, %v4855_v12  ;;  %vm16173_vm7 = vcmp.eq.s32.totalorder %v12243_v52, 1  ;;  %v4902_v23 = vmax.f32 %v4899_v63, %v4901_v54  ;;  %v4925_v45 = vmax.f32 %v4922_v28, %v4924_v57 }
 0xc4d   :  { %v4869_v34 = vsel %vm16173_vm7, %v13465_v18, -1e+30  ;;  %v4903_v32 = vmax.f32 %v4896_v24, %v4897_v49  ;;  %v4926_v53 = vmax.f32 %v4919_v39, %v4920_v5  ;;  %v4940_v20 = vsel %vm679_vm8, %v4934_v19, -inf  ;;  %v16177_v24 = vld [vmem:[#allocation109_spill] sm:$0xff]  ;;  %v16179_v39 = vld [vmem:[#allocation70_spill] sm:$0xff] }
 0xc4e   :  { %v4941_v36 = vsel %vm679_vm8, %v4935_v10, -inf  ;;  %vm16174_vm14 = vcmp.eq.s32.totalorder %v15747_v31, 1  ;;  %vm16175_vm10 = vcmp.eq.s32.totalorder %v15746_v42, 1  ;;  %v4945_v12 = vmax.f32 %v4940_v20, %v4944_v21 }
 0xc4f   :  { %v4936_v26 = vsel %vm16174_vm14, %v13459_v48, -1e+30  ;;  %v4937_v6 = vsel %vm16175_vm10, %v13457_v44, -1e+30  ;;  %v4947_v8 = vmax.f32 %v4941_v36, %v4946_v59  ;;  %vm16176_vm5 = vcmp.eq.s32.totalorder %v15748_v47, 1 }
 0xc50   :  { %v4870_v57 = vsel %vm16176_vm5, %v13463_v0, -1e+30  ;;  %v4871_v54 = vsel %vm679_vm8, %v4865_v50, -inf  ;;  %v4872_v63 = vsel %vm679_vm8, %v4866_v25, -inf  ;;  %v4875_v28 = vsel %vm679_vm8, %v4869_v34, -inf  ;;  %v16183_v34 = vld [vmem:[#allocation69_spill] sm:$0xff] }
 0xc51   :  { %v4904_v62 = vmax.f32 %v4902_v23, %v4903_v32  ;;  %v4927_v10 = vmax.f32 %v4925_v45, %v4926_v53  ;;  %vm16178_vm11 = vcmp.eq.s32.totalorder %v16177_v24, 1  ;;  %vm16180_vm13 = vcmp.eq.s32.totalorder %v16179_v39, 1  ;;  %v16181_v23 = vld [vmem:[#allocation68_spill] sm:$0xff]  ;;  %v16194_v39 = vld [vmem:[#allocation85_spill] sm:$0xff] }
 0xc52   :  { %v4961_v49 = vsel %vm16178_vm11, %v13465_v18, -1e+30  ;;  %v4962_v36 = vsel %vm16180_vm13, %v13463_v0, -1e+30  ;;  %v13767_v20 = vsel %vm679_vm8, %v4867_v40, -inf  ;;  %v13770_v5 = vsel %vm679_vm8, %v4868_v56, -inf }
 0xc53   :  { %v4942_v50 = vsel %vm679_vm8, %v4936_v26, -inf  ;;  %v4943_v25 = vsel %vm679_vm8, %v4937_v6, -inf  ;;  %v13774_v32 = vmax.f32 %v4856_v13, %v4857_v46  ;;  %v4948_v53 = vmax.f32 %v4945_v12, %v4947_v8  ;;  %v16185_v46 = vld [vmem:[#allocation97_spill] sm:$0xff] }
 0xc54   :  { %vm16182_vm1 = vcmp.eq.s32.totalorder %v16181_v23, 1  ;;  %vm16184_vm7 = vcmp.eq.s32.totalorder %v16183_v34, 1  ;;  %v4876_v40 = vmax.f32 %v4871_v54, %v4875_v28  ;;  %v4877_v21 = vsel %vm679_vm8, %v4870_v57, -inf  ;;  %v16187_v34 = vld [vmem:[#allocation119_spill] sm:$0xff] }
 0xc55   :  { %v4957_v45 = vsel %vm16182_vm1, %v13453_v38, -1e+30  ;;  %v4958_v19 = vsel %vm16184_vm7, %v13451_v43, -1e+30  ;;  %v4967_v56 = vsel %vm679_vm8, %v4961_v49, -inf  ;;  %v4969_v26 = vsel %vm679_vm8, %v4962_v36, -inf }
 0xc56   :  { %v4905_v59 = vrot.slane %v4904_v62, 4  ;;  %v4928_v6 = vrot.slane %v4927_v10, 4  ;;  %v4949_v13 = vmax.f32 %v4942_v50, %v4943_v25  ;;  %vm16186_vm14 = vcmp.eq.s32.totalorder %v16185_v46, 1  ;;  %v16189_v57 = vld [vmem:[#allocation87_spill] sm:$0xff] }
 0xc57   :  { %v4959_v12 = vsel %vm16186_vm14, %v13459_v48, -1e+30  ;;  %v4963_v8 = vsel %vm679_vm8, %v4957_v45, -inf  ;;  %v4964_v23 = vsel %vm679_vm8, %v4958_v19, -inf  ;;  %vm16188_vm10 = vcmp.eq.s32.totalorder %v16187_v34, 1  ;;  %v16192_v19 = vld [vmem:[#allocation83_spill] sm:$0xff] }
 0xc58   :  { %v4984_v54 = vsel %vm16188_vm10, %v13465_v18, -1e+30  ;;  %vm16190_vm5 = vcmp.eq.s32.totalorder %v16189_v57, 1  ;;  %v4950_v49 = vmax.f32 %v4948_v53, %v4949_v13  ;;  %vm16191_vm11 = vcmp.eq.s32.totalorder %v15758_v37, 1 }
 0xc59   :  { %v4985_v28 = vsel %vm16190_vm5, %v13463_v0, -1e+30  ;;  %v4960_v36 = vsel %vm16191_vm11, %v13457_v44, -1e+30  ;;  %v4968_v50 = vmax.f32 %v4963_v8, %v4967_v56  ;;  %v4970_v25 = vmax.f32 %v4964_v23, %v4969_v26 }
 0xc5a   :  { %v4878_v46 = vmax.f32 %v4872_v63, %v4877_v21  ;;  %vm16193_vm13 = vcmp.eq.s32.totalorder %v16192_v19, 1  ;;  %vm16195_vm1 = vcmp.eq.s32.totalorder %v16194_v39, 1  ;;  %v13807_v24 = vmax.f32 %v4904_v62, %v4905_v59 }
 0xc5b   :  { %v4980_v34 = vsel %vm16193_vm13, %v13453_v38, -1e+30  ;;  %v4981_v57 = vsel %vm16195_vm1, %v13451_v43, -1e+30  ;;  %v13809_v53 = vmax.f32 %v4927_v10, %v4928_v6  ;;  %v4990_v13 = vsel %vm679_vm8, %v4984_v54, -inf }
 0xc5c   :  { %v4992_v23 = vsel %vm679_vm8, %v4985_v28, -inf  ;;  %v4965_v63 = vsel %vm679_vm8, %v4959_v12, -inf  ;;  %v4966_v21 = vsel %vm679_vm8, %v4960_v36, -inf  ;;  %v4982_v26 = vsel %vm1719_vm9, %v13459_v48, -1e+30  ;;  %v16199_v36 = vld [vmem:[#allocation103_spill] sm:$0xff] }
 0xc5d   :  { %v4983_v45 = vsel %vm1720_vm2, %v13457_v44, -1e+30  ;;  %v4951_v62 = vrot.slane %v4950_v49, 4  ;;  %v4971_v59 = vmax.f32 %v4968_v50, %v4970_v25  ;;  %v4986_v10 = vsel %vm679_vm8, %v4980_v34, -inf  ;;  %v16205_v25 = vld [vmem:[#allocation120_spill] sm:$0xff] }
 0xc5e   :  { %v4987_v6 = vsel %vm679_vm8, %v4981_v57, -inf  ;;  %v4991_v54 = vmax.f32 %v4986_v10, %v4990_v13  ;;  %vm16198_vm7 = vcmp.eq.s32.totalorder %v15765_v7, 1  ;;  %vm16200_vm14 = vcmp.eq.s32.totalorder %v16199_v36, 1 }
 0xc5f   :  { %v4993_v28 = vmax.f32 %v4987_v6, %v4992_v23  ;;  %v5007_v12 = vsel %vm16198_vm7, %v13465_v18, -1e+30  ;;  %v5008_v56 = vsel %vm16200_vm14, %v13463_v0, -1e+30  ;;  %v4879_v39 = vmax.f32 %v4876_v40, %v4878_v46  ;;  %v16207_v23 = vld [vmem:[#allocation124_spill] sm:$0xff] }
 0xc60   :  { %v4972_v19 = vmax.f32 %v4965_v63, %v4966_v21  ;;  %v4988_v8 = vsel %vm679_vm8, %v4982_v26, -inf  ;;  %v4989_v50 = vsel %vm679_vm8, %v4983_v45, -inf  ;;  %v4907_v34 = vrot.slane %v13807_v24, 2  ;;  %v16203_v26 = vld [vmem:[#allocation123_spill] sm:$0xff] }
 0xc61   :  { %v4930_v57 = vrot.slane %v13809_v53, 2  ;;  %v5003_v13 = vsel %vm1764_vm0, %v13453_v38, -1e+30  ;;  %v5004_v10 = vsel %vm1765_vm15, %v13451_v43, -1e+30  ;;  %v13839_v6 = vmax.f32 %v4950_v49, %v4951_v62 }
 0xc62   :  { %v4973_v40 = vmax.f32 %v4971_v59, %v4972_v19  ;;  %v5013_v46 = vsel %vm679_vm8, %v5007_v12, -inf  ;;  %v5015_v63 = vsel %vm679_vm8, %v5008_v56, -inf  ;;  %v4994_v45 = vmax.f32 %v4991_v54, %v4993_v28  ;;  %v16209_v19 = vld [vmem:[#allocation126_spill] sm:$0xff] }
 0xc63   :  { %v4995_v21 = vmax.f32 %v4988_v8, %v4989_v50  ;;  %vm16204_vm10 = vcmp.eq.s32.totalorder %v16203_v26, 1  ;;  %vm16206_vm5 = vcmp.eq.s32.totalorder %v16205_v25, 1  ;;  %vm16208_vm11 = vcmp.eq.s32.totalorder %v16207_v23, 1  ;;  %v16212_v50 = vld [vmem:[#allocation118_spill] sm:$0xff] }
 0xc64   :  { %v5030_v36 = vsel %vm16204_vm10, %v13465_v18, -1e+30  ;;  %v5031_v7 = vsel %vm16206_vm5, %v13463_v0, -1e+30  ;;  %v5005_v49 = vsel %vm16208_vm11, %v13459_v48, -1e+30 }
 0xc65   :  { %vm16210_vm13 = vcmp.eq.s32.totalorder %v16209_v19, 1  ;;  %v5009_v56 = vsel %vm679_vm8, %v5003_v13, -inf  ;;  %v5010_v8 = vsel %vm679_vm8, %v5004_v10, -inf  ;;  %v5026_v12 = vsel %vm1811_vm6, %v13453_v38, -1e+30  ;;  %v16214_v19 = vld [vmem:[#allocation130_spill] sm:$0xff] }
 0xc66   :  { %v5006_v62 = vsel %vm16210_vm13, %v13457_v44, -1e+30  ;;  %v5014_v59 = vmax.f32 %v5009_v56, %v5013_v46  ;;  %v5016_v54 = vmax.f32 %v5010_v8, %v5015_v63  ;;  %vm16213_vm1 = vcmp.eq.s32.totalorder %v16212_v50, 1  ;;  %v16216_v10 = vld [vmem:[#allocation135_spill] sm:$0xff] }
 0xc67   :  { %v5027_v25 = vsel %vm16213_vm1, %v13451_v43, -1e+30  ;;  %v5036_v23 = vsel %vm679_vm8, %v5030_v36, -inf  ;;  %v5038_v26 = vsel %vm679_vm8, %v5031_v7, -inf  ;;  %vm16215_vm7 = vcmp.eq.s32.totalorder %v16214_v19, 1 }
 0xc68   :  { %v5053_v13 = vsel %vm16215_vm7, %v13465_v18, -1e+30  ;;  %vm16217_vm14 = vcmp.eq.s32.totalorder %v16216_v10, 1  ;;  %v5011_v63 = vsel %vm679_vm8, %v5005_v49, -inf  ;;  %v5012_v56 = vsel %vm679_vm8, %v5006_v62, -inf }
 0xc69   :  { %v5054_v46 = vsel %vm16217_vm14, %v13463_v0, -1e+30  ;;  %v5028_v50 = vsel %vm1813_vm4, %v13459_v48, -1e+30  ;;  %v5029_v7 = vsel %vm1814_vm3, %v13457_v44, -1e+30  ;;  %v4996_v47 = vmax.f32 %v4994_v45, %v4995_v21 }
 0xc6a   :  { %v5032_v28 = vsel %vm679_vm8, %v5026_v12, -inf  ;;  %v5033_v18 = vsel %vm679_vm8, %v5027_v25, -inf  ;;  %v5049_v0 = vsel %vm1858_vm12, %v13453_v38, -1e+30  ;;  %vm16221_vm10 = vcmp.eq.s32.totalorder %v15985_v9, 1 }
 0xc6b   :  { %v5050_v49 = vsel %vm16221_vm10, %v13451_v43, -1e+30  ;;  %v5037_v62 = vmax.f32 %v5032_v28, %v5036_v23  ;;  %v5039_v10 = vmax.f32 %v5033_v18, %v5038_v26  ;;  %v5059_v8 = vsel %vm679_vm8, %v5053_v13, -inf }
 0xc6c   :  { %v5061_v37 = vsel %vm679_vm8, %v5054_v46, -inf  ;;  %v4974_v36 = vrot.slane %v4973_v40, 4  ;;  %v5017_v42 = vmax.f32 %v5014_v59, %v5016_v54  ;;  %v5018_v12 = vmax.f32 %v5011_v63, %v5012_v56 }
 0xc6d   :  { %v5034_v25 = vsel %vm679_vm8, %v5028_v50, -inf  ;;  %v5035_v31 = vsel %vm679_vm8, %v5029_v7, -inf  ;;  %v5055_v38 = vsel %vm679_vm8, %v5049_v0, -inf  ;;  %v5056_v19 = vsel %vm679_vm8, %v5050_v49, -inf }
 0xc6e   :  { %vm16222_vm5 = vcmp.eq.s32.totalorder %v12541_v22, 1  ;;  %vm16223_vm11 = vcmp.eq.s32.totalorder %v12543_v61, 1  ;;  %v5060_v26 = vmax.f32 %v5055_v38, %v5059_v8  ;;  %v5062_v45 = vmax.f32 %v5056_v19, %v5061_v37 }
 0xc6f   :  { %v5051_v43 = vsel %vm16222_vm5, %v13459_v48, -1e+30  ;;  %v5052_v23 = vsel %vm16223_vm11, %v13457_v44, -1e+30  ;;  %v16224_v21 = vrot.slane %v13673_v1, 4  ;;  %v4859_v54 = vrot.slane %v13774_v32, 4 }
 0xc70   :  { %v16225_v28 = vmax.f32 %v13767_v20, %v13770_v5  ;;  %v5040_v13 = vmax.f32 %v5037_v62, %v5039_v10  ;;  %v4908_v46 = vmax.f32 %v13807_v24, %v4907_v34  ;;  %v4931_v48 = vmax.f32 %v13809_v53, %v4930_v57 }
 0xc71   :  { %v4837_v59 = vmax.f32 %v13673_v1, %v16224_v21  ;;  %v4953_v63 = vrot.slane %v13839_v6, 2  ;;  %v5019_v44 = vmax.f32 %v5017_v42, %v5018_v12  ;;  %v4997_v56 = vrot.slane %v4996_v47, 4 }
 0xc72   :  { %v4881_v50 = vmax.f32 %v4879_v39, %v16225_v28  ;;  %v5041_v37 = vmax.f32 %v5034_v25, %v5035_v31  ;;  %v5057_v19 = vsel %vm679_vm8, %v5051_v43, -inf  ;;  %v5058_v1 = vsel %vm679_vm8, %v5052_v23, -inf  ;;  %v8944_v25 = vld [vmem:[%s15286_s12 + $0x50] sm:$0xff] }
 0xc73   :  { %v16226_v8 = vrot.slane %v13622_v17, 2  ;;  %v16227_v39 = vrot.slane %v13636_v27, 2  ;;  %v4975_v24 = vmax.f32 %v4973_v40, %v4974_v36  ;;  %v5063_v5 = vmax.f32 %v5060_v26, %v5062_v45 }
 0xc74   :  { %v4838_v53 = vrot.slane %v4837_v59, 2  ;;  %v4882_v34 = vrot.slane %v4881_v50, 4  ;;  %vm16228_vm13 = vcmask 1040384   ;;  %v5042_v42 = vmax.f32 %v5040_v13, %v5041_v37 }
 0xc75   :  { %v4793_v7 = vmax.f32 %v13622_v17, %v16226_v8  ;;  %v4816_v20 = vmax.f32 %v13636_v27, %v16227_v39  ;;  %v5072_v31 = vsel %vm16228_vm13, %v13624_v4, %v13634_v14  ;;  %v4860_v57 = vmax.f32 %v13774_v32, %v4859_v54  ;;  %v8945_v4 = vld [vmem:[%s15286_s12 + $0x58] sm:$0xff]  ;;  %vm16232_vm10 = vmmov %vm16228_vm13 }
 0xc76   :  { %v4909_v10 = vrot.slane %v4908_v46, 1  ;;  %v5020_v18 = vrot.slane %v5019_v44, 4  ;;  %v5064_v0 = vmax.f32 %v5057_v19, %v5058_v1  ;;  %v4932_v49 = vrot.slane %v4931_v48, 1  ;;  %v5262_v19 = vld [vmem:[#allocation14 + $0x48] sm:$0xff] }
 0xc77   :  { %v4954_v17 = vmax.f32 %v13839_v6, %v4953_v63  ;;  %v4998_v62 = vmax.f32 %v4996_v47, %v4997_v56  ;;  %v4794_v12 = vrot.slane %v4793_v7, 1  ;;  %v4976_v27 = vrot.slane %v4975_v24, 2 }
 0xc78   :  { %v5065_v40 = vmax.f32 %v5063_v5, %v5064_v0  ;;  %v4817_v14 = vrot.slane %v4816_v20, 1  ;;  %v4883_v32 = vmax.f32 %v4881_v50, %v4882_v34  ;;  %vm16229_vm1 = vcmask 1041408  }
 0xc79   :  { %v5073_v38 = vsel %vm16229_vm1, %v5072_v31, %v13651_v29  ;;  %v5043_v6 = vrot.slane %v5042_v42, 4  ;;  %v4839_v43 = vmax.f32 %v4837_v59, %v4838_v53  ;;  %v4861_v23 = vrot.slane %v4860_v57, 2  ;;  %v5261_v29 = vld [vmem:[#allocation14 + $0x40] sm:$0xff]  ;;  %vm16234_vm11 = vmmov %vm16229_vm1 }
 0xc7a   :  { %v4910_v26 = vmax.f32 %v4908_v46, %v4909_v10  ;;  %v5021_v45 = vmax.f32 %v5019_v44, %v5020_v18  ;;  %v4933_v54 = vmax.f32 %v4931_v48, %v4932_v49  ;;  %v4955_v28 = vrot.slane %v4954_v17, 1 }
 0xc7b   :  { %v4999_v13 = vrot.slane %v4998_v62, 2  ;;  %v10531_v56 = vpack.c.bf16 %v8945_v4, %v8944_v25  ;;  %v4977_v37 = vmax.f32 %v4975_v24, %v4976_v27  ;;  %v5066_v50 = vrot.slane %v5065_v40, 4  ;;  %v5349_v4 = vld [vmem:[#allocation16 + $0x40] sm:$0xff] }
 0xc7c   :  { %v4795_v1 = vmax.f32 %v4793_v7, %v4794_v12  ;;  %v4884_v59 = vrot.slane %v4883_v32, 2  ;;  %v5044_v8 = vmax.f32 %v5042_v42, %v5043_v6  ;;  %vm16230_vm7 = vcmp.ge.f32.partialorder %v13368_v55, 0.1  ;;  %v5263_v55 = vld [vmem:[#allocation14 + $0x50] sm:$0xff] }
 0xc7d   :  { %v3958_v46 = vsel %vm16230_vm7, %v13380_v30, 0.0  ;;  %v4818_v48 = vmax.f32 %v4816_v20, %v4817_v14  ;;  %v4862_v44 = vmax.f32 %v4860_v57, %v4861_v23  ;;  %v5022_v39 = vrot.slane %v5021_v45, 2  ;;  %v5264_v30 = vld [vmem:[#allocation14 + $0x58] sm:$0xff]  ;;  %v5350_v14 = vld [vmem:[#allocation16 + $0x48] sm:$0xff] }
 0xc7e   :  { %v4840_v24 = vrot.slane %v4839_v43, 1  ;;  %vm16231_vm14 = vcmask 1042432   ;;  %v4956_v53 = vmax.f32 %v4954_v17, %v4955_v28  ;;  %v5000_v7 = vmax.f32 %v4998_v62, %v4999_v13  ;;  %v5351_v28 = vld [vmem:[#allocation16 + $0x50] sm:$0xff]  ;;  %v5352_v13 = vld [vmem:[#allocation16 + $0x58] sm:$0xff] }
 0xc7f   :  { %v5074_v5 = vsel %vm16231_vm14, %v5073_v38, %v4795_v1  ;;  %v10535_v34 = vpack.c.bf16 %v5262_v19, %v5261_v29  ;;  %v4978_v31 = vrot.slane %v4977_v37, 1  ;;  %v5067_v42 = vmax.f32 %v5065_v40, %v5066_v50  ;;  %vm16237_vm7 = vmmov %vm16231_vm14 }
 0xc80   :  { %v5079_v10 = vsel %vm16232_vm10, %v4910_v26, %v4933_v54  ;;  %v4885_v20 = vmax.f32 %v4883_v32, %v4884_v59  ;;  %v5045_v57 = vrot.slane %v5044_v8, 2  ;;  %v4863_v18 = vrot.slane %v4862_v44, 1 }
 0xc81   :  { %vm16233_vm5 = vcmask 1043456   ;;  %v5023_v0 = vmax.f32 %v5021_v45, %v5022_v39  ;;  %v4841_v49 = vmax.f32 %v4839_v43, %v4840_v24  ;;  %v5001_v12 = vrot.slane %v5000_v7, 1  ;;  %v5450_v39 = vld [vmem:[#allocation17 + $0x58] sm:$0xff] }
 0xc82   :  { %v5080_v17 = vsel %vm16234_vm11, %v5079_v10, %v4956_v53  ;;  %v10539_v62 = vpack.c.bf16 %v5264_v30, %v5263_v55  ;;  %v4979_v27 = vmax.f32 %v4977_v37, %v4978_v31  ;;  %v5068_v25 = vrot.slane %v5067_v42, 2  ;;  %vm16239_vm10 = vmmov %vm16233_vm5  ;;  %v8961_v53 = vld [vmem:[%s15280_s6 + $0x38] sm:$0xff]  ;;  %v10921_v30 = vld [vmem:[%s15622_s20] sm:$0xff] }
 0xc83   :  { %vm16235_vm13 = vcmp.ge.f32.partialorder %v13370_v33, 0.1  ;;  %v4886_v32 = vrot.slane %v4885_v20, 1  ;;  %vm16236_vm1 = vcmask 1044480   ;;  %v5046_v6 = vmax.f32 %v5044_v8, %v5045_v57  ;;  %v10923_v57 = vld [vmem:[%s15622_s20 + $0x10] sm:$0xff] }
 0xc84   :  { %v3959_v40 = vsel %vm16235_vm13, %v13375_v41, 0.0  ;;  %v4864_v43 = vmax.f32 %v4862_v44, %v4863_v18  ;;  %v5024_v23 = vrot.slane %v5023_v0, 1  ;;  %v5081_v26 = vsel %vm16237_vm7, %v5080_v17, %v4979_v27  ;;  %vm16241_vm11 = vmmov %vm16236_vm1  ;;  %v10924_v18 = vld [vmem:[%s15622_s20 + $0x18] sm:$0xff]  ;;  %v14009_v27 = vld [vmem:[#allocation5 + $0x20] sm:$0xff] }
 0xc85   :  { %v5002_v45 = vmax.f32 %v5000_v7, %v5001_v12  ;;  %vm16238_vm14 = vcmask 1045504   ;;  %v5069_v41 = vmax.f32 %v5067_v42, %v5068_v25  ;;  %v4887_v54 = vmax.f32 %v4885_v20, %v4886_v32  ;;  %v10922_v20 = vld [vmem:[%s15622_s20 + $0x8] sm:$0xff] }
 0xc86   :  { %v5025_v37 = vmax.f32 %v5023_v0, %v5024_v23  ;;  %v10547_v29 = vpack.c.bf16 %v5352_v13, %v5351_v28  ;;  %vm16242_vm13 = vcmp.gt.f32.partialorder %v11909_v35, 0.0  ;;  %v10926_v0 = vld [vmem:[%s15622_s20 + $0x28] sm:$0xff]  ;;  %v5856_v28 = vld [vmem:[#allocation8 + $0x78] sm:$0xff] }
 0xc87   :  { %v5070_v19 = vrot.slane %v5069_v41, 1  ;;  %v5854_v23 = vld [vmem:[#allocation8 + $0x68] sm:$0xff] }
 0xceb   :  { %v13922_v36 = vpop.f32.mrb[40].mxu0 }
 0xcec   :  { %v4693_v47 = vpop.f32.mrb[41].mxu0  ;;  %v4703_v63 = vmul.f32 %v12263_v3, %v13922_v36 }
 0xced   :  { %v4702_v21 = vmul.f32 %v12255_v60, %v4693_v47 }
 0xcef   :  { %9956 = vmatprep.mubr.msk.f32.mxu0 %vm679_vm8, %v4702_v21  ;;  %v10543_v21 = vpack.c.bf16 %v5350_v14, %v5349_v4  ;;  %v14011_v4 = vld [vmem:[#allocation5 + $0x28] sm:$0xff] }
 0xcf0   :  { %9957 = vmatmul.mubr.msk.f32.vlgmr.msra.gmra.mrb[42].mxu0 %vm679_vm8, %v4703_v63  ;;  %v5047_v63 = vrot.slane %v5046_v6, 1 }
 0xcf1   :  { %10530 = vmatpush3.bf16.msra.mxu0 %v13477_v11  ;;  %9967 = vmatprep.mubr.msk.f32.mxu0 %vm679_vm8, %v3958_v46  ;;  %v5075_v11 = vsel %vm16233_vm5, %v5074_v5, %v4818_v48  ;;  %vm16240_vm5 = vcmask 1046528   ;;  %v5071_v46 = vmax.f32 %v5069_v41, %v5070_v19  ;;  %v8960_v5 = vld [vmem:[%s15280_s6 + $0x30] sm:$0xff] }
 0xcf2   :  { %10532 = vmatprep.subr.bf16.mxu0 %v10531_v56  ;;  %v5076_v38 = vsel %vm16236_vm1, %v5075_v11, %v4841_v49  ;;  %v5048_v1 = vmax.f32 %v5046_v6, %v5047_v63  ;;  %vm16243_vm1 = vmmov %vm16238_vm14  ;;  %v10559_v7 = vpack.c.bf16 %v8961_v53, %v8960_v5  ;;  %v10925_v11 = vld [vmem:[%s15622_s20 + $0x20] sm:$0xff]  ;;  %v16261_v19 = vld [vmem:[#allocation32_spill] sm:$0xff] }
 0xcf3   :  { %v5077_v33 = vsel %vm16238_vm14, %v5076_v38, %v4864_v43  ;;  %vm16244_vm7 = vmmov %vm16240_vm5  ;;  %vm16245_vm14 = vcmp.gt.f32.partialorder %v16010_v16, 0.0  ;;  %v8957_v49 = vld [vmem:[%s15292_s18 + $0x2] ss:$0 sm:$0xff]  ;;  %v5853_v43 = vld [vmem:[#allocation8 + $0x60] sm:$0xff] }
 0xcf4   :  { %v5078_v50 = vsel %vm16240_vm5, %v5077_v33, %v4887_v54  ;;  %v10575_v33 = vpack.c.bf16 %v5854_v23, %v5853_v43  ;;  %v5855_v54 = vld [vmem:[#allocation8 + $0x70] sm:$0xff] }
 0xcf5   :  { %10534 = vmatpush3.bf16.msra.mxu0 %v10531_v56  ;;  %v5082_v56 = vsel %vm16239_vm10, %v5081_v26, %v5002_v45  ;;  %v5086_v59 = vsel %vm16242_vm13, %v5078_v50, 0.0  ;;  %vm16246_vm10 = vcmask 130048   ;;  %v16257_v50 = vld [vmem:[#allocation30_spill] sm:$0xff] }
 0xcf6   :  { %10536 = vmatprep.subr.bf16.mxu0 %v10535_v34  ;;  %vm16247_vm5 = vmmov %vm16246_vm10 }
 0xcf7   :  { %vm16249_vm13 = vmmov %vm16247_vm5 }
 0xcf8   :  { %9968 = vmatmul.mubr.msk.f32.vlgmr.msra.gmra.mrb[42].mxu0 %vm679_vm8, %v3959_v40 }
 0xcf9   :  { %10538 = vmatpush3.bf16.msra.mxu0 %v10535_v34  ;;  %9978 = vmatprep.mubr.msk.f32.mxu0 %vm679_vm8, %v4693_v47  ;;  %v5083_v47 = vsel %vm16241_vm11, %v5082_v56, %v5025_v37  ;;  %v8955_v34 = vld [vmem:[%s15290_s16 + $0x2] ss:$0 sm:$0xff]  ;;  %vm16248_vm11 = vmmov %vm16247_vm5  ;;  %v10579_v56 = vpack.c.bf16 %v5856_v28, %v5855_v54 }
 0xcfa   :  { %10540 = vmatprep.subr.bf16.mxu0 %v10539_v62  ;;  %v5084_v8 = vsel %vm16243_vm1, %v5083_v47, %v5048_v1  ;;  %vm16250_vm1 = vmmov %vm16247_vm5  ;;  %v16255_v37 = vld [vmem:[#allocation38_spill] sm:$0xff]  ;;  %v16263_v47 = vld [vmem:[#allocation40_spill] sm:$0xff] }
 0xcfb   :  { %v5085_v48 = vsel %vm16244_vm7, %v5084_v8, %v5071_v46  ;;  %vm16251_vm7 = vmmov %vm16250_vm1  ;;  %v16265_v1 = vld [vmem:[#allocation33_spill] sm:$0xff]  ;;  %v16268_v8 = vld [vmem:[#allocation34_spill] sm:$0xff] }
 0xcfc   :  { %v5087_v44 = vsel %vm16245_vm14, %v5085_v48, 0.0  ;;  %vm16252_vm14 = vmmov %vm16250_vm1  ;;  %v16270_v46 = vld [vmem:[#allocation27_spill] sm:$0xff] }
 0xcfd   :  { %10542 = vmatpush3.bf16.msra.mxu0 %v10539_v62  ;;  %v8985_v48 = vld [vmem:[%s15282_s8 + $0x60] sm:$0xff] }
 0xcfe   :  { %10544 = vmatprep.subr.bf16.mxu0 %v10543_v21 }
 0xd00   :  { %9979 = vmatmul.mubr.msk.f32.vlgmr.msra.gmra.mrb[42].mxu0 %vm679_vm8, %v13922_v36  ;;  %v5449_v36 = vld [vmem:[#allocation17 + $0x50] sm:$0xff] }
 0xd01   :  { %10546 = vmatpush3.bf16.msra.mxu0 %v10543_v21  ;;  %9989 = vmatprep.mubr.msk.f32.mxu0 %vm679_vm8, %v5086_v59  ;;  %v10555_v24 = vpack.c.bf16 %v5450_v39, %v5449_v36  ;;  %v16266_v59 = vld [vmem:[#allocation39_spill] sm:$0xff]  ;;  %v8987_v39 = vld [vmem:[%s15282_s8 + $0x70] sm:$0xff] }
 0xd02   :  { %10548 = vmatprep.subr.bf16.mxu0 %v10547_v29 }
 0xd03   :  { %10556 = vmatprep.subr.bf16.mxu1 %v10555_v24 }
 0xd04   :  { %10558 = vmatpush3.bf16.msra.mxu1 %v10555_v24  ;;  %v8988_v24 = vld [vmem:[%s15282_s8 + $0x78] sm:$0xff] }
 0xd05   :  { %10550 = vmatpush3.bf16.msra.mxu0 %v10547_v29  ;;  %10560 = vmatprep.subr.bf16.mxu1 %v10559_v7  ;;  %v16259_v29 = vld [vmem:[#allocation37_spill] sm:$0xff] }
 0xd08   :  { %9990 = vmatmul.mubr.msk.f32.vlgmr.msra.gmra.mrb[42].mxu0 %vm679_vm8, %v5087_v44  ;;  %v8986_v44 = vld [vmem:[%s15282_s8 + $0x68] sm:$0xff] }
 0xd09   :  { %10020 = vmatprep.mubr.msk.f32.mxu0 %vm16246_vm10, %v16012_v15  ;;  %vm16253_vm10 = vmmov %vm16250_vm1  ;;  %v10583_v36 = vpack.c.bf16 %v8986_v44, %v8985_v48  ;;  %v6685_v44 = vld [vmem:[#allocation13 + $0x60] sm:$0xff] }
 0xddb   :  { %v9991_v31 = vpop.f32.mrb[42].mxu0 }
 0xddc   :  { %v5425_v42 = vpop.f32.mrb[43].mxu0  ;;  %v5445_v55 = vadd.f32 %v9991_v31, %v8955_v34  ;;  %v10587_v31 = vpack.c.bf16 %v8988_v24, %v8987_v39 }
 0xddd   :  { %v5444_v10 = vadd.f32 %v8955_v34, %v5425_v42 }
 0xddf   :  { %10000 = vmatprep.mubr.msk.f32.mxu1 %vm679_vm8, %v5444_v10 }
 0xde0   :  { %10001 = vmatmul.mubr.msk.f32.vlgmr.msra.gmra.mrb[44].mxu1 %vm679_vm8, %v5445_v55 }
 0xde1   :  { %10562 = vmatpush3.bf16.msra.mxu1 %v10559_v7  ;;  %10007 = vmatprep.mubr.msk.f32.mxu1 %vm16247_vm5, %v10921_v30  ;;  %vm15611_vm5 = vcmp.ge.f32.partialorder %v14009_v27, 0.1 }
 0xde4   :  { %10008 = vmatmul.mubr.msk.f32.vlgmr.msra.gmra.mrb[46].mxu1 %vm16248_vm11, %v10922_v20  ;;  %vm15610_vm11 = vcmp.ge.f32.partialorder %v14011_v4, 0.1  ;;  %v6084_v20 = vld [vmem:[#allocation10 + $0x18] sm:$0xff] }
 0xde5   :  { %10010 = vmatprep.mubr.msk.f32.mxu1 %vm16249_vm13, %v10923_v57  ;;  %vm10564_vm13 = vmpackc.low %vm15610_vm11, %vm15611_vm5 }
 0xde6   :  { %vm16262_vm11 = vmmov %vm16250_vm1 }
 0xde7   :  { %vm16264_vm5 = vmmov %vm16250_vm1 }
 0xde8   :  { %10011 = vmatmul.mubr.msk.f32.gmra.mrb[48].mxu1 %vm16250_vm1, %v10924_v18 }
 0xde9   :  { %10013 = vmatprep.mubr.msk.f32.mxu1 %vm16251_vm7, %v10925_v11  ;;  %vm16254_vm7 = vmmov %vm16250_vm1 }
 0xdec   :  { %10014 = vmatmul.mubr.msk.f32.gmra.mrb[50].mxu1 %vm16252_vm14, %v10926_v0  ;;  %vm16256_vm14 = vmmov %vm16250_vm1 }
 0xded   :  { %10033 = vmatprep.mubr.msk.f32.mxu1 %vm16253_vm10, %v16020_v51  ;;  %vm16258_vm10 = vmmov %vm16250_vm1 }
 0xeb3   :  { %v10002_v12 = vpop.f32.mrb[44].mxu1 }
 0xeb4   :  { %v5537_v17 = vadd.f32 %v10002_v12, %v8957_v49  ;;  %v5531_v62 = vpop.f32.mrb[45].mxu1 }
 0xeb5   :  { %v5532_v25 = vadd.f32 %v8957_v49, %v5531_v62  ;;  %v8962_v49 = vld [vmem:[#allocation7 + $0x3] ss:$0 sm:$0xff] }
 0xeb6   :  { %v5541_v40 = vmax.f32 %v5537_v17, 0.0 }
 0xeb7   :  { %v5540_v14 = vmax.f32 %v5532_v25, 0.0  ;;  %v14014_v32 = vpop.f32.mrb[46].mxu1 }
 0xeb8   :  { %v14016_v38 = vmul.f32 1.1111112, %v5541_v40  ;;  %v14018_v6 = vpop.f32.mrb[47].mxu1  ;;  %v5634_v17 = vadd.f32 %v14014_v32, %v8962_v49 }
 0xeb9   :  { %v14021_v26 = vmul.f32 1.1111112, %v5540_v14  ;;  %v5629_v12 = vadd.f32 %v8962_v49, %v14018_v6  ;;  %v9007_v6 = vld [vmem:[#allocation11 + $0x3] ss:$0 sm:$0xff] }
 0xebb   :  { %v10563_v45 = vpack.c.bf16 %v14016_v38, %v14021_v26  ;;  %v14029_v21 = vpop.f32.mrb[48].mxu1 }
 0xebc   :  { %v14031_v41 = vpop.f32.mrb[49].mxu1  ;;  %v5644_v25 = vadd.f32 %v14029_v21, %v8962_v49 }
 0xebd   :  { %10565 = vmatprep.subr.msk.bf16.mxu0 %vm10564_vm13, %v10563_v45  ;;  %10571 = vmatprep.subr.msk.bf16.mxu1 %vm10564_vm13, %v10563_v45  ;;  %v5639_v62 = vadd.f32 %v8962_v49, %v14031_v41 }
 0xebe   :  { %10568 = vmatpush3.bf16.msk.msra.mxu0 %vm10564_vm13, %v10563_v45  ;;  %10574 = vmatpush3.bf16.msk.msra.mxu1 %vm10564_vm13, %v10563_v45  ;;  %vm16260_vm13 = vmmov %vm16250_vm1 }
 0xebf   :  { %v14033_v13 = vpop.f32.mrb[50].mxu1  ;;  %10576 = vmatprep.subr.bf16.mxu0 %v10575_v33 }
 0xec0   :  { %v5648_v63 = vpop.f32.mrb[51].mxu1  ;;  %v5654_v14 = vadd.f32 %v14033_v13, %v8962_v49 }
 0xec1   :  { %10021 = vmatmul.mubr.msk.f32.vlgmr.msra.gmra.mrb[44].mxu0 %vm16250_vm1, %v16022_v58  ;;  %10034 = vmatmul.mubr.msk.f32.vlgmr.msra.gmra.mrb[52].mxu1 %vm16254_vm7, %v16024_v2  ;;  %vm16267_vm7 = vmmov %vm16250_vm1  ;;  %v5649_v40 = vadd.f32 %v8962_v49, %v5648_v63 }
 0xec2   :  { %10023 = vmatprep.mubr.msk.f32.mxu0 %vm16256_vm14, %v16255_v37  ;;  %10036 = vmatprep.mubr.msk.f32.mxu1 %vm16258_vm10, %v16257_v50  ;;  %vm16269_vm14 = vmmov %vm16250_vm1  ;;  %vm16271_vm10 = vcmask 392192  }
 0xec3   :  { %10578 = vmatpush3.bf16.msra.mxu0 %v10575_v33 }
 0xec4   :  { %10580 = vmatprep.subr.bf16.mxu0 %v10579_v56 }
 0xec5   :  { %10024 = vmatmul.mubr.msk.f32.gmra.mrb[46].mxu0 %vm16260_vm13, %v16259_v29  ;;  %10037 = vmatmul.mubr.msk.f32.gmra.mrb[54].mxu1 %vm16262_vm11, %v16261_v19 }
 0xec6   :  { %10026 = vmatprep.mubr.msk.f32.mxu0 %vm16264_vm5, %v16263_v47  ;;  %10039 = vmatprep.mubr.msk.f32.mxu1 %vm16250_vm1, %v16265_v1  ;;  %vm16272_vm5 = vcmask 64512  }
 0xec7   :  { %10582 = vmatpush3.bf16.msra.mxu0 %v10579_v56  ;;  %vm16273_vm11 = vmmov %vm16272_vm5 }
 0xec8   :  { %10584 = vmatprep.subr.bf16.mxu0 %v10583_v36  ;;  %vm16274_vm13 = vmmov %vm16272_vm5 }
 0xec9   :  { %10027 = vmatmul.mubr.msk.f32.gmra.mrb[48].mxu0 %vm16267_vm7, %v16266_v59  ;;  %10040 = vmatmul.mubr.msk.f32.gmra.mrb[56].mxu1 %vm16269_vm14, %v16268_v8  ;;  %vm16275_vm1 = vmmov %vm16272_vm5 }
 0xeca   :  { %10099 = vmatprep.mubr.msk.f32.mxu1 %vm16271_vm10, %v16270_v46  ;;  %vm16276_vm7 = vmmov %vm16275_vm1 }
 0xecb   :  { %vm16277_vm14 = vmmov %vm16275_vm1 }
 0xf94   :  { %v10022_v5 = vpop.f32.mrb[44].mxu0  ;;  %v10035_v53 = vpop.f32.mrb[52].mxu1 }
 0xf95   :  { %v5723_v7 = vpop.f32.mrb[45].mxu0  ;;  %v5818_v34 = vpop.f32.mrb[53].mxu1 }
 0xf96   :  { %10050 = vmatprep.mubr.msk.f32.mxu0 %vm679_vm8, %v5818_v34  ;;  %v6688_v34 = vld [vmem:[#allocation13 + $0x78] sm:$0xff] }
 0xf97   :  { %10051 = vmatmul.mubr.msk.f32.vlgmr.msra.gmra.mrb[50].mxu0 %vm679_vm8, %v10035_v53  ;;  %v16278_v53 = vld [vmem:[#allocation28_spill] sm:$0xff] }
 0xf98   :  { %v10025_v42 = vpop.f32.mrb[46].mxu0  ;;  %v10038_v10 = vpop.f32.mrb[54].mxu1  ;;  %10586 = vmatpush3.bf16.msra.mxu0 %v10583_v36  ;;  %v6686_v36 = vld [vmem:[#allocation13 + $0x68] sm:$0xff] }
 0xf99   :  { %v5733_v55 = vpop.f32.mrb[47].mxu0  ;;  %v5828_v30 = vpop.f32.mrb[55].mxu1  ;;  %10588 = vmatprep.subr.bf16.mxu0 %v10587_v31 }
 0xf9a   :  { %10053 = vmatprep.mubr.msk.f32.mxu0 %vm679_vm8, %v5828_v30  ;;  %v7038_v30 = vld [vmem:[#allocation17 + $0x60] sm:$0xff] }
 0xf9b   :  { %10054 = vmatmul.mubr.msk.f32.gmra.mrb[52].mxu0 %vm679_vm8, %v10038_v10  ;;  %v9011_v10 = vld [vmem:[%s15286_s12 + $0x68] sm:$0xff] }
 0xf9c   :  { %v10028_v57 = vpop.f32.mrb[48].mxu0  ;;  %v10041_v18 = vpop.f32.mrb[56].mxu1  ;;  %10590 = vmatpush3.bf16.msra.mxu0 %v10587_v31 }
 0xf9d   :  { %v5743_v11 = vpop.f32.mrb[49].mxu0  ;;  %v5838_v0 = vpop.f32.mrb[57].mxu1  ;;  %10076 = vmatprep.subr.mxu0 %v6084_v20 }
 0xf9e   :  { %10056 = vmatprep.mubr.msk.f32.mxu0 %vm679_vm8, %v5838_v0  ;;  %v16281_v0 = vld [vmem:[#allocation43_spill] sm:$0xff] }
 0xf9f   :  { %10057 = vmatmul.mubr.msk.f32.gmra.mrb[54].mxu0 %vm679_vm8, %v10041_v18  ;;  %v16279_v18 = vld [vmem:[#allocation72_spill] sm:$0xff] }
 0xfa0   :  { %10067 = vmatprep.mubr.msk.f32.mxu0 %vm679_vm8, %v5723_v7  ;;  %v6687_v7 = vld [vmem:[#allocation13 + $0x70] sm:$0xff] }
 0xfa1   :  { %v10607_v31 = vpack.c.bf16 %v6688_v34, %v6687_v7  ;;  %v16299_v34 = vld [vmem:[#allocation48_spill] sm:$0xff] }
 0xfa3   :  { %10068 = vmatmul.mubr.msk.f32.vlgmr.msra.gmra.mrb[50].mxu0 %vm679_vm8, %v10022_v5  ;;  %v10603_v5 = vpack.c.bf16 %v6686_v36, %v6685_v44 }
 0xfa4   :  { %10070 = vmatprep.mubr.msk.f32.mxu0 %vm679_vm8, %v5733_v55  ;;  %10077 = vmatpush3.msra.mxu0 %v6084_v20  ;;  %v7039_v20 = vld [vmem:[#allocation17 + $0x68] sm:$0xff] }
 0xfa7   :  { %10071 = vmatmul.mubr.msk.f32.gmra.mrb[52].mxu0 %vm679_vm8, %v10025_v42  ;;  %v9010_v42 = vld [vmem:[%s15286_s12 + $0x60] sm:$0xff] }
 0xfa8   :  { %10073 = vmatprep.mubr.msk.f32.mxu0 %vm679_vm8, %v5743_v11  ;;  %v14118_v55 = vpack.c.bf16 %v9011_v10, %v9010_v42 }
 0xfab   :  { %10074 = vmatmul.mubr.msk.f32.gmra.mrb[54].mxu0 %vm679_vm8, %v10028_v57  ;;  %v10635_v57 = vpack.c.bf16 %v7039_v20, %v7038_v30  ;;  %v16301_v20 = vld [vmem:[#allocation46_spill] sm:$0xff] }
 0xfac   :  { %10078 = vmatprep.mubr.msk.f32.mxu0 %vm16272_vm5, %v5629_v12  ;;  %vm16280_vm5 = vcmp.eq.s32.totalorder %v16279_v18, 1  ;;  %v16283_v12 = vld [vmem:[#allocation71_spill] sm:$0xff] }
 0xfad   :  { %10636 = vmatprep.subr.bf16.mxu0 %v10635_v57 }
 0xfaf   :  { %10079 = vmatmul.mubr.msk.f32.vlgmr.msra.gmra.mrb[50].mxu0 %vm16273_vm11, %v5634_v17  ;;  %vm16282_vm11 = vcmp.eq.s32.totalorder %v16281_v0, 1 }
 0xfb0   :  { %10081 = vmatprep.mubr.msk.f32.mxu0 %vm16274_vm13, %v5639_v62  ;;  %10638 = vmatpush3.bf16.msra.mxu0 %v10635_v57  ;;  %vm16284_vm13 = vcmp.eq.s32.totalorder %v16283_v12, 1  ;;  %v16285_v62 = vld [vmem:[#allocation42_spill] sm:$0xff] }
 0xfb3   :  { %10082 = vmatmul.mubr.msk.f32.gmra.mrb[52].mxu0 %vm16275_vm1, %v5644_v25  ;;  %vm16286_vm1 = vcmp.eq.s32.totalorder %v16285_v62, 1 }
 0xfb4   :  { %10084 = vmatprep.mubr.msk.f32.mxu0 %vm16276_vm7, %v5649_v40  ;;  %v16287_v40 = vld [vmem:[#allocation74_spill] sm:$0xff] }
 0xfb5   :  { %vm16288_vm7 = vcmp.eq.s32.totalorder %v16287_v40, 1 }
 0xfb7   :  { %10085 = vmatmul.mubr.msk.f32.gmra.mrb[54].mxu0 %vm16277_vm14, %v5654_v14 }
0x1082   :  { %v10080_v43 = vpop.f32.mrb[50].mxu0 }
0x1083   :  { %v14092_v32 = vadd.f32 %v10080_v43, %v9007_v6  ;;  %v6169_v23 = vpop.f32.mrb[51].mxu0 }
0x1084   :  { %v14094_v45 = vadd.f32 %v9007_v6, %v6169_v23  ;;  %v16291_v23 = vld [vmem:[#allocation76_spill] sm:$0xff] }
0x1085   :  { %v6296_v25 = vsel %vm16286_vm1, %v14092_v32, -1e+30  ;;  %vm16300_vm1 = vcmp.eq.s32.totalorder %v16299_v34, 1 }
0x1086   :  { %v10083_v33 = vpop.f32.mrb[52].mxu0  ;;  %v10591_v21 = vpack.c.bf16 %v14092_v32, %v14094_v45  ;;  %v6295_v17 = vsel %vm16284_vm13, %v14094_v45, -1e+30  ;;  %v6318_v14 = vsel %vm16288_vm7, %v14094_v45, -1e+30  ;;  %vm16302_vm7 = vcmp.eq.s32.totalorder %v16301_v20, 1 }
0x1087   :  { %v14098_v41 = vadd.f32 %v10083_v33, %v9007_v6  ;;  %v6179_v54 = vpop.f32.mrb[53].mxu0  ;;  %v6301_v36 = vsel %vm679_vm8, %v6295_v17, -inf  ;;  %v6324_v42 = vsel %vm679_vm8, %v6318_v14, -inf  ;;  %v6341_v57 = vsel %vm16302_vm7, %v14094_v45, -1e+30  ;;  %v16305_v17 = vld [vmem:[#allocation54_spill] sm:$0xff] }
0x1088   :  { %v14100_v28 = vadd.f32 %v9007_v6, %v6179_v54  ;;  %10592 = vmatprep.subr.bf16.mxu1 %v10591_v21  ;;  %v16307_v20 = vld [vmem:[#allocation55_spill] sm:$0xff] }
0x1089   :  { %10594 = vmatpush3.bf16.msra.mxu1 %v10591_v21 }
0x108a   :  { %v10086_v13 = vpop.f32.mrb[54].mxu0  ;;  %v10595_v63 = vpack.c.bf16 %v14098_v41, %v14100_v28 }
0x108b   :  { %v14104_v56 = vadd.f32 %v10086_v13, %v9007_v6  ;;  %v6189_v48 = vpop.f32.mrb[55].mxu0  ;;  %v16293_v13 = vld [vmem:[#allocation44_spill] sm:$0xff] }
0x108c   :  { %v14106_v39 = vadd.f32 %v9007_v6, %v6189_v48  ;;  %10596 = vmatprep.subr.bf16.mxu1 %v10595_v63  ;;  %v16289_v6 = vld [vmem:[#allocation45_spill] sm:$0xff]  ;;  %v16295_v48 = vld [vmem:[#allocation78_spill] sm:$0xff] }
0x108d   :  { %10598 = vmatpush3.bf16.msra.mxu1 %v10595_v63  ;;  %v6300_v49 = vsel %vm16282_vm11, %v14104_v56, -1e+30  ;;  %vm16290_vm14 = vcmp.eq.s32.totalorder %v16289_v6, 1  ;;  %vm16296_vm11 = vcmp.eq.s32.totalorder %v16295_v48, 1 }
0x108e   :  { %v10599_v24 = vpack.c.bf16 %v14104_v56, %v14106_v39  ;;  %v6299_v11 = vsel %vm16280_vm5, %v14106_v39, -1e+30  ;;  %v6322_v43 = vsel %vm16290_vm14, %v14106_v39, -1e+30  ;;  %v6307_v54 = vsel %vm679_vm8, %v6300_v49, -inf }
0x108f   :  { %v6305_v21 = vsel %vm679_vm8, %v6299_v11, -inf  ;;  %vm16294_vm5 = vcmp.eq.s32.totalorder %v16293_v13, 1  ;;  %v6342_v44 = vsel %vm16296_vm11, %v14092_v32, -1e+30  ;;  %v6328_v10 = vsel %vm679_vm8, %v6322_v43, -inf  ;;  %v16303_v11 = vld [vmem:[#allocation84_spill] sm:$0xff] }
0x1090   :  { %10600 = vmatprep.subr.bf16.mxu1 %v10599_v24  ;;  %v6319_v63 = vsel %vm16294_vm5, %v14092_v32, -1e+30  ;;  %vm16304_vm14 = vcmp.eq.s32.totalorder %v16303_v11, 1  ;;  %v6306_v34 = vmax.f32 %v6301_v36, %v6305_v21  ;;  %v6348_v43 = vsel %vm679_vm8, %v6342_v44, -inf  ;;  %v16309_v11 = vld [vmem:[#allocation86_spill] sm:$0xff] }
0x1091   :  { %10602 = vmatpush3.bf16.msra.mxu1 %v10599_v24  ;;  %v6302_v24 = vsel %vm679_vm8, %v6296_v25, -inf  ;;  %v6297_v49 = vsel %vm16304_vm14, %v14100_v28, -1e+30  ;;  %v6325_v14 = vsel %vm679_vm8, %v6319_v63, -inf  ;;  %vm16308_vm5 = vcmp.eq.s32.totalorder %v16307_v20, 1  ;;  %v16311_v63 = vld [vmem:[#allocation62_spill] sm:$0xff] }
0x1092   :  { %10604 = vmatprep.subr.bf16.mxu1 %v10603_v5  ;;  %v6320_v13 = vsel %vm16308_vm5, %v14100_v28, -1e+30  ;;  %vm16310_vm11 = vcmp.eq.s32.totalorder %v16309_v11, 1  ;;  %v6303_v21 = vsel %vm679_vm8, %v6297_v49, -inf  ;;  %v6347_v36 = vsel %vm679_vm8, %v6341_v57, -inf }
0x1094   :  { %10100 = vmatmul.mubr.msk.f32.vlgmr.msra.gmra.mrb[58].mxu1 %vm16271_vm10, %v16278_v53  ;;  %vm16292_vm10 = vcmp.eq.s32.totalorder %v16291_v23, 1  ;;  %v6321_v23 = vsel %vm16310_vm11, %v14098_v41, -1e+30  ;;  %v16389_v53 = vld [vmem:[#allocation60_spill] sm:$0xff] }
0x1095   :  { %10606 = vmatpush3.bf16.msra.mxu1 %v10603_v5  ;;  %v6323_v33 = vsel %vm16292_vm10, %v14104_v56, -1e+30  ;;  %v16297_v5 = vld [vmem:[#allocation47_spill] sm:$0xff]  ;;  %vm16306_vm10 = vcmp.eq.s32.totalorder %v16305_v17, 1  ;;  %v6329_v17 = vmax.f32 %v6324_v42, %v6328_v10  ;;  %v6326_v42 = vsel %vm679_vm8, %v6320_v13, -inf }
0x1096   :  { %10608 = vmatprep.subr.bf16.mxu1 %v10607_v31  ;;  %vm16298_vm13 = vcmp.eq.s32.totalorder %v16297_v5, 1  ;;  %v6330_v30 = vsel %vm679_vm8, %v6323_v33, -inf  ;;  %v6298_v25 = vsel %vm16306_vm10, %v14098_v41, -1e+30  ;;  %v6308_v5 = vmax.f32 %v6302_v24, %v6307_v54 }
0x1097   :  { %v6345_v7 = vsel %vm16298_vm13, %v14106_v39, -1e+30  ;;  %v6331_v6 = vmax.f32 %v6325_v14, %v6330_v30  ;;  %v6304_v54 = vsel %vm679_vm8, %v6298_v25, -inf  ;;  %vm16312_vm13 = vcmp.eq.s32.totalorder %v16311_v63, 1 }
0x1098   :  { %v6351_v33 = vsel %vm679_vm8, %v6345_v7, -inf  ;;  %v6344_v44 = vsel %vm16312_vm13, %v14098_v41, -1e+30  ;;  %v6309_v24 = vmax.f32 %v6306_v34, %v6308_v5  ;;  %v16313_v7 = vld [vmem:[#allocation88_spill] sm:$0xff]  ;;  %v6327_v10 = vsel %vm679_vm8, %v6321_v23, -inf }
0x1099   :  { %10610 = vmatpush3.bf16.msra.mxu1 %v10607_v31  ;;  %v6346_v31 = vsel %vm16300_vm1, %v14104_v56, -1e+30  ;;  %vm16314_vm1 = vcmp.eq.s32.totalorder %v16313_v7, 1  ;;  %v6352_v20 = vmax.f32 %v6347_v36, %v6351_v33  ;;  %v6310_v30 = vmax.f32 %v6303_v21, %v6304_v54  ;;  %v16315_v7 = vld [vmem:[#allocation96_spill] sm:$0xff]  ;;  %v16321_v21 = vld [vmem:[#allocation57_spill] sm:$0xff] }
0x109a   :  { %10612 = vmatprep.subr.bf16.mxu1 %v14118_v55  ;;  %v6353_v48 = vsel %vm679_vm8, %v6346_v31, -inf  ;;  %v6343_v31 = vsel %vm16314_vm1, %v14100_v28, -1e+30  ;;  %v6332_v49 = vmax.f32 %v6329_v17, %v6331_v6  ;;  %v6350_v14 = vsel %vm679_vm8, %v6344_v44, -inf  ;;  %v16319_v6 = vld [vmem:[#allocation56_spill] sm:$0xff]  ;;  %v16325_v36 = vld [vmem:[#allocation65_spill] sm:$0xff] }
0x109b   :  { %v6354_v11 = vmax.f32 %v6348_v43, %v6353_v48  ;;  %v6349_v25 = vsel %vm679_vm8, %v6343_v31, -inf  ;;  %v6311_v63 = vmax.f32 %v6309_v24, %v6310_v30  ;;  %v6333_v40 = vmax.f32 %v6326_v42, %v6327_v10  ;;  %v16317_v48 = vld [vmem:[#allocation58_spill] sm:$0xff]  ;;  %v16323_v54 = vld [vmem:[#allocation64_spill] sm:$0xff]  ;;  %v16327_v42 = vld [vmem:[#allocation73_spill] sm:$0xff] }
0x109c   :  { %v6356_v34 = vmax.f32 %v6349_v25, %v6350_v14  ;;  %vm16316_vm7 = vcmp.eq.s32.totalorder %v16315_v7, 1  ;;  %vm16318_vm14 = vcmp.eq.s32.totalorder %v16317_v48, 1  ;;  %vm16320_vm10 = vcmp.eq.s32.totalorder %v16319_v6, 1  ;;  %v16329_v30 = vld [vmem:[#allocation98_spill] sm:$0xff] }
0x109d   :  { %v6355_v57 = vmax.f32 %v6352_v20, %v6354_v11  ;;  %v6334_v5 = vmax.f32 %v6332_v49, %v6333_v40  ;;  %v6368_v33 = vsel %vm16316_vm7, %v14106_v39, -1e+30  ;;  %v6369_v13 = vsel %vm16318_vm14, %v14104_v56, -1e+30 }
0x109e   :  { %v6312_v23 = vrot.slane %v6311_v63, 4  ;;  %v6364_v17 = vsel %vm16320_vm10, %v14094_v45, -1e+30  ;;  %vm16322_vm5 = vcmp.eq.s32.totalorder %v16321_v21, 1  ;;  %v6374_v40 = vsel %vm679_vm8, %v6368_v33, -inf  ;;  %v16333_v33 = vld [vmem:[#allocation104_spill] sm:$0xff] }
0x109f   :  { %v6357_v43 = vmax.f32 %v6355_v57, %v6356_v34  ;;  %v6365_v20 = vsel %vm16322_vm5, %v14092_v32, -1e+30  ;;  %v6376_v11 = vsel %vm679_vm8, %v6369_v13, -inf  ;;  %vm16324_vm11 = vcmp.eq.s32.totalorder %v16323_v54, 1  ;;  %v16331_v57 = vld [vmem:[#allocation63_spill] sm:$0xff] }
0x10a0   :  { %v6391_v44 = vsel %vm16324_vm11, %v14106_v39, -1e+30  ;;  %vm16326_vm13 = vcmp.eq.s32.totalorder %v16325_v36, 1  ;;  %v6335_v31 = vrot.slane %v6334_v5, 4  ;;  %vm16328_vm1 = vcmp.eq.s32.totalorder %v16327_v42, 1 }
0x10a1   :  { %v6392_v24 = vsel %vm16326_vm13, %v14104_v56, -1e+30  ;;  %v6366_v10 = vsel %vm16328_vm1, %v14100_v28, -1e+30  ;;  %vm16330_vm7 = vcmp.eq.s32.totalorder %v16329_v30, 1  ;;  %v6370_v25 = vsel %vm679_vm8, %v6364_v17, -inf }
0x10a2   :  { %v6367_v49 = vsel %vm16330_vm7, %v14098_v41, -1e+30  ;;  %v6371_v14 = vsel %vm679_vm8, %v6365_v20, -inf  ;;  %vm16332_vm14 = vcmp.eq.s32.totalorder %v16331_v57, 1  ;;  %vm16334_vm10 = vcmp.eq.s32.totalorder %v16333_v33, 1  ;;  %v16335_v33 = vld [vmem:[#allocation89_spill] sm:$0xff] }
0x10a3   :  { %v6387_v34 = vsel %vm16332_vm14, %v14094_v45, -1e+30  ;;  %v6388_v13 = vsel %vm16334_vm10, %v14092_v32, -1e+30  ;;  %v6375_v36 = vmax.f32 %v6370_v25, %v6374_v40  ;;  %v6377_v54 = vmax.f32 %v6371_v14, %v6376_v11  ;;  %v16337_v11 = vld [vmem:[#allocation107_spill] sm:$0xff] }
0x10a4   :  { %v6397_v42 = vsel %vm679_vm8, %v6391_v44, -inf  ;;  %v6399_v21 = vsel %vm679_vm8, %v6392_v24, -inf  ;;  %v6313_v30 = vmax.f32 %v6311_v63, %v6312_v23  ;;  %v6358_v6 = vrot.slane %v6357_v43, 4 }
0x10a5   :  { %v6372_v17 = vsel %vm679_vm8, %v6366_v10, -inf  ;;  %v6336_v48 = vmax.f32 %v6334_v5, %v6335_v31  ;;  %v6373_v20 = vsel %vm679_vm8, %v6367_v49, -inf  ;;  %v6393_v57 = vsel %vm679_vm8, %v6387_v34, -inf }
0x10a6   :  { %v6394_v7 = vsel %vm679_vm8, %v6388_v13, -inf  ;;  %vm16336_vm5 = vcmp.eq.s32.totalorder %v16335_v33, 1  ;;  %vm16338_vm11 = vcmp.eq.s32.totalorder %v16337_v11, 1  ;;  %v6398_v24 = vmax.f32 %v6393_v57, %v6397_v42  ;;  %v16339_v11 = vld [vmem:[#allocation115_spill] sm:$0xff]  ;;  %v16345_v57 = vld [vmem:[#allocation77_spill] sm:$0xff] }
0x10a7   :  { %v6389_v40 = vsel %vm16336_vm5, %v14100_v28, -1e+30  ;;  %v6390_v44 = vsel %vm16338_vm11, %v14098_v41, -1e+30  ;;  %v6400_v63 = vmax.f32 %v6394_v7, %v6399_v21  ;;  %v6378_v23 = vmax.f32 %v6375_v36, %v6377_v54  ;;  %v16341_v7 = vld [vmem:[#allocation79_spill] sm:$0xff] }
0x10a8   :  { %v6314_v25 = vrot.slane %v6313_v30, 2  ;;  %v6359_v10 = vmax.f32 %v6357_v43, %v6358_v6  ;;  %v6337_v5 = vrot.slane %v6336_v48, 2  ;;  %v6379_v31 = vmax.f32 %v6372_v17, %v6373_v20  ;;  %v16343_v54 = vld [vmem:[#allocation75_spill] sm:$0xff] }
0x10a9   :  { %v6395_v49 = vsel %vm679_vm8, %v6389_v40, -inf  ;;  %v6396_v14 = vsel %vm679_vm8, %v6390_v44, -inf  ;;  %v6401_v34 = vmax.f32 %v6398_v24, %v6400_v63  ;;  %vm16340_vm13 = vcmp.eq.s32.totalorder %v16339_v11, 1  ;;  %v16347_v24 = vld [vmem:[#allocation105_spill] sm:$0xff] }
0x10aa   :  { %v6380_v13 = vmax.f32 %v6378_v23, %v6379_v31  ;;  %v6315_v62 = vmax.f32 %v6313_v30, %v6314_v25  ;;  %v6360_v33 = vrot.slane %v6359_v10, 2  ;;  %v6402_v12 = vmax.f32 %v6395_v49, %v6396_v14  ;;  %v16349_v23 = vld [vmem:[#allocation117_spill] sm:$0xff] }
0x10ab   :  { %v6338_v0 = vmax.f32 %v6336_v48, %v6337_v5  ;;  %v6414_v42 = vsel %vm16340_vm13, %v14106_v39, -1e+30  ;;  %vm16342_vm1 = vcmp.eq.s32.totalorder %v16341_v7, 1  ;;  %vm16344_vm7 = vcmp.eq.s32.totalorder %v16343_v54, 1 }
0x10ac   :  { %v6415_v43 = vsel %vm16342_vm1, %v14104_v56, -1e+30  ;;  %v6403_v6 = vmax.f32 %v6401_v34, %v6402_v12  ;;  %v6381_v21 = vrot.slane %v6380_v13, 4  ;;  %v6410_v36 = vsel %vm16344_vm7, %v14094_v45, -1e+30 }
0x10ad   :  { %vm16346_vm14 = vcmp.eq.s32.totalorder %v16345_v57, 1  ;;  %v6316_v17 = vrot.slane %v6315_v62, 1  ;;  %v6361_v48 = vmax.f32 %v6359_v10, %v6360_v33  ;;  %v6420_v20 = vsel %vm679_vm8, %v6414_v42, -inf  ;;  %v16353_v57 = vld [vmem:[#allocation122_spill] sm:$0xff] }
0x10ae   :  { %v6411_v30 = vsel %vm16346_vm14, %v14092_v32, -1e+30  ;;  %v6422_v40 = vsel %vm679_vm8, %v6415_v43, -inf  ;;  %v6339_v44 = vrot.slane %v6338_v0, 1  ;;  %vm16348_vm10 = vcmp.eq.s32.totalorder %v16347_v24, 1  ;;  %v16351_v24 = vld [vmem:[#allocation91_spill] sm:$0xff] }
0x10af   :  { %v6412_v12 = vsel %vm16348_vm10, %v14100_v28, -1e+30  ;;  %v6404_v63 = vrot.slane %v6403_v6, 4  ;;  %vm16350_vm5 = vcmp.eq.s32.totalorder %v16349_v23, 1  ;;  %v6416_v5 = vsel %vm679_vm8, %v6410_v36, -inf }
0x10b0   :  { %v6413_v25 = vsel %vm16350_vm5, %v14098_v41, -1e+30  ;;  %v6417_v31 = vsel %vm679_vm8, %v6411_v30, -inf  ;;  %v14263_v49 = vmax.f32 %v6380_v13, %v6381_v21  ;;  %v6421_v33 = vmax.f32 %v6416_v5, %v6420_v20 }
0x10b1   :  { %v6423_v10 = vmax.f32 %v6417_v31, %v6422_v40  ;;  %v14265_v14 = vmax.f32 %v6315_v62, %v6316_v17  ;;  %v6362_v34 = vrot.slane %v6361_v48, 1  ;;  %v6418_v42 = vsel %vm679_vm8, %v6412_v12, -inf  ;;  %v16355_v62 = vld [vmem:[#allocation127_spill] sm:$0xff]  ;;  %v16357_v17 = vld [vmem:[#allocation125_spill] sm:$0xff] }
0x10b2   :  { %v6419_v43 = vsel %vm679_vm8, %v6413_v25, -inf  ;;  %vm16352_vm11 = vcmp.eq.s32.totalorder %v16351_v24, 1  ;;  %vm16354_vm13 = vcmp.eq.s32.totalorder %v16353_v57, 1  ;;  %v14275_v30 = vmax.f32 %v6338_v0, %v6339_v44  ;;  %v16359_v25 = vld [vmem:[#allocation93_spill] sm:$0xff]  ;;  %v16361_v0 = vld [vmem:[#allocation95_spill] sm:$0xff] }
0x10b3   :  { %v6433_v23 = vsel %vm16352_vm11, %v14094_v45, -1e+30  ;;  %v6435_v36 = vsel %vm16354_vm13, %v14100_v28, -1e+30  ;;  %v14277_v13 = vmax.f32 %v6403_v6, %v6404_v63  ;;  %vm16356_vm1 = vcmp.eq.s32.totalorder %v16355_v62, 1 }
0x10b4   :  { %v6436_v21 = vsel %vm16356_vm1, %v14098_v41, -1e+30  ;;  %vm16358_vm7 = vcmp.eq.s32.totalorder %v16357_v17, 1  ;;  %v6424_v12 = vmax.f32 %v6421_v33, %v6423_v10  ;;  %vm16360_vm14 = vcmp.eq.s32.totalorder %v16359_v25, 1  ;;  %v16363_v10 = vld [vmem:[#allocation50_spill] sm:$0xff]  ;;  %v16371_v25 = vld [vmem:[#allocation52_spill] sm:$0xff] }
0x10b5   :  { %v6437_v20 = vsel %vm16358_vm7, %v14106_v39, -1e+30  ;;  %v6434_v5 = vsel %vm16360_vm14, %v14092_v32, -1e+30  ;;  %vm16362_vm10 = vcmp.eq.s32.totalorder %v16361_v0, 1  ;;  %v14292_v44 = vmax.f32 %v6361_v48, %v6362_v34  ;;  %v16365_v0 = vld [vmem:[#allocation82_spill] sm:$0xff] }
0x10b6   :  { %v6438_v6 = vsel %vm16362_vm10, %v14104_v56, -1e+30  ;;  %v6425_v63 = vmax.f32 %v6418_v42, %v6419_v43  ;;  %v6439_v31 = vsel %vm679_vm8, %v6433_v23, -inf  ;;  %v14296_v62 = vsel %vm679_vm8, %v6435_v36, -inf  ;;  %v16367_v43 = vld [vmem:[#allocation80_spill] sm:$0xff]  ;;  %v16373_v34 = vld [vmem:[#allocation53_spill] sm:$0xff] }
0x10b7   :  { %v14299_v17 = vsel %vm679_vm8, %v6436_v21, -inf  ;;  %v6443_v33 = vsel %vm679_vm8, %v6437_v20, -inf  ;;  %vm16364_vm5 = vcmp.eq.s32.totalorder %v16363_v10, 1  ;;  %vm16366_vm11 = vcmp.eq.s32.totalorder %v16365_v0, 1  ;;  %v16369_v20 = vld [vmem:[#allocation49_spill] sm:$0xff] }
0x10b8   :  { %v6483_v40 = vsel %vm16364_vm5, %v14106_v39, -1e+30  ;;  %v6484_v48 = vsel %vm16366_vm11, %v14104_v56, -1e+30  ;;  %v6440_v23 = vsel %vm679_vm8, %v6434_v5, -inf  ;;  %v6445_v42 = vsel %vm679_vm8, %v6438_v6, -inf }
0x10b9   :  { %vm16368_vm13 = vcmp.eq.s32.totalorder %v16367_v43, 1  ;;  %v14314_v21 = vmax.f32 %v6424_v12, %v6425_v63  ;;  %vm16370_vm1 = vcmp.eq.s32.totalorder %v16369_v20, 1  ;;  %vm16372_vm7 = vcmp.eq.s32.totalorder %v16371_v25, 1  ;;  %v16375_v20 = vld [vmem:[#allocation108_spill] sm:$0xff]  ;;  %v16377_v25 = vld [vmem:[#allocation51_spill] sm:$0xff] }
0x10ba   :  { %v6479_v36 = vsel %vm16368_vm13, %v14094_v45, -1e+30  ;;  %v6480_v10 = vsel %vm16370_vm1, %v14092_v32, -1e+30  ;;  %v6506_v0 = vsel %vm16372_vm7, %v14106_v39, -1e+30  ;;  %v6444_v57 = vmax.f32 %v6439_v31, %v6443_v33 }
0x10bb   :  { %vm16374_vm14 = vcmp.eq.s32.totalorder %v16373_v34, 1  ;;  %v6448_v6 = vmax.f32 %v14296_v62, %v14299_v17  ;;  %v6489_v43 = vsel %vm679_vm8, %v6483_v40, -inf  ;;  %v6491_v12 = vsel %vm679_vm8, %v6484_v48, -inf  ;;  %v16379_v34 = vld [vmem:[#allocation92_spill] sm:$0xff]  ;;  %v16381_v48 = vld [vmem:[#allocation90_spill] sm:$0xff] }
0x10bc   :  { %v6507_v5 = vsel %vm16374_vm14, %v14104_v56, -1e+30  ;;  %v6446_v63 = vmax.f32 %v6440_v23, %v6445_v42  ;;  %vm16376_vm10 = vcmp.eq.s32.totalorder %v16375_v20, 1  ;;  %vm16378_vm5 = vcmp.eq.s32.totalorder %v16377_v25, 1  ;;  %v16383_v42 = vld [vmem:[#allocation66_spill] sm:$0xff] }
0x10bd   :  { %v6456_v24 = vsel %vm16376_vm10, %v14094_v45, -1e+30  ;;  %v6502_v54 = vsel %vm16378_vm5, %v14094_v45, -1e+30  ;;  %vm16380_vm11 = vcmp.eq.s32.totalorder %v16379_v34, 1  ;;  %v6485_v33 = vsel %vm679_vm8, %v6479_v36, -inf }
0x10be   :  { %v6503_v31 = vsel %vm16380_vm11, %v14092_v32, -1e+30  ;;  %v6486_v62 = vsel %vm679_vm8, %v6480_v10, -inf  ;;  %v6512_v17 = vsel %vm679_vm8, %v6506_v0, -inf  ;;  %v6514_v40 = vsel %vm679_vm8, %v6507_v5, -inf  ;;  %v16385_v34 = vld [vmem:[#allocation67_spill] sm:$0xff] }
0x10bf   :  { %vm16382_vm13 = vcmp.eq.s32.totalorder %v16381_v48, 1  ;;  %vm16384_vm1 = vcmp.eq.s32.totalorder %v16383_v42, 1  ;;  %v6490_v20 = vmax.f32 %v6485_v33, %v6489_v43  ;;  %v6492_v7 = vmax.f32 %v6486_v62, %v6491_v12  ;;  %v16387_v10 = vld [vmem:[#allocation94_spill] sm:$0xff]  ;;  %v16391_v43 = vld [vmem:[#allocation61_spill] sm:$0xff] }
0x10c0   :  { %v6481_v23 = vsel %vm16382_vm13, %v14100_v28, -1e+30  ;;  %v6482_v25 = vsel %vm16384_vm1, %v14098_v41, -1e+30  ;;  %vm16386_vm7 = vcmp.eq.s32.totalorder %v16385_v34, 1  ;;  %vm16388_vm14 = vcmp.eq.s32.totalorder %v16387_v10, 1 }
0x10c1   :  { %v6504_v36 = vsel %vm16386_vm7, %v14100_v28, -1e+30  ;;  %v6505_v0 = vsel %vm16388_vm14, %v14098_v41, -1e+30  ;;  %v6508_v5 = vsel %vm679_vm8, %v6502_v54, -inf  ;;  %v6509_v11 = vsel %vm679_vm8, %v6503_v31, -inf }
0x10c2   :  { %v6513_v48 = vmax.f32 %v6508_v5, %v6512_v17  ;;  %v6515_v18 = vmax.f32 %v6509_v11, %v6514_v40  ;;  %vm16390_vm10 = vcmp.eq.s32.totalorder %v16389_v53, 1  ;;  %vm16392_vm5 = vcmp.eq.s32.totalorder %v16391_v43, 1  ;;  %v16393_v62 = vld [vmem:[#allocation110_spill] sm:$0xff]  ;;  %v16395_v40 = vld [vmem:[#allocation59_spill] sm:$0xff]  ;;  %v16397_v43 = vld [vmem:[#allocation100_spill] sm:$0xff] }
0x10c3   :  { %v6529_v42 = vsel %vm16390_vm10, %v14106_v39, -1e+30  ;;  %v6530_v12 = vsel %vm16392_vm5, %v14104_v56, -1e+30  ;;  %vm16394_vm11 = vcmp.eq.s32.totalorder %v16393_v62, 1  ;;  %v6487_v54 = vsel %vm679_vm8, %v6481_v23, -inf }
0x10c4   :  { %v6457_v10 = vsel %vm16394_vm11, %v14092_v32, -1e+30  ;;  %v6488_v31 = vsel %vm679_vm8, %v6482_v25, -inf  ;;  %v6510_v11 = vsel %vm679_vm8, %v6504_v36, -inf  ;;  %v6511_v17 = vsel %vm679_vm8, %v6505_v0, -inf  ;;  %v16399_v53 = vld [vmem:[#allocation132_spill] sm:$0xff] }
0x10c5   :  { %vm16396_vm13 = vcmp.eq.s32.totalorder %v16395_v40, 1  ;;  %vm16398_vm1 = vcmp.eq.s32.totalorder %v16397_v43, 1  ;;  %vm16400_vm7 = vcmp.eq.s32.totalorder %v16399_v53, 1  ;;  %v16401_v23 = vld [vmem:[#allocation131_spill] sm:$0xff]  ;;  %v6535_v36 = vsel %vm679_vm8, %v6529_v42, -inf  ;;  %v16406_v42 = vld [vmem:[#allocation102_spill] sm:$0xff] }
0x10c6   :  { %v6525_v5 = vsel %vm16396_vm13, %v14094_v45, -1e+30  ;;  %v6526_v33 = vsel %vm16398_vm1, %v14092_v32, -1e+30  ;;  %v6458_v62 = vsel %vm16400_vm7, %v14100_v28, -1e+30  ;;  %v6447_v34 = vmax.f32 %v6444_v57, %v6446_v63 }
0x10c7   :  { %vm16402_vm14 = vcmp.eq.s32.totalorder %v16401_v23, 1  ;;  %v6537_v0 = vsel %vm679_vm8, %v6530_v12, -inf  ;;  %vm16403_vm10 = vcmp.eq.s32.totalorder %v12243_v52, 1  ;;  %v6493_v46 = vmax.f32 %v6490_v20, %v6492_v7  ;;  %v16404_v23 = vld [vmem:[#allocation81_spill] sm:$0xff]  ;;  %v16408_v52 = vld [vmem:[#allocation112_spill] sm:$0xff] }
0x10c8   :  { %v6459_v25 = vsel %vm16402_vm14, %v14098_v41, -1e+30  ;;  %v6460_v40 = vsel %vm16403_vm10, %v14106_v39, -1e+30  ;;  %v6516_v43 = vmax.f32 %v6513_v48, %v6515_v18  ;;  %v6494_v8 = vmax.f32 %v6487_v54, %v6488_v31  ;;  %v16410_v31 = vld [vmem:[#allocation109_spill] sm:$0xff] }
0x10c9   :  { %v6517_v59 = vmax.f32 %v6510_v11, %v6511_v17  ;;  %v6531_v53 = vsel %vm679_vm8, %v6525_v5, -inf  ;;  %v6532_v1 = vsel %vm679_vm8, %v6526_v33, -inf  ;;  %vm16405_vm5 = vcmp.eq.s32.totalorder %v16404_v23, 1  ;;  %v16412_v17 = vld [vmem:[#allocation70_spill] sm:$0xff] }
0x10ca   :  { %v6527_v47 = vsel %vm16405_vm5, %v14100_v28, -1e+30  ;;  %vm16407_vm11 = vcmp.eq.s32.totalorder %v16406_v42, 1  ;;  %v6536_v63 = vmax.f32 %v6531_v53, %v6535_v36  ;;  %v6538_v12 = vmax.f32 %v6532_v1, %v6537_v0 }
0x10cb   :  { %v6528_v57 = vsel %vm16407_vm11, %v14098_v41, -1e+30  ;;  %vm16409_vm13 = vcmp.eq.s32.totalorder %v16408_v52, 1  ;;  %v6462_v7 = vsel %vm679_vm8, %v6456_v24, -inf  ;;  %v6463_v20 = vsel %vm679_vm8, %v6457_v10, -inf  ;;  %v16428_v52 = vld [vmem:[#allocation85_spill] sm:$0xff] }
0x10cc   :  { %v6461_v18 = vsel %vm16409_vm13, %v14104_v56, -1e+30  ;;  %v6466_v48 = vsel %vm679_vm8, %v6460_v40, -inf  ;;  %v6495_v33 = vmax.f32 %v6493_v46, %v6494_v8  ;;  %v6518_v54 = vmax.f32 %v6516_v43, %v6517_v59  ;;  %v16414_v46 = vld [vmem:[#allocation68_spill] sm:$0xff]  ;;  %v16416_v40 = vld [vmem:[#allocation69_spill] sm:$0xff] }
0x10cd   :  { %vm16411_vm1 = vcmp.eq.s32.totalorder %v16410_v31, 1  ;;  %vm16413_vm7 = vcmp.eq.s32.totalorder %v16412_v17, 1  ;;  %v14408_v53 = vsel %vm679_vm8, %v6458_v62, -inf  ;;  %v14411_v5 = vsel %vm679_vm8, %v6459_v25, -inf }
0x10ce   :  { %v6552_v11 = vsel %vm16411_vm1, %v14106_v39, -1e+30  ;;  %v6553_v1 = vsel %vm16413_vm7, %v14104_v56, -1e+30  ;;  %v6533_v24 = vsel %vm679_vm8, %v6527_v47, -inf  ;;  %v6534_v10 = vsel %vm679_vm8, %v6528_v57, -inf }
0x10cf   :  { %v14415_v8 = vmax.f32 %v6447_v34, %v6448_v6  ;;  %v6539_v59 = vmax.f32 %v6536_v63, %v6538_v12  ;;  %vm16415_vm14 = vcmp.eq.s32.totalorder %v16414_v46, 1  ;;  %vm16417_vm10 = vcmp.eq.s32.totalorder %v16416_v40, 1  ;;  %v16418_v6 = vld [vmem:[#allocation97_spill] sm:$0xff]  ;;  %v16420_v40 = vld [vmem:[#allocation119_spill] sm:$0xff] }
0x10d0   :  { %v6548_v43 = vsel %vm16415_vm14, %v14094_v45, -1e+30  ;;  %v6549_v36 = vsel %vm16417_vm10, %v14092_v32, -1e+30  ;;  %v6467_v62 = vmax.f32 %v6462_v7, %v6466_v48  ;;  %v6468_v0 = vsel %vm679_vm8, %v6461_v18, -inf  ;;  %v16422_v18 = vld [vmem:[#allocation87_spill] sm:$0xff] }
0x10d1   :  { %v6558_v25 = vsel %vm679_vm8, %v6552_v11, -inf  ;;  %v6560_v47 = vsel %vm679_vm8, %v6553_v1, -inf  ;;  %v6496_v17 = vrot.slane %v6495_v33, 4  ;;  %v6519_v57 = vrot.slane %v6518_v54, 4  ;;  %v16424_v1 = vld [vmem:[#allocation111_spill] sm:$0xff] }
0x10d2   :  { %v6540_v34 = vmax.f32 %v6533_v24, %v6534_v10  ;;  %vm16419_vm5 = vcmp.eq.s32.totalorder %v16418_v6, 1  ;;  %v6554_v12 = vsel %vm679_vm8, %v6548_v43, -inf  ;;  %v6555_v46 = vsel %vm679_vm8, %v6549_v36, -inf  ;;  %v16426_v36 = vld [vmem:[#allocation83_spill] sm:$0xff] }
0x10d3   :  { %v6550_v63 = vsel %vm16419_vm5, %v14100_v28, -1e+30  ;;  %vm16421_vm11 = vcmp.eq.s32.totalorder %v16420_v40, 1  ;;  %vm16423_vm13 = vcmp.eq.s32.totalorder %v16422_v18, 1  ;;  %vm16425_vm1 = vcmp.eq.s32.totalorder %v16424_v1, 1 }
0x10d4   :  { %v6575_v7 = vsel %vm16421_vm11, %v14106_v39, -1e+30  ;;  %v6576_v48 = vsel %vm16423_vm13, %v14104_v56, -1e+30  ;;  %v6541_v11 = vmax.f32 %v6539_v59, %v6540_v34  ;;  %v6551_v24 = vsel %vm16425_vm1, %v14098_v41, -1e+30 }
0x10d5   :  { %v6559_v10 = vmax.f32 %v6554_v12, %v6558_v25  ;;  %v6561_v6 = vmax.f32 %v6555_v46, %v6560_v47  ;;  %v6469_v31 = vmax.f32 %v6463_v20, %v6468_v0  ;;  %vm16427_vm7 = vcmp.eq.s32.totalorder %v16426_v36, 1 }
0x10d6   :  { %v6571_v40 = vsel %vm16427_vm7, %v14094_v45, -1e+30  ;;  %vm16429_vm14 = vcmp.eq.s32.totalorder %v16428_v52, 1  ;;  %v14448_v42 = vmax.f32 %v6495_v33, %v6496_v17  ;;  %v14450_v59 = vmax.f32 %v6518_v54, %v6519_v57  ;;  %v16434_v52 = vld [vmem:[#allocation103_spill] sm:$0xff] }
0x10d7   :  { %v6572_v18 = vsel %vm16429_vm14, %v14092_v32, -1e+30  ;;  %v6581_v34 = vsel %vm679_vm8, %v6575_v7, -inf  ;;  %v6583_v46 = vsel %vm679_vm8, %v6576_v48, -inf  ;;  %v6556_v20 = vsel %vm679_vm8, %v6550_v63, -inf  ;;  %v16432_v63 = vld [vmem:[#allocation113_spill] sm:$0xff] }
0x10d8   :  { %v6557_v0 = vsel %vm679_vm8, %v6551_v24, -inf  ;;  %v6573_v47 = vsel %vm1719_vm9, %v14100_v28, -1e+30  ;;  %v6574_v43 = vsel %vm1720_vm2, %v14098_v41, -1e+30  ;;  %v6542_v33 = vrot.slane %v6541_v11, 4 }
0x10d9   :  { %v6562_v17 = vmax.f32 %v6559_v10, %v6561_v6  ;;  %v6577_v54 = vsel %vm679_vm8, %v6571_v40, -inf  ;;  %v6578_v57 = vsel %vm679_vm8, %v6572_v18, -inf  ;;  %vm16433_vm10 = vcmp.eq.s32.totalorder %v16432_v63, 1  ;;  %v16440_v10 = vld [vmem:[#allocation120_spill] sm:$0xff] }
0x10da   :  { %v6582_v7 = vmax.f32 %v6577_v54, %v6581_v34  ;;  %v6584_v48 = vmax.f32 %v6578_v57, %v6583_v46  ;;  %v6598_v24 = vsel %vm16433_vm10, %v14106_v39, -1e+30  ;;  %vm16435_vm5 = vcmp.eq.s32.totalorder %v16434_v52, 1  ;;  %v16442_v46 = vld [vmem:[#allocation124_spill] sm:$0xff] }
0x10db   :  { %v6599_v25 = vsel %vm16435_vm5, %v14104_v56, -1e+30  ;;  %v6470_v36 = vmax.f32 %v6467_v62, %v6469_v31  ;;  %v6563_v1 = vmax.f32 %v6556_v20, %v6557_v0  ;;  %v6579_v12 = vsel %vm679_vm8, %v6573_v47, -inf  ;;  %v16438_v47 = vld [vmem:[#allocation123_spill] sm:$0xff] }
0x10dc   :  { %v6580_v6 = vsel %vm679_vm8, %v6574_v43, -inf  ;;  %v6498_v40 = vrot.slane %v14448_v42, 2  ;;  %v6521_v18 = vrot.slane %v14450_v59, 2  ;;  %v6594_v34 = vsel %vm1764_vm0, %v14094_v45, -1e+30 }
0x10dd   :  { %v6595_v54 = vsel %vm1765_vm15, %v14092_v32, -1e+30  ;;  %v14480_v57 = vmax.f32 %v6541_v11, %v6542_v33  ;;  %v6564_v31 = vmax.f32 %v6562_v17, %v6563_v1  ;;  %v6604_v62 = vsel %vm679_vm8, %v6598_v24, -inf  ;;  %v16444_v1 = vld [vmem:[#allocation126_spill] sm:$0xff] }
0x10de   :  { %v6606_v20 = vsel %vm679_vm8, %v6599_v25, -inf  ;;  %v6585_v43 = vmax.f32 %v6582_v7, %v6584_v48  ;;  %v6586_v0 = vmax.f32 %v6579_v12, %v6580_v6  ;;  %vm16439_vm11 = vcmp.eq.s32.totalorder %v16438_v47, 1  ;;  %v16447_v6 = vld [vmem:[#allocation118_spill] sm:$0xff] }
0x10df   :  { %v6621_v52 = vsel %vm16439_vm11, %v14106_v39, -1e+30  ;;  %vm16441_vm13 = vcmp.eq.s32.totalorder %v16440_v10, 1  ;;  %vm16443_vm1 = vcmp.eq.s32.totalorder %v16442_v46, 1  ;;  %vm16445_vm7 = vcmp.eq.s32.totalorder %v16444_v1, 1  ;;  %v16449_v1 = vld [vmem:[#allocation130_spill] sm:$0xff] }
0x10e0   :  { %v6622_v63 = vsel %vm16441_vm13, %v14104_v56, -1e+30  ;;  %v6596_v11 = vsel %vm16443_vm1, %v14100_v28, -1e+30  ;;  %v6597_v33 = vsel %vm16445_vm7, %v14098_v41, -1e+30  ;;  %v6587_v19 = vmax.f32 %v6585_v43, %v6586_v0 }
0x10e1   :  { %v6600_v25 = vsel %vm679_vm8, %v6594_v34, -inf  ;;  %v6601_v12 = vsel %vm679_vm8, %v6595_v54, -inf  ;;  %v6617_v24 = vsel %vm1811_vm6, %v14094_v45, -1e+30  ;;  %vm16448_vm14 = vcmp.eq.s32.totalorder %v16447_v6, 1  ;;  %v16451_v54 = vld [vmem:[#allocation135_spill] sm:$0xff] }
0x10e2   :  { %v6605_v17 = vmax.f32 %v6600_v25, %v6604_v62  ;;  %v6607_v7 = vmax.f32 %v6601_v12, %v6606_v20  ;;  %v6618_v10 = vsel %vm16448_vm14, %v14092_v32, -1e+30  ;;  %v6627_v46 = vsel %vm679_vm8, %v6621_v52, -inf }
0x10e3   :  { %v6629_v47 = vsel %vm679_vm8, %v6622_v63, -inf  ;;  %vm16450_vm10 = vcmp.eq.s32.totalorder %v16449_v1, 1  ;;  %vm16452_vm5 = vcmp.eq.s32.totalorder %v16451_v54, 1  ;;  %v6602_v20 = vsel %vm679_vm8, %v6596_v11, -inf }
0x10e4   :  { %v6644_v34 = vsel %vm16450_vm10, %v14106_v39, -1e+30  ;;  %v6645_v62 = vsel %vm16452_vm5, %v14104_v56, -1e+30  ;;  %v6603_v25 = vsel %vm679_vm8, %v6597_v33, -inf  ;;  %v6623_v48 = vsel %vm679_vm8, %v6617_v24, -inf }
0x10e5   :  { %v6619_v6 = vsel %vm1813_vm4, %v14100_v28, -1e+30  ;;  %v6620_v63 = vsel %vm1814_vm3, %v14098_v41, -1e+30  ;;  %v6624_v39 = vsel %vm679_vm8, %v6618_v10, -inf  ;;  %vm16456_vm11 = vcmp.eq.s32.totalorder %v15985_v9, 1 }
0x10e6   :  { %v6640_v56 = vsel %vm1858_vm12, %v14094_v45, -1e+30  ;;  %v6641_v11 = vsel %vm16456_vm11, %v14092_v32, -1e+30  ;;  %v6628_v33 = vmax.f32 %v6623_v48, %v6627_v46  ;;  %v6630_v54 = vmax.f32 %v6624_v39, %v6629_v47 }
0x10e7   :  { %v6650_v12 = vsel %vm679_vm8, %v6644_v34, -inf  ;;  %v6652_v23 = vsel %vm679_vm8, %v6645_v62, -inf  ;;  %v6565_v52 = vrot.slane %v6564_v31, 4  ;;  %v6608_v29 = vmax.f32 %v6605_v17, %v6607_v7 }
0x10e8   :  { %v6609_v24 = vmax.f32 %v6602_v20, %v6603_v25  ;;  %v6625_v10 = vsel %vm679_vm8, %v6619_v6, -inf  ;;  %v6626_v50 = vsel %vm679_vm8, %v6620_v63, -inf  ;;  %v6646_v45 = vsel %vm679_vm8, %v6640_v56, -inf }
0x10e9   :  { %v6647_v1 = vsel %vm679_vm8, %v6641_v11, -inf  ;;  %vm16457_vm13 = vcmp.eq.s32.totalorder %v12541_v22, 1  ;;  %vm16458_vm1 = vcmp.eq.s32.totalorder %v12543_v61, 1  ;;  %v6651_v47 = vmax.f32 %v6646_v45, %v6650_v12 }
0x10ea   :  { %v6642_v32 = vsel %vm16457_vm13, %v14100_v28, -1e+30  ;;  %v6643_v46 = vsel %vm16458_vm1, %v14098_v41, -1e+30  ;;  %v6653_v43 = vmax.f32 %v6647_v1, %v6652_v23  ;;  %v16459_v0 = vrot.slane %v14314_v21, 4 }
0x10eb   :  { %v6450_v7 = vrot.slane %v14415_v8, 4  ;;  %v16460_v48 = vmax.f32 %v14408_v53, %v14411_v5  ;;  %v6631_v34 = vmax.f32 %v6628_v33, %v6630_v54  ;;  %v6499_v62 = vmax.f32 %v14448_v42, %v6498_v40 }
0x10ec   :  { %v6428_v17 = vmax.f32 %v14314_v21, %v16459_v0  ;;  %v6522_v28 = vmax.f32 %v14450_v59, %v6521_v18  ;;  %v6544_v20 = vrot.slane %v14480_v57, 2  ;;  %v6610_v41 = vmax.f32 %v6608_v29, %v6609_v24 }
0x10ed   :  { %v6472_v6 = vmax.f32 %v6470_v36, %v16460_v48  ;;  %v6588_v25 = vrot.slane %v6587_v19, 4  ;;  %v6632_v23 = vmax.f32 %v6625_v10, %v6626_v50  ;;  %v6648_v1 = vsel %vm679_vm8, %v6642_v32, -inf  ;;  %v9012_v10 = vld [vmem:[%s15286_s12 + $0x70] sm:$0xff] }
0x10ee   :  { %v6649_v21 = vsel %vm679_vm8, %v6643_v46, -inf  ;;  %v16461_v12 = vrot.slane %v14263_v49, 2  ;;  %v16462_v53 = vrot.slane %v14277_v13, 2  ;;  %v6566_v42 = vmax.f32 %v6564_v31, %v6565_v52 }
0x10ef   :  { %v6654_v36 = vmax.f32 %v6651_v47, %v6653_v43  ;;  %v6429_v59 = vrot.slane %v6428_v17, 2  ;;  %v6473_v40 = vrot.slane %v6472_v6, 4  ;;  %vm16463_vm7 = vcmask 1040384  }
0x10f0   :  { %v6384_v63 = vmax.f32 %v14263_v49, %v16461_v12  ;;  %v6407_v5 = vmax.f32 %v14277_v13, %v16462_v53  ;;  %v6663_v50 = vsel %vm16463_vm7, %v14265_v14, %v14275_v30  ;;  %v6633_v29 = vmax.f32 %v6631_v34, %v6632_v23  ;;  %v9013_v14 = vld [vmem:[%s15286_s12 + $0x78] sm:$0xff]  ;;  %vm16467_vm11 = vmmov %vm16463_vm7 }
0x10f1   :  { %v6451_v18 = vmax.f32 %v14415_v8, %v6450_v7  ;;  %v6500_v54 = vrot.slane %v6499_v62, 1  ;;  %v6611_v39 = vrot.slane %v6610_v41, 4  ;;  %v6655_v56 = vmax.f32 %v6648_v1, %v6649_v21  ;;  %v6853_v1 = vld [vmem:[#allocation14 + $0x68] sm:$0xff] }
0x10f2   :  { %v6523_v11 = vrot.slane %v6522_v28, 1  ;;  %v6545_v49 = vmax.f32 %v14480_v57, %v6544_v20  ;;  %v6589_v33 = vmax.f32 %v6587_v19, %v6588_v25  ;;  %v6385_v24 = vrot.slane %v6384_v63, 1 }
0x10f3   :  { %v6567_v13 = vrot.slane %v6566_v42, 2  ;;  %v6656_v31 = vmax.f32 %v6654_v36, %v6655_v56  ;;  %v6408_v30 = vrot.slane %v6407_v5, 1  ;;  %v6474_v8 = vmax.f32 %v6472_v6, %v6473_v40 }
0x10f4   :  { %vm16464_vm14 = vcmask 1041408   ;;  %v6634_v57 = vrot.slane %v6633_v29, 4  ;;  %v6430_v32 = vmax.f32 %v6428_v17, %v6429_v59  ;;  %v6452_v46 = vrot.slane %v6451_v18, 2 }
0x10f5   :  { %v6664_v45 = vsel %vm16464_vm14, %v6663_v50, %v14292_v44  ;;  %v6501_v47 = vmax.f32 %v6499_v62, %v6500_v54  ;;  %v6612_v43 = vmax.f32 %v6610_v41, %v6611_v39  ;;  %v6524_v7 = vmax.f32 %v6522_v28, %v6523_v11  ;;  %v6852_v44 = vld [vmem:[#allocation14 + $0x60] sm:$0xff]  ;;  %vm16469_vm1 = vmmov %vm16464_vm14 }
0x10f6   :  { %v6546_v48 = vrot.slane %v6545_v49, 1  ;;  %v6590_v34 = vrot.slane %v6589_v33, 2  ;;  %v10615_v25 = vpack.c.bf16 %v9013_v14, %v9012_v10  ;;  %v6568_v23 = vmax.f32 %v6566_v42, %v6567_v13  ;;  %v6940_v14 = vld [vmem:[#allocation16 + $0x60] sm:$0xff] }
0x10f7   :  { %v6657_v6 = vrot.slane %v6656_v31, 4  ;;  %v6386_v21 = vmax.f32 %v6384_v63, %v6385_v24  ;;  %v6475_v17 = vrot.slane %v6474_v8, 2  ;;  %v6635_v12 = vmax.f32 %v6633_v29, %v6634_v57 }
0x10f8   :  { %vm16465_vm10 = vcmp.ge.f32.partialorder %v14009_v27, 0.1  ;;  %v6409_v28 = vmax.f32 %v6407_v5, %v6408_v30  ;;  %v6453_v41 = vmax.f32 %v6451_v18, %v6452_v46  ;;  %v6613_v53 = vrot.slane %v6612_v43, 2  ;;  %v6854_v27 = vld [vmem:[#allocation14 + $0x70] sm:$0xff]  ;;  %v6941_v30 = vld [vmem:[#allocation16 + $0x68] sm:$0xff] }
0x10f9   :  { %v5549_v62 = vsel %vm16465_vm10, %v14021_v26, 0.0  ;;  %v6431_v42 = vrot.slane %v6430_v32, 1  ;;  %vm16466_vm5 = vcmask 1042432   ;;  %v6547_v59 = vmax.f32 %v6545_v49, %v6546_v48  ;;  %v6855_v26 = vld [vmem:[#allocation14 + $0x78] sm:$0xff]  ;;  %v6942_v48 = vld [vmem:[#allocation16 + $0x70] sm:$0xff] }
0x10fa   :  { %v6665_v36 = vsel %vm16466_vm5, %v6664_v45, %v6386_v21  ;;  %v6591_v63 = vmax.f32 %v6589_v33, %v6590_v34  ;;  %v10619_v40 = vpack.c.bf16 %v6853_v1, %v6852_v44  ;;  %v6569_v50 = vrot.slane %v6568_v23, 1  ;;  %vm16472_vm10 = vmmov %vm16466_vm5  ;;  %v6943_v34 = vld [vmem:[#allocation16 + $0x78] sm:$0xff] }
0x10fb   :  { %v6658_v29 = vmax.f32 %v6656_v31, %v6657_v6  ;;  %v6670_v54 = vsel %vm16467_vm11, %v6501_v47, %v6524_v7  ;;  %v6476_v5 = vmax.f32 %v6474_v8, %v6475_v17  ;;  %v6636_v18 = vrot.slane %v6635_v12, 2 }
0x10fc   :  { %v6454_v39 = vrot.slane %v6453_v41, 1  ;;  %vm16468_vm13 = vcmask 1043456   ;;  %v6614_v56 = vmax.f32 %v6612_v43, %v6613_v53  ;;  %v6432_v11 = vmax.f32 %v6430_v32, %v6431_v42  ;;  %v7041_v53 = vld [vmem:[#allocation17 + $0x78] sm:$0xff] }
0x10fd   :  { %v6592_v24 = vrot.slane %v6591_v63, 1  ;;  %v6671_v49 = vsel %vm16469_vm1, %v6670_v54, %v6547_v59  ;;  %v10623_v33 = vpack.c.bf16 %v6855_v26, %v6854_v27  ;;  %v6570_v13 = vmax.f32 %v6568_v23, %v6569_v50  ;;  %vm16474_vm11 = vmmov %vm16468_vm13  ;;  %v9029_v59 = vld [vmem:[%s15280_s6 + $0x48] sm:$0xff]  ;;  %v10927_v27 = vld [vmem:[%s15622_s20] sm:$0xff] }
0x10fe   :  { %v6659_v10 = vrot.slane %v6658_v29, 2  ;;  %vm16470_vm7 = vcmp.ge.f32.partialorder %v14011_v4, 0.1  ;;  %v6477_v8 = vrot.slane %v6476_v5, 1  ;;  %vm16471_vm14 = vcmask 1044480   ;;  %v10928_v26 = vld [vmem:[%s15622_s20 + $0x8] sm:$0xff] }
0x10ff   :  { %v5550_v31 = vsel %vm16470_vm7, %v14016_v38, 0.0  ;;  %v6637_v57 = vmax.f32 %v6635_v12, %v6636_v18  ;;  %v6455_v32 = vmax.f32 %v6453_v41, %v6454_v39  ;;  %v6615_v46 = vrot.slane %v6614_v56, 1  ;;  %vm16476_vm1 = vmmov %vm16471_vm14  ;;  %v10930_v18 = vld [vmem:[%s15622_s20 + $0x18] sm:$0xff]  ;;  %v10931_v39 = vld [vmem:[%s15622_s20 + $0x20] sm:$0xff] }
0x1100   :  { %v6672_v47 = vsel %vm16472_vm10, %v6671_v49, %v6570_v13  ;;  %v6593_v43 = vmax.f32 %v6591_v63, %v6592_v24  ;;  %vm16473_vm5 = vcmask 1045504   ;;  %v6660_v38 = vmax.f32 %v6658_v29, %v6659_v10 }
0x1101   :  { %v6478_v7 = vmax.f32 %v6476_v5, %v6477_v8  ;;  %v6616_v23 = vmax.f32 %v6614_v56, %v6615_v46  ;;  %v10631_v44 = vpack.c.bf16 %v6943_v34, %v6942_v48  ;;  %vm16477_vm7 = vcmp.gt.f32.partialorder %v11909_v35, 0.0  ;;  %v10929_v5 = vld [vmem:[%s15622_s20 + $0x10] sm:$0xff]  ;;  %v9025_v56 = vld [vmem:[%s15292_s18 + $0x3] ss:$0 sm:$0xff] }
0x1102   :  { %v6661_v1 = vrot.slane %v6660_v38, 1 }
0x1167   :  { %v14563_v52 = vpop.f32.mrb[58].mxu1 }
0x1168   :  { %v6284_v19 = vpop.f32.mrb[59].mxu1  ;;  %v6294_v20 = vmul.f32 %v12263_v3, %v14563_v52 }
0x1169   :  { %v6293_v0 = vmul.f32 %v12255_v60, %v6284_v19 }
0x116b   :  { %10110 = vmatprep.mubr.msk.f32.mxu1 %vm679_vm8, %v6293_v0  ;;  %v10627_v0 = vpack.c.bf16 %v6941_v30, %v6940_v14 }
0x116c   :  { %10111 = vmatmul.mubr.msk.f32.vlgmr.msra.gmra.mrb[60].mxu1 %vm679_vm8, %v6294_v20  ;;  %v6638_v20 = vrot.slane %v6637_v57, 1 }
0x116d   :  { %10614 = vmatpush3.bf16.msra.mxu1 %v14118_v55  ;;  %10121 = vmatprep.mubr.msk.f32.mxu1 %vm679_vm8, %v5549_v62  ;;  %v6666_v55 = vsel %vm16468_vm13, %v6665_v36, %v6409_v28  ;;  %vm16475_vm13 = vcmask 1046528   ;;  %v6662_v62 = vmax.f32 %v6660_v38, %v6661_v1  ;;  %v9028_v36 = vld [vmem:[%s15280_s6 + $0x40] sm:$0xff] }
0x116e   :  { %10616 = vmatprep.subr.bf16.mxu1 %v10615_v25  ;;  %v6667_v45 = vsel %vm16471_vm14, %v6666_v55, %v6432_v11  ;;  %v6639_v21 = vmax.f32 %v6637_v57, %v6638_v20  ;;  %vm16478_vm14 = vmmov %vm16473_vm5  ;;  %v10643_v63 = vpack.c.bf16 %v9029_v59, %v9028_v36  ;;  %v10932_v55 = vld [vmem:[%s15622_s20 + $0x28] sm:$0xff]  ;;  %v7447_v38 = vld [vmem:[#allocation8 + $0x98] sm:$0xff] }
0x116f   :  { %v6668_v4 = vsel %vm16473_vm5, %v6667_v45, %v6455_v32  ;;  %vm16479_vm10 = vmmov %vm16475_vm13  ;;  %vm16480_vm5 = vcmp.gt.f32.partialorder %v16010_v16, 0.0  ;;  %v7444_v45 = vld [vmem:[#allocation8 + $0x80] sm:$0xff]  ;;  %v7445_v57 = vld [vmem:[#allocation8 + $0x88] sm:$0xff] }
0x1170   :  { %v6669_v6 = vsel %vm16475_vm13, %v6668_v4, %v6478_v7  ;;  %v7446_v4 = vld [vmem:[#allocation8 + $0x90] sm:$0xff]  ;;  %v9053_v1 = vld [vmem:[%s15282_s8 + $0x80] sm:$0xff] }
0x1171   :  { %10618 = vmatpush3.bf16.msra.mxu1 %v10615_v25  ;;  %v6673_v25 = vsel %vm16474_vm11, %v6672_v47, %v6593_v43  ;;  %v6677_v17 = vsel %vm16477_vm7, %v6669_v6, 0.0  ;;  %vm16481_vm11 = vcmask 130048   ;;  %v10659_v47 = vpack.c.bf16 %v7445_v57, %v7444_v45  ;;  %v16491_v20 = vld [vmem:[#allocation30_spill] sm:$0xff]  ;;  %v16497_v6 = vld [vmem:[#allocation40_spill] sm:$0xff] }
0x1172   :  { %10620 = vmatprep.subr.bf16.mxu1 %v10619_v40  ;;  %vm16482_vm13 = vmmov %vm16481_vm11  ;;  %v10663_v34 = vpack.c.bf16 %v7447_v38, %v7446_v4  ;;  %v8276_v4 = vld [vmem:[#allocation13 + $0x80] sm:$0xff]  ;;  %v8277_v38 = vld [vmem:[#allocation13 + $0x88] sm:$0xff] }
0x1174   :  { %10122 = vmatmul.mubr.msk.f32.vlgmr.msra.gmra.mrb[60].mxu1 %vm679_vm8, %v5550_v31  ;;  %v14652_v31 = vld [vmem:[#allocation5 + $0x38] sm:$0xff] }
0x1175   :  { %10622 = vmatpush3.bf16.msra.mxu1 %v10619_v40  ;;  %10132 = vmatprep.mubr.msk.f32.mxu1 %vm679_vm8, %v6284_v19  ;;  %v6674_v19 = vsel %vm16476_vm1, %v6673_v25, %v6616_v23  ;;  %v9023_v40 = vld [vmem:[%s15290_s16 + $0x3] ss:$0 sm:$0xff]  ;;  %vm16483_vm1 = vmmov %vm16481_vm11  ;;  %v16493_v25 = vld [vmem:[#allocation37_spill] sm:$0xff] }
0x1176   :  { %10624 = vmatprep.subr.bf16.mxu1 %v10623_v33  ;;  %v6675_v12 = vsel %vm16478_vm14, %v6674_v19, %v6639_v21  ;;  %vm16484_vm7 = vmmov %vm16483_vm1  ;;  %v16495_v23 = vld [vmem:[#allocation32_spill] sm:$0xff] }
0x1177   :  { %v6676_v28 = vsel %vm16479_vm10, %v6675_v12, %v6662_v62  ;;  %vm16485_vm14 = vmmov %vm16483_vm1  ;;  %v9054_v19 = vld [vmem:[%s15282_s8 + $0x88] sm:$0xff]  ;;  %v9056_v12 = vld [vmem:[%s15282_s8 + $0x98] sm:$0xff] }
0x1178   :  { %v6678_v41 = vsel %vm16480_vm5, %v6676_v28, 0.0  ;;  %vm16486_vm10 = vmmov %vm16483_vm1  ;;  %v10667_v21 = vpack.c.bf16 %v9054_v19, %v9053_v1  ;;  %v8630_v1 = vld [vmem:[#allocation17 + $0x88] sm:$0xff] }
0x1179   :  { %10626 = vmatpush3.bf16.msra.mxu1 %v10623_v33  ;;  %vm16487_vm5 = vmmov %vm16483_vm1  ;;  %v14650_v33 = vld [vmem:[#allocation5 + $0x30] sm:$0xff] }
0x117a   :  { %10628 = vmatprep.subr.bf16.mxu1 %v10627_v0 }
0x117c   :  { %10133 = vmatmul.mubr.msk.f32.vlgmr.msra.gmra.mrb[60].mxu1 %vm679_vm8, %v14563_v52  ;;  %v7040_v52 = vld [vmem:[#allocation17 + $0x70] sm:$0xff] }
0x117d   :  { %10630 = vmatpush3.bf16.msra.mxu1 %v10627_v0  ;;  %10143 = vmatprep.mubr.msk.f32.mxu1 %vm679_vm8, %v6677_v17  ;;  %v10639_v42 = vpack.c.bf16 %v7041_v53, %v7040_v52  ;;  %v9055_v17 = vld [vmem:[%s15282_s8 + $0x90] sm:$0xff] }
0x117e   :  { %10632 = vmatprep.subr.bf16.mxu1 %v10631_v44  ;;  %v10671_v53 = vpack.c.bf16 %v9056_v12, %v9055_v17  ;;  %v16516_v12 = vld [vmem:[#allocation43_spill] sm:$0xff] }
0x117f   :  { %10640 = vmatprep.subr.bf16.mxu0 %v10639_v42 }
0x1180   :  { %10642 = vmatpush3.bf16.msra.mxu0 %v10639_v42 }
0x1181   :  { %10634 = vmatpush3.bf16.msra.mxu1 %v10631_v44  ;;  %10644 = vmatprep.subr.bf16.mxu0 %v10643_v63  ;;  %v16505_v44 = vld [vmem:[#allocation27_spill] sm:$0xff] }
0x1184   :  { %10144 = vmatmul.mubr.msk.f32.vlgmr.msra.gmra.mrb[60].mxu1 %vm679_vm8, %v6678_v41 }
0x1185   :  { %10174 = vmatprep.mubr.msk.f32.mxu1 %vm16481_vm11, %v16012_v15  ;;  %vm16488_vm11 = vmmov %vm16483_vm1 }
0x1257   :  { %v10145_v15 = vpop.f32.mrb[60].mxu1 }
0x1258   :  { %v7016_v50 = vpop.f32.mrb[61].mxu1  ;;  %v7036_v54 = vadd.f32 %v10145_v15, %v9023_v40 }
0x1259   :  { %v7035_v29 = vadd.f32 %v9023_v40, %v7016_v50  ;;  %v7675_v40 = vld [vmem:[#allocation10 + $0x20] sm:$0xff] }
0x125b   :  { %10154 = vmatprep.mubr.msk.f32.mxu0 %vm679_vm8, %v7035_v29 }
0x125c   :  { %10155 = vmatmul.mubr.msk.f32.vlgmr.msra.gmra.mrb[56].mxu0 %vm679_vm8, %v7036_v54 }
0x125d   :  { %10646 = vmatpush3.bf16.msra.mxu0 %v10643_v63  ;;  %10161 = vmatprep.mubr.msk.f32.mxu0 %vm16482_vm13, %v10927_v27  ;;  %vm15614_vm13 = vcmp.ge.f32.partialorder %v14650_v33, 0.1  ;;  %v9030_v27 = vld [vmem:[#allocation7 + $0x4] ss:$0 sm:$0xff] }
0x1260   :  { %10162 = vmatmul.mubr.msk.f32.vlgmr.msra.gmra.mrb[58].mxu0 %vm16483_vm1, %v10928_v26  ;;  %vm15613_vm1 = vcmp.ge.f32.partialorder %v14652_v31, 0.1 }
0x1261   :  { %10164 = vmatprep.mubr.msk.f32.mxu0 %vm16484_vm7, %v10929_v5  ;;  %vm10648_vm7 = vmpackc.low %vm15613_vm1, %vm15614_vm13 }
0x1262   :  { %vm16496_vm1 = vmmov %vm16487_vm5 }
0x1263   :  { %vm16498_vm13 = vmmov %vm16496_vm1 }
0x1264   :  { %10165 = vmatmul.mubr.msk.f32.gmra.mrb[60].mxu0 %vm16485_vm14, %v10930_v18  ;;  %vm16489_vm14 = vmmov %vm16487_vm5 }
0x1265   :  { %10167 = vmatprep.mubr.msk.f32.mxu0 %vm16486_vm10, %v10931_v39  ;;  %vm16490_vm10 = vmmov %vm16487_vm5 }
0x1268   :  { %10168 = vmatmul.mubr.msk.f32.gmra.mrb[62].mxu0 %vm16487_vm5, %v10932_v55 }
0x1269   :  { %10187 = vmatprep.mubr.msk.f32.mxu0 %vm16488_vm11, %v16020_v51  ;;  %vm16492_vm11 = vmmov %vm16487_vm5 }
0x132f   :  { %v10156_v11 = vpop.f32.mrb[56].mxu0 }
0x1330   :  { %v7128_v24 = vadd.f32 %v10156_v11, %v9025_v56  ;;  %v7122_v49 = vpop.f32.mrb[57].mxu0  ;;  %v9075_v11 = vld [vmem:[#allocation11 + $0x4] ss:$0 sm:$0xff] }
0x1331   :  { %v7123_v13 = vadd.f32 %v9025_v56, %v7122_v49 }
0x1332   :  { %v7132_v10 = vmax.f32 %v7128_v24, 0.0 }
0x1333   :  { %v7131_v14 = vmax.f32 %v7123_v13, 0.0  ;;  %v14655_v30 = vpop.f32.mrb[58].mxu0 }
0x1334   :  { %v14657_v8 = vmul.f32 1.1111112, %v7132_v10  ;;  %v14659_v51 = vpop.f32.mrb[59].mxu0  ;;  %v7225_v5 = vadd.f32 %v14655_v30, %v9030_v27 }
0x1335   :  { %v14662_v32 = vmul.f32 1.1111112, %v7131_v14  ;;  %v7220_v26 = vadd.f32 %v9030_v27, %v14659_v51 }
0x1337   :  { %v10647_v46 = vpack.c.bf16 %v14657_v8, %v14662_v32  ;;  %v14670_v43 = vpop.f32.mrb[60].mxu0 }
0x1338   :  { %v14672_v0 = vpop.f32.mrb[61].mxu0  ;;  %v7235_v39 = vadd.f32 %v14670_v43, %v9030_v27 }
0x1339   :  { %10649 = vmatprep.subr.msk.bf16.mxu1 %vm10648_vm7, %v10647_v46  ;;  %10655 = vmatprep.subr.msk.bf16.mxu0 %vm10648_vm7, %v10647_v46  ;;  %v7230_v18 = vadd.f32 %v9030_v27, %v14672_v0 }
0x133a   :  { %10652 = vmatpush3.bf16.msk.msra.mxu1 %vm10648_vm7, %v10647_v46  ;;  %10658 = vmatpush3.bf16.msk.msra.mxu0 %vm10648_vm7, %v10647_v46  ;;  %vm16494_vm7 = vmmov %vm16487_vm5 }
0x133b   :  { %10660 = vmatprep.subr.bf16.mxu1 %v10659_v47  ;;  %v14674_v7 = vpop.f32.mrb[62].mxu0 }
0x133c   :  { %v7239_v48 = vpop.f32.mrb[63].mxu0  ;;  %v7245_v56 = vadd.f32 %v14674_v7, %v9030_v27 }
0x133d   :  { %10175 = vmatmul.mubr.msk.f32.vlgmr.msra.gmra.mrb[62].mxu1 %vm16489_vm14, %v16022_v58  ;;  %10188 = vmatmul.mubr.msk.f32.vlgmr.msra.gmra.mrb[64].mxu0 %vm16490_vm10, %v16024_v2  ;;  %v16499_v58 = vld [vmem:[#allocation33_spill] sm:$0xff]  ;;  %vm16500_vm14 = vmmov %vm16496_vm1  ;;  %v16501_v2 = vld [vmem:[#allocation39_spill] sm:$0xff]  ;;  %v7240_v55 = vadd.f32 %v9030_v27, %v7239_v48 }
0x133e   :  { %10177 = vmatprep.mubr.msk.f32.mxu1 %vm16487_vm5, %v16255_v37  ;;  %10190 = vmatprep.mubr.msk.f32.mxu0 %vm16492_vm11, %v16491_v20  ;;  %vm16502_vm10 = vmmov %vm16496_vm1  ;;  %v16503_v37 = vld [vmem:[#allocation34_spill] sm:$0xff]  ;;  %vm16506_vm11 = vcmask 392192   ;;  %v16513_v20 = vld [vmem:[#allocation28_spill] sm:$0xff] }
0x133f   :  { %10662 = vmatpush3.bf16.msra.mxu1 %v10659_v47  ;;  %vm16504_vm5 = vmmov %vm16496_vm1 }
0x1340   :  { %10664 = vmatprep.subr.bf16.mxu1 %v10663_v34 }
0x1341   :  { %10178 = vmatmul.mubr.msk.f32.gmra.mrb[64].mxu1 %vm16494_vm7, %v16493_v25  ;;  %10191 = vmatmul.mubr.msk.f32.gmra.mrb[66].mxu0 %vm16496_vm1, %v16495_v23  ;;  %v8278_v25 = vld [vmem:[#allocation13 + $0x90] sm:$0xff]  ;;  %v8279_v23 = vld [vmem:[#allocation13 + $0x98] sm:$0xff] }
0x1342   :  { %10180 = vmatprep.mubr.msk.f32.mxu1 %vm16498_vm13, %v16497_v6  ;;  %10193 = vmatprep.mubr.msk.f32.mxu0 %vm16500_vm14, %v16499_v58  ;;  %vm16507_vm13 = vcmask 64512   ;;  %v10691_v6 = vpack.c.bf16 %v8279_v23, %v8278_v25  ;;  %v9078_v58 = vld [vmem:[%s15286_s12 + $0x80] sm:$0xff] }
0x1343   :  { %10666 = vmatpush3.bf16.msra.mxu1 %v10663_v34  ;;  %vm16508_vm1 = vmmov %vm16507_vm13  ;;  %v10687_v34 = vpack.c.bf16 %v8277_v38, %v8276_v4  ;;  %v16540_v4 = vld [vmem:[#allocation54_spill] sm:$0xff] }
0x1344   :  { %10668 = vmatprep.subr.bf16.mxu1 %v10667_v21  ;;  %vm16509_vm7 = vmmov %vm16508_vm1 }
0x1345   :  { %10181 = vmatmul.mubr.msk.f32.gmra.mrb[66].mxu1 %vm16502_vm10, %v16501_v2  ;;  %10194 = vmatmul.mubr.msk.f32.gmra.mrb[68].mxu0 %vm16504_vm5, %v16503_v37  ;;  %vm16510_vm14 = vmmov %vm16508_vm1  ;;  %v9079_v2 = vld [vmem:[%s15286_s12 + $0x88] sm:$0xff] }
0x1346   :  { %10253 = vmatprep.mubr.msk.f32.mxu0 %vm16506_vm11, %v16505_v44  ;;  %vm16511_vm10 = vmmov %vm16508_vm1  ;;  %v14759_v37 = vpack.c.bf16 %v9079_v2, %v9078_v58  ;;  %v8629_v44 = vld [vmem:[#allocation17 + $0x80] sm:$0xff]  ;;  %v16542_v58 = vld [vmem:[#allocation55_spill] sm:$0xff] }
0x1347   :  { %vm16512_vm5 = vmmov %vm16508_vm1  ;;  %v10719_v19 = vpack.c.bf16 %v8630_v1, %v8629_v44  ;;  %v16544_v44 = vld [vmem:[#allocation86_spill] sm:$0xff] }
0x1410   :  { %v10176_v62 = vpop.f32.mrb[62].mxu1  ;;  %v10189_v28 = vpop.f32.mrb[64].mxu0 }
0x1411   :  { %v7314_v41 = vpop.f32.mrb[63].mxu1  ;;  %v7409_v52 = vpop.f32.mrb[65].mxu0 }
0x1412   :  { %10204 = vmatprep.mubr.msk.f32.mxu1 %vm679_vm8, %v7409_v52  ;;  %v16520_v52 = vld [vmem:[#allocation42_spill] sm:$0xff] }
0x1413   :  { %10205 = vmatmul.mubr.msk.f32.vlgmr.msra.gmra.mrb[68].mxu1 %vm679_vm8, %v10189_v28  ;;  %v16518_v28 = vld [vmem:[#allocation71_spill] sm:$0xff] }
0x1414   :  { %v10179_v42 = vpop.f32.mrb[64].mxu1  ;;  %v10192_v36 = vpop.f32.mrb[66].mxu0  ;;  %10670 = vmatpush3.bf16.msra.mxu1 %v10667_v21  ;;  %v16514_v21 = vld [vmem:[#allocation72_spill] sm:$0xff] }
0x1415   :  { %v7324_v59 = vpop.f32.mrb[65].mxu1  ;;  %v7419_v63 = vpop.f32.mrb[67].mxu0  ;;  %10672 = vmatprep.subr.bf16.mxu1 %v10671_v53 }
0x1416   :  { %10207 = vmatprep.mubr.msk.f32.mxu1 %vm679_vm8, %v7419_v63 }
0x1417   :  { %10208 = vmatmul.mubr.msk.f32.gmra.mrb[70].mxu1 %vm679_vm8, %v10192_v36 }
0x1418   :  { %v10182_v15 = vpop.f32.mrb[66].mxu1  ;;  %v10195_v50 = vpop.f32.mrb[68].mxu0  ;;  %10674 = vmatpush3.bf16.msra.mxu1 %v10671_v53 }
0x1419   :  { %v7334_v29 = vpop.f32.mrb[67].mxu1  ;;  %v7429_v54 = vpop.f32.mrb[69].mxu0  ;;  %10230 = vmatprep.subr.mxu1 %v7675_v40 }
0x141a   :  { %10210 = vmatprep.mubr.msk.f32.mxu1 %vm679_vm8, %v7429_v54  ;;  %v16528_v54 = vld [vmem:[#allocation44_spill] sm:$0xff] }
0x141b   :  { %10211 = vmatmul.mubr.msk.f32.gmra.mrb[72].mxu1 %vm679_vm8, %v10195_v50 }
0x141c   :  { %10221 = vmatprep.mubr.msk.f32.mxu1 %vm679_vm8, %v7314_v41 }
0x141f   :  { %10222 = vmatmul.mubr.msk.f32.vlgmr.msra.gmra.mrb[68].mxu1 %vm679_vm8, %v10176_v62 }
0x1420   :  { %10224 = vmatprep.mubr.msk.f32.mxu1 %vm679_vm8, %v7324_v59  ;;  %10231 = vmatpush3.msra.mxu1 %v7675_v40  ;;  %v16524_v59 = vld [vmem:[#allocation45_spill] sm:$0xff]  ;;  %v16526_v40 = vld [vmem:[#allocation76_spill] sm:$0xff] }
0x1421   :  { %10720 = vmatprep.subr.bf16.mxu1 %v10719_v19 }
0x1423   :  { %10225 = vmatmul.mubr.msk.f32.gmra.mrb[70].mxu1 %vm679_vm8, %v10179_v42  ;;  %v16522_v42 = vld [vmem:[#allocation74_spill] sm:$0xff] }
0x1424   :  { %10227 = vmatprep.mubr.msk.f32.mxu1 %vm679_vm8, %v7334_v29 }
0x1427   :  { %10228 = vmatmul.mubr.msk.f32.gmra.mrb[72].mxu1 %vm679_vm8, %v10182_v15 }
0x1428   :  { %10232 = vmatprep.mubr.msk.f32.mxu1 %vm16507_vm13, %v7220_v26  ;;  %vm16515_vm13 = vcmp.eq.s32.totalorder %v16514_v21, 1  ;;  %v16530_v26 = vld [vmem:[#allocation78_spill] sm:$0xff] }
0x142b   :  { %10233 = vmatmul.mubr.msk.f32.vlgmr.msra.gmra.mrb[68].mxu1 %vm16508_vm1, %v7225_v5  ;;  %vm16517_vm1 = vcmp.eq.s32.totalorder %v16516_v12, 1 }
0x142c   :  { %10235 = vmatprep.mubr.msk.f32.mxu1 %vm16509_vm7, %v7230_v18  ;;  %10722 = vmatpush3.bf16.msra.mxu1 %v10719_v19  ;;  %vm16519_vm7 = vcmp.eq.s32.totalorder %v16518_v28, 1 }
0x142f   :  { %10236 = vmatmul.mubr.msk.f32.gmra.mrb[70].mxu1 %vm16510_vm14, %v7235_v39  ;;  %vm16521_vm14 = vcmp.eq.s32.totalorder %v16520_v52, 1 }
0x1430   :  { %10238 = vmatprep.mubr.msk.f32.mxu1 %vm16511_vm10, %v7240_v55  ;;  %vm16523_vm10 = vcmp.eq.s32.totalorder %v16522_v42, 1  ;;  %v16532_v55 = vld [vmem:[#allocation47_spill] sm:$0xff] }
0x1433   :  { %10239 = vmatmul.mubr.msk.f32.gmra.mrb[72].mxu1 %vm16512_vm5, %v7245_v56  ;;  %vm16525_vm5 = vcmp.eq.s32.totalorder %v16524_v59, 1 }
0x14fe   :  { %v10234_v24 = vpop.f32.mrb[68].mxu1 }
0x14ff   :  { %v14733_v49 = vadd.f32 %v10234_v24, %v9075_v11  ;;  %v7760_v13 = vpop.f32.mrb[69].mxu1 }
0x1500   :  { %v14735_v10 = vadd.f32 %v9075_v11, %v7760_v13 }
0x1501   :  { %v7887_v53 = vsel %vm16521_vm14, %v14733_v49, -1e+30 }
0x1502   :  { %v10237_v14 = vpop.f32.mrb[70].mxu1  ;;  %v10675_v30 = vpack.c.bf16 %v14733_v49, %v14735_v10  ;;  %v7886_v41 = vsel %vm16519_vm7, %v14735_v10, -1e+30  ;;  %v7909_v36 = vsel %vm16523_vm10, %v14735_v10, -1e+30  ;;  %v7893_v39 = vsel %vm679_vm8, %v7887_v53, -inf }
0x1503   :  { %v14739_v51 = vadd.f32 %v10237_v14, %v9075_v11  ;;  %v7770_v45 = vpop.f32.mrb[71].mxu1  ;;  %v7892_v18 = vsel %vm679_vm8, %v7886_v41, -inf  ;;  %vm16533_vm7 = vcmp.eq.s32.totalorder %v16532_v55, 1  ;;  %v7915_v13 = vsel %vm679_vm8, %v7909_v36, -inf  ;;  %v16548_v53 = vld [vmem:[#allocation88_spill] sm:$0xff] }
0x1504   :  { %v14741_v57 = vadd.f32 %v9075_v11, %v7770_v45  ;;  %10676 = vmatprep.subr.bf16.mxu0 %v10675_v30  ;;  %v16536_v45 = vld [vmem:[#allocation46_spill] sm:$0xff]  ;;  %v16550_v55 = vld [vmem:[#allocation96_spill] sm:$0xff] }
0x1505   :  { %10678 = vmatpush3.bf16.msra.mxu0 %v10675_v30  ;;  %vm16537_vm10 = vcmp.eq.s32.totalorder %v16536_v45, 1 }
0x1506   :  { %v10240_v46 = vpop.f32.mrb[72].mxu1  ;;  %v10679_v47 = vpack.c.bf16 %v14739_v51, %v14741_v57 }
0x1507   :  { %v14745_v43 = vadd.f32 %v10240_v46, %v9075_v11  ;;  %v7780_v0 = vpop.f32.mrb[73].mxu1  ;;  %v7932_v46 = vsel %vm16537_vm10, %v14735_v10, -1e+30  ;;  %vm16551_vm10 = vcmp.eq.s32.totalorder %v16550_v55, 1 }
0x1508   :  { %v14747_v7 = vadd.f32 %v9075_v11, %v7780_v0  ;;  %10680 = vmatprep.subr.bf16.mxu0 %v10679_v47  ;;  %v16534_v11 = vld [vmem:[#allocation48_spill] sm:$0xff]  ;;  %v7938_v41 = vsel %vm679_vm8, %v7932_v46, -inf  ;;  %v16556_v46 = vld [vmem:[#allocation57_spill] sm:$0xff] }
0x1509   :  { %10682 = vmatpush3.bf16.msra.mxu0 %v10679_v47  ;;  %v7891_v62 = vsel %vm16517_vm1, %v14745_v43, -1e+30  ;;  %vm16531_vm1 = vcmp.eq.s32.totalorder %v16530_v26, 1  ;;  %vm16535_vm14 = vcmp.eq.s32.totalorder %v16534_v11, 1  ;;  %v16538_v47 = vld [vmem:[#allocation84_spill] sm:$0xff]  ;;  %v16552_v11 = vld [vmem:[#allocation58_spill] sm:$0xff] }
0x150a   :  { %v10683_v48 = vpack.c.bf16 %v14745_v43, %v14747_v7  ;;  %v7890_v17 = vsel %vm16515_vm13, %v14747_v7, -1e+30  ;;  %v7913_v63 = vsel %vm16525_vm5, %v14747_v7, -1e+30  ;;  %v7898_v29 = vsel %vm679_vm8, %v7891_v62, -inf  ;;  %v16546_v62 = vld [vmem:[#allocation62_spill] sm:$0xff] }
0x150b   :  { %v7896_v50 = vsel %vm679_vm8, %v7890_v17, -inf  ;;  %vm16529_vm13 = vcmp.eq.s32.totalorder %v16528_v54, 1  ;;  %v7933_v5 = vsel %vm16531_vm1, %v14733_v49, -1e+30  ;;  %v7936_v56 = vsel %vm16533_vm7, %v14747_v7, -1e+30 }
0x150c   :  { %10684 = vmatprep.subr.bf16.mxu0 %v10683_v48  ;;  %v7910_v27 = vsel %vm16529_vm13, %v14733_v49, -1e+30  ;;  %v7937_v24 = vsel %vm16535_vm14, %v14745_v43, -1e+30  ;;  %v7919_v14 = vsel %vm679_vm8, %v7913_v63, -inf  ;;  %vm16539_vm5 = vcmp.eq.s32.totalorder %v16538_v47, 1 }
0x150d   :  { %10686 = vmatpush3.bf16.msra.mxu0 %v10683_v48  ;;  %v7888_v0 = vsel %vm16539_vm5, %v14741_v57, -1e+30  ;;  %v7897_v48 = vmax.f32 %v7892_v18, %v7896_v50  ;;  %v7939_v25 = vsel %vm679_vm8, %v7933_v5, -inf  ;;  %v7942_v23 = vsel %vm679_vm8, %v7936_v56, -inf }
0x150e   :  { %10688 = vmatprep.subr.bf16.mxu0 %v10687_v34  ;;  %vm16543_vm13 = vcmp.eq.s32.totalorder %v16542_v58, 1  ;;  %vm16545_vm1 = vcmp.eq.s32.totalorder %v16544_v44, 1  ;;  %v7920_v19 = vmax.f32 %v7915_v13, %v7919_v14  ;;  %v7894_v17 = vsel %vm679_vm8, %v7888_v0, -inf  ;;  %v16564_v58 = vld [vmem:[#allocation98_spill] sm:$0xff] }
0x150f   :  { %v7911_v2 = vsel %vm16543_vm13, %v14741_v57, -1e+30  ;;  %v7912_v1 = vsel %vm16545_vm1, %v14739_v51, -1e+30  ;;  %vm16547_vm7 = vcmp.eq.s32.totalorder %v16546_v62, 1  ;;  %vm16549_vm14 = vcmp.eq.s32.totalorder %v16548_v53, 1 }
0x1510   :  { %10254 = vmatmul.mubr.msk.f32.vlgmr.msra.gmra.mrb[70].mxu0 %vm16506_vm11, %v16513_v20  ;;  %vm16527_vm11 = vcmp.eq.s32.totalorder %v16526_v40, 1  ;;  %v7916_v20 = vsel %vm679_vm8, %v7910_v27, -inf  ;;  %v7935_v28 = vsel %vm16547_vm7, %v14739_v51, -1e+30  ;;  %v7934_v42 = vsel %vm16549_vm14, %v14741_v57, -1e+30 }
0x1511   :  { %10690 = vmatpush3.bf16.msra.mxu0 %v10687_v34  ;;  %v7914_v15 = vsel %vm16527_vm11, %v14745_v43, -1e+30  ;;  %vm16541_vm11 = vcmp.eq.s32.totalorder %v16540_v4, 1  ;;  %v7899_v34 = vmax.f32 %v7893_v39, %v7898_v29  ;;  %v7943_v36 = vmax.f32 %v7938_v41, %v7942_v23  ;;  %v16562_v23 = vld [vmem:[#allocation73_spill] sm:$0xff] }
0x1512   :  { %10692 = vmatprep.subr.bf16.mxu0 %v10691_v6  ;;  %v7921_v30 = vsel %vm679_vm8, %v7914_v15, -inf  ;;  %v7889_v38 = vsel %vm16541_vm11, %v14739_v51, -1e+30  ;;  %v7917_v63 = vsel %vm679_vm8, %v7911_v2, -inf  ;;  %v7918_v40 = vsel %vm679_vm8, %v7912_v1, -inf }
0x1513   :  { %v7922_v21 = vmax.f32 %v7916_v20, %v7921_v30  ;;  %v7895_v12 = vsel %vm679_vm8, %v7889_v38, -inf  ;;  %v7900_v52 = vmax.f32 %v7897_v48, %v7899_v34  ;;  %v7940_v29 = vsel %vm679_vm8, %v7934_v42, -inf  ;;  %v16554_v30 = vld [vmem:[#allocation56_spill] sm:$0xff]  ;;  %v16560_v34 = vld [vmem:[#allocation65_spill] sm:$0xff] }
0x1514   :  { %v7901_v15 = vmax.f32 %v7894_v17, %v7895_v12  ;;  %v7941_v54 = vsel %vm679_vm8, %v7935_v28, -inf  ;;  %v7924_v26 = vmax.f32 %v7917_v63, %v7918_v40  ;;  %v7959_v56 = vsel %vm16551_vm10, %v14747_v7, -1e+30  ;;  %v16558_v38 = vld [vmem:[#allocation64_spill] sm:$0xff] }
0x1515   :  { %10694 = vmatpush3.bf16.msra.mxu0 %v10691_v6  ;;  %v7944_v6 = vsel %vm679_vm8, %v7937_v24, -inf  ;;  %v7923_v50 = vmax.f32 %v7920_v19, %v7922_v21  ;;  %v7947_v39 = vmax.f32 %v7940_v29, %v7941_v54  ;;  %vm16553_vm5 = vcmp.eq.s32.totalorder %v16552_v11, 1  ;;  %v16566_v19 = vld [vmem:[#allocation63_spill] sm:$0xff]  ;;  %v16568_v17 = vld [vmem:[#allocation104_spill] sm:$0xff] }
0x1516   :  { %10696 = vmatprep.subr.bf16.mxu0 %v14759_v37  ;;  %v7945_v59 = vmax.f32 %v7939_v25, %v7944_v6  ;;  %v7902_v27 = vmax.f32 %v7900_v52, %v7901_v15  ;;  %v7960_v24 = vsel %vm16553_vm5, %v14745_v43, -1e+30  ;;  %vm16555_vm11 = vcmp.eq.s32.totalorder %v16554_v30, 1  ;;  %v16572_v54 = vld [vmem:[#allocation107_spill] sm:$0xff] }
0x1517   :  { %v7925_v18 = vmax.f32 %v7923_v50, %v7924_v26  ;;  %v7955_v45 = vsel %vm16555_vm11, %v14735_v10, -1e+30  ;;  %vm16557_vm13 = vcmp.eq.s32.totalorder %v16556_v46, 1  ;;  %v7965_v0 = vsel %vm679_vm8, %v7959_v56, -inf  ;;  %v16570_v50 = vld [vmem:[#allocation89_spill] sm:$0xff] }
0x1518   :  { %v7946_v5 = vmax.f32 %v7943_v36, %v7945_v59  ;;  %v7903_v13 = vrot.slane %v7902_v27, 4  ;;  %v7956_v47 = vsel %vm16557_vm13, %v14733_v49, -1e+30  ;;  %v7967_v4 = vsel %vm679_vm8, %v7960_v24, -inf }
0x1519   :  { %vm16559_vm1 = vcmp.eq.s32.totalorder %v16558_v38, 1  ;;  %vm16561_vm7 = vcmp.eq.s32.totalorder %v16560_v34, 1  ;;  %v7926_v25 = vrot.slane %v7925_v18, 4  ;;  %vm16563_vm14 = vcmp.eq.s32.totalorder %v16562_v23, 1  ;;  %v16574_v38 = vld [vmem:[#allocation115_spill] sm:$0xff] }
0x151a   :  { %v7948_v14 = vmax.f32 %v7946_v5, %v7947_v39  ;;  %v7982_v48 = vsel %vm16559_vm1, %v14747_v7, -1e+30  ;;  %v7983_v20 = vsel %vm16561_vm7, %v14745_v43, -1e+30  ;;  %v7957_v6 = vsel %vm16563_vm14, %v14741_v57, -1e+30 }
0x151b   :  { %vm16565_vm10 = vcmp.eq.s32.totalorder %v16564_v58, 1  ;;  %v7961_v44 = vsel %vm679_vm8, %v7955_v45, -inf  ;;  %v7962_v1 = vsel %vm679_vm8, %v7956_v47, -inf  ;;  %vm16567_vm5 = vcmp.eq.s32.totalorder %v16566_v19, 1  ;;  %v16576_v34 = vld [vmem:[#allocation79_spill] sm:$0xff]  ;;  %v16580_v58 = vld [vmem:[#allocation77_spill] sm:$0xff] }
0x151c   :  { %v7958_v2 = vsel %vm16565_vm10, %v14739_v51, -1e+30  ;;  %v7978_v21 = vsel %vm16567_vm5, %v14735_v10, -1e+30  ;;  %vm16569_vm11 = vcmp.eq.s32.totalorder %v16568_v17, 1  ;;  %v7966_v62 = vmax.f32 %v7961_v44, %v7965_v0  ;;  %v16578_v23 = vld [vmem:[#allocation75_spill] sm:$0xff] }
0x151d   :  { %v7979_v12 = vsel %vm16569_vm11, %v14733_v49, -1e+30  ;;  %v7968_v28 = vmax.f32 %v7962_v1, %v7967_v4  ;;  %v7988_v41 = vsel %vm679_vm8, %v7982_v48, -inf  ;;  %v7990_v52 = vsel %vm679_vm8, %v7983_v20, -inf }
0x151e   :  { %v7904_v53 = vmax.f32 %v7902_v27, %v7903_v13  ;;  %v7949_v42 = vrot.slane %v7948_v14, 4  ;;  %v7963_v36 = vsel %vm679_vm8, %v7957_v6, -inf  ;;  %v7927_v59 = vmax.f32 %v7925_v18, %v7926_v25 }
0x151f   :  { %v7964_v63 = vsel %vm679_vm8, %v7958_v2, -inf  ;;  %v7984_v40 = vsel %vm679_vm8, %v7978_v21, -inf  ;;  %v7985_v15 = vsel %vm679_vm8, %v7979_v12, -inf  ;;  %vm16571_vm13 = vcmp.eq.s32.totalorder %v16570_v50, 1  ;;  %v16582_v12 = vld [vmem:[#allocation105_spill] sm:$0xff] }
0x1520   :  { %v7980_v29 = vsel %vm16571_vm13, %v14741_v57, -1e+30  ;;  %vm16573_vm1 = vcmp.eq.s32.totalorder %v16572_v54, 1  ;;  %v7989_v5 = vmax.f32 %v7984_v40, %v7988_v41  ;;  %v7991_v27 = vmax.f32 %v7985_v15, %v7990_v52  ;;  %v16584_v41 = vld [vmem:[#allocation117_spill] sm:$0xff]  ;;  %v16586_v54 = vld [vmem:[#allocation91_spill] sm:$0xff] }
0x1521   :  { %v7981_v26 = vsel %vm16573_vm1, %v14739_v51, -1e+30  ;;  %v7969_v39 = vmax.f32 %v7966_v62, %v7968_v28  ;;  %v7905_v55 = vrot.slane %v7904_v53, 2  ;;  %v7950_v56 = vmax.f32 %v7948_v14, %v7949_v42 }
0x1522   :  { %v7928_v18 = vrot.slane %v7927_v59, 2  ;;  %v7970_v11 = vmax.f32 %v7963_v36, %v7964_v63  ;;  %v7986_v24 = vsel %vm679_vm8, %v7980_v29, -inf  ;;  %v7987_v13 = vsel %vm679_vm8, %v7981_v26, -inf }
0x1523   :  { %v7992_v30 = vmax.f32 %v7989_v5, %v7991_v27  ;;  %v7906_v46 = vmax.f32 %v7904_v53, %v7905_v55  ;;  %v7951_v47 = vrot.slane %v7950_v56, 2  ;;  %v7993_v0 = vmax.f32 %v7986_v24, %v7987_v13  ;;  %v16588_v5 = vld [vmem:[#allocation122_spill] sm:$0xff] }
0x1524   :  { %v7971_v45 = vmax.f32 %v7969_v39, %v7970_v11  ;;  %v7929_v4 = vmax.f32 %v7927_v59, %v7928_v18  ;;  %vm16575_vm7 = vcmp.eq.s32.totalorder %v16574_v38, 1  ;;  %vm16577_vm14 = vcmp.eq.s32.totalorder %v16576_v34, 1  ;;  %v16592_v11 = vld [vmem:[#allocation125_spill] sm:$0xff] }
0x1525   :  { %v8005_v48 = vsel %vm16575_vm7, %v14747_v7, -1e+30  ;;  %v8006_v14 = vsel %vm16577_vm14, %v14745_v43, -1e+30  ;;  %v7994_v20 = vmax.f32 %v7992_v30, %v7993_v0  ;;  %vm16579_vm10 = vcmp.eq.s32.totalorder %v16578_v23, 1 }
0x1526   :  { %v7972_v25 = vrot.slane %v7971_v45, 4  ;;  %v8001_v6 = vsel %vm16579_vm10, %v14735_v10, -1e+30  ;;  %vm16581_vm5 = vcmp.eq.s32.totalorder %v16580_v58, 1  ;;  %v7907_v44 = vrot.slane %v7906_v46, 1 }
0x1527   :  { %v8002_v2 = vsel %vm16581_vm5, %v14733_v49, -1e+30  ;;  %v7952_v1 = vmax.f32 %v7950_v56, %v7951_v47  ;;  %v8011_v19 = vsel %vm679_vm8, %v8005_v48, -inf  ;;  %v8013_v21 = vsel %vm679_vm8, %v8006_v14, -inf  ;;  %v16590_v56 = vld [vmem:[#allocation127_spill] sm:$0xff] }
0x1528   :  { %v7930_v17 = vrot.slane %v7929_v4, 1  ;;  %vm16583_vm11 = vcmp.eq.s32.totalorder %v16582_v12, 1  ;;  %v7995_v28 = vrot.slane %v7994_v20, 4  ;;  %vm16585_vm13 = vcmp.eq.s32.totalorder %v16584_v41, 1  ;;  %v16596_v47 = vld [vmem:[#allocation95_spill] sm:$0xff]  ;;  %v16604_v12 = vld [vmem:[#allocation49_spill] sm:$0xff] }
0x1529   :  { %v8003_v62 = vsel %vm16583_vm11, %v14741_v57, -1e+30  ;;  %v8004_v52 = vsel %vm16585_vm13, %v14739_v51, -1e+30  ;;  %v8007_v53 = vsel %vm679_vm8, %v8001_v6, -inf  ;;  %v8008_v42 = vsel %vm679_vm8, %v8002_v2, -inf }
0x152a   :  { %v14904_v36 = vmax.f32 %v7971_v45, %v7972_v25  ;;  %v8012_v59 = vmax.f32 %v8007_v53, %v8011_v19  ;;  %v8014_v63 = vmax.f32 %v8008_v42, %v8013_v21  ;;  %v14906_v40 = vmax.f32 %v7906_v46, %v7907_v44  ;;  %v16594_v45 = vld [vmem:[#allocation93_spill] sm:$0xff]  ;;  %v16598_v25 = vld [vmem:[#allocation50_spill] sm:$0xff]  ;;  %v16602_v19 = vld [vmem:[#allocation80_spill] sm:$0xff] }
0x152b   :  { %v7953_v15 = vrot.slane %v7952_v1, 1  ;;  %v8009_v50 = vsel %vm679_vm8, %v8003_v62, -inf  ;;  %v8010_v29 = vsel %vm679_vm8, %v8004_v52, -inf  ;;  %vm16587_vm1 = vcmp.eq.s32.totalorder %v16586_v54, 1  ;;  %v16600_v6 = vld [vmem:[#allocation82_spill] sm:$0xff]  ;;  %v16608_v52 = vld [vmem:[#allocation53_spill] sm:$0xff] }
0x152c   :  { %v8024_v26 = vsel %vm16587_vm1, %v14735_v10, -1e+30  ;;  %vm16589_vm7 = vcmp.eq.s32.totalorder %v16588_v5, 1  ;;  %v14916_v39 = vmax.f32 %v7929_v4, %v7930_v17  ;;  %v14918_v55 = vmax.f32 %v7994_v20, %v7995_v28  ;;  %v16606_v28 = vld [vmem:[#allocation52_spill] sm:$0xff] }
0x152d   :  { %v8026_v27 = vsel %vm16589_vm7, %v14741_v57, -1e+30  ;;  %vm16591_vm14 = vcmp.eq.s32.totalorder %v16590_v56, 1  ;;  %vm16593_vm10 = vcmp.eq.s32.totalorder %v16592_v11, 1  ;;  %v7974_v13 = vrot.slane %v14904_v36, 2 }
0x152e   :  { %v8027_v18 = vsel %vm16591_vm14, %v14739_v51, -1e+30  ;;  %v8028_v24 = vsel %vm16593_vm10, %v14747_v7, -1e+30  ;;  %v8015_v30 = vmax.f32 %v8012_v59, %v8014_v63  ;;  %vm16595_vm5 = vcmp.eq.s32.totalorder %v16594_v45, 1  ;;  %v16616_v45 = vld [vmem:[#allocation90_spill] sm:$0xff] }
0x152f   :  { %v8025_v46 = vsel %vm16595_vm5, %v14733_v49, -1e+30  ;;  %vm16597_vm11 = vcmp.eq.s32.totalorder %v16596_v47, 1  ;;  %v14933_v4 = vmax.f32 %v7952_v1, %v7953_v15  ;;  %v8016_v38 = vmax.f32 %v8009_v50, %v8010_v29  ;;  %v16610_v29 = vld [vmem:[#allocation108_spill] sm:$0xff]  ;;  %v16618_v47 = vld [vmem:[#allocation66_spill] sm:$0xff] }
0x1530   :  { %v8029_v0 = vsel %vm16597_vm11, %v14745_v43, -1e+30  ;;  %v8030_v48 = vsel %vm679_vm8, %v8024_v26, -inf  ;;  %v14937_v34 = vsel %vm679_vm8, %v8026_v27, -inf  ;;  %v14940_v14 = vsel %vm679_vm8, %v8027_v18, -inf  ;;  %v16612_v26 = vld [vmem:[#allocation51_spill] sm:$0xff] }
0x1531   :  { %v8034_v20 = vsel %vm679_vm8, %v8028_v24, -inf  ;;  %vm16599_vm13 = vcmp.eq.s32.totalorder %v16598_v25, 1  ;;  %vm16601_vm1 = vcmp.eq.s32.totalorder %v16600_v6, 1  ;;  %v7997_v2 = vrot.slane %v14918_v55, 2  ;;  %v16614_v27 = vld [vmem:[#allocation92_spill] sm:$0xff] }
0x1532   :  { %v8074_v23 = vsel %vm16599_vm13, %v14747_v7, -1e+30  ;;  %v8075_v58 = vsel %vm16601_vm1, %v14745_v43, -1e+30  ;;  %v8031_v44 = vsel %vm679_vm8, %v8025_v46, -inf  ;;  %v8036_v1 = vsel %vm679_vm8, %v8029_v0, -inf }
0x1533   :  { %vm16603_vm7 = vcmp.eq.s32.totalorder %v16602_v19, 1  ;;  %v14955_v17 = vmax.f32 %v8015_v30, %v8016_v38  ;;  %vm16605_vm14 = vcmp.eq.s32.totalorder %v16604_v12, 1  ;;  %vm16607_vm10 = vcmp.eq.s32.totalorder %v16606_v28, 1  ;;  %v16628_v28 = vld [vmem:[#allocation110_spill] sm:$0xff] }
0x1534   :  { %v8070_v21 = vsel %vm16603_vm7, %v14735_v10, -1e+30  ;;  %v8071_v62 = vsel %vm16605_vm14, %v14733_v49, -1e+30  ;;  %v8097_v41 = vsel %vm16607_vm10, %v14747_v7, -1e+30  ;;  %v8035_v42 = vmax.f32 %v8030_v48, %v8034_v20 }
0x1535   :  { %vm16609_vm5 = vcmp.eq.s32.totalorder %v16608_v52, 1  ;;  %v8039_v59 = vmax.f32 %v14937_v34, %v14940_v14  ;;  %v8080_v63 = vsel %vm679_vm8, %v8074_v23, -inf  ;;  %v8082_v15 = vsel %vm679_vm8, %v8075_v58, -inf  ;;  %v16620_v34 = vld [vmem:[#allocation67_spill] sm:$0xff]  ;;  %v16622_v20 = vld [vmem:[#allocation94_spill] sm:$0xff] }
0x1536   :  { %v8098_v53 = vsel %vm16609_vm5, %v14745_v43, -1e+30  ;;  %v8037_v50 = vmax.f32 %v8031_v44, %v8036_v1  ;;  %vm16611_vm11 = vcmp.eq.s32.totalorder %v16610_v29, 1  ;;  %vm16613_vm13 = vcmp.eq.s32.totalorder %v16612_v26, 1  ;;  %v16624_v1 = vld [vmem:[#allocation60_spill] sm:$0xff]  ;;  %v16630_v29 = vld [vmem:[#allocation59_spill] sm:$0xff] }
0x1537   :  { %v8047_v54 = vsel %vm16611_vm11, %v14735_v10, -1e+30  ;;  %v8093_v5 = vsel %vm16613_vm13, %v14735_v10, -1e+30  ;;  %vm16615_vm1 = vcmp.eq.s32.totalorder %v16614_v27, 1  ;;  %v8076_v18 = vsel %vm679_vm8, %v8070_v21, -inf }
0x1538   :  { %v8094_v56 = vsel %vm16615_vm1, %v14733_v49, -1e+30  ;;  %v8077_v11 = vsel %vm679_vm8, %v8071_v62, -inf  ;;  %v8103_v24 = vsel %vm679_vm8, %v8097_v41, -inf  ;;  %v8105_v30 = vsel %vm679_vm8, %v8098_v53, -inf  ;;  %v16626_v21 = vld [vmem:[#allocation61_spill] sm:$0xff] }
0x1539   :  { %vm16617_vm7 = vcmp.eq.s32.totalorder %v16616_v45, 1  ;;  %vm16619_vm14 = vcmp.eq.s32.totalorder %v16618_v47, 1  ;;  %v8081_v38 = vmax.f32 %v8076_v18, %v8080_v63  ;;  %v8083_v48 = vmax.f32 %v8077_v11, %v8082_v15  ;;  %v16636_v11 = vld [vmem:[#allocation131_spill] sm:$0xff]  ;;  %v16638_v47 = vld [vmem:[#allocation129_spill] sm:$0xff] }
0x153a   :  { %v8072_v46 = vsel %vm16617_vm7, %v14741_v57, -1e+30  ;;  %v8073_v0 = vsel %vm16619_vm14, %v14739_v51, -1e+30  ;;  %vm16621_vm10 = vcmp.eq.s32.totalorder %v16620_v34, 1  ;;  %vm16623_vm5 = vcmp.eq.s32.totalorder %v16622_v20, 1 }
0x153b   :  { %v8095_v14 = vsel %vm16621_vm10, %v14741_v57, -1e+30  ;;  %v8096_v25 = vsel %vm16623_vm5, %v14739_v51, -1e+30  ;;  %v8099_v23 = vsel %vm679_vm8, %v8093_v5, -inf  ;;  %v8100_v6 = vsel %vm679_vm8, %v8094_v56, -inf }
0x153c   :  { %v8104_v58 = vmax.f32 %v8099_v23, %v8103_v24  ;;  %v8106_v44 = vmax.f32 %v8100_v6, %v8105_v30  ;;  %vm16625_vm11 = vcmp.eq.s32.totalorder %v16624_v1, 1  ;;  %vm16627_vm13 = vcmp.eq.s32.totalorder %v16626_v21, 1  ;;  %v16632_v5 = vld [vmem:[#allocation100_spill] sm:$0xff]  ;;  %v16640_v1 = vld [vmem:[#allocation81_spill] sm:$0xff] }
0x153d   :  { %v8120_v19 = vsel %vm16625_vm11, %v14747_v7, -1e+30  ;;  %v8121_v12 = vsel %vm16627_vm13, %v14745_v43, -1e+30  ;;  %v8018_v62 = vrot.slane %v14955_v17, 4  ;;  %vm16629_vm1 = vcmp.eq.s32.totalorder %v16628_v28, 1 }
0x153e   :  { %v8048_v41 = vsel %vm16629_vm1, %v14733_v49, -1e+30  ;;  %v8078_v52 = vsel %vm679_vm8, %v8072_v46, -inf  ;;  %v8079_v53 = vsel %vm679_vm8, %v8073_v0, -inf  ;;  %v8101_v63 = vsel %vm679_vm8, %v8095_v14, -inf  ;;  %v16634_v56 = vld [vmem:[#allocation132_spill] sm:$0xff] }
0x153f   :  { %v8102_v15 = vsel %vm679_vm8, %v8096_v25, -inf  ;;  %vm16631_vm7 = vcmp.eq.s32.totalorder %v16630_v29, 1  ;;  %vm16633_vm14 = vcmp.eq.s32.totalorder %v16632_v5, 1  ;;  %vm16635_vm10 = vcmp.eq.s32.totalorder %v16634_v56, 1  ;;  %v16644_v28 = vld [vmem:[#allocation112_spill] sm:$0xff]  ;;  %v16648_v29 = vld [vmem:[#allocation70_spill] sm:$0xff] }
0x1540   :  { %v8116_v26 = vsel %vm16631_vm7, %v14735_v10, -1e+30  ;;  %v8117_v27 = vsel %vm16633_vm14, %v14733_v49, -1e+30  ;;  %v8049_v18 = vsel %vm16635_vm10, %v14741_v57, -1e+30  ;;  %v8038_v46 = vmax.f32 %v8035_v42, %v8037_v50 }
0x1541   :  { %vm16637_vm5 = vcmp.eq.s32.totalorder %v16636_v11, 1  ;;  %v8126_v30 = vsel %vm679_vm8, %v8120_v19, -inf  ;;  %v8128_v45 = vsel %vm679_vm8, %v8121_v12, -inf  ;;  %vm16639_vm11 = vcmp.eq.s32.totalorder %v16638_v47, 1  ;;  %v16642_v19 = vld [vmem:[#allocation102_spill] sm:$0xff]  ;;  %v16652_v47 = vld [vmem:[#allocation69_spill] sm:$0xff] }
0x1542   :  { %v8050_v24 = vsel %vm16637_vm5, %v14739_v51, -1e+30  ;;  %v8051_v0 = vsel %vm16639_vm11, %v14747_v7, -1e+30  ;;  %v8084_v34 = vmax.f32 %v8081_v38, %v8083_v48  ;;  %v8107_v14 = vmax.f32 %v8104_v58, %v8106_v44 }
0x1543   :  { %v8085_v20 = vmax.f32 %v8078_v52, %v8079_v53  ;;  %v8108_v25 = vmax.f32 %v8101_v63, %v8102_v15  ;;  %v8122_v23 = vsel %vm679_vm8, %v8116_v26, -inf  ;;  %v8123_v6 = vsel %vm679_vm8, %v8117_v27, -inf  ;;  %v16646_v63 = vld [vmem:[#allocation109_spill] sm:$0xff] }
0x1544   :  { %vm16641_vm13 = vcmp.eq.s32.totalorder %v16640_v1, 1  ;;  %vm16643_vm1 = vcmp.eq.s32.totalorder %v16642_v19, 1  ;;  %v8127_v50 = vmax.f32 %v8122_v23, %v8126_v30  ;;  %v8129_v12 = vmax.f32 %v8123_v6, %v8128_v45  ;;  %v16650_v30 = vld [vmem:[#allocation68_spill] sm:$0xff] }
0x1545   :  { %v8118_v21 = vsel %vm16641_vm13, %v14741_v57, -1e+30  ;;  %v8119_v42 = vsel %vm16643_vm1, %v14739_v51, -1e+30  ;;  %vm16645_vm7 = vcmp.eq.s32.totalorder %v16644_v28, 1  ;;  %v8053_v48 = vsel %vm679_vm8, %v8047_v54, -inf }
0x1546   :  { %v8052_v38 = vsel %vm16645_vm7, %v14745_v43, -1e+30  ;;  %v8054_v58 = vsel %vm679_vm8, %v8048_v41, -inf  ;;  %v8057_v44 = vsel %vm679_vm8, %v8051_v0, -inf  ;;  %v8086_v52 = vmax.f32 %v8084_v34, %v8085_v20  ;;  %v16660_v28 = vld [vmem:[#allocation111_spill] sm:$0xff] }
0x1547   :  { %v8109_v53 = vmax.f32 %v8107_v14, %v8108_v25  ;;  %vm16647_vm14 = vcmp.eq.s32.totalorder %v16646_v63, 1  ;;  %vm16649_vm10 = vcmp.eq.s32.totalorder %v16648_v29, 1  ;;  %v15049_v5 = vsel %vm679_vm8, %v8049_v18, -inf  ;;  %v16662_v29 = vld [vmem:[#allocation83_spill] sm:$0xff] }
0x1548   :  { %v8143_v15 = vsel %vm16647_vm14, %v14747_v7, -1e+30  ;;  %v8144_v26 = vsel %vm16649_vm10, %v14745_v43, -1e+30  ;;  %v15052_v27 = vsel %vm679_vm8, %v8050_v24, -inf  ;;  %v8124_v54 = vsel %vm679_vm8, %v8118_v21, -inf }
0x1549   :  { %v8125_v41 = vsel %vm679_vm8, %v8119_v42, -inf  ;;  %v15056_v56 = vmax.f32 %v8038_v46, %v8039_v59  ;;  %v8130_v11 = vmax.f32 %v8127_v50, %v8129_v12  ;;  %vm16651_vm5 = vcmp.eq.s32.totalorder %v16650_v30, 1  ;;  %v16654_v46 = vld [vmem:[#allocation97_spill] sm:$0xff]  ;;  %v16656_v21 = vld [vmem:[#allocation119_spill] sm:$0xff] }
0x154a   :  { %v8139_v45 = vsel %vm16651_vm5, %v14735_v10, -1e+30  ;;  %vm16653_vm11 = vcmp.eq.s32.totalorder %v16652_v47, 1  ;;  %v8058_v18 = vmax.f32 %v8053_v48, %v8057_v44  ;;  %v8059_v34 = vsel %vm679_vm8, %v8052_v38, -inf  ;;  %v16658_v42 = vld [vmem:[#allocation87_spill] sm:$0xff] }
0x154b   :  { %v8140_v0 = vsel %vm16653_vm11, %v14733_v49, -1e+30  ;;  %v8149_v24 = vsel %vm679_vm8, %v8143_v15, -inf  ;;  %v8151_v14 = vsel %vm679_vm8, %v8144_v26, -inf  ;;  %v8087_v20 = vrot.slane %v8086_v52, 4 }
0x154c   :  { %v8110_v25 = vrot.slane %v8109_v53, 4  ;;  %v8131_v59 = vmax.f32 %v8124_v54, %v8125_v41  ;;  %vm16655_vm13 = vcmp.eq.s32.totalorder %v16654_v46, 1  ;;  %v8145_v6 = vsel %vm679_vm8, %v8139_v45, -inf  ;;  %v16664_v54 = vld [vmem:[#allocation85_spill] sm:$0xff] }
0x154d   :  { %v8141_v23 = vsel %vm16655_vm13, %v14741_v57, -1e+30  ;;  %v8146_v1 = vsel %vm679_vm8, %v8140_v0, -inf  ;;  %vm16657_vm1 = vcmp.eq.s32.totalorder %v16656_v21, 1  ;;  %vm16659_vm7 = vcmp.eq.s32.totalorder %v16658_v42, 1  ;;  %v16670_v21 = vld [vmem:[#allocation103_spill] sm:$0xff] }
0x154e   :  { %v8166_v19 = vsel %vm16657_vm1, %v14747_v7, -1e+30  ;;  %v8167_v50 = vsel %vm16659_vm7, %v14745_v43, -1e+30  ;;  %v8132_v12 = vmax.f32 %v8130_v11, %v8131_v59  ;;  %vm16661_vm14 = vcmp.eq.s32.totalorder %v16660_v28, 1 }
0x154f   :  { %v8142_v38 = vsel %vm16661_vm14, %v14739_v51, -1e+30  ;;  %v8150_v48 = vmax.f32 %v8145_v6, %v8149_v24  ;;  %v8152_v44 = vmax.f32 %v8146_v1, %v8151_v14  ;;  %v8060_v63 = vmax.f32 %v8054_v58, %v8059_v34  ;;  %v16674_v34 = vld [vmem:[#allocation123_spill] sm:$0xff]  ;;  %v16676_v14 = vld [vmem:[#allocation120_spill] sm:$0xff] }
0x1550   :  { %v8062_v15 = vmax.f32 %v15049_v5, %v15052_v27  ;;  %vm16663_vm10 = vcmp.eq.s32.totalorder %v16662_v29, 1  ;;  %vm16665_vm5 = vcmp.eq.s32.totalorder %v16664_v54, 1  ;;  %v15089_v30 = vmax.f32 %v8086_v52, %v8087_v20  ;;  %v16685_v29 = vld [vmem:[#allocation130_spill] sm:$0xff]  ;;  %v16687_v54 = vld [vmem:[#allocation135_spill] sm:$0xff] }
0x1551   :  { %v8162_v26 = vsel %vm16663_vm10, %v14735_v10, -1e+30  ;;  %v8163_v41 = vsel %vm16665_vm5, %v14733_v49, -1e+30  ;;  %v15091_v11 = vmax.f32 %v8109_v53, %v8110_v25  ;;  %v8172_v45 = vsel %vm679_vm8, %v8166_v19, -inf }
0x1552   :  { %v8174_v47 = vsel %vm679_vm8, %v8167_v50, -inf  ;;  %v8147_v58 = vsel %vm679_vm8, %v8141_v23, -inf  ;;  %v8148_v0 = vsel %vm679_vm8, %v8142_v38, -inf  ;;  %v8164_v24 = vsel %vm1719_vm9, %v14741_v57, -1e+30  ;;  %v16668_v23 = vld [vmem:[#allocation113_spill] sm:$0xff] }
0x1553   :  { %v8165_v59 = vsel %vm1720_vm2, %v14739_v51, -1e+30  ;;  %v8133_v52 = vrot.slane %v8132_v12, 4  ;;  %v8153_v20 = vmax.f32 %v8150_v48, %v8152_v44  ;;  %v8168_v53 = vsel %vm679_vm8, %v8162_v26, -inf }
0x1554   :  { %v8169_v25 = vsel %vm679_vm8, %v8163_v41, -inf  ;;  %v8173_v46 = vmax.f32 %v8168_v53, %v8172_v45  ;;  %vm16669_vm11 = vcmp.eq.s32.totalorder %v16668_v23, 1  ;;  %vm16671_vm13 = vcmp.eq.s32.totalorder %v16670_v21, 1  ;;  %v16678_v53 = vld [vmem:[#allocation124_spill] sm:$0xff] }
0x1555   :  { %v8175_v6 = vmax.f32 %v8169_v25, %v8174_v47  ;;  %v8189_v1 = vsel %vm16669_vm11, %v14747_v7, -1e+30  ;;  %v8190_v19 = vsel %vm16671_vm13, %v14745_v43, -1e+30  ;;  %v8061_v42 = vmax.f32 %v8058_v18, %v8060_v63 }
0x1556   :  { %v8154_v50 = vmax.f32 %v8147_v58, %v8148_v0  ;;  %v8170_v28 = vsel %vm679_vm8, %v8164_v24, -inf  ;;  %v8171_v38 = vsel %vm679_vm8, %v8165_v59, -inf  ;;  %v8089_v48 = vrot.slane %v15089_v30, 2 }
0x1557   :  { %v8112_v44 = vrot.slane %v15091_v11, 2  ;;  %v8185_v26 = vsel %vm1764_vm0, %v14735_v10, -1e+30  ;;  %v8186_v41 = vsel %vm1765_vm15, %v14733_v49, -1e+30  ;;  %v15121_v45 = vmax.f32 %v8132_v12, %v8133_v52  ;;  %v16680_v52 = vld [vmem:[#allocation126_spill] sm:$0xff] }
0x1558   :  { %v8155_v18 = vmax.f32 %v8153_v20, %v8154_v50  ;;  %v8195_v63 = vsel %vm679_vm8, %v8189_v1, -inf  ;;  %v8197_v47 = vsel %vm679_vm8, %v8190_v19, -inf  ;;  %v8176_v58 = vmax.f32 %v8173_v46, %v8175_v6  ;;  %v16683_v19 = vld [vmem:[#allocation118_spill] sm:$0xff] }
0x1559   :  { %v8177_v0 = vmax.f32 %v8170_v28, %v8171_v38  ;;  %vm16675_vm2 = vcmp.eq.s32.totalorder %v16674_v34, 1  ;;  %vm16677_vm0 = vcmp.eq.s32.totalorder %v16676_v14, 1  ;;  %vm16679_vm15 = vcmp.eq.s32.totalorder %v16678_v53, 1 }
0x155a   :  { %v8212_v24 = vsel %vm16675_vm2, %v14747_v7, -1e+30  ;;  %v8213_v59 = vsel %vm16677_vm0, %v14745_v43, -1e+30  ;;  %v8187_v12 = vsel %vm16679_vm15, %v14741_v57, -1e+30  ;;  %v7998_v5 = vmax.f32 %v14918_v55, %v7997_v2 }
0x155b   :  { %vm16681_vm9 = vcmp.eq.s32.totalorder %v16680_v52, 1  ;;  %v8191_v25 = vsel %vm679_vm8, %v8185_v26, -inf  ;;  %v8192_v46 = vsel %vm679_vm8, %v8186_v41, -inf  ;;  %v8208_v21 = vsel %vm1811_vm6, %v14735_v10, -1e+30  ;;  %v9080_v52 = vld [vmem:[%s15286_s12 + $0x90] sm:$0xff] }
0x155c   :  { %v8188_v20 = vsel %vm16681_vm9, %v14739_v51, -1e+30  ;;  %v8196_v6 = vmax.f32 %v8191_v25, %v8195_v63  ;;  %v8198_v23 = vmax.f32 %v8192_v46, %v8197_v47  ;;  %vm16684_vm1 = vcmp.eq.s32.totalorder %v16683_v19, 1 }
0x155d   :  { %v8209_v50 = vsel %vm16684_vm1, %v14733_v49, -1e+30  ;;  %v8218_v28 = vsel %vm679_vm8, %v8212_v24, -inf  ;;  %v8220_v38 = vsel %vm679_vm8, %v8213_v59, -inf  ;;  %vm16686_vm7 = vcmp.eq.s32.totalorder %v16685_v29, 1 }
0x155e   :  { %v8235_v26 = vsel %vm16686_vm7, %v14747_v7, -1e+30  ;;  %vm16688_vm14 = vcmp.eq.s32.totalorder %v16687_v54, 1  ;;  %v8193_v63 = vsel %vm679_vm8, %v8187_v12, -inf  ;;  %v8194_v47 = vsel %vm679_vm8, %v8188_v20, -inf }
0x155f   :  { %v8236_v41 = vsel %vm16688_vm14, %v14745_v43, -1e+30  ;;  %v8210_v14 = vsel %vm1813_vm4, %v14741_v57, -1e+30  ;;  %v8211_v59 = vsel %vm1814_vm3, %v14739_v51, -1e+30  ;;  %v8178_v29 = vmax.f32 %v8176_v58, %v8177_v0 }
0x1560   :  { %v8214_v53 = vsel %vm679_vm8, %v8208_v21, -inf  ;;  %v8215_v7 = vsel %vm679_vm8, %v8209_v50, -inf  ;;  %v8231_v43 = vsel %vm1858_vm12, %v14735_v10, -1e+30  ;;  %vm16692_vm6 = vcmp.eq.s32.totalorder %v15985_v9, 1 }
0x1561   :  { %v8232_v12 = vsel %vm16692_vm6, %v14733_v49, -1e+30  ;;  %v8219_v20 = vmax.f32 %v8214_v53, %v8218_v28  ;;  %v8221_v25 = vmax.f32 %v8215_v7, %v8220_v38  ;;  %v8241_v46 = vsel %vm679_vm8, %v8235_v26, -inf }
0x1562   :  { %v8243_v1 = vsel %vm679_vm8, %v8236_v41, -inf  ;;  %v8156_v19 = vrot.slane %v8155_v18, 4  ;;  %v8199_v54 = vmax.f32 %v8196_v6, %v8198_v23  ;;  %v8200_v21 = vmax.f32 %v8193_v63, %v8194_v47 }
0x1563   :  { %v8216_v50 = vsel %vm679_vm8, %v8210_v14, -inf  ;;  %v8217_v34 = vsel %vm679_vm8, %v8211_v59, -inf  ;;  %v8237_v10 = vsel %vm679_vm8, %v8231_v43, -inf  ;;  %v8238_v24 = vsel %vm679_vm8, %v8232_v12, -inf }
0x1564   :  { %vm16693_vm12 = vcmp.eq.s32.totalorder %v12541_v22, 1  ;;  %vm16694_vm4 = vcmp.eq.s32.totalorder %v12543_v61, 1  ;;  %v8242_v28 = vmax.f32 %v8237_v10, %v8241_v46  ;;  %v8244_v58 = vmax.f32 %v8238_v24, %v8243_v1 }
0x1565   :  { %v8233_v9 = vsel %vm16693_vm12, %v14741_v57, -1e+30  ;;  %v8234_v49 = vsel %vm16694_vm4, %v14739_v51, -1e+30  ;;  %v8019_v0 = vmax.f32 %v14955_v17, %v8018_v62  ;;  %v8041_v6 = vrot.slane %v15056_v56, 4 }
0x1566   :  { %v8063_v23 = vmax.f32 %v8061_v42, %v8062_v15  ;;  %v8222_v38 = vmax.f32 %v8219_v20, %v8221_v25  ;;  %v8090_v22 = vmax.f32 %v15089_v30, %v8089_v48  ;;  %v8113_v57 = vmax.f32 %v15091_v11, %v8112_v44 }
0x1567   :  { %v8135_v61 = vrot.slane %v15121_v45, 2  ;;  %v8201_v51 = vmax.f32 %v8199_v54, %v8200_v21  ;;  %v8179_v26 = vrot.slane %v8178_v29, 4  ;;  %v8223_v41 = vmax.f32 %v8216_v50, %v8217_v34 }
0x1568   :  { %v8239_v63 = vsel %vm679_vm8, %v8233_v9, -inf  ;;  %v8240_v17 = vsel %vm679_vm8, %v8234_v49, -inf  ;;  %v7975_v62 = vmax.f32 %v14904_v36, %v7974_v13  ;;  %v8157_v27 = vmax.f32 %v8155_v18, %v8156_v19  ;;  %v8444_v9 = vld [vmem:[#allocation14 + $0x88] sm:$0xff] }
0x1569   :  { %v8245_v15 = vmax.f32 %v8242_v28, %v8244_v58  ;;  %v8020_v30 = vrot.slane %v8019_v0, 2  ;;  %v8064_v11 = vrot.slane %v8063_v23, 4  ;;  %vm16695_vm3 = vcmask 1040384  }
0x156a   :  { %v8254_v42 = vsel %vm16695_vm3, %v14906_v40, %v14916_v39  ;;  %v8224_v48 = vmax.f32 %v8222_v38, %v8223_v41  ;;  %v8042_v44 = vmax.f32 %v15056_v56, %v8041_v6  ;;  %v8091_v47 = vrot.slane %v8090_v22, 1  ;;  %v9081_v40 = vld [vmem:[%s15286_s12 + $0x98] sm:$0xff]  ;;  %vm16699_vm13 = vmmov %vm16695_vm3 }
0x156b   :  { %v8202_v14 = vrot.slane %v8201_v51, 4  ;;  %v8246_v59 = vmax.f32 %v8239_v63, %v8240_v17  ;;  %v8114_v53 = vrot.slane %v8113_v57, 1  ;;  %v8136_v36 = vmax.f32 %v15121_v45, %v8135_v61 }
0x156c   :  { %v8180_v13 = vmax.f32 %v8178_v29, %v8179_v26  ;;  %v7976_v7 = vrot.slane %v7975_v62, 1  ;;  %v8158_v55 = vrot.slane %v8157_v27, 2  ;;  %v7999_v39 = vrot.slane %v7998_v5, 1 }
0x156d   :  { %v8247_v2 = vmax.f32 %v8245_v15, %v8246_v59  ;;  %v8065_v56 = vmax.f32 %v8063_v23, %v8064_v11  ;;  %vm16696_vm10 = vcmask 1041408   ;;  %v8225_v45 = vrot.slane %v8224_v48, 4 }
0x156e   :  { %v8255_v43 = vsel %vm16696_vm10, %v8254_v42, %v14933_v4  ;;  %v8021_v20 = vmax.f32 %v8019_v0, %v8020_v30  ;;  %v8043_v25 = vrot.slane %v8042_v44, 2  ;;  %v8092_v46 = vmax.f32 %v8090_v22, %v8091_v47  ;;  %v8443_v4 = vld [vmem:[#allocation14 + $0x80] sm:$0xff]  ;;  %vm16701_vm0 = vmmov %vm16696_vm10 }
0x156f   :  { %v8203_v1 = vmax.f32 %v8201_v51, %v8202_v14  ;;  %v8115_v29 = vmax.f32 %v8113_v57, %v8114_v53  ;;  %v8137_v54 = vrot.slane %v8136_v36, 1  ;;  %v8181_v21 = vrot.slane %v8180_v13, 2  ;;  %v8531_v47 = vld [vmem:[#allocation16 + $0x80] sm:$0xff]  ;;  %v8532_v14 = vld [vmem:[#allocation16 + $0x88] sm:$0xff] }
0x1570   :  { %v10699_v34 = vpack.c.bf16 %v9081_v40, %v9080_v52  ;;  %v8159_v10 = vmax.f32 %v8157_v27, %v8158_v55  ;;  %v8248_v24 = vrot.slane %v8247_v2, 4  ;;  %v7977_v49 = vmax.f32 %v7975_v62, %v7976_v7 }
0x1571   :  { %v8066_v28 = vrot.slane %v8065_v56, 2  ;;  %v8226_v58 = vmax.f32 %v8224_v48, %v8225_v45  ;;  %vm16697_vm5 = vcmp.ge.f32.partialorder %v14650_v33, 0.1  ;;  %v8000_v0 = vmax.f32 %v7998_v5, %v7999_v39  ;;  %v8445_v33 = vld [vmem:[#allocation14 + $0x90] sm:$0xff] }
0x1572   :  { %v8044_v6 = vmax.f32 %v8042_v44, %v8043_v25  ;;  %v8204_v23 = vrot.slane %v8203_v1, 2  ;;  %vm16698_vm11 = vcmask 1042432   ;;  %v8138_v22 = vmax.f32 %v8136_v36, %v8137_v54  ;;  %v8533_v39 = vld [vmem:[#allocation16 + $0x90] sm:$0xff] }
0x1573   :  { %v8256_v38 = vsel %vm16698_vm11, %v8255_v43, %v7977_v49  ;;  %v8182_v57 = vmax.f32 %v8180_v13, %v8181_v21  ;;  %v10703_v61 = vpack.c.bf16 %v8444_v9, %v8443_v4  ;;  %v8160_v51 = vrot.slane %v8159_v10, 1  ;;  %vm16704_vm1 = vmmov %vm16698_vm11 }
0x1574   :  { %v8249_v26 = vmax.f32 %v8247_v2, %v8248_v24  ;;  %v8261_v41 = vsel %vm16699_vm13, %v8092_v46, %v8115_v29  ;;  %v8067_v63 = vmax.f32 %v8065_v56, %v8066_v28  ;;  %v8227_v17 = vrot.slane %v8226_v58, 2  ;;  %v8534_v56 = vld [vmem:[#allocation16 + $0x98] sm:$0xff] }
0x1575   :  { %v8045_v62 = vrot.slane %v8044_v6, 1  ;;  %vm16700_vm2 = vcmask 1043456   ;;  %v8205_v5 = vmax.f32 %v8203_v1, %v8204_v23  ;;  %v8183_v15 = vrot.slane %v8182_v57, 1 }
0x1576   :  { %v8262_v30 = vsel %vm16701_vm0, %v8261_v41, %v8138_v22  ;;  %v8161_v42 = vmax.f32 %v8159_v10, %v8160_v51  ;;  %v8250_v48 = vrot.slane %v8249_v26, 2  ;;  %vm16702_vm15 = vcmp.ge.f32.partialorder %v14652_v31, 0.1  ;;  %vm16706_vm14 = vmmov %vm16700_vm2  ;;  %v8631_v10 = vld [vmem:[#allocation17 + $0x90] sm:$0xff] }
0x1577   :  { %v7141_v44 = vsel %vm16702_vm15, %v14657_v8, 0.0  ;;  %v8068_v59 = vrot.slane %v8067_v63, 1  ;;  %vm16703_vm9 = vcmask 1044480   ;;  %v8228_v36 = vmax.f32 %v8226_v58, %v8227_v17 }
0x1578   :  { %v8046_v13 = vmax.f32 %v8044_v6, %v8045_v62  ;;  %v8206_v7 = vrot.slane %v8205_v5, 1  ;;  %v8263_v55 = vsel %vm16704_vm1, %v8262_v30, %v8161_v42  ;;  %v8184_v2 = vmax.f32 %v8182_v57, %v8183_v15  ;;  %vm16708_vm12 = vmmov %vm16703_vm9 }
0x1579   :  { %v10711_v52 = vpack.c.bf16 %v8532_v14, %v8531_v47  ;;  %vm16705_vm7 = vcmask 1045504   ;;  %v8251_v8 = vmax.f32 %v8249_v26, %v8250_v48  ;;  %v8069_v40 = vmax.f32 %v8067_v63, %v8068_v59 }
0x157a   :  { %v8229_v43 = vrot.slane %v8228_v36, 1  ;;  %v8264_v45 = vsel %vm16706_vm14, %v8263_v55, %v8184_v2  ;;  %vm16707_vm6 = vcmask 1046528   ;;  %v10715_v46 = vpack.c.bf16 %v8534_v56, %v8533_v39  ;;  %vm16710_vm3 = vmmov %vm16705_vm7 }
0x157b   :  { %v8252_v1 = vrot.slane %v8251_v8, 1  ;;  %vm16709_vm4 = vcmp.gt.f32.partialorder %v11909_v35, 0.0  ;;  %vm16711_vm10 = vmmov %vm16707_vm6  ;;  %v9091_v35 = vld [vmem:[%s15290_s16 + $0x4] ss:$0 sm:$0xff]  ;;  %s11220_s16 = smov [#allocation19]  }
0x157c   :  { %s8740_s26 = sshll.u32 %s11220_s16, 4  ;;  %s8741_s26 = int_to_ptr.vmem [resolvable:$true] %s8740_s26 }
0x157d   :  { %v8253_v21 = vmax.f32 %v8251_v8, %v8252_v1  ;;  %p11158_p11 = scmp.lt.s32.totalorder %s8741_s26, %s8741_s26 }
0x15e3   :  { %v15204_v18 = vpop.f32.mrb[70].mxu0 }
0x15e4   :  { %v7875_v12 = vpop.f32.mrb[71].mxu0  ;;  %v7885_v50 = vmul.f32 %v12263_v3, %v15204_v18  ;;  %v8022_v3 = vrot.slane %v8021_v20, 1 }
0x15e5   :  { %v7884_v19 = vmul.f32 %v12255_v60, %v7875_v12  ;;  %v7140_v60 = vsel %vm16697_vm5, %v14662_v32, 0.0  ;;  %v8446_v32 = vld [vmem:[#allocation14 + $0x98] sm:$0xff]  ;;  %vm16712_vm5 = vcmp.gt.f32.partialorder %v16010_v16, 0.0  ;;  %v9093_v16 = vld [vmem:[%s15292_s18 + $0x4] ss:$0 sm:$0xff]  ;;  %s11153_s18 = scalar_lea.vmem %s8741_s26, 256 }
0x15e6   :  { %v8023_v27 = vmax.f32 %v8021_v20, %v8022_v3  ;;  %v10707_v11 = vpack.c.bf16 %v8446_v32, %v8445_v33  ;;  %v8207_v20 = vmax.f32 %v8205_v5, %v8206_v7  ;;  %v8725_v3 = vld [vmem:[#allocation5 + $0x40] sm:$0xff]  ;;  %p11154_p10 = scmp.ne.s32.totalorder %s8741_s26, %s11153_s18  ;;  %p11159_p12 = scmp.lt.s32.totalorder %s11153_s18, %s11153_s18 }
0x15e7   :  { %10264 = vmatprep.mubr.msk.f32.mxu0 %vm679_vm8, %v7884_v19  ;;  %v8230_v19 = vmax.f32 %v8228_v36, %v8229_v43  ;;  %vm8727_vm13 = vcmp.ge.f32.partialorder %v8725_v3, 0.1 }
0x15e8   :  { %10265 = vmatmul.mubr.msk.f32.vlgmr.msra.gmra.mrb[72].mxu0 %vm679_vm8, %v7885_v50  ;;  %p11160_p13 = por %p11159_p12, %p11158_p11 }
0x15e9   :  { %10698 = vmatpush3.bf16.msra.mxu0 %v14759_v37  ;;  %10275 = vmatprep.mubr.msk.f32.mxu0 %vm679_vm8, %v7140_v60  ;;  %v8257_v37 = vsel %vm16700_vm2, %v8256_v38, %v8000_v0  ;;  %v8726_v0 = vld [vmem:[#allocation5 + $0x48] sm:$0xff] }
0x15ea   :  { %10700 = vmatprep.subr.bf16.mxu0 %v10699_v34  ;;  %v8258_v53 = vsel %vm16703_vm9, %v8257_v37, %v8023_v27  ;;  %vm8728_vm11 = vcmp.ge.f32.partialorder %v8726_v0, 0.1  ;;  %p11161_p0 = pnand %p11160_p13, %p11154_p10 }
0x15eb   :  { %v8259_v31 = vsel %vm16705_vm7, %v8258_v53, %v8046_v13 }
0x15ec   :  { %v8260_v25 = vsel %vm16707_vm6, %v8259_v31, %v8069_v40 }
0x15ed   :  { %10702 = vmatpush3.bf16.msra.mxu0 %v10699_v34  ;;  %v8268_v29 = vsel %vm16709_vm4, %v8260_v25, 0.0 }
0x15ee   :  { %10704 = vmatprep.subr.bf16.mxu0 %v10703_v61 }
0x15f0   :  { %10276 = vmatmul.mubr.msk.f32.vlgmr.msra.gmra.mrb[72].mxu0 %vm679_vm8, %v7141_v44 }
0x15f1   :  { %10706 = vmatpush3.bf16.msra.mxu0 %v10703_v61  ;;  %10286 = vmatprep.mubr.msk.f32.mxu0 %vm679_vm8, %v7875_v12  ;;  %v8265_v12 = vsel %vm16708_vm12, %v8264_v45, %v8207_v20 }
0x15f2   :  { %10708 = vmatprep.subr.bf16.mxu0 %v10707_v11  ;;  %v8266_v54 = vsel %vm16710_vm3, %v8265_v12, %v8230_v19 }
0x15f3   :  { %v8267_v50 = vsel %vm16711_vm10, %v8266_v54, %v8253_v21 }
0x15f4   :  { %v8269_v34 = vsel %vm16712_vm5, %v8267_v50, 0.0 }
0x15f5   :  { %10710 = vmatpush3.bf16.msra.mxu0 %v10707_v11 }
0x15f6   :  { %10712 = vmatprep.subr.bf16.mxu0 %v10711_v52 }
0x15f8   :  { %10287 = vmatmul.mubr.msk.f32.vlgmr.msra.gmra.mrb[72].mxu0 %vm679_vm8, %v15204_v18  ;;  %v8632_v18 = vld [vmem:[#allocation17 + $0x98] sm:$0xff] }
0x15f9   :  { %10714 = vmatpush3.bf16.msra.mxu0 %v10711_v52  ;;  %10297 = vmatprep.mubr.msk.f32.mxu0 %vm679_vm8, %v8268_v29  ;;  %v10723_v24 = vpack.c.bf16 %v8632_v18, %v8631_v10 }
0x15fa   :  { %10716 = vmatprep.subr.bf16.mxu0 %v10715_v46 }
0x15fb   :  { %10724 = vmatprep.subr.bf16.mxu1 %v10723_v24 }
0x15fc   :  { %10726 = vmatpush3.bf16.msra.mxu1 %v10723_v24 }
0x15fd   :  { %10718 = vmatpush3.bf16.msra.mxu0 %v10715_v46 }
0x1600   :  { %10298 = vmatmul.mubr.msk.f32.vlgmr.msra.gmra.mrb[72].mxu0 %vm679_vm8, %v8269_v34 }
0x16d3   :  { %v10299_v4 = vpop.f32.mrb[72].mxu0 }
0x16d4   :  { %v8607_v9 = vpop.f32.mrb[73].mxu0  ;;  %v8627_v28 = vadd.f32 %v10299_v4, %v9091_v35 }
0x16d5   :  { %v8626_v49 = vadd.f32 %v9091_v35, %v8607_v9 }
0x16d7   :  { %10308 = vmatprep.mubr.msk.f32.mxu1 %vm679_vm8, %v8626_v49 }
0x16d8   :  { %10309 = vmatmul.mubr.msk.f32.vlgmr.msra.gmra.mrb[74].mxu1 %vm679_vm8, %v8627_v28 }
0x17ab   :  { %v10310_v58 = vpop.f32.mrb[74].mxu1 }
0x17ac   :  { %v8719_v60 = vadd.f32 %v10310_v58, %v9093_v16  ;;  %v8713_v6 = vpop.f32.mrb[75].mxu1 }
0x17ad   :  { %v8714_v23 = vadd.f32 %v9093_v16, %v8713_v6 }
0x17ae   :  { %v8723_v38 = vmax.f32 %v8719_v60, 0.0 }
0x17af   :  { %v8722_v22 = vmax.f32 %v8714_v23, 0.0 }
0x17b0   :  { %v8730_v57 = vmul.f32 1.1111112, %v8723_v38 }
0x17b1   :  { %v8729_v61 = vmul.f32 1.1111112, %v8722_v22 }
0x17b2   :  { %v8732_v51 = vsel %vm8728_vm11, %v8730_v57, 0.0 }
0x17b3   :  { %8734 = vst.msk [vmem:[#allocation19 + $0x8] sm:$0xff] %vm679_vm8, %v8732_v51  ;;  %v8731_v26 = vsel %vm8727_vm13, %v8729_v61, 0.0 }
0x17b4   :  { %8733 = vst.msk [vmem:[#allocation19] sm:$0xff] %vm679_vm8, %v8731_v26 }
0x17b5   :  { %11164 = shalt.err (!%p11161_p0)
}
0x17b6   :  { %s11165_s13 = scalar_lea.hbm %s15293_s19, 256 }
0x17b7   :  { %p11166_p1 = scmp.ne.s32.totalorder %s15293_s19, %s11165_s13  ;;  %p11169_p2 = scmp.lt.u32.totalorder %s11165_s13, %s15293_s19 }
0x17b9   :  { %p11171_p3 = pnand %p11169_p2, %p11166_p1 }
0x17bb   :  { %11174 = shalt.err (!%p11171_p3)
}
0x17bc   :  { %8746 = dma.vmem_to_hbm [thread:$0]  %s8741_s26, 256, %s15293_s19, [#allocation4], %s11191_s27, %s11191_s27, %s11192_s28  }
0x17bd   :  { %11187 = dma.done.wait [#allocation4], 256  }
0x17be   :  { %11188 = vsyncadd [#allocation4], 4294967040 }
0x17bf   :  { %8750 = vsyncpa [#allocation3], 1 }
0x17c0   :  { %8751 = vsyncpa [#allocation6], 1 }
0x17c1   :  { %8752 = vsyncpa [#allocation9], 1 }
0x17c2   :  { %8753 = vsyncpa [#allocation12], 1 }
0x17c3   :  { %8754 = vsyncpa [#allocation15], 1 }
0x17c4   :  { %8755 = vsyncpa [#allocation18], 1 }
0x17c5   :  { %8756 = vsyncpa [#allocation4], 1 }

</bundles_post_ra>
